<compile_context>
chip_gen: v6e
topology: v6e:2x2x1
jax: 0.10.0
libtpu: 0.0.40
codegen_flags: <defaults>
</compile_context>

<pallas_src>
import math

import jax
import jax.numpy as jnp
from jax.experimental import pallas as pl
from jax.experimental.pallas import tpu as pltpu


_NEG_SLOPE = 0.01   # torch.nn.LeakyReLU() default negative slope
_KSIZE = 5
_PAD = 2


def _leaky_relu(v):
    return jnp.where(v >= 0, v, _NEG_SLOPE * v)


def _cnn_decoder_kernel(x_ref, wfc_ref, bfc_ref, w1_ref, w2_ref, cb_ref,
                        o_ref, pad_ref):
    """Fused Linear -> LeakyReLU -> 2x (ConvTranspose2d -> LeakyReLU).

    x_ref   : (B, latent)        VMEM
    wfc_ref : (S, latent, S)     VMEM   Linear weight, chunked per image row
    bfc_ref : (S, 1, S)          VMEM   Linear bias, chunked per image row
    w1_ref  : (25,)              SMEM   conv-0 5x5 kernel, flattened
    w2_ref  : (25,)              SMEM   conv-1 5x5 kernel, flattened
    cb_ref  : (2,)               SMEM   conv biases [c1, c2]
    o_ref   : (B, S, S)          VMEM   output image
    pad_ref : (B, S+4, S+4)      VMEM scratch: zero-padded working image
    """
    batch = x_ref.shape[0]
    size = o_ref.shape[1]

    # Zero the halo once; the interior is fully overwritten before every read.
    pad_ref[...] = jnp.zeros_like(pad_ref)

    # fc_layer: Dropout(p=0) -> Linear(latent, S*S) -> LeakyReLU, computed one
    # image row at a time straight into the padded scratch (avoids any tiled-dim
    # reshape inside the kernel).
    x = x_ref[...]
    for r in range(size):
        h_r = jnp.dot(x, wfc_ref[r], preferred_element_type=jnp.float32,
                      precision=jax.lax.Precision.HIGHEST)          # (B, S)
        h_r = _leaky_relu(h_r + bfc_ref[r])
        pad_ref[:, _PAD + r, _PAD:_PAD + size] = h_r

    def conv_transpose(w_ref, bias):
        # ConvTranspose2d(1->1, k=5, s=1, p=2) == 25 shifted multiply-adds on
        # the zero-padded image (pure VPU, exact f32).
        acc = jnp.zeros((batch, size, size), jnp.float32)
        for u in range(_KSIZE):
            for v in range(_KSIZE):
                w = w_ref[(_KSIZE - 1 - u) * _KSIZE + (_KSIZE - 1 - v)]
                acc = acc + w * pad_ref[:, u:u + size, v:v + size]
        return _leaky_relu(acc + bias)

    y = conv_transpose(w1_ref, cb_ref[0])                 # conv layer 0
    pad_ref[:, _PAD:_PAD + size, _PAD:_PAD + size] = y    # feed conv layer 1
    y = conv_transpose(w2_ref, cb_ref[1])                 # conv layer 1

    o_ref[...] = y                                        # already f32


class CNNDecoderPallas:
    """Pallas TPU implementation of cca_zoo CNNDecoder (default config)."""

    def __init__(self, latent_dimensions: int, feature_size=(28, 28), key=None):
        if key is None:
            key = jax.random.PRNGKey(0)
        self.latent_dimensions = latent_dimensions
        self._size = int(feature_size[0])
        self._hw = self._size * self._size

        k_fw, k_fb, k_1w, k_1b, k_2w, k_2b = jax.random.split(key, 6)

        # nn.Linear default init: U(+-1/sqrt(fan_in)).  Stored as (in, out).
        b_fc = 1.0 / math.sqrt(latent_dimensions)
        self.w_fc = jax.random.uniform(
            k_fw, (latent_dimensions, self._hw), jnp.float32, -b_fc, b_fc)
        self.b_fc = jax.random.uniform(k_fb, (self._hw,), jnp.float32, -b_fc, b_fc)

        # nn.ConvTranspose2d default init: U(+-1/sqrt(in_ch * kh * kw)) = +-0.2.
        b_c = 1.0 / math.sqrt(1 * _KSIZE * _KSIZE)
        self.w_c1 = jax.random.uniform(k_1w, (_KSIZE, _KSIZE), jnp.float32, -b_c, b_c)
        self.c1 = jax.random.uniform(k_1b, (), jnp.float32, -b_c, b_c)
        self.w_c2 = jax.random.uniform(k_2w, (_KSIZE, _KSIZE), jnp.float32, -b_c, b_c)
        self.c2 = jax.random.uniform(k_2b, (), jnp.float32, -b_c, b_c)

        # Kernel-side weight packaging (once, at construction):
        #  * Linear weight/bias chunked per output-image row -> aligned leading
        #    dim indexing in the kernel, no in-kernel reshapes.
        #  * 5x5 conv kernels flattened for SMEM scalar reads; biases as scalars.
        s = self._size
        self._wfc_rows = self.w_fc.reshape(latent_dimensions, s, s).transpose(1, 0, 2)
        self._bfc_rows = self.b_fc.reshape(s, 1, s)
        self._w1_flat = self.w_c1.reshape(-1)
        self._w2_flat = self.w_c2.reshape(-1)
        self._conv_bias = jnp.stack([self.c1, self.c2])

    def forward(self, x: jax.Array) -> jax.Array:
        assert x.ndim == 2 and x.shape[1] == self.latent_dimensions, (
            f"expected (batch, {self.latent_dimensions}), got {x.shape}")
        batch = x.shape[0]
        s = self._size

        vmem = pl.BlockSpec(memory_space=pltpu.MemorySpace.VMEM)
        smem = pl.BlockSpec(memory_space=pltpu.MemorySpace.SMEM)

        flops = (2 * batch * self.latent_dimensions * self._hw        # fc matmul
                 + 2 * (2 * batch * self._hw * _KSIZE * _KSIZE))      # two convs
        bytes_accessed = 4 * (x.size + self._wfc_rows.size + self._bfc_rows.size
                              + self._w1_flat.size + self._w2_flat.size
                              + self._conv_bias.size + batch * self._hw)

        out = pl.pallas_call(
            _cnn_decoder_kernel,
            out_shape=jax.ShapeDtypeStruct((batch, s, s), jnp.float32),
            in_specs=[vmem, vmem, vmem, smem, smem, smem],
            out_specs=vmem,
            scratch_shapes=[
                pltpu.VMEM((batch, s + 2 * _PAD, s + 2 * _PAD), jnp.float32)],
            cost_estimate=pl.CostEstimate(
                flops=flops, transcendentals=0, bytes_accessed=bytes_accessed),
        )(x, self._wfc_rows, self._bfc_rows, self._w1_flat, self._w2_flat,
          self._conv_bias)
        # NCHW view expected by the PyTorch module; pure metadata reshape.
        return out.reshape(batch, 1, s, s)

    __call__ = forward


def _reference_forward(x, dec: "CNNDecoderPallas"):
    """Pure-JAX reference implementing the PyTorch forward directly."""
    size = dec._size
    h = jnp.dot(x, dec.w_fc, precision=jax.lax.Precision.HIGHEST) + dec.b_fc
    h = jnp.where(h >= 0, h, _NEG_SLOPE * h)
    img = h.reshape(-1, size, size)

    def conv_transpose(img, w, bias):
        xp = jnp.pad(img, ((0, 0), (_PAD, _PAD), (_PAD, _PAD)))
        out = jnp.zeros_like(img)
        for u in range(_KSIZE):
            for v in range(_KSIZE):
                out = out + w[_KSIZE - 1 - u, _KSIZE - 1 - v] * xp[:, u:u + size, v:v + size]
        return out + bias

    y = conv_transpose(img, dec.w_c1, dec.c1)
    y = jnp.where(y >= 0, y, _NEG_SLOPE * y)
    y = conv_transpose(y, dec.w_c2, dec.c2)
    y = jnp.where(y >= 0, y, _NEG_SLOPE * y)
    return y.reshape(-1, 1, size, size)


if __name__ == "__main__":
    key = jax.random.PRNGKey(0)
    k_params, k_x = jax.random.split(key)

    batch = 2
    latent_dimensions = 32

    decoder = CNNDecoderPallas(latent_dimensions, feature_size=(28, 28), key=k_params)
    x = jax.random.normal(k_x, (batch, latent_dimensions), dtype=jnp.float32)

    out = jax.block_until_ready(decoder(x))
    assert out.shape == (batch, 1, 28, 28), out.shape
    assert out.dtype == jnp.float32

    ref = jax.block_until_ready(_reference_forward(x, decoder))
    # Convs are exact f32 on the VPU and the fc matmul runs at HIGHEST
    # precision, so the tolerance is tight.
    assert bool(jnp.allclose(out, ref, rtol=1e-4, atol=1e-4)), (
        float(jnp.max(jnp.abs(out - ref))))

    print("KERNEL_OK")
</pallas_src>

<mosaic_0001>
module attributes {stable_mosaic.version = 11 : i64} {
  func.func @_cnn_decoder_kernel(%arg0: memref<2x32xf32, #tpu.memory_space<vmem>>, %arg1: memref<28x32x28xf32, #tpu.memory_space<vmem>>, %arg2: memref<28x1x28xf32, #tpu.memory_space<vmem>>, %arg3: memref<25xf32, #tpu.memory_space<smem>>, %arg4: memref<25xf32, #tpu.memory_space<smem>>, %arg5: memref<2xf32, #tpu.memory_space<smem>>, %arg6: memref<2x28x28xf32, #tpu.memory_space<vmem>>, %arg7: memref<2x32x32xf32, #tpu.memory_space<vmem>>) attributes {dimension_semantics = [], scalar_prefetch = 0 : i64, scratch_operands = 1 : i64, tpu.core_type = #tpu.core_type<tc>} {
    %cst = arith.constant 0.000000e+00 : f32
    %0 = vector.broadcast %cst : f32 to vector<2x32x32xf32>
    %c0 = arith.constant 0 : index
    %c0_0 = arith.constant 0 : index
    %c0_1 = arith.constant 0 : index
    %1 = vector.load %arg7[%c0, %c0_0, %c0_1] : memref<2x32x32xf32, #tpu.memory_space<vmem>>, vector<2x32x32xf32>
    tpu.vector_store %arg7[%c0, %c0_0, %c0_1], %0 {strides = array<i32>} : memref<2x32x32xf32, #tpu.memory_space<vmem>>, vector<2x32x32xf32>,
    %c0_2 = arith.constant 0 : index
    %c0_3 = arith.constant 0 : index
    %2 = vector.load %arg0[%c0_2, %c0_3] : memref<2x32xf32, #tpu.memory_space<vmem>>, vector<2x32xf32>
    %c0_4 = arith.constant 0 : index
    %c0_5 = arith.constant 0 : index
    %c0_6 = arith.constant 0 : index
    %3 = vector.load %arg1[%c0_4, %c0_5, %c0_6] : memref<28x32x28xf32, #tpu.memory_space<vmem>>, vector<1x32x28xf32>
    %4 = vector.shape_cast %3 : vector<1x32x28xf32> to vector<32x28xf32>
    %cst_7 = arith.constant dense<0.000000e+00> : vector<2x28xf32>
    %5 = tpu.matmul %2, %4, %cst_7 {dimension_numbers = #tpu.dot_dimension_numbers<[1], [0], [0], [1], [0, 0, 1, 1], [], []>, precision = #tpu.contract_precision<fp32>} : vector<2x32xf32>, vector<32x28xf32>, vector<2x28xf32> -> vector<2x28xf32>
    %c0_8 = arith.constant 0 : index
    %c0_9 = arith.constant 0 : index
    %c0_10 = arith.constant 0 : index
    %6 = vector.load %arg2[%c0_8, %c0_9, %c0_10] : memref<28x1x28xf32, #tpu.memory_space<vmem>>, vector<1x1x28xf32>
    %7 = vector.shape_cast %6 : vector<1x1x28xf32> to vector<1x28xf32>
    %8 = vector.broadcast %7 : vector<1x28xf32> to vector<2x28xf32>
    %9 = arith.addf %5, %8 : vector<2x28xf32>
    %cst_11 = arith.constant 0.000000e+00 : f32
    %10 = vector.broadcast %cst_11 : f32 to vector<2x28xf32>
    %11 = arith.cmpf oge, %9, %10 : vector<2x28xf32>
    %cst_12 = arith.constant 0.00999999977 : f32
    %12 = vector.broadcast %cst_12 : f32 to vector<2x28xf32>
    %13 = arith.mulf %12, %9 : vector<2x28xf32>
    %14 = arith.select %11, %9, %13 : vector<2x28xi1>, vector<2x28xf32>
    %c0_13 = arith.constant 0 : index
    %c2 = arith.constant 2 : index
    %c2_14 = arith.constant 2 : index
    %15 = vector.load %arg7[%c0_13, %c2, %c2_14] : memref<2x32x32xf32, #tpu.memory_space<vmem>>, vector<2x1x28xf32>
    %16 = vector.shape_cast %15 : vector<2x1x28xf32> to vector<2x28xf32>
    %17 = vector.shape_cast %14 : vector<2x28xf32> to vector<2x1x28xf32>
    tpu.vector_store %arg7[%c0_13, %c2, %c2_14], %17 {strides = array<i32>} : memref<2x32x32xf32, #tpu.memory_space<vmem>>, vector<2x1x28xf32>,
    %c1 = arith.constant 1 : index
    %c0_15 = arith.constant 0 : index
    %c0_16 = arith.constant 0 : index
    %18 = vector.load %arg1[%c1, %c0_15, %c0_16] : memref<28x32x28xf32, #tpu.memory_space<vmem>>, vector<1x32x28xf32>
    %19 = vector.shape_cast %18 : vector<1x32x28xf32> to vector<32x28xf32>
    %cst_17 = arith.constant dense<0.000000e+00> : vector<2x28xf32>
    %20 = tpu.matmul %2, %19, %cst_17 {dimension_numbers = #tpu.dot_dimension_numbers<[1], [0], [0], [1], [0, 0, 1, 1], [], []>, precision = #tpu.contract_precision<fp32>} : vector<2x32xf32>, vector<32x28xf32>, vector<2x28xf32> -> vector<2x28xf32>
    %c1_18 = arith.constant 1 : index
    %c0_19 = arith.constant 0 : index
    %c0_20 = arith.constant 0 : index
    %21 = vector.load %arg2[%c1_18, %c0_19, %c0_20] : memref<28x1x28xf32, #tpu.memory_space<vmem>>, vector<1x1x28xf32>
    %22 = vector.shape_cast %21 : vector<1x1x28xf32> to vector<1x28xf32>
    %23 = vector.broadcast %22 : vector<1x28xf32> to vector<2x28xf32>
    %24 = arith.addf %20, %23 : vector<2x28xf32>
    %cst_21 = arith.constant 0.000000e+00 : f32
    %25 = vector.broadcast %cst_21 : f32 to vector<2x28xf32>
    %26 = arith.cmpf oge, %24, %25 : vector<2x28xf32>
    %cst_22 = arith.constant 0.00999999977 : f32
    %27 = vector.broadcast %cst_22 : f32 to vector<2x28xf32>
    %28 = arith.mulf %27, %24 : vector<2x28xf32>
    %29 = arith.select %26, %24, %28 : vector<2x28xi1>, vector<2x28xf32>
    %c0_23 = arith.constant 0 : index
    %c3 = arith.constant 3 : index
    %c2_24 = arith.constant 2 : index
    %30 = vector.load %arg7[%c0_23, %c3, %c2_24] : memref<2x32x32xf32, #tpu.memory_space<vmem>>, vector<2x1x28xf32>
    %31 = vector.shape_cast %30 : vector<2x1x28xf32> to vector<2x28xf32>
    %32 = vector.shape_cast %29 : vector<2x28xf32> to vector<2x1x28xf32>
    tpu.vector_store %arg7[%c0_23, %c3, %c2_24], %32 {strides = array<i32>} : memref<2x32x32xf32, #tpu.memory_space<vmem>>, vector<2x1x28xf32>,
    %c2_25 = arith.constant 2 : index
    %c0_26 = arith.constant 0 : index
    %c0_27 = arith.constant 0 : index
    %33 = vector.load %arg1[%c2_25, %c0_26, %c0_27] : memref<28x32x28xf32, #tpu.memory_space<vmem>>, vector<1x32x28xf32>
    %34 = vector.shape_cast %33 : vector<1x32x28xf32> to vector<32x28xf32>
    %cst_28 = arith.constant dense<0.000000e+00> : vector<2x28xf32>
    %35 = tpu.matmul %2, %34, %cst_28 {dimension_numbers = #tpu.dot_dimension_numbers<[1], [0], [0], [1], [0, 0, 1, 1], [], []>, precision = #tpu.contract_precision<fp32>} : vector<2x32xf32>, vector<32x28xf32>, vector<2x28xf32> -> vector<2x28xf32>
    %c2_29 = arith.constant 2 : index
    %c0_30 = arith.constant 0 : index
    %c0_31 = arith.constant 0 : index
    %36 = vector.load %arg2[%c2_29, %c0_30, %c0_31] : memref<28x1x28xf32, #tpu.memory_space<vmem>>, vector<1x1x28xf32>
    %37 = vector.shape_cast %36 : vector<1x1x28xf32> to vector<1x28xf32>
    %38 = vector.broadcast %37 : vector<1x28xf32> to vector<2x28xf32>
    %39 = arith.addf %35, %38 : vector<2x28xf32>
    %cst_32 = arith.constant 0.000000e+00 : f32
    %40 = vector.broadcast %cst_32 : f32 to vector<2x28xf32>
    %41 = arith.cmpf oge, %39, %40 : vector<2x28xf32>
    %cst_33 = arith.constant 0.00999999977 : f32
    %42 = vector.broadcast %cst_33 : f32 to vector<2x28xf32>
    %43 = arith.mulf %42, %39 : vector<2x28xf32>
    %44 = arith.select %41, %39, %43 : vector<2x28xi1>, vector<2x28xf32>
    %c0_34 = arith.constant 0 : index
    %c4 = arith.constant 4 : index
    %c2_35 = arith.constant 2 : index
    %45 = vector.load %arg7[%c0_34, %c4, %c2_35] : memref<2x32x32xf32, #tpu.memory_space<vmem>>, vector<2x1x28xf32>
    %46 = vector.shape_cast %45 : vector<2x1x28xf32> to vector<2x28xf32>
    %47 = vector.shape_cast %44 : vector<2x28xf32> to vector<2x1x28xf32>
    tpu.vector_store %arg7[%c0_34, %c4, %c2_35], %47 {strides = array<i32>} : memref<2x32x32xf32, #tpu.memory_space<vmem>>, vector<2x1x28xf32>,
    %c3_36 = arith.constant 3 : index
    %c0_37 = arith.constant 0 : index
    %c0_38 = arith.constant 0 : index
    %48 = vector.load %arg1[%c3_36, %c0_37, %c0_38] : memref<28x32x28xf32, #tpu.memory_space<vmem>>, vector<1x32x28xf32>
    %49 = vector.shape_cast %48 : vector<1x32x28xf32> to vector<32x28xf32>
    %cst_39 = arith.constant dense<0.000000e+00> : vector<2x28xf32>
    %50 = tpu.matmul %2, %49, %cst_39 {dimension_numbers = #tpu.dot_dimension_numbers<[1], [0], [0], [1], [0, 0, 1, 1], [], []>, precision = #tpu.contract_precision<fp32>} : vector<2x32xf32>, vector<32x28xf32>, vector<2x28xf32> -> vector<2x28xf32>
    %c3_40 = arith.constant 3 : index
    %c0_41 = arith.constant 0 : index
    %c0_42 = arith.constant 0 : index
    %51 = vector.load %arg2[%c3_40, %c0_41, %c0_42] : memref<28x1x28xf32, #tpu.memory_space<vmem>>, vector<1x1x28xf32>
    %52 = vector.shape_cast %51 : vector<1x1x28xf32> to vector<1x28xf32>
    %53 = vector.broadcast %52 : vector<1x28xf32> to vector<2x28xf32>
    %54 = arith.addf %50, %53 : vector<2x28xf32>
    %cst_43 = arith.constant 0.000000e+00 : f32
    %55 = vector.broadcast %cst_43 : f32 to vector<2x28xf32>
    %56 = arith.cmpf oge, %54, %55 : vector<2x28xf32>
    %cst_44 = arith.constant 0.00999999977 : f32
    %57 = vector.broadcast %cst_44 : f32 to vector<2x28xf32>
    %58 = arith.mulf %57, %54 : vector<2x28xf32>
    %59 = arith.select %56, %54, %58 : vector<2x28xi1>, vector<2x28xf32>
    %c0_45 = arith.constant 0 : index
    %c5 = arith.constant 5 : index
    %c2_46 = arith.constant 2 : index
    %60 = vector.load %arg7[%c0_45, %c5, %c2_46] : memref<2x32x32xf32, #tpu.memory_space<vmem>>, vector<2x1x28xf32>
    %61 = vector.shape_cast %60 : vector<2x1x28xf32> to vector<2x28xf32>
    %62 = vector.shape_cast %59 : vector<2x28xf32> to vector<2x1x28xf32>
    tpu.vector_store %arg7[%c0_45, %c5, %c2_46], %62 {strides = array<i32>} : memref<2x32x32xf32, #tpu.memory_space<vmem>>, vector<2x1x28xf32>,
    %c4_47 = arith.constant 4 : index
    %c0_48 = arith.constant 0 : index
    %c0_49 = arith.constant 0 : index
    %63 = vector.load %arg1[%c4_47, %c0_48, %c0_49] : memref<28x32x28xf32, #tpu.memory_space<vmem>>, vector<1x32x28xf32>
    %64 = vector.shape_cast %63 : vector<1x32x28xf32> to vector<32x28xf32>
    %cst_50 = arith.constant dense<0.000000e+00> : vector<2x28xf32>
    %65 = tpu.matmul %2, %64, %cst_50 {dimension_numbers = #tpu.dot_dimension_numbers<[1], [0], [0], [1], [0, 0, 1, 1], [], []>, precision = #tpu.contract_precision<fp32>} : vector<2x32xf32>, vector<32x28xf32>, vector<2x28xf32> -> vector<2x28xf32>
    %c4_51 = arith.constant 4 : index
    %c0_52 = arith.constant 0 : index
    %c0_53 = arith.constant 0 : index
    %66 = vector.load %arg2[%c4_51, %c0_52, %c0_53] : memref<28x1x28xf32, #tpu.memory_space<vmem>>, vector<1x1x28xf32>
    %67 = vector.shape_cast %66 : vector<1x1x28xf32> to vector<1x28xf32>
    %68 = vector.broadcast %67 : vector<1x28xf32> to vector<2x28xf32>
    %69 = arith.addf %65, %68 : vector<2x28xf32>
    %cst_54 = arith.constant 0.000000e+00 : f32
    %70 = vector.broadcast %cst_54 : f32 to vector<2x28xf32>
    %71 = arith.cmpf oge, %69, %70 : vector<2x28xf32>
    %cst_55 = arith.constant 0.00999999977 : f32
    %72 = vector.broadcast %cst_55 : f32 to vector<2x28xf32>
    %73 = arith.mulf %72, %69 : vector<2x28xf32>
    %74 = arith.select %71, %69, %73 : vector<2x28xi1>, vector<2x28xf32>
    %c0_56 = arith.constant 0 : index
    %c6 = arith.constant 6 : index
    %c2_57 = arith.constant 2 : index
    %75 = vector.load %arg7[%c0_56, %c6, %c2_57] : memref<2x32x32xf32, #tpu.memory_space<vmem>>, vector<2x1x28xf32>
    %76 = vector.shape_cast %75 : vector<2x1x28xf32> to vector<2x28xf32>
    %77 = vector.shape_cast %74 : vector<2x28xf32> to vector<2x1x28xf32>
    tpu.vector_store %arg7[%c0_56, %c6, %c2_57], %77 {strides = array<i32>} : memref<2x32x32xf32, #tpu.memory_space<vmem>>, vector<2x1x28xf32>,
    %c5_58 = arith.constant 5 : index
    %c0_59 = arith.constant 0 : index
    %c0_60 = arith.constant 0 : index
    %78 = vector.load %arg1[%c5_58, %c0_59, %c0_60] : memref<28x32x28xf32, #tpu.memory_space<vmem>>, vector<1x32x28xf32>
    %79 = vector.shape_cast %78 : vector<1x32x28xf32> to vector<32x28xf32>
    %cst_61 = arith.constant dense<0.000000e+00> : vector<2x28xf32>
    %80 = tpu.matmul %2, %79, %cst_61 {dimension_numbers = #tpu.dot_dimension_numbers<[1], [0], [0], [1], [0, 0, 1, 1], [], []>, precision = #tpu.contract_precision<fp32>} : vector<2x32xf32>, vector<32x28xf32>, vector<2x28xf32> -> vector<2x28xf32>
    %c5_62 = arith.constant 5 : index
    %c0_63 = arith.constant 0 : index
    %c0_64 = arith.constant 0 : index
    %81 = vector.load %arg2[%c5_62, %c0_63, %c0_64] : memref<28x1x28xf32, #tpu.memory_space<vmem>>, vector<1x1x28xf32>
    %82 = vector.shape_cast %81 : vector<1x1x28xf32> to vector<1x28xf32>
    %83 = vector.broadcast %82 : vector<1x28xf32> to vector<2x28xf32>
    %84 = arith.addf %80, %83 : vector<2x28xf32>
    %cst_65 = arith.constant 0.000000e+00 : f32
    %85 = vector.broadcast %cst_65 : f32 to vector<2x28xf32>
    %86 = arith.cmpf oge, %84, %85 : vector<2x28xf32>
    %cst_66 = arith.constant 0.00999999977 : f32
    %87 = vector.broadcast %cst_66 : f32 to vector<2x28xf32>
    %88 = arith.mulf %87, %84 : vector<2x28xf32>
    %89 = arith.select %86, %84, %88 : vector<2x28xi1>, vector<2x28xf32>
    %c0_67 = arith.constant 0 : index
    %c7 = arith.constant 7 : index
    %c2_68 = arith.constant 2 : index
    %90 = vector.load %arg7[%c0_67, %c7, %c2_68] : memref<2x32x32xf32, #tpu.memory_space<vmem>>, vector<2x1x28xf32>
    %91 = vector.shape_cast %90 : vector<2x1x28xf32> to vector<2x28xf32>
    %92 = vector.shape_cast %89 : vector<2x28xf32> to vector<2x1x28xf32>
    tpu.vector_store %arg7[%c0_67, %c7, %c2_68], %92 {strides = array<i32>} : memref<2x32x32xf32, #tpu.memory_space<vmem>>, vector<2x1x28xf32>,
    %c6_69 = arith.constant 6 : index
    %c0_70 = arith.constant 0 : index
    %c0_71 = arith.constant 0 : index
    %93 = vector.load %arg1[%c6_69, %c0_70, %c0_71] : memref<28x32x28xf32, #tpu.memory_space<vmem>>, vector<1x32x28xf32>
    %94 = vector.shape_cast %93 : vector<1x32x28xf32> to vector<32x28xf32>
    %cst_72 = arith.constant dense<0.000000e+00> : vector<2x28xf32>
    %95 = tpu.matmul %2, %94, %cst_72 {dimension_numbers = #tpu.dot_dimension_numbers<[1], [0], [0], [1], [0, 0, 1, 1], [], []>, precision = #tpu.contract_precision<fp32>} : vector<2x32xf32>, vector<32x28xf32>, vector<2x28xf32> -> vector<2x28xf32>
    %c6_73 = arith.constant 6 : index
    %c0_74 = arith.constant 0 : index
    %c0_75 = arith.constant 0 : index
    %96 = vector.load %arg2[%c6_73, %c0_74, %c0_75] : memref<28x1x28xf32, #tpu.memory_space<vmem>>, vector<1x1x28xf32>
    %97 = vector.shape_cast %96 : vector<1x1x28xf32> to vector<1x28xf32>
    %98 = vector.broadcast %97 : vector<1x28xf32> to vector<2x28xf32>
    %99 = arith.addf %95, %98 : vector<2x28xf32>
    %cst_76 = arith.constant 0.000000e+00 : f32
    %100 = vector.broadcast %cst_76 : f32 to vector<2x28xf32>
    %101 = arith.cmpf oge, %99, %100 : vector<2x28xf32>
    %cst_77 = arith.constant 0.00999999977 : f32
    %102 = vector.broadcast %cst_77 : f32 to vector<2x28xf32>
    %103 = arith.mulf %102, %99 : vector<2x28xf32>
    %104 = arith.select %101, %99, %103 : vector<2x28xi1>, vector<2x28xf32>
    %c0_78 = arith.constant 0 : index
    %c8 = arith.constant 8 : index
    %c2_79 = arith.constant 2 : index
    %105 = vector.load %arg7[%c0_78, %c8, %c2_79] : memref<2x32x32xf32, #tpu.memory_space<vmem>>, vector<2x1x28xf32>
    %106 = vector.shape_cast %105 : vector<2x1x28xf32> to vector<2x28xf32>
    %107 = vector.shape_cast %104 : vector<2x28xf32> to vector<2x1x28xf32>
    tpu.vector_store %arg7[%c0_78, %c8, %c2_79], %107 {strides = array<i32>} : memref<2x32x32xf32, #tpu.memory_space<vmem>>, vector<2x1x28xf32>,
    %c7_80 = arith.constant 7 : index
    %c0_81 = arith.constant 0 : index
    %c0_82 = arith.constant 0 : index
    %108 = vector.load %arg1[%c7_80, %c0_81, %c0_82] : memref<28x32x28xf32, #tpu.memory_space<vmem>>, vector<1x32x28xf32>
    %109 = vector.shape_cast %108 : vector<1x32x28xf32> to vector<32x28xf32>
    %cst_83 = arith.constant dense<0.000000e+00> : vector<2x28xf32>
    %110 = tpu.matmul %2, %109, %cst_83 {dimension_numbers = #tpu.dot_dimension_numbers<[1], [0], [0], [1], [0, 0, 1, 1], [], []>, precision = #tpu.contract_precision<fp32>} : vector<2x32xf32>, vector<32x28xf32>, vector<2x28xf32> -> vector<2x28xf32>
    %c7_84 = arith.constant 7 : index
    %c0_85 = arith.constant 0 : index
    %c0_86 = arith.constant 0 : index
    %111 = vector.load %arg2[%c7_84, %c0_85, %c0_86] : memref<28x1x28xf32, #tpu.memory_space<vmem>>, vector<1x1x28xf32>
    %112 = vector.shape_cast %111 : vector<1x1x28xf32> to vector<1x28xf32>
    %113 = vector.broadcast %112 : vector<1x28xf32> to vector<2x28xf32>
    %114 = arith.addf %110, %113 : vector<2x28xf32>
    %cst_87 = arith.constant 0.000000e+00 : f32
    %115 = vector.broadcast %cst_87 : f32 to vector<2x28xf32>
    %116 = arith.cmpf oge, %114, %115 : vector<2x28xf32>
    %cst_88 = arith.constant 0.00999999977 : f32
    %117 = vector.broadcast %cst_88 : f32 to vector<2x28xf32>
    %118 = arith.mulf %117, %114 : vector<2x28xf32>
    %119 = arith.select %116, %114, %118 : vector<2x28xi1>, vector<2x28xf32>
    %c0_89 = arith.constant 0 : index
    %c9 = arith.constant 9 : index
    %c2_90 = arith.constant 2 : index
    %120 = vector.load %arg7[%c0_89, %c9, %c2_90] : memref<2x32x32xf32, #tpu.memory_space<vmem>>, vector<2x1x28xf32>
    %121 = vector.shape_cast %120 : vector<2x1x28xf32> to vector<2x28xf32>
    %122 = vector.shape_cast %119 : vector<2x28xf32> to vector<2x1x28xf32>
    tpu.vector_store %arg7[%c0_89, %c9, %c2_90], %122 {strides = array<i32>} : memref<2x32x32xf32, #tpu.memory_space<vmem>>, vector<2x1x28xf32>,
    %c8_91 = arith.constant 8 : index
    %c0_92 = arith.constant 0 : index
    %c0_93 = arith.constant 0 : index
    %123 = vector.load %arg1[%c8_91, %c0_92, %c0_93] : memref<28x32x28xf32, #tpu.memory_space<vmem>>, vector<1x32x28xf32>
    %124 = vector.shape_cast %123 : vector<1x32x28xf32> to vector<32x28xf32>
    %cst_94 = arith.constant dense<0.000000e+00> : vector<2x28xf32>
    %125 = tpu.matmul %2, %124, %cst_94 {dimension_numbers = #tpu.dot_dimension_numbers<[1], [0], [0], [1], [0, 0, 1, 1], [], []>, precision = #tpu.contract_precision<fp32>} : vector<2x32xf32>, vector<32x28xf32>, vector<2x28xf32> -> vector<2x28xf32>
    %c8_95 = arith.constant 8 : index
    %c0_96 = arith.constant 0 : index
    %c0_97 = arith.constant 0 : index
    %126 = vector.load %arg2[%c8_95, %c0_96, %c0_97] : memref<28x1x28xf32, #tpu.memory_space<vmem>>, vector<1x1x28xf32>
    %127 = vector.shape_cast %126 : vector<1x1x28xf32> to vector<1x28xf32>
    %128 = vector.broadcast %127 : vector<1x28xf32> to vector<2x28xf32>
    %129 = arith.addf %125, %128 : vector<2x28xf32>
    %cst_98 = arith.constant 0.000000e+00 : f32
    %130 = vector.broadcast %cst_98 : f32 to vector<2x28xf32>
    %131 = arith.cmpf oge, %129, %130 : vector<2x28xf32>
    %cst_99 = arith.constant 0.00999999977 : f32
    %132 = vector.broadcast %cst_99 : f32 to vector<2x28xf32>
    %133 = arith.mulf %132, %129 : vector<2x28xf32>
    %134 = arith.select %131, %129, %133 : vector<2x28xi1>, vector<2x28xf32>
    %c0_100 = arith.constant 0 : index
    %c10 = arith.constant 10 : index
    %c2_101 = arith.constant 2 : index
    %135 = vector.load %arg7[%c0_100, %c10, %c2_101] : memref<2x32x32xf32, #tpu.memory_space<vmem>>, vector<2x1x28xf32>
    %136 = vector.shape_cast %135 : vector<2x1x28xf32> to vector<2x28xf32>
    %137 = vector.shape_cast %134 : vector<2x28xf32> to vector<2x1x28xf32>
    tpu.vector_store %arg7[%c0_100, %c10, %c2_101], %137 {strides = array<i32>} : memref<2x32x32xf32, #tpu.memory_space<vmem>>, vector<2x1x28xf32>,
    %c9_102 = arith.constant 9 : index
    %c0_103 = arith.constant 0 : index
    %c0_104 = arith.constant 0 : index
    %138 = vector.load %arg1[%c9_102, %c0_103, %c0_104] : memref<28x32x28xf32, #tpu.memory_space<vmem>>, vector<1x32x28xf32>
    %139 = vector.shape_cast %138 : vector<1x32x28xf32> to vector<32x28xf32>
    %cst_105 = arith.constant dense<0.000000e+00> : vector<2x28xf32>
    %140 = tpu.matmul %2, %139, %cst_105 {dimension_numbers = #tpu.dot_dimension_numbers<[1], [0], [0], [1], [0, 0, 1, 1], [], []>, precision = #tpu.contract_precision<fp32>} : vector<2x32xf32>, vector<32x28xf32>, vector<2x28xf32> -> vector<2x28xf32>
    %c9_106 = arith.constant 9 : index
    %c0_107 = arith.constant 0 : index
    %c0_108 = arith.constant 0 : index
    %141 = vector.load %arg2[%c9_106, %c0_107, %c0_108] : memref<28x1x28xf32, #tpu.memory_space<vmem>>, vector<1x1x28xf32>
    %142 = vector.shape_cast %141 : vector<1x1x28xf32> to vector<1x28xf32>
    %143 = vector.broadcast %142 : vector<1x28xf32> to vector<2x28xf32>
    %144 = arith.addf %140, %143 : vector<2x28xf32>
    %cst_109 = arith.constant 0.000000e+00 : f32
    %145 = vector.broadcast %cst_109 : f32 to vector<2x28xf32>
    %146 = arith.cmpf oge, %144, %145 : vector<2x28xf32>
    %cst_110 = arith.constant 0.00999999977 : f32
    %147 = vector.broadcast %cst_110 : f32 to vector<2x28xf32>
    %148 = arith.mulf %147, %144 : vector<2x28xf32>
    %149 = arith.select %146, %144, %148 : vector<2x28xi1>, vector<2x28xf32>
    %c0_111 = arith.constant 0 : index
    %c11 = arith.constant 11 : index
    %c2_112 = arith.constant 2 : index
    %150 = vector.load %arg7[%c0_111, %c11, %c2_112] : memref<2x32x32xf32, #tpu.memory_space<vmem>>, vector<2x1x28xf32>
    %151 = vector.shape_cast %150 : vector<2x1x28xf32> to vector<2x28xf32>
    %152 = vector.shape_cast %149 : vector<2x28xf32> to vector<2x1x28xf32>
    tpu.vector_store %arg7[%c0_111, %c11, %c2_112], %152 {strides = array<i32>} : memref<2x32x32xf32, #tpu.memory_space<vmem>>, vector<2x1x28xf32>,
    %c10_113 = arith.constant 10 : index
    %c0_114 = arith.constant 0 : index
    %c0_115 = arith.constant 0 : index
    %153 = vector.load %arg1[%c10_113, %c0_114, %c0_115] : memref<28x32x28xf32, #tpu.memory_space<vmem>>, vector<1x32x28xf32>
    %154 = vector.shape_cast %153 : vector<1x32x28xf32> to vector<32x28xf32>
    %cst_116 = arith.constant dense<0.000000e+00> : vector<2x28xf32>
    %155 = tpu.matmul %2, %154, %cst_116 {dimension_numbers = #tpu.dot_dimension_numbers<[1], [0], [0], [1], [0, 0, 1, 1], [], []>, precision = #tpu.contract_precision<fp32>} : vector<2x32xf32>, vector<32x28xf32>, vector<2x28xf32> -> vector<2x28xf32>
    %c10_117 = arith.constant 10 : index
    %c0_118 = arith.constant 0 : index
    %c0_119 = arith.constant 0 : index
    %156 = vector.load %arg2[%c10_117, %c0_118, %c0_119] : memref<28x1x28xf32, #tpu.memory_space<vmem>>, vector<1x1x28xf32>
    %157 = vector.shape_cast %156 : vector<1x1x28xf32> to vector<1x28xf32>
    %158 = vector.broadcast %157 : vector<1x28xf32> to vector<2x28xf32>
    %159 = arith.addf %155, %158 : vector<2x28xf32>
    %cst_120 = arith.constant 0.000000e+00 : f32
    %160 = vector.broadcast %cst_120 : f32 to vector<2x28xf32>
    %161 = arith.cmpf oge, %159, %160 : vector<2x28xf32>
    %cst_121 = arith.constant 0.00999999977 : f32
    %162 = vector.broadcast %cst_121 : f32 to vector<2x28xf32>
    %163 = arith.mulf %162, %159 : vector<2x28xf32>
    %164 = arith.select %161, %159, %163 : vector<2x28xi1>, vector<2x28xf32>
    %c0_122 = arith.constant 0 : index
    %c12 = arith.constant 12 : index
    %c2_123 = arith.constant 2 : index
    %165 = vector.load %arg7[%c0_122, %c12, %c2_123] : memref<2x32x32xf32, #tpu.memory_space<vmem>>, vector<2x1x28xf32>
    %166 = vector.shape_cast %165 : vector<2x1x28xf32> to vector<2x28xf32>
    %167 = vector.shape_cast %164 : vector<2x28xf32> to vector<2x1x28xf32>
    tpu.vector_store %arg7[%c0_122, %c12, %c2_123], %167 {strides = array<i32>} : memref<2x32x32xf32, #tpu.memory_space<vmem>>, vector<2x1x28xf32>,
    %c11_124 = arith.constant 11 : index
    %c0_125 = arith.constant 0 : index
    %c0_126 = arith.constant 0 : index
    %168 = vector.load %arg1[%c11_124, %c0_125, %c0_126] : memref<28x32x28xf32, #tpu.memory_space<vmem>>, vector<1x32x28xf32>
    %169 = vector.shape_cast %168 : vector<1x32x28xf32> to vector<32x28xf32>
    %cst_127 = arith.constant dense<0.000000e+00> : vector<2x28xf32>
    %170 = tpu.matmul %2, %169, %cst_127 {dimension_numbers = #tpu.dot_dimension_numbers<[1], [0], [0], [1], [0, 0, 1, 1], [], []>, precision = #tpu.contract_precision<fp32>} : vector<2x32xf32>, vector<32x28xf32>, vector<2x28xf32> -> vector<2x28xf32>
    %c11_128 = arith.constant 11 : index
    %c0_129 = arith.constant 0 : index
    %c0_130 = arith.constant 0 : index
    %171 = vector.load %arg2[%c11_128, %c0_129, %c0_130] : memref<28x1x28xf32, #tpu.memory_space<vmem>>, vector<1x1x28xf32>
    %172 = vector.shape_cast %171 : vector<1x1x28xf32> to vector<1x28xf32>
    %173 = vector.broadcast %172 : vector<1x28xf32> to vector<2x28xf32>
    %174 = arith.addf %170, %173 : vector<2x28xf32>
    %cst_131 = arith.constant 0.000000e+00 : f32
    %175 = vector.broadcast %cst_131 : f32 to vector<2x28xf32>
    %176 = arith.cmpf oge, %174, %175 : vector<2x28xf32>
    %cst_132 = arith.constant 0.00999999977 : f32
    %177 = vector.broadcast %cst_132 : f32 to vector<2x28xf32>
    %178 = arith.mulf %177, %174 : vector<2x28xf32>
    %179 = arith.select %176, %174, %178 : vector<2x28xi1>, vector<2x28xf32>
    %c0_133 = arith.constant 0 : index
    %c13 = arith.constant 13 : index
    %c2_134 = arith.constant 2 : index
    %180 = vector.load %arg7[%c0_133, %c13, %c2_134] : memref<2x32x32xf32, #tpu.memory_space<vmem>>, vector<2x1x28xf32>
    %181 = vector.shape_cast %180 : vector<2x1x28xf32> to vector<2x28xf32>
    %182 = vector.shape_cast %179 : vector<2x28xf32> to vector<2x1x28xf32>
    tpu.vector_store %arg7[%c0_133, %c13, %c2_134], %182 {strides = array<i32>} : memref<2x32x32xf32, #tpu.memory_space<vmem>>, vector<2x1x28xf32>,
    %c12_135 = arith.constant 12 : index
    %c0_136 = arith.constant 0 : index
    %c0_137 = arith.constant 0 : index
    %183 = vector.load %arg1[%c12_135, %c0_136, %c0_137] : memref<28x32x28xf32, #tpu.memory_space<vmem>>, vector<1x32x28xf32>
    %184 = vector.shape_cast %183 : vector<1x32x28xf32> to vector<32x28xf32>
    %cst_138 = arith.constant dense<0.000000e+00> : vector<2x28xf32>
    %185 = tpu.matmul %2, %184, %cst_138 {dimension_numbers = #tpu.dot_dimension_numbers<[1], [0], [0], [1], [0, 0, 1, 1], [], []>, precision = #tpu.contract_precision<fp32>} : vector<2x32xf32>, vector<32x28xf32>, vector<2x28xf32> -> vector<2x28xf32>
    %c12_139 = arith.constant 12 : index
    %c0_140 = arith.constant 0 : index
    %c0_141 = arith.constant 0 : index
    %186 = vector.load %arg2[%c12_139, %c0_140, %c0_141] : memref<28x1x28xf32, #tpu.memory_space<vmem>>, vector<1x1x28xf32>
    %187 = vector.shape_cast %186 : vector<1x1x28xf32> to vector<1x28xf32>
    %188 = vector.broadcast %187 : vector<1x28xf32> to vector<2x28xf32>
    %189 = arith.addf %185, %188 : vector<2x28xf32>
    %cst_142 = arith.constant 0.000000e+00 : f32
    %190 = vector.broadcast %cst_142 : f32 to vector<2x28xf32>
    %191 = arith.cmpf oge, %189, %190 : vector<2x28xf32>
    %cst_143 = arith.constant 0.00999999977 : f32
    %192 = vector.broadcast %cst_143 : f32 to vector<2x28xf32>
    %193 = arith.mulf %192, %189 : vector<2x28xf32>
    %194 = arith.select %191, %189, %193 : vector<2x28xi1>, vector<2x28xf32>
    %c0_144 = arith.constant 0 : index
    %c14 = arith.constant 14 : index
    %c2_145 = arith.constant 2 : index
    %195 = vector.load %arg7[%c0_144, %c14, %c2_145] : memref<2x32x32xf32, #tpu.memory_space<vmem>>, vector<2x1x28xf32>
    %196 = vector.shape_cast %195 : vector<2x1x28xf32> to vector<2x28xf32>
    %197 = vector.shape_cast %194 : vector<2x28xf32> to vector<2x1x28xf32>
    tpu.vector_store %arg7[%c0_144, %c14, %c2_145], %197 {strides = array<i32>} : memref<2x32x32xf32, #tpu.memory_space<vmem>>, vector<2x1x28xf32>,
    %c13_146 = arith.constant 13 : index
    %c0_147 = arith.constant 0 : index
    %c0_148 = arith.constant 0 : index
    %198 = vector.load %arg1[%c13_146, %c0_147, %c0_148] : memref<28x32x28xf32, #tpu.memory_space<vmem>>, vector<1x32x28xf32>
    %199 = vector.shape_cast %198 : vector<1x32x28xf32> to vector<32x28xf32>
    %cst_149 = arith.constant dense<0.000000e+00> : vector<2x28xf32>
    %200 = tpu.matmul %2, %199, %cst_149 {dimension_numbers = #tpu.dot_dimension_numbers<[1], [0], [0], [1], [0, 0, 1, 1], [], []>, precision = #tpu.contract_precision<fp32>} : vector<2x32xf32>, vector<32x28xf32>, vector<2x28xf32> -> vector<2x28xf32>
    %c13_150 = arith.constant 13 : index
    %c0_151 = arith.constant 0 : index
    %c0_152 = arith.constant 0 : index
    %201 = vector.load %arg2[%c13_150, %c0_151, %c0_152] : memref<28x1x28xf32, #tpu.memory_space<vmem>>, vector<1x1x28xf32>
    %202 = vector.shape_cast %201 : vector<1x1x28xf32> to vector<1x28xf32>
    %203 = vector.broadcast %202 : vector<1x28xf32> to vector<2x28xf32>
    %204 = arith.addf %200, %203 : vector<2x28xf32>
    %cst_153 = arith.constant 0.000000e+00 : f32
    %205 = vector.broadcast %cst_153 : f32 to vector<2x28xf32>
    %206 = arith.cmpf oge, %204, %205 : vector<2x28xf32>
    %cst_154 = arith.constant 0.00999999977 : f32
    %207 = vector.broadcast %cst_154 : f32 to vector<2x28xf32>
    %208 = arith.mulf %207, %204 : vector<2x28xf32>
    %209 = arith.select %206, %204, %208 : vector<2x28xi1>, vector<2x28xf32>
    %c0_155 = arith.constant 0 : index
    %c15 = arith.constant 15 : index
    %c2_156 = arith.constant 2 : index
    %210 = vector.load %arg7[%c0_155, %c15, %c2_156] : memref<2x32x32xf32, #tpu.memory_space<vmem>>, vector<2x1x28xf32>
    %211 = vector.shape_cast %210 : vector<2x1x28xf32> to vector<2x28xf32>
    %212 = vector.shape_cast %209 : vector<2x28xf32> to vector<2x1x28xf32>
    tpu.vector_store %arg7[%c0_155, %c15, %c2_156], %212 {strides = array<i32>} : memref<2x32x32xf32, #tpu.memory_space<vmem>>, vector<2x1x28xf32>,
    %c14_157 = arith.constant 14 : index
    %c0_158 = arith.constant 0 : index
    %c0_159 = arith.constant 0 : index
    %213 = vector.load %arg1[%c14_157, %c0_158, %c0_159] : memref<28x32x28xf32, #tpu.memory_space<vmem>>, vector<1x32x28xf32>
    %214 = vector.shape_cast %213 : vector<1x32x28xf32> to vector<32x28xf32>
    %cst_160 = arith.constant dense<0.000000e+00> : vector<2x28xf32>
    %215 = tpu.matmul %2, %214, %cst_160 {dimension_numbers = #tpu.dot_dimension_numbers<[1], [0], [0], [1], [0, 0, 1, 1], [], []>, precision = #tpu.contract_precision<fp32>} : vector<2x32xf32>, vector<32x28xf32>, vector<2x28xf32> -> vector<2x28xf32>
    %c14_161 = arith.constant 14 : index
    %c0_162 = arith.constant 0 : index
    %c0_163 = arith.constant 0 : index
    %216 = vector.load %arg2[%c14_161, %c0_162, %c0_163] : memref<28x1x28xf32, #tpu.memory_space<vmem>>, vector<1x1x28xf32>
    %217 = vector.shape_cast %216 : vector<1x1x28xf32> to vector<1x28xf32>
    %218 = vector.broadcast %217 : vector<1x28xf32> to vector<2x28xf32>
    %219 = arith.addf %215, %218 : vector<2x28xf32>
    %cst_164 = arith.constant 0.000000e+00 : f32
    %220 = vector.broadcast %cst_164 : f32 to vector<2x28xf32>
    %221 = arith.cmpf oge, %219, %220 : vector<2x28xf32>
    %cst_165 = arith.constant 0.00999999977 : f32
    %222 = vector.broadcast %cst_165 : f32 to vector<2x28xf32>
    %223 = arith.mulf %222, %219 : vector<2x28xf32>
    %224 = arith.select %221, %219, %223 : vector<2x28xi1>, vector<2x28xf32>
    %c0_166 = arith.constant 0 : index
    %c16 = arith.constant 16 : index
    %c2_167 = arith.constant 2 : index
    %225 = vector.load %arg7[%c0_166, %c16, %c2_167] : memref<2x32x32xf32, #tpu.memory_space<vmem>>, vector<2x1x28xf32>
    %226 = vector.shape_cast %225 : vector<2x1x28xf32> to vector<2x28xf32>
    %227 = vector.shape_cast %224 : vector<2x28xf32> to vector<2x1x28xf32>
    tpu.vector_store %arg7[%c0_166, %c16, %c2_167], %227 {strides = array<i32>} : memref<2x32x32xf32, #tpu.memory_space<vmem>>, vector<2x1x28xf32>,
    %c15_168 = arith.constant 15 : index
    %c0_169 = arith.constant 0 : index
    %c0_170 = arith.constant 0 : index
    %228 = vector.load %arg1[%c15_168, %c0_169, %c0_170] : memref<28x32x28xf32, #tpu.memory_space<vmem>>, vector<1x32x28xf32>
    %229 = vector.shape_cast %228 : vector<1x32x28xf32> to vector<32x28xf32>
    %cst_171 = arith.constant dense<0.000000e+00> : vector<2x28xf32>
    %230 = tpu.matmul %2, %229, %cst_171 {dimension_numbers = #tpu.dot_dimension_numbers<[1], [0], [0], [1], [0, 0, 1, 1], [], []>, precision = #tpu.contract_precision<fp32>} : vector<2x32xf32>, vector<32x28xf32>, vector<2x28xf32> -> vector<2x28xf32>
    %c15_172 = arith.constant 15 : index
    %c0_173 = arith.constant 0 : index
    %c0_174 = arith.constant 0 : index
    %231 = vector.load %arg2[%c15_172, %c0_173, %c0_174] : memref<28x1x28xf32, #tpu.memory_space<vmem>>, vector<1x1x28xf32>
    %232 = vector.shape_cast %231 : vector<1x1x28xf32> to vector<1x28xf32>
    %233 = vector.broadcast %232 : vector<1x28xf32> to vector<2x28xf32>
    %234 = arith.addf %230, %233 : vector<2x28xf32>
    %cst_175 = arith.constant 0.000000e+00 : f32
    %235 = vector.broadcast %cst_175 : f32 to vector<2x28xf32>
    %236 = arith.cmpf oge, %234, %235 : vector<2x28xf32>
    %cst_176 = arith.constant 0.00999999977 : f32
    %237 = vector.broadcast %cst_176 : f32 to vector<2x28xf32>
    %238 = arith.mulf %237, %234 : vector<2x28xf32>
    %239 = arith.select %236, %234, %238 : vector<2x28xi1>, vector<2x28xf32>
    %c0_177 = arith.constant 0 : index
    %c17 = arith.constant 17 : index
    %c2_178 = arith.constant 2 : index
    %240 = vector.load %arg7[%c0_177, %c17, %c2_178] : memref<2x32x32xf32, #tpu.memory_space<vmem>>, vector<2x1x28xf32>
    %241 = vector.shape_cast %240 : vector<2x1x28xf32> to vector<2x28xf32>
    %242 = vector.shape_cast %239 : vector<2x28xf32> to vector<2x1x28xf32>
    tpu.vector_store %arg7[%c0_177, %c17, %c2_178], %242 {strides = array<i32>} : memref<2x32x32xf32, #tpu.memory_space<vmem>>, vector<2x1x28xf32>,
    %c16_179 = arith.constant 16 : index
    %c0_180 = arith.constant 0 : index
    %c0_181 = arith.constant 0 : index
    %243 = vector.load %arg1[%c16_179, %c0_180, %c0_181] : memref<28x32x28xf32, #tpu.memory_space<vmem>>, vector<1x32x28xf32>
    %244 = vector.shape_cast %243 : vector<1x32x28xf32> to vector<32x28xf32>
    %cst_182 = arith.constant dense<0.000000e+00> : vector<2x28xf32>
    %245 = tpu.matmul %2, %244, %cst_182 {dimension_numbers = #tpu.dot_dimension_numbers<[1], [0], [0], [1], [0, 0, 1, 1], [], []>, precision = #tpu.contract_precision<fp32>} : vector<2x32xf32>, vector<32x28xf32>, vector<2x28xf32> -> vector<2x28xf32>
    %c16_183 = arith.constant 16 : index
    %c0_184 = arith.constant 0 : index
    %c0_185 = arith.constant 0 : index
    %246 = vector.load %arg2[%c16_183, %c0_184, %c0_185] : memref<28x1x28xf32, #tpu.memory_space<vmem>>, vector<1x1x28xf32>
    %247 = vector.shape_cast %246 : vector<1x1x28xf32> to vector<1x28xf32>
    %248 = vector.broadcast %247 : vector<1x28xf32> to vector<2x28xf32>
    %249 = arith.addf %245, %248 : vector<2x28xf32>
    %cst_186 = arith.constant 0.000000e+00 : f32
    %250 = vector.broadcast %cst_186 : f32 to vector<2x28xf32>
    %251 = arith.cmpf oge, %249, %250 : vector<2x28xf32>
    %cst_187 = arith.constant 0.00999999977 : f32
    %252 = vector.broadcast %cst_187 : f32 to vector<2x28xf32>
    %253 = arith.mulf %252, %249 : vector<2x28xf32>
    %254 = arith.select %251, %249, %253 : vector<2x28xi1>, vector<2x28xf32>
    %c0_188 = arith.constant 0 : index
    %c18 = arith.constant 18 : index
    %c2_189 = arith.constant 2 : index
    %255 = vector.load %arg7[%c0_188, %c18, %c2_189] : memref<2x32x32xf32, #tpu.memory_space<vmem>>, vector<2x1x28xf32>
    %256 = vector.shape_cast %255 : vector<2x1x28xf32> to vector<2x28xf32>
    %257 = vector.shape_cast %254 : vector<2x28xf32> to vector<2x1x28xf32>
    tpu.vector_store %arg7[%c0_188, %c18, %c2_189], %257 {strides = array<i32>} : memref<2x32x32xf32, #tpu.memory_space<vmem>>, vector<2x1x28xf32>,
    %c17_190 = arith.constant 17 : index
    %c0_191 = arith.constant 0 : index
    %c0_192 = arith.constant 0 : index
    %258 = vector.load %arg1[%c17_190, %c0_191, %c0_192] : memref<28x32x28xf32, #tpu.memory_space<vmem>>, vector<1x32x28xf32>
    %259 = vector.shape_cast %258 : vector<1x32x28xf32> to vector<32x28xf32>
    %cst_193 = arith.constant dense<0.000000e+00> : vector<2x28xf32>
    %260 = tpu.matmul %2, %259, %cst_193 {dimension_numbers = #tpu.dot_dimension_numbers<[1], [0], [0], [1], [0, 0, 1, 1], [], []>, precision = #tpu.contract_precision<fp32>} : vector<2x32xf32>, vector<32x28xf32>, vector<2x28xf32> -> vector<2x28xf32>
    %c17_194 = arith.constant 17 : index
    %c0_195 = arith.constant 0 : index
    %c0_196 = arith.constant 0 : index
    %261 = vector.load %arg2[%c17_194, %c0_195, %c0_196] : memref<28x1x28xf32, #tpu.memory_space<vmem>>, vector<1x1x28xf32>
    %262 = vector.shape_cast %261 : vector<1x1x28xf32> to vector<1x28xf32>
    %263 = vector.broadcast %262 : vector<1x28xf32> to vector<2x28xf32>
    %264 = arith.addf %260, %263 : vector<2x28xf32>
    %cst_197 = arith.constant 0.000000e+00 : f32
    %265 = vector.broadcast %cst_197 : f32 to vector<2x28xf32>
    %266 = arith.cmpf oge, %264, %265 : vector<2x28xf32>
    %cst_198 = arith.constant 0.00999999977 : f32
    %267 = vector.broadcast %cst_198 : f32 to vector<2x28xf32>
    %268 = arith.mulf %267, %264 : vector<2x28xf32>
    %269 = arith.select %266, %264, %268 : vector<2x28xi1>, vector<2x28xf32>
    %c0_199 = arith.constant 0 : index
    %c19 = arith.constant 19 : index
    %c2_200 = arith.constant 2 : index
    %270 = vector.load %arg7[%c0_199, %c19, %c2_200] : memref<2x32x32xf32, #tpu.memory_space<vmem>>, vector<2x1x28xf32>
    %271 = vector.shape_cast %270 : vector<2x1x28xf32> to vector<2x28xf32>
    %272 = vector.shape_cast %269 : vector<2x28xf32> to vector<2x1x28xf32>
    tpu.vector_store %arg7[%c0_199, %c19, %c2_200], %272 {strides = array<i32>} : memref<2x32x32xf32, #tpu.memory_space<vmem>>, vector<2x1x28xf32>,
    %c18_201 = arith.constant 18 : index
    %c0_202 = arith.constant 0 : index
    %c0_203 = arith.constant 0 : index
    %273 = vector.load %arg1[%c18_201, %c0_202, %c0_203] : memref<28x32x28xf32, #tpu.memory_space<vmem>>, vector<1x32x28xf32>
    %274 = vector.shape_cast %273 : vector<1x32x28xf32> to vector<32x28xf32>
    %cst_204 = arith.constant dense<0.000000e+00> : vector<2x28xf32>
    %275 = tpu.matmul %2, %274, %cst_204 {dimension_numbers = #tpu.dot_dimension_numbers<[1], [0], [0], [1], [0, 0, 1, 1], [], []>, precision = #tpu.contract_precision<fp32>} : vector<2x32xf32>, vector<32x28xf32>, vector<2x28xf32> -> vector<2x28xf32>
    %c18_205 = arith.constant 18 : index
    %c0_206 = arith.constant 0 : index
    %c0_207 = arith.constant 0 : index
    %276 = vector.load %arg2[%c18_205, %c0_206, %c0_207] : memref<28x1x28xf32, #tpu.memory_space<vmem>>, vector<1x1x28xf32>
    %277 = vector.shape_cast %276 : vector<1x1x28xf32> to vector<1x28xf32>
    %278 = vector.broadcast %277 : vector<1x28xf32> to vector<2x28xf32>
    %279 = arith.addf %275, %278 : vector<2x28xf32>
    %cst_208 = arith.constant 0.000000e+00 : f32
    %280 = vector.broadcast %cst_208 : f32 to vector<2x28xf32>
    %281 = arith.cmpf oge, %279, %280 : vector<2x28xf32>
    %cst_209 = arith.constant 0.00999999977 : f32
    %282 = vector.broadcast %cst_209 : f32 to vector<2x28xf32>
    %283 = arith.mulf %282, %279 : vector<2x28xf32>
    %284 = arith.select %281, %279, %283 : vector<2x28xi1>, vector<2x28xf32>
    %c0_210 = arith.constant 0 : index
    %c20 = arith.constant 20 : index
    %c2_211 = arith.constant 2 : index
    %285 = vector.load %arg7[%c0_210, %c20, %c2_211] : memref<2x32x32xf32, #tpu.memory_space<vmem>>, vector<2x1x28xf32>
    %286 = vector.shape_cast %285 : vector<2x1x28xf32> to vector<2x28xf32>
    %287 = vector.shape_cast %284 : vector<2x28xf32> to vector<2x1x28xf32>
    tpu.vector_store %arg7[%c0_210, %c20, %c2_211], %287 {strides = array<i32>} : memref<2x32x32xf32, #tpu.memory_space<vmem>>, vector<2x1x28xf32>,
    %c19_212 = arith.constant 19 : index
    %c0_213 = arith.constant 0 : index
    %c0_214 = arith.constant 0 : index
    %288 = vector.load %arg1[%c19_212, %c0_213, %c0_214] : memref<28x32x28xf32, #tpu.memory_space<vmem>>, vector<1x32x28xf32>
    %289 = vector.shape_cast %288 : vector<1x32x28xf32> to vector<32x28xf32>
    %cst_215 = arith.constant dense<0.000000e+00> : vector<2x28xf32>
    %290 = tpu.matmul %2, %289, %cst_215 {dimension_numbers = #tpu.dot_dimension_numbers<[1], [0], [0], [1], [0, 0, 1, 1], [], []>, precision = #tpu.contract_precision<fp32>} : vector<2x32xf32>, vector<32x28xf32>, vector<2x28xf32> -> vector<2x28xf32>
    %c19_216 = arith.constant 19 : index
    %c0_217 = arith.constant 0 : index
    %c0_218 = arith.constant 0 : index
    %291 = vector.load %arg2[%c19_216, %c0_217, %c0_218] : memref<28x1x28xf32, #tpu.memory_space<vmem>>, vector<1x1x28xf32>
    %292 = vector.shape_cast %291 : vector<1x1x28xf32> to vector<1x28xf32>
    %293 = vector.broadcast %292 : vector<1x28xf32> to vector<2x28xf32>
    %294 = arith.addf %290, %293 : vector<2x28xf32>
    %cst_219 = arith.constant 0.000000e+00 : f32
    %295 = vector.broadcast %cst_219 : f32 to vector<2x28xf32>
    %296 = arith.cmpf oge, %294, %295 : vector<2x28xf32>
    %cst_220 = arith.constant 0.00999999977 : f32
    %297 = vector.broadcast %cst_220 : f32 to vector<2x28xf32>
    %298 = arith.mulf %297, %294 : vector<2x28xf32>
    %299 = arith.select %296, %294, %298 : vector<2x28xi1>, vector<2x28xf32>
    %c0_221 = arith.constant 0 : index
    %c21 = arith.constant 21 : index
    %c2_222 = arith.constant 2 : index
    %300 = vector.load %arg7[%c0_221, %c21, %c2_222] : memref<2x32x32xf32, #tpu.memory_space<vmem>>, vector<2x1x28xf32>
    %301 = vector.shape_cast %300 : vector<2x1x28xf32> to vector<2x28xf32>
    %302 = vector.shape_cast %299 : vector<2x28xf32> to vector<2x1x28xf32>
    tpu.vector_store %arg7[%c0_221, %c21, %c2_222], %302 {strides = array<i32>} : memref<2x32x32xf32, #tpu.memory_space<vmem>>, vector<2x1x28xf32>,
    %c20_223 = arith.constant 20 : index
    %c0_224 = arith.constant 0 : index
    %c0_225 = arith.constant 0 : index
    %303 = vector.load %arg1[%c20_223, %c0_224, %c0_225] : memref<28x32x28xf32, #tpu.memory_space<vmem>>, vector<1x32x28xf32>
    %304 = vector.shape_cast %303 : vector<1x32x28xf32> to vector<32x28xf32>
    %cst_226 = arith.constant dense<0.000000e+00> : vector<2x28xf32>
    %305 = tpu.matmul %2, %304, %cst_226 {dimension_numbers = #tpu.dot_dimension_numbers<[1], [0], [0], [1], [0, 0, 1, 1], [], []>, precision = #tpu.contract_precision<fp32>} : vector<2x32xf32>, vector<32x28xf32>, vector<2x28xf32> -> vector<2x28xf32>
    %c20_227 = arith.constant 20 : index
    %c0_228 = arith.constant 0 : index
    %c0_229 = arith.constant 0 : index
    %306 = vector.load %arg2[%c20_227, %c0_228, %c0_229] : memref<28x1x28xf32, #tpu.memory_space<vmem>>, vector<1x1x28xf32>
    %307 = vector.shape_cast %306 : vector<1x1x28xf32> to vector<1x28xf32>
    %308 = vector.broadcast %307 : vector<1x28xf32> to vector<2x28xf32>
    %309 = arith.addf %305, %308 : vector<2x28xf32>
    %cst_230 = arith.constant 0.000000e+00 : f32
    %310 = vector.broadcast %cst_230 : f32 to vector<2x28xf32>
    %311 = arith.cmpf oge, %309, %310 : vector<2x28xf32>
    %cst_231 = arith.constant 0.00999999977 : f32
    %312 = vector.broadcast %cst_231 : f32 to vector<2x28xf32>
    %313 = arith.mulf %312, %309 : vector<2x28xf32>
    %314 = arith.select %311, %309, %313 : vector<2x28xi1>, vector<2x28xf32>
    %c0_232 = arith.constant 0 : index
    %c22 = arith.constant 22 : index
    %c2_233 = arith.constant 2 : index
    %315 = vector.load %arg7[%c0_232, %c22, %c2_233] : memref<2x32x32xf32, #tpu.memory_space<vmem>>, vector<2x1x28xf32>
    %316 = vector.shape_cast %315 : vector<2x1x28xf32> to vector<2x28xf32>
    %317 = vector.shape_cast %314 : vector<2x28xf32> to vector<2x1x28xf32>
    tpu.vector_store %arg7[%c0_232, %c22, %c2_233], %317 {strides = array<i32>} : memref<2x32x32xf32, #tpu.memory_space<vmem>>, vector<2x1x28xf32>,
    %c21_234 = arith.constant 21 : index
    %c0_235 = arith.constant 0 : index
    %c0_236 = arith.constant 0 : index
    %318 = vector.load %arg1[%c21_234, %c0_235, %c0_236] : memref<28x32x28xf32, #tpu.memory_space<vmem>>, vector<1x32x28xf32>
    %319 = vector.shape_cast %318 : vector<1x32x28xf32> to vector<32x28xf32>
    %cst_237 = arith.constant dense<0.000000e+00> : vector<2x28xf32>
    %320 = tpu.matmul %2, %319, %cst_237 {dimension_numbers = #tpu.dot_dimension_numbers<[1], [0], [0], [1], [0, 0, 1, 1], [], []>, precision = #tpu.contract_precision<fp32>} : vector<2x32xf32>, vector<32x28xf32>, vector<2x28xf32> -> vector<2x28xf32>
    %c21_238 = arith.constant 21 : index
    %c0_239 = arith.constant 0 : index
    %c0_240 = arith.constant 0 : index
    %321 = vector.load %arg2[%c21_238, %c0_239, %c0_240] : memref<28x1x28xf32, #tpu.memory_space<vmem>>, vector<1x1x28xf32>
    %322 = vector.shape_cast %321 : vector<1x1x28xf32> to vector<1x28xf32>
    %323 = vector.broadcast %322 : vector<1x28xf32> to vector<2x28xf32>
    %324 = arith.addf %320, %323 : vector<2x28xf32>
    %cst_241 = arith.constant 0.000000e+00 : f32
    %325 = vector.broadcast %cst_241 : f32 to vector<2x28xf32>
    %326 = arith.cmpf oge, %324, %325 : vector<2x28xf32>
    %cst_242 = arith.constant 0.00999999977 : f32
    %327 = vector.broadcast %cst_242 : f32 to vector<2x28xf32>
    %328 = arith.mulf %327, %324 : vector<2x28xf32>
    %329 = arith.select %326, %324, %328 : vector<2x28xi1>, vector<2x28xf32>
    %c0_243 = arith.constant 0 : index
    %c23 = arith.constant 23 : index
    %c2_244 = arith.constant 2 : index
    %330 = vector.load %arg7[%c0_243, %c23, %c2_244] : memref<2x32x32xf32, #tpu.memory_space<vmem>>, vector<2x1x28xf32>
    %331 = vector.shape_cast %330 : vector<2x1x28xf32> to vector<2x28xf32>
    %332 = vector.shape_cast %329 : vector<2x28xf32> to vector<2x1x28xf32>
    tpu.vector_store %arg7[%c0_243, %c23, %c2_244], %332 {strides = array<i32>} : memref<2x32x32xf32, #tpu.memory_space<vmem>>, vector<2x1x28xf32>,
    %c22_245 = arith.constant 22 : index
    %c0_246 = arith.constant 0 : index
    %c0_247 = arith.constant 0 : index
    %333 = vector.load %arg1[%c22_245, %c0_246, %c0_247] : memref<28x32x28xf32, #tpu.memory_space<vmem>>, vector<1x32x28xf32>
    %334 = vector.shape_cast %333 : vector<1x32x28xf32> to vector<32x28xf32>
    %cst_248 = arith.constant dense<0.000000e+00> : vector<2x28xf32>
    %335 = tpu.matmul %2, %334, %cst_248 {dimension_numbers = #tpu.dot_dimension_numbers<[1], [0], [0], [1], [0, 0, 1, 1], [], []>, precision = #tpu.contract_precision<fp32>} : vector<2x32xf32>, vector<32x28xf32>, vector<2x28xf32> -> vector<2x28xf32>
    %c22_249 = arith.constant 22 : index
    %c0_250 = arith.constant 0 : index
    %c0_251 = arith.constant 0 : index
    %336 = vector.load %arg2[%c22_249, %c0_250, %c0_251] : memref<28x1x28xf32, #tpu.memory_space<vmem>>, vector<1x1x28xf32>
    %337 = vector.shape_cast %336 : vector<1x1x28xf32> to vector<1x28xf32>
    %338 = vector.broadcast %337 : vector<1x28xf32> to vector<2x28xf32>
    %339 = arith.addf %335, %338 : vector<2x28xf32>
    %cst_252 = arith.constant 0.000000e+00 : f32
    %340 = vector.broadcast %cst_252 : f32 to vector<2x28xf32>
    %341 = arith.cmpf oge, %339, %340 : vector<2x28xf32>
    %cst_253 = arith.constant 0.00999999977 : f32
    %342 = vector.broadcast %cst_253 : f32 to vector<2x28xf32>
    %343 = arith.mulf %342, %339 : vector<2x28xf32>
    %344 = arith.select %341, %339, %343 : vector<2x28xi1>, vector<2x28xf32>
    %c0_254 = arith.constant 0 : index
    %c24 = arith.constant 24 : index
    %c2_255 = arith.constant 2 : index
    %345 = vector.load %arg7[%c0_254, %c24, %c2_255] : memref<2x32x32xf32, #tpu.memory_space<vmem>>, vector<2x1x28xf32>
    %346 = vector.shape_cast %345 : vector<2x1x28xf32> to vector<2x28xf32>
    %347 = vector.shape_cast %344 : vector<2x28xf32> to vector<2x1x28xf32>
    tpu.vector_store %arg7[%c0_254, %c24, %c2_255], %347 {strides = array<i32>} : memref<2x32x32xf32, #tpu.memory_space<vmem>>, vector<2x1x28xf32>,
    %c23_256 = arith.constant 23 : index
    %c0_257 = arith.constant 0 : index
    %c0_258 = arith.constant 0 : index
    %348 = vector.load %arg1[%c23_256, %c0_257, %c0_258] : memref<28x32x28xf32, #tpu.memory_space<vmem>>, vector<1x32x28xf32>
    %349 = vector.shape_cast %348 : vector<1x32x28xf32> to vector<32x28xf32>
    %cst_259 = arith.constant dense<0.000000e+00> : vector<2x28xf32>
    %350 = tpu.matmul %2, %349, %cst_259 {dimension_numbers = #tpu.dot_dimension_numbers<[1], [0], [0], [1], [0, 0, 1, 1], [], []>, precision = #tpu.contract_precision<fp32>} : vector<2x32xf32>, vector<32x28xf32>, vector<2x28xf32> -> vector<2x28xf32>
    %c23_260 = arith.constant 23 : index
    %c0_261 = arith.constant 0 : index
    %c0_262 = arith.constant 0 : index
    %351 = vector.load %arg2[%c23_260, %c0_261, %c0_262] : memref<28x1x28xf32, #tpu.memory_space<vmem>>, vector<1x1x28xf32>
    %352 = vector.shape_cast %351 : vector<1x1x28xf32> to vector<1x28xf32>
    %353 = vector.broadcast %352 : vector<1x28xf32> to vector<2x28xf32>
    %354 = arith.addf %350, %353 : vector<2x28xf32>
    %cst_263 = arith.constant 0.000000e+00 : f32
    %355 = vector.broadcast %cst_263 : f32 to vector<2x28xf32>
    %356 = arith.cmpf oge, %354, %355 : vector<2x28xf32>
    %cst_264 = arith.constant 0.00999999977 : f32
    %357 = vector.broadcast %cst_264 : f32 to vector<2x28xf32>
    %358 = arith.mulf %357, %354 : vector<2x28xf32>
    %359 = arith.select %356, %354, %358 : vector<2x28xi1>, vector<2x28xf32>
    %c0_265 = arith.constant 0 : index
    %c25 = arith.constant 25 : index
    %c2_266 = arith.constant 2 : index
    %360 = vector.load %arg7[%c0_265, %c25, %c2_266] : memref<2x32x32xf32, #tpu.memory_space<vmem>>, vector<2x1x28xf32>
    %361 = vector.shape_cast %360 : vector<2x1x28xf32> to vector<2x28xf32>
    %362 = vector.shape_cast %359 : vector<2x28xf32> to vector<2x1x28xf32>
    tpu.vector_store %arg7[%c0_265, %c25, %c2_266], %362 {strides = array<i32>} : memref<2x32x32xf32, #tpu.memory_space<vmem>>, vector<2x1x28xf32>,
    %c24_267 = arith.constant 24 : index
    %c0_268 = arith.constant 0 : index
    %c0_269 = arith.constant 0 : index
    %363 = vector.load %arg1[%c24_267, %c0_268, %c0_269] : memref<28x32x28xf32, #tpu.memory_space<vmem>>, vector<1x32x28xf32>
    %364 = vector.shape_cast %363 : vector<1x32x28xf32> to vector<32x28xf32>
    %cst_270 = arith.constant dense<0.000000e+00> : vector<2x28xf32>
    %365 = tpu.matmul %2, %364, %cst_270 {dimension_numbers = #tpu.dot_dimension_numbers<[1], [0], [0], [1], [0, 0, 1, 1], [], []>, precision = #tpu.contract_precision<fp32>} : vector<2x32xf32>, vector<32x28xf32>, vector<2x28xf32> -> vector<2x28xf32>
    %c24_271 = arith.constant 24 : index
    %c0_272 = arith.constant 0 : index
    %c0_273 = arith.constant 0 : index
    %366 = vector.load %arg2[%c24_271, %c0_272, %c0_273] : memref<28x1x28xf32, #tpu.memory_space<vmem>>, vector<1x1x28xf32>
    %367 = vector.shape_cast %366 : vector<1x1x28xf32> to vector<1x28xf32>
    %368 = vector.broadcast %367 : vector<1x28xf32> to vector<2x28xf32>
    %369 = arith.addf %365, %368 : vector<2x28xf32>
    %cst_274 = arith.constant 0.000000e+00 : f32
    %370 = vector.broadcast %cst_274 : f32 to vector<2x28xf32>
    %371 = arith.cmpf oge, %369, %370 : vector<2x28xf32>
    %cst_275 = arith.constant 0.00999999977 : f32
    %372 = vector.broadcast %cst_275 : f32 to vector<2x28xf32>
    %373 = arith.mulf %372, %369 : vector<2x28xf32>
    %374 = arith.select %371, %369, %373 : vector<2x28xi1>, vector<2x28xf32>
    %c0_276 = arith.constant 0 : index
    %c26 = arith.constant 26 : index
    %c2_277 = arith.constant 2 : index
    %375 = vector.load %arg7[%c0_276, %c26, %c2_277] : memref<2x32x32xf32, #tpu.memory_space<vmem>>, vector<2x1x28xf32>
    %376 = vector.shape_cast %375 : vector<2x1x28xf32> to vector<2x28xf32>
    %377 = vector.shape_cast %374 : vector<2x28xf32> to vector<2x1x28xf32>
    tpu.vector_store %arg7[%c0_276, %c26, %c2_277], %377 {strides = array<i32>} : memref<2x32x32xf32, #tpu.memory_space<vmem>>, vector<2x1x28xf32>,
    %c25_278 = arith.constant 25 : index
    %c0_279 = arith.constant 0 : index
    %c0_280 = arith.constant 0 : index
    %378 = vector.load %arg1[%c25_278, %c0_279, %c0_280] : memref<28x32x28xf32, #tpu.memory_space<vmem>>, vector<1x32x28xf32>
    %379 = vector.shape_cast %378 : vector<1x32x28xf32> to vector<32x28xf32>
    %cst_281 = arith.constant dense<0.000000e+00> : vector<2x28xf32>
    %380 = tpu.matmul %2, %379, %cst_281 {dimension_numbers = #tpu.dot_dimension_numbers<[1], [0], [0], [1], [0, 0, 1, 1], [], []>, precision = #tpu.contract_precision<fp32>} : vector<2x32xf32>, vector<32x28xf32>, vector<2x28xf32> -> vector<2x28xf32>
    %c25_282 = arith.constant 25 : index
    %c0_283 = arith.constant 0 : index
    %c0_284 = arith.constant 0 : index
    %381 = vector.load %arg2[%c25_282, %c0_283, %c0_284] : memref<28x1x28xf32, #tpu.memory_space<vmem>>, vector<1x1x28xf32>
    %382 = vector.shape_cast %381 : vector<1x1x28xf32> to vector<1x28xf32>
    %383 = vector.broadcast %382 : vector<1x28xf32> to vector<2x28xf32>
    %384 = arith.addf %380, %383 : vector<2x28xf32>
    %cst_285 = arith.constant 0.000000e+00 : f32
    %385 = vector.broadcast %cst_285 : f32 to vector<2x28xf32>
    %386 = arith.cmpf oge, %384, %385 : vector<2x28xf32>
    %cst_286 = arith.constant 0.00999999977 : f32
    %387 = vector.broadcast %cst_286 : f32 to vector<2x28xf32>
    %388 = arith.mulf %387, %384 : vector<2x28xf32>
    %389 = arith.select %386, %384, %388 : vector<2x28xi1>, vector<2x28xf32>
    %c0_287 = arith.constant 0 : index
    %c27 = arith.constant 27 : index
    %c2_288 = arith.constant 2 : index
    %390 = vector.load %arg7[%c0_287, %c27, %c2_288] : memref<2x32x32xf32, #tpu.memory_space<vmem>>, vector<2x1x28xf32>
    %391 = vector.shape_cast %390 : vector<2x1x28xf32> to vector<2x28xf32>
    %392 = vector.shape_cast %389 : vector<2x28xf32> to vector<2x1x28xf32>
    tpu.vector_store %arg7[%c0_287, %c27, %c2_288], %392 {strides = array<i32>} : memref<2x32x32xf32, #tpu.memory_space<vmem>>, vector<2x1x28xf32>,
    %c26_289 = arith.constant 26 : index
    %c0_290 = arith.constant 0 : index
    %c0_291 = arith.constant 0 : index
    %393 = vector.load %arg1[%c26_289, %c0_290, %c0_291] : memref<28x32x28xf32, #tpu.memory_space<vmem>>, vector<1x32x28xf32>
    %394 = vector.shape_cast %393 : vector<1x32x28xf32> to vector<32x28xf32>
    %cst_292 = arith.constant dense<0.000000e+00> : vector<2x28xf32>
    %395 = tpu.matmul %2, %394, %cst_292 {dimension_numbers = #tpu.dot_dimension_numbers<[1], [0], [0], [1], [0, 0, 1, 1], [], []>, precision = #tpu.contract_precision<fp32>} : vector<2x32xf32>, vector<32x28xf32>, vector<2x28xf32> -> vector<2x28xf32>
    %c26_293 = arith.constant 26 : index
    %c0_294 = arith.constant 0 : index
    %c0_295 = arith.constant 0 : index
    %396 = vector.load %arg2[%c26_293, %c0_294, %c0_295] : memref<28x1x28xf32, #tpu.memory_space<vmem>>, vector<1x1x28xf32>
    %397 = vector.shape_cast %396 : vector<1x1x28xf32> to vector<1x28xf32>
    %398 = vector.broadcast %397 : vector<1x28xf32> to vector<2x28xf32>
    %399 = arith.addf %395, %398 : vector<2x28xf32>
    %cst_296 = arith.constant 0.000000e+00 : f32
    %400 = vector.broadcast %cst_296 : f32 to vector<2x28xf32>
    %401 = arith.cmpf oge, %399, %400 : vector<2x28xf32>
    %cst_297 = arith.constant 0.00999999977 : f32
    %402 = vector.broadcast %cst_297 : f32 to vector<2x28xf32>
    %403 = arith.mulf %402, %399 : vector<2x28xf32>
    %404 = arith.select %401, %399, %403 : vector<2x28xi1>, vector<2x28xf32>
    %c0_298 = arith.constant 0 : index
    %c28 = arith.constant 28 : index
    %c2_299 = arith.constant 2 : index
    %405 = vector.load %arg7[%c0_298, %c28, %c2_299] : memref<2x32x32xf32, #tpu.memory_space<vmem>>, vector<2x1x28xf32>
    %406 = vector.shape_cast %405 : vector<2x1x28xf32> to vector<2x28xf32>
    %407 = vector.shape_cast %404 : vector<2x28xf32> to vector<2x1x28xf32>
    tpu.vector_store %arg7[%c0_298, %c28, %c2_299], %407 {strides = array<i32>} : memref<2x32x32xf32, #tpu.memory_space<vmem>>, vector<2x1x28xf32>,
    %c27_300 = arith.constant 27 : index
    %c0_301 = arith.constant 0 : index
    %c0_302 = arith.constant 0 : index
    %408 = vector.load %arg1[%c27_300, %c0_301, %c0_302] : memref<28x32x28xf32, #tpu.memory_space<vmem>>, vector<1x32x28xf32>
    %409 = vector.shape_cast %408 : vector<1x32x28xf32> to vector<32x28xf32>
    %cst_303 = arith.constant dense<0.000000e+00> : vector<2x28xf32>
    %410 = tpu.matmul %2, %409, %cst_303 {dimension_numbers = #tpu.dot_dimension_numbers<[1], [0], [0], [1], [0, 0, 1, 1], [], []>, precision = #tpu.contract_precision<fp32>} : vector<2x32xf32>, vector<32x28xf32>, vector<2x28xf32> -> vector<2x28xf32>
    %c27_304 = arith.constant 27 : index
    %c0_305 = arith.constant 0 : index
    %c0_306 = arith.constant 0 : index
    %411 = vector.load %arg2[%c27_304, %c0_305, %c0_306] : memref<28x1x28xf32, #tpu.memory_space<vmem>>, vector<1x1x28xf32>
    %412 = vector.shape_cast %411 : vector<1x1x28xf32> to vector<1x28xf32>
    %413 = vector.broadcast %412 : vector<1x28xf32> to vector<2x28xf32>
    %414 = arith.addf %410, %413 : vector<2x28xf32>
    %cst_307 = arith.constant 0.000000e+00 : f32
    %415 = vector.broadcast %cst_307 : f32 to vector<2x28xf32>
    %416 = arith.cmpf oge, %414, %415 : vector<2x28xf32>
    %cst_308 = arith.constant 0.00999999977 : f32
    %417 = vector.broadcast %cst_308 : f32 to vector<2x28xf32>
    %418 = arith.mulf %417, %414 : vector<2x28xf32>
    %419 = arith.select %416, %414, %418 : vector<2x28xi1>, vector<2x28xf32>
    %c0_309 = arith.constant 0 : index
    %c29 = arith.constant 29 : index
    %c2_310 = arith.constant 2 : index
    %420 = vector.load %arg7[%c0_309, %c29, %c2_310] : memref<2x32x32xf32, #tpu.memory_space<vmem>>, vector<2x1x28xf32>
    %421 = vector.shape_cast %420 : vector<2x1x28xf32> to vector<2x28xf32>
    %422 = vector.shape_cast %419 : vector<2x28xf32> to vector<2x1x28xf32>
    tpu.vector_store %arg7[%c0_309, %c29, %c2_310], %422 {strides = array<i32>} : memref<2x32x32xf32, #tpu.memory_space<vmem>>, vector<2x1x28xf32>,
    %c0_311 = arith.constant 0 : index
    %423 = memref.load %arg5[%c0_311] : memref<2xf32, #tpu.memory_space<smem>>
    %cst_312 = arith.constant 0.000000e+00 : f32
    %424 = vector.broadcast %cst_312 : f32 to vector<2x28x28xf32>
    %c24_313 = arith.constant 24 : index
    %425 = memref.load %arg3[%c24_313] : memref<25xf32, #tpu.memory_space<smem>>
    %c0_314 = arith.constant 0 : index
    %c0_315 = arith.constant 0 : index
    %c0_316 = arith.constant 0 : index
    %426 = vector.load %arg7[%c0_314, %c0_315, %c0_316] : memref<2x32x32xf32, #tpu.memory_space<vmem>>, vector<2x28x28xf32>
    %427 = vector.broadcast %425 : f32 to vector<2x28x28xf32>
    %428 = arith.mulf %427, %426 : vector<2x28x28xf32>
    %429 = arith.addf %424, %428 : vector<2x28x28xf32>
    %c23_317 = arith.constant 23 : index
    %430 = memref.load %arg3[%c23_317] : memref<25xf32, #tpu.memory_space<smem>>
    %c0_318 = arith.constant 0 : index
    %c0_319 = arith.constant 0 : index
    %c1_320 = arith.constant 1 : index
    %431 = vector.load %arg7[%c0_318, %c0_319, %c1_320] : memref<2x32x32xf32, #tpu.memory_space<vmem>>, vector<2x28x28xf32>
    %432 = vector.broadcast %430 : f32 to vector<2x28x28xf32>
    %433 = arith.mulf %432, %431 : vector<2x28x28xf32>
    %434 = arith.addf %429, %433 : vector<2x28x28xf32>
    %c22_321 = arith.constant 22 : index
    %435 = memref.load %arg3[%c22_321] : memref<25xf32, #tpu.memory_space<smem>>
    %c0_322 = arith.constant 0 : index
    %c0_323 = arith.constant 0 : index
    %c2_324 = arith.constant 2 : index
    %436 = vector.load %arg7[%c0_322, %c0_323, %c2_324] : memref<2x32x32xf32, #tpu.memory_space<vmem>>, vector<2x28x28xf32>
    %437 = vector.broadcast %435 : f32 to vector<2x28x28xf32>
    %438 = arith.mulf %437, %436 : vector<2x28x28xf32>
    %439 = arith.addf %434, %438 : vector<2x28x28xf32>
    %c21_325 = arith.constant 21 : index
    %440 = memref.load %arg3[%c21_325] : memref<25xf32, #tpu.memory_space<smem>>
    %c0_326 = arith.constant 0 : index
    %c0_327 = arith.constant 0 : index
    %c3_328 = arith.constant 3 : index
    %441 = vector.load %arg7[%c0_326, %c0_327, %c3_328] : memref<2x32x32xf32, #tpu.memory_space<vmem>>, vector<2x28x28xf32>
    %442 = vector.broadcast %440 : f32 to vector<2x28x28xf32>
    %443 = arith.mulf %442, %441 : vector<2x28x28xf32>
    %444 = arith.addf %439, %443 : vector<2x28x28xf32>
    %c20_329 = arith.constant 20 : index
    %445 = memref.load %arg3[%c20_329] : memref<25xf32, #tpu.memory_space<smem>>
    %c0_330 = arith.constant 0 : index
    %c0_331 = arith.constant 0 : index
    %c4_332 = arith.constant 4 : index
    %446 = vector.load %arg7[%c0_330, %c0_331, %c4_332] : memref<2x32x32xf32, #tpu.memory_space<vmem>>, vector<2x28x28xf32>
    %447 = vector.broadcast %445 : f32 to vector<2x28x28xf32>
    %448 = arith.mulf %447, %446 : vector<2x28x28xf32>
    %449 = arith.addf %444, %448 : vector<2x28x28xf32>
    %c19_333 = arith.constant 19 : index
    %450 = memref.load %arg3[%c19_333] : memref<25xf32, #tpu.memory_space<smem>>
    %c0_334 = arith.constant 0 : index
    %c1_335 = arith.constant 1 : index
    %c0_336 = arith.constant 0 : index
    %451 = vector.load %arg7[%c0_334, %c1_335, %c0_336] : memref<2x32x32xf32, #tpu.memory_space<vmem>>, vector<2x28x28xf32>
    %452 = vector.broadcast %450 : f32 to vector<2x28x28xf32>
    %453 = arith.mulf %452, %451 : vector<2x28x28xf32>
    %454 = arith.addf %449, %453 : vector<2x28x28xf32>
    %c18_337 = arith.constant 18 : index
    %455 = memref.load %arg3[%c18_337] : memref<25xf32, #tpu.memory_space<smem>>
    %c0_338 = arith.constant 0 : index
    %c1_339 = arith.constant 1 : index
    %c1_340 = arith.constant 1 : index
    %456 = vector.load %arg7[%c0_338, %c1_339, %c1_340] : memref<2x32x32xf32, #tpu.memory_space<vmem>>, vector<2x28x28xf32>
    %457 = vector.broadcast %455 : f32 to vector<2x28x28xf32>
    %458 = arith.mulf %457, %456 : vector<2x28x28xf32>
    %459 = arith.addf %454, %458 : vector<2x28x28xf32>
    %c17_341 = arith.constant 17 : index
    %460 = memref.load %arg3[%c17_341] : memref<25xf32, #tpu.memory_space<smem>>
    %c0_342 = arith.constant 0 : index
    %c1_343 = arith.constant 1 : index
    %c2_344 = arith.constant 2 : index
    %461 = vector.load %arg7[%c0_342, %c1_343, %c2_344] : memref<2x32x32xf32, #tpu.memory_space<vmem>>, vector<2x28x28xf32>
    %462 = vector.broadcast %460 : f32 to vector<2x28x28xf32>
    %463 = arith.mulf %462, %461 : vector<2x28x28xf32>
    %464 = arith.addf %459, %463 : vector<2x28x28xf32>
    %c16_345 = arith.constant 16 : index
    %465 = memref.load %arg3[%c16_345] : memref<25xf32, #tpu.memory_space<smem>>
    %c0_346 = arith.constant 0 : index
    %c1_347 = arith.constant 1 : index
    %c3_348 = arith.constant 3 : index
    %466 = vector.load %arg7[%c0_346, %c1_347, %c3_348] : memref<2x32x32xf32, #tpu.memory_space<vmem>>, vector<2x28x28xf32>
    %467 = vector.broadcast %465 : f32 to vector<2x28x28xf32>
    %468 = arith.mulf %467, %466 : vector<2x28x28xf32>
    %469 = arith.addf %464, %468 : vector<2x28x28xf32>
    %c15_349 = arith.constant 15 : index
    %470 = memref.load %arg3[%c15_349] : memref<25xf32, #tpu.memory_space<smem>>
    %c0_350 = arith.constant 0 : index
    %c1_351 = arith.constant 1 : index
    %c4_352 = arith.constant 4 : index
    %471 = vector.load %arg7[%c0_350, %c1_351, %c4_352] : memref<2x32x32xf32, #tpu.memory_space<vmem>>, vector<2x28x28xf32>
    %472 = vector.broadcast %470 : f32 to vector<2x28x28xf32>
    %473 = arith.mulf %472, %471 : vector<2x28x28xf32>
    %474 = arith.addf %469, %473 : vector<2x28x28xf32>
    %c14_353 = arith.constant 14 : index
    %475 = memref.load %arg3[%c14_353] : memref<25xf32, #tpu.memory_space<smem>>
    %c0_354 = arith.constant 0 : index
    %c2_355 = arith.constant 2 : index
    %c0_356 = arith.constant 0 : index
    %476 = vector.load %arg7[%c0_354, %c2_355, %c0_356] : memref<2x32x32xf32, #tpu.memory_space<vmem>>, vector<2x28x28xf32>
    %477 = vector.broadcast %475 : f32 to vector<2x28x28xf32>
    %478 = arith.mulf %477, %476 : vector<2x28x28xf32>
    %479 = arith.addf %474, %478 : vector<2x28x28xf32>
    %c13_357 = arith.constant 13 : index
    %480 = memref.load %arg3[%c13_357] : memref<25xf32, #tpu.memory_space<smem>>
    %c0_358 = arith.constant 0 : index
    %c2_359 = arith.constant 2 : index
    %c1_360 = arith.constant 1 : index
    %481 = vector.load %arg7[%c0_358, %c2_359, %c1_360] : memref<2x32x32xf32, #tpu.memory_space<vmem>>, vector<2x28x28xf32>
    %482 = vector.broadcast %480 : f32 to vector<2x28x28xf32>
    %483 = arith.mulf %482, %481 : vector<2x28x28xf32>
    %484 = arith.addf %479, %483 : vector<2x28x28xf32>
    %c12_361 = arith.constant 12 : index
    %485 = memref.load %arg3[%c12_361] : memref<25xf32, #tpu.memory_space<smem>>
    %c0_362 = arith.constant 0 : index
    %c2_363 = arith.constant 2 : index
    %c2_364 = arith.constant 2 : index
    %486 = vector.load %arg7[%c0_362, %c2_363, %c2_364] : memref<2x32x32xf32, #tpu.memory_space<vmem>>, vector<2x28x28xf32>
    %487 = vector.broadcast %485 : f32 to vector<2x28x28xf32>
    %488 = arith.mulf %487, %486 : vector<2x28x28xf32>
    %489 = arith.addf %484, %488 : vector<2x28x28xf32>
    %c11_365 = arith.constant 11 : index
    %490 = memref.load %arg3[%c11_365] : memref<25xf32, #tpu.memory_space<smem>>
    %c0_366 = arith.constant 0 : index
    %c2_367 = arith.constant 2 : index
    %c3_368 = arith.constant 3 : index
    %491 = vector.load %arg7[%c0_366, %c2_367, %c3_368] : memref<2x32x32xf32, #tpu.memory_space<vmem>>, vector<2x28x28xf32>
    %492 = vector.broadcast %490 : f32 to vector<2x28x28xf32>
    %493 = arith.mulf %492, %491 : vector<2x28x28xf32>
    %494 = arith.addf %489, %493 : vector<2x28x28xf32>
    %c10_369 = arith.constant 10 : index
    %495 = memref.load %arg3[%c10_369] : memref<25xf32, #tpu.memory_space<smem>>
    %c0_370 = arith.constant 0 : index
    %c2_371 = arith.constant 2 : index
    %c4_372 = arith.constant 4 : index
    %496 = vector.load %arg7[%c0_370, %c2_371, %c4_372] : memref<2x32x32xf32, #tpu.memory_space<vmem>>, vector<2x28x28xf32>
    %497 = vector.broadcast %495 : f32 to vector<2x28x28xf32>
    %498 = arith.mulf %497, %496 : vector<2x28x28xf32>
    %499 = arith.addf %494, %498 : vector<2x28x28xf32>
    %c9_373 = arith.constant 9 : index
    %500 = memref.load %arg3[%c9_373] : memref<25xf32, #tpu.memory_space<smem>>
    %c0_374 = arith.constant 0 : index
    %c3_375 = arith.constant 3 : index
    %c0_376 = arith.constant 0 : index
    %501 = vector.load %arg7[%c0_374, %c3_375, %c0_376] : memref<2x32x32xf32, #tpu.memory_space<vmem>>, vector<2x28x28xf32>
    %502 = vector.broadcast %500 : f32 to vector<2x28x28xf32>
    %503 = arith.mulf %502, %501 : vector<2x28x28xf32>
    %504 = arith.addf %499, %503 : vector<2x28x28xf32>
    %c8_377 = arith.constant 8 : index
    %505 = memref.load %arg3[%c8_377] : memref<25xf32, #tpu.memory_space<smem>>
    %c0_378 = arith.constant 0 : index
    %c3_379 = arith.constant 3 : index
    %c1_380 = arith.constant 1 : index
    %506 = vector.load %arg7[%c0_378, %c3_379, %c1_380] : memref<2x32x32xf32, #tpu.memory_space<vmem>>, vector<2x28x28xf32>
    %507 = vector.broadcast %505 : f32 to vector<2x28x28xf32>
    %508 = arith.mulf %507, %506 : vector<2x28x28xf32>
    %509 = arith.addf %504, %508 : vector<2x28x28xf32>
    %c7_381 = arith.constant 7 : index
    %510 = memref.load %arg3[%c7_381] : memref<25xf32, #tpu.memory_space<smem>>
    %c0_382 = arith.constant 0 : index
    %c3_383 = arith.constant 3 : index
    %c2_384 = arith.constant 2 : index
    %511 = vector.load %arg7[%c0_382, %c3_383, %c2_384] : memref<2x32x32xf32, #tpu.memory_space<vmem>>, vector<2x28x28xf32>
    %512 = vector.broadcast %510 : f32 to vector<2x28x28xf32>
    %513 = arith.mulf %512, %511 : vector<2x28x28xf32>
    %514 = arith.addf %509, %513 : vector<2x28x28xf32>
    %c6_385 = arith.constant 6 : index
    %515 = memref.load %arg3[%c6_385] : memref<25xf32, #tpu.memory_space<smem>>
    %c0_386 = arith.constant 0 : index
    %c3_387 = arith.constant 3 : index
    %c3_388 = arith.constant 3 : index
    %516 = vector.load %arg7[%c0_386, %c3_387, %c3_388] : memref<2x32x32xf32, #tpu.memory_space<vmem>>, vector<2x28x28xf32>
    %517 = vector.broadcast %515 : f32 to vector<2x28x28xf32>
    %518 = arith.mulf %517, %516 : vector<2x28x28xf32>
    %519 = arith.addf %514, %518 : vector<2x28x28xf32>
    %c5_389 = arith.constant 5 : index
    %520 = memref.load %arg3[%c5_389] : memref<25xf32, #tpu.memory_space<smem>>
    %c0_390 = arith.constant 0 : index
    %c3_391 = arith.constant 3 : index
    %c4_392 = arith.constant 4 : index
    %521 = vector.load %arg7[%c0_390, %c3_391, %c4_392] : memref<2x32x32xf32, #tpu.memory_space<vmem>>, vector<2x28x28xf32>
    %522 = vector.broadcast %520 : f32 to vector<2x28x28xf32>
    %523 = arith.mulf %522, %521 : vector<2x28x28xf32>
    %524 = arith.addf %519, %523 : vector<2x28x28xf32>
    %c4_393 = arith.constant 4 : index
    %525 = memref.load %arg3[%c4_393] : memref<25xf32, #tpu.memory_space<smem>>
    %c0_394 = arith.constant 0 : index
    %c4_395 = arith.constant 4 : index
    %c0_396 = arith.constant 0 : index
    %526 = vector.load %arg7[%c0_394, %c4_395, %c0_396] : memref<2x32x32xf32, #tpu.memory_space<vmem>>, vector<2x28x28xf32>
    %527 = vector.broadcast %525 : f32 to vector<2x28x28xf32>
    %528 = arith.mulf %527, %526 : vector<2x28x28xf32>
    %529 = arith.addf %524, %528 : vector<2x28x28xf32>
    %c3_397 = arith.constant 3 : index
    %530 = memref.load %arg3[%c3_397] : memref<25xf32, #tpu.memory_space<smem>>
    %c0_398 = arith.constant 0 : index
    %c4_399 = arith.constant 4 : index
    %c1_400 = arith.constant 1 : index
    %531 = vector.load %arg7[%c0_398, %c4_399, %c1_400] : memref<2x32x32xf32, #tpu.memory_space<vmem>>, vector<2x28x28xf32>
    %532 = vector.broadcast %530 : f32 to vector<2x28x28xf32>
    %533 = arith.mulf %532, %531 : vector<2x28x28xf32>
    %534 = arith.addf %529, %533 : vector<2x28x28xf32>
    %c2_401 = arith.constant 2 : index
    %535 = memref.load %arg3[%c2_401] : memref<25xf32, #tpu.memory_space<smem>>
    %c0_402 = arith.constant 0 : index
    %c4_403 = arith.constant 4 : index
    %c2_404 = arith.constant 2 : index
    %536 = vector.load %arg7[%c0_402, %c4_403, %c2_404] : memref<2x32x32xf32, #tpu.memory_space<vmem>>, vector<2x28x28xf32>
    %537 = vector.broadcast %535 : f32 to vector<2x28x28xf32>
    %538 = arith.mulf %537, %536 : vector<2x28x28xf32>
    %539 = arith.addf %534, %538 : vector<2x28x28xf32>
    %c1_405 = arith.constant 1 : index
    %540 = memref.load %arg3[%c1_405] : memref<25xf32, #tpu.memory_space<smem>>
    %c0_406 = arith.constant 0 : index
    %c4_407 = arith.constant 4 : index
    %c3_408 = arith.constant 3 : index
    %541 = vector.load %arg7[%c0_406, %c4_407, %c3_408] : memref<2x32x32xf32, #tpu.memory_space<vmem>>, vector<2x28x28xf32>
    %542 = vector.broadcast %540 : f32 to vector<2x28x28xf32>
    %543 = arith.mulf %542, %541 : vector<2x28x28xf32>
    %544 = arith.addf %539, %543 : vector<2x28x28xf32>
    %c0_409 = arith.constant 0 : index
    %545 = memref.load %arg3[%c0_409] : memref<25xf32, #tpu.memory_space<smem>>
    %c0_410 = arith.constant 0 : index
    %c4_411 = arith.constant 4 : index
    %c4_412 = arith.constant 4 : index
    %546 = vector.load %arg7[%c0_410, %c4_411, %c4_412] : memref<2x32x32xf32, #tpu.memory_space<vmem>>, vector<2x28x28xf32>
    %547 = vector.broadcast %545 : f32 to vector<2x28x28xf32>
    %548 = arith.mulf %547, %546 : vector<2x28x28xf32>
    %549 = arith.addf %544, %548 : vector<2x28x28xf32>
    %550 = vector.broadcast %423 : f32 to vector<2x28x28xf32>
    %551 = arith.addf %549, %550 : vector<2x28x28xf32>
    %cst_413 = arith.constant 0.000000e+00 : f32
    %552 = vector.broadcast %cst_413 : f32 to vector<2x28x28xf32>
    %553 = arith.cmpf oge, %551, %552 : vector<2x28x28xf32>
    %cst_414 = arith.constant 0.00999999977 : f32
    %554 = vector.broadcast %cst_414 : f32 to vector<2x28x28xf32>
    %555 = arith.mulf %554, %551 : vector<2x28x28xf32>
    %556 = arith.select %553, %551, %555 : vector<2x28x28xi1>, vector<2x28x28xf32>
    %c0_415 = arith.constant 0 : index
    %c2_416 = arith.constant 2 : index
    %c2_417 = arith.constant 2 : index
    %557 = vector.load %arg7[%c0_415, %c2_416, %c2_417] : memref<2x32x32xf32, #tpu.memory_space<vmem>>, vector<2x28x28xf32>
    tpu.vector_store %arg7[%c0_415, %c2_416, %c2_417], %556 {strides = array<i32>} : memref<2x32x32xf32, #tpu.memory_space<vmem>>, vector<2x28x28xf32>,
    %c1_418 = arith.constant 1 : index
    %558 = memref.load %arg5[%c1_418] : memref<2xf32, #tpu.memory_space<smem>>
    %cst_419 = arith.constant 0.000000e+00 : f32
    %559 = vector.broadcast %cst_419 : f32 to vector<2x28x28xf32>
    %c24_420 = arith.constant 24 : index
    %560 = memref.load %arg4[%c24_420] : memref<25xf32, #tpu.memory_space<smem>>
    %c0_421 = arith.constant 0 : index
    %c0_422 = arith.constant 0 : index
    %c0_423 = arith.constant 0 : index
    %561 = vector.load %arg7[%c0_421, %c0_422, %c0_423] : memref<2x32x32xf32, #tpu.memory_space<vmem>>, vector<2x28x28xf32>
    %562 = vector.broadcast %560 : f32 to vector<2x28x28xf32>
    %563 = arith.mulf %562, %561 : vector<2x28x28xf32>
    %564 = arith.addf %559, %563 : vector<2x28x28xf32>
    %c23_424 = arith.constant 23 : index
    %565 = memref.load %arg4[%c23_424] : memref<25xf32, #tpu.memory_space<smem>>
    %c0_425 = arith.constant 0 : index
    %c0_426 = arith.constant 0 : index
    %c1_427 = arith.constant 1 : index
    %566 = vector.load %arg7[%c0_425, %c0_426, %c1_427] : memref<2x32x32xf32, #tpu.memory_space<vmem>>, vector<2x28x28xf32>
    %567 = vector.broadcast %565 : f32 to vector<2x28x28xf32>
    %568 = arith.mulf %567, %566 : vector<2x28x28xf32>
    %569 = arith.addf %564, %568 : vector<2x28x28xf32>
    %c22_428 = arith.constant 22 : index
    %570 = memref.load %arg4[%c22_428] : memref<25xf32, #tpu.memory_space<smem>>
    %c0_429 = arith.constant 0 : index
    %c0_430 = arith.constant 0 : index
    %c2_431 = arith.constant 2 : index
    %571 = vector.load %arg7[%c0_429, %c0_430, %c2_431] : memref<2x32x32xf32, #tpu.memory_space<vmem>>, vector<2x28x28xf32>
    %572 = vector.broadcast %570 : f32 to vector<2x28x28xf32>
    %573 = arith.mulf %572, %571 : vector<2x28x28xf32>
    %574 = arith.addf %569, %573 : vector<2x28x28xf32>
    %c21_432 = arith.constant 21 : index
    %575 = memref.load %arg4[%c21_432] : memref<25xf32, #tpu.memory_space<smem>>
    %c0_433 = arith.constant 0 : index
    %c0_434 = arith.constant 0 : index
    %c3_435 = arith.constant 3 : index
    %576 = vector.load %arg7[%c0_433, %c0_434, %c3_435] : memref<2x32x32xf32, #tpu.memory_space<vmem>>, vector<2x28x28xf32>
    %577 = vector.broadcast %575 : f32 to vector<2x28x28xf32>
    %578 = arith.mulf %577, %576 : vector<2x28x28xf32>
    %579 = arith.addf %574, %578 : vector<2x28x28xf32>
    %c20_436 = arith.constant 20 : index
    %580 = memref.load %arg4[%c20_436] : memref<25xf32, #tpu.memory_space<smem>>
    %c0_437 = arith.constant 0 : index
    %c0_438 = arith.constant 0 : index
    %c4_439 = arith.constant 4 : index
    %581 = vector.load %arg7[%c0_437, %c0_438, %c4_439] : memref<2x32x32xf32, #tpu.memory_space<vmem>>, vector<2x28x28xf32>
    %582 = vector.broadcast %580 : f32 to vector<2x28x28xf32>
    %583 = arith.mulf %582, %581 : vector<2x28x28xf32>
    %584 = arith.addf %579, %583 : vector<2x28x28xf32>
    %c19_440 = arith.constant 19 : index
    %585 = memref.load %arg4[%c19_440] : memref<25xf32, #tpu.memory_space<smem>>
    %c0_441 = arith.constant 0 : index
    %c1_442 = arith.constant 1 : index
    %c0_443 = arith.constant 0 : index
    %586 = vector.load %arg7[%c0_441, %c1_442, %c0_443] : memref<2x32x32xf32, #tpu.memory_space<vmem>>, vector<2x28x28xf32>
    %587 = vector.broadcast %585 : f32 to vector<2x28x28xf32>
    %588 = arith.mulf %587, %586 : vector<2x28x28xf32>
    %589 = arith.addf %584, %588 : vector<2x28x28xf32>
    %c18_444 = arith.constant 18 : index
    %590 = memref.load %arg4[%c18_444] : memref<25xf32, #tpu.memory_space<smem>>
    %c0_445 = arith.constant 0 : index
    %c1_446 = arith.constant 1 : index
    %c1_447 = arith.constant 1 : index
    %591 = vector.load %arg7[%c0_445, %c1_446, %c1_447] : memref<2x32x32xf32, #tpu.memory_space<vmem>>, vector<2x28x28xf32>
    %592 = vector.broadcast %590 : f32 to vector<2x28x28xf32>
    %593 = arith.mulf %592, %591 : vector<2x28x28xf32>
    %594 = arith.addf %589, %593 : vector<2x28x28xf32>
    %c17_448 = arith.constant 17 : index
    %595 = memref.load %arg4[%c17_448] : memref<25xf32, #tpu.memory_space<smem>>
    %c0_449 = arith.constant 0 : index
    %c1_450 = arith.constant 1 : index
    %c2_451 = arith.constant 2 : index
    %596 = vector.load %arg7[%c0_449, %c1_450, %c2_451] : memref<2x32x32xf32, #tpu.memory_space<vmem>>, vector<2x28x28xf32>
    %597 = vector.broadcast %595 : f32 to vector<2x28x28xf32>
    %598 = arith.mulf %597, %596 : vector<2x28x28xf32>
    %599 = arith.addf %594, %598 : vector<2x28x28xf32>
    %c16_452 = arith.constant 16 : index
    %600 = memref.load %arg4[%c16_452] : memref<25xf32, #tpu.memory_space<smem>>
    %c0_453 = arith.constant 0 : index
    %c1_454 = arith.constant 1 : index
    %c3_455 = arith.constant 3 : index
    %601 = vector.load %arg7[%c0_453, %c1_454, %c3_455] : memref<2x32x32xf32, #tpu.memory_space<vmem>>, vector<2x28x28xf32>
    %602 = vector.broadcast %600 : f32 to vector<2x28x28xf32>
    %603 = arith.mulf %602, %601 : vector<2x28x28xf32>
    %604 = arith.addf %599, %603 : vector<2x28x28xf32>
    %c15_456 = arith.constant 15 : index
    %605 = memref.load %arg4[%c15_456] : memref<25xf32, #tpu.memory_space<smem>>
    %c0_457 = arith.constant 0 : index
    %c1_458 = arith.constant 1 : index
    %c4_459 = arith.constant 4 : index
    %606 = vector.load %arg7[%c0_457, %c1_458, %c4_459] : memref<2x32x32xf32, #tpu.memory_space<vmem>>, vector<2x28x28xf32>
    %607 = vector.broadcast %605 : f32 to vector<2x28x28xf32>
    %608 = arith.mulf %607, %606 : vector<2x28x28xf32>
    %609 = arith.addf %604, %608 : vector<2x28x28xf32>
    %c14_460 = arith.constant 14 : index
    %610 = memref.load %arg4[%c14_460] : memref<25xf32, #tpu.memory_space<smem>>
    %c0_461 = arith.constant 0 : index
    %c2_462 = arith.constant 2 : index
    %c0_463 = arith.constant 0 : index
    %611 = vector.load %arg7[%c0_461, %c2_462, %c0_463] : memref<2x32x32xf32, #tpu.memory_space<vmem>>, vector<2x28x28xf32>
    %612 = vector.broadcast %610 : f32 to vector<2x28x28xf32>
    %613 = arith.mulf %612, %611 : vector<2x28x28xf32>
    %614 = arith.addf %609, %613 : vector<2x28x28xf32>
    %c13_464 = arith.constant 13 : index
    %615 = memref.load %arg4[%c13_464] : memref<25xf32, #tpu.memory_space<smem>>
    %c0_465 = arith.constant 0 : index
    %c2_466 = arith.constant 2 : index
    %c1_467 = arith.constant 1 : index
    %616 = vector.load %arg7[%c0_465, %c2_466, %c1_467] : memref<2x32x32xf32, #tpu.memory_space<vmem>>, vector<2x28x28xf32>
    %617 = vector.broadcast %615 : f32 to vector<2x28x28xf32>
    %618 = arith.mulf %617, %616 : vector<2x28x28xf32>
    %619 = arith.addf %614, %618 : vector<2x28x28xf32>
    %c12_468 = arith.constant 12 : index
    %620 = memref.load %arg4[%c12_468] : memref<25xf32, #tpu.memory_space<smem>>
    %c0_469 = arith.constant 0 : index
    %c2_470 = arith.constant 2 : index
    %c2_471 = arith.constant 2 : index
    %621 = vector.load %arg7[%c0_469, %c2_470, %c2_471] : memref<2x32x32xf32, #tpu.memory_space<vmem>>, vector<2x28x28xf32>
    %622 = vector.broadcast %620 : f32 to vector<2x28x28xf32>
    %623 = arith.mulf %622, %621 : vector<2x28x28xf32>
    %624 = arith.addf %619, %623 : vector<2x28x28xf32>
    %c11_472 = arith.constant 11 : index
    %625 = memref.load %arg4[%c11_472] : memref<25xf32, #tpu.memory_space<smem>>
    %c0_473 = arith.constant 0 : index
    %c2_474 = arith.constant 2 : index
    %c3_475 = arith.constant 3 : index
    %626 = vector.load %arg7[%c0_473, %c2_474, %c3_475] : memref<2x32x32xf32, #tpu.memory_space<vmem>>, vector<2x28x28xf32>
    %627 = vector.broadcast %625 : f32 to vector<2x28x28xf32>
    %628 = arith.mulf %627, %626 : vector<2x28x28xf32>
    %629 = arith.addf %624, %628 : vector<2x28x28xf32>
    %c10_476 = arith.constant 10 : index
    %630 = memref.load %arg4[%c10_476] : memref<25xf32, #tpu.memory_space<smem>>
    %c0_477 = arith.constant 0 : index
    %c2_478 = arith.constant 2 : index
    %c4_479 = arith.constant 4 : index
    %631 = vector.load %arg7[%c0_477, %c2_478, %c4_479] : memref<2x32x32xf32, #tpu.memory_space<vmem>>, vector<2x28x28xf32>
    %632 = vector.broadcast %630 : f32 to vector<2x28x28xf32>
    %633 = arith.mulf %632, %631 : vector<2x28x28xf32>
    %634 = arith.addf %629, %633 : vector<2x28x28xf32>
    %c9_480 = arith.constant 9 : index
    %635 = memref.load %arg4[%c9_480] : memref<25xf32, #tpu.memory_space<smem>>
    %c0_481 = arith.constant 0 : index
    %c3_482 = arith.constant 3 : index
    %c0_483 = arith.constant 0 : index
    %636 = vector.load %arg7[%c0_481, %c3_482, %c0_483] : memref<2x32x32xf32, #tpu.memory_space<vmem>>, vector<2x28x28xf32>
    %637 = vector.broadcast %635 : f32 to vector<2x28x28xf32>
    %638 = arith.mulf %637, %636 : vector<2x28x28xf32>
    %639 = arith.addf %634, %638 : vector<2x28x28xf32>
    %c8_484 = arith.constant 8 : index
    %640 = memref.load %arg4[%c8_484] : memref<25xf32, #tpu.memory_space<smem>>
    %c0_485 = arith.constant 0 : index
    %c3_486 = arith.constant 3 : index
    %c1_487 = arith.constant 1 : index
    %641 = vector.load %arg7[%c0_485, %c3_486, %c1_487] : memref<2x32x32xf32, #tpu.memory_space<vmem>>, vector<2x28x28xf32>
    %642 = vector.broadcast %640 : f32 to vector<2x28x28xf32>
    %643 = arith.mulf %642, %641 : vector<2x28x28xf32>
    %644 = arith.addf %639, %643 : vector<2x28x28xf32>
    %c7_488 = arith.constant 7 : index
    %645 = memref.load %arg4[%c7_488] : memref<25xf32, #tpu.memory_space<smem>>
    %c0_489 = arith.constant 0 : index
    %c3_490 = arith.constant 3 : index
    %c2_491 = arith.constant 2 : index
    %646 = vector.load %arg7[%c0_489, %c3_490, %c2_491] : memref<2x32x32xf32, #tpu.memory_space<vmem>>, vector<2x28x28xf32>
    %647 = vector.broadcast %645 : f32 to vector<2x28x28xf32>
    %648 = arith.mulf %647, %646 : vector<2x28x28xf32>
    %649 = arith.addf %644, %648 : vector<2x28x28xf32>
    %c6_492 = arith.constant 6 : index
    %650 = memref.load %arg4[%c6_492] : memref<25xf32, #tpu.memory_space<smem>>
    %c0_493 = arith.constant 0 : index
    %c3_494 = arith.constant 3 : index
    %c3_495 = arith.constant 3 : index
    %651 = vector.load %arg7[%c0_493, %c3_494, %c3_495] : memref<2x32x32xf32, #tpu.memory_space<vmem>>, vector<2x28x28xf32>
    %652 = vector.broadcast %650 : f32 to vector<2x28x28xf32>
    %653 = arith.mulf %652, %651 : vector<2x28x28xf32>
    %654 = arith.addf %649, %653 : vector<2x28x28xf32>
    %c5_496 = arith.constant 5 : index
    %655 = memref.load %arg4[%c5_496] : memref<25xf32, #tpu.memory_space<smem>>
    %c0_497 = arith.constant 0 : index
    %c3_498 = arith.constant 3 : index
    %c4_499 = arith.constant 4 : index
    %656 = vector.load %arg7[%c0_497, %c3_498, %c4_499] : memref<2x32x32xf32, #tpu.memory_space<vmem>>, vector<2x28x28xf32>
    %657 = vector.broadcast %655 : f32 to vector<2x28x28xf32>
    %658 = arith.mulf %657, %656 : vector<2x28x28xf32>
    %659 = arith.addf %654, %658 : vector<2x28x28xf32>
    %c4_500 = arith.constant 4 : index
    %660 = memref.load %arg4[%c4_500] : memref<25xf32, #tpu.memory_space<smem>>
    %c0_501 = arith.constant 0 : index
    %c4_502 = arith.constant 4 : index
    %c0_503 = arith.constant 0 : index
    %661 = vector.load %arg7[%c0_501, %c4_502, %c0_503] : memref<2x32x32xf32, #tpu.memory_space<vmem>>, vector<2x28x28xf32>
    %662 = vector.broadcast %660 : f32 to vector<2x28x28xf32>
    %663 = arith.mulf %662, %661 : vector<2x28x28xf32>
    %664 = arith.addf %659, %663 : vector<2x28x28xf32>
    %c3_504 = arith.constant 3 : index
    %665 = memref.load %arg4[%c3_504] : memref<25xf32, #tpu.memory_space<smem>>
    %c0_505 = arith.constant 0 : index
    %c4_506 = arith.constant 4 : index
    %c1_507 = arith.constant 1 : index
    %666 = vector.load %arg7[%c0_505, %c4_506, %c1_507] : memref<2x32x32xf32, #tpu.memory_space<vmem>>, vector<2x28x28xf32>
    %667 = vector.broadcast %665 : f32 to vector<2x28x28xf32>
    %668 = arith.mulf %667, %666 : vector<2x28x28xf32>
    %669 = arith.addf %664, %668 : vector<2x28x28xf32>
    %c2_508 = arith.constant 2 : index
    %670 = memref.load %arg4[%c2_508] : memref<25xf32, #tpu.memory_space<smem>>
    %c0_509 = arith.constant 0 : index
    %c4_510 = arith.constant 4 : index
    %c2_511 = arith.constant 2 : index
    %671 = vector.load %arg7[%c0_509, %c4_510, %c2_511] : memref<2x32x32xf32, #tpu.memory_space<vmem>>, vector<2x28x28xf32>
    %672 = vector.broadcast %670 : f32 to vector<2x28x28xf32>
    %673 = arith.mulf %672, %671 : vector<2x28x28xf32>
    %674 = arith.addf %669, %673 : vector<2x28x28xf32>
    %c1_512 = arith.constant 1 : index
    %675 = memref.load %arg4[%c1_512] : memref<25xf32, #tpu.memory_space<smem>>
    %c0_513 = arith.constant 0 : index
    %c4_514 = arith.constant 4 : index
    %c3_515 = arith.constant 3 : index
    %676 = vector.load %arg7[%c0_513, %c4_514, %c3_515] : memref<2x32x32xf32, #tpu.memory_space<vmem>>, vector<2x28x28xf32>
    %677 = vector.broadcast %675 : f32 to vector<2x28x28xf32>
    %678 = arith.mulf %677, %676 : vector<2x28x28xf32>
    %679 = arith.addf %674, %678 : vector<2x28x28xf32>
    %c0_516 = arith.constant 0 : index
    %680 = memref.load %arg4[%c0_516] : memref<25xf32, #tpu.memory_space<smem>>
    %c0_517 = arith.constant 0 : index
    %c4_518 = arith.constant 4 : index
    %c4_519 = arith.constant 4 : index
    %681 = vector.load %arg7[%c0_517, %c4_518, %c4_519] : memref<2x32x32xf32, #tpu.memory_space<vmem>>, vector<2x28x28xf32>
    %682 = vector.broadcast %680 : f32 to vector<2x28x28xf32>
    %683 = arith.mulf %682, %681 : vector<2x28x28xf32>
    %684 = arith.addf %679, %683 : vector<2x28x28xf32>
    %685 = vector.broadcast %558 : f32 to vector<2x28x28xf32>
    %686 = arith.addf %684, %685 : vector<2x28x28xf32>
    %cst_520 = arith.constant 0.000000e+00 : f32
    %687 = vector.broadcast %cst_520 : f32 to vector<2x28x28xf32>
    %688 = arith.cmpf oge, %686, %687 : vector<2x28x28xf32>
    %cst_521 = arith.constant 0.00999999977 : f32
    %689 = vector.broadcast %cst_521 : f32 to vector<2x28x28xf32>
    %690 = arith.mulf %689, %686 : vector<2x28x28xf32>
    %691 = arith.select %688, %686, %690 : vector<2x28x28xi1>, vector<2x28x28xf32>
    %c0_522 = arith.constant 0 : index
    %c0_523 = arith.constant 0 : index
    %c0_524 = arith.constant 0 : index
    %692 = vector.load %arg6[%c0_522, %c0_523, %c0_524] : memref<2x28x28xf32, #tpu.memory_space<vmem>>, vector<2x28x28xf32>
    tpu.vector_store %arg6[%c0_522, %c0_523, %c0_524], %691 {strides = array<i32>} : memref<2x28x28xf32, #tpu.memory_space<vmem>>, vector<2x28x28xf32>,
    return
  }
}

</mosaic_0001>

<bundles_post_ra>
// kernel: tpu_custom_call.1
= control target key start
LH: loop header
LB: loop body
LE: loop exit
PB: predicated region body
PF: predicated region fallthrough
CT: control target
= control target key end

     0   :  { %11 = vsyncpa [#allocation4], 0  ;;  %s25838_s0 = inlined_call_operand.hbm [shape: f32[2,32], index: 0, kind: input, shape index: {}]   ;;  %s25839_s1 = inlined_call_operand.hbm [shape: f32[28,32,28], index: 1, kind: input, shape index: {}]   ;;  %s25840_s2 = inlined_call_operand.hbm [shape: f32[28,1,28], index: 2, kind: input, shape index: {}]   ;;  %s25841_s3 = inlined_call_operand.vmem [shape: f32[25], index: 3, kind: input, shape index: {}]   ;;  %s25842_s4 = inlined_call_operand.vmem [shape: f32[25], index: 4, kind: input, shape index: {}]   ;;  %s25843_s5 = inlined_call_operand.vmem [shape: f32[2], index: 5, kind: input, shape index: {}]   ;;  %s25844_s6 = inlined_call_operand.vmem [shape: f32[2,28,28], index: 6, kind: output, shape index: {}]  }
   0x1   :  { %12 = vsyncpa [#allocation7], 0 }
   0x2   :  { %13 = vsyncpa [#allocation5], 0 }
   0x3   :  { %14 = vsyncpa [#allocation11], 0  ;;  %s20513_s21 = smov [#allocation6]   ;;  %s65_s25 = sshll.u32 %s25842_s4, 4  ;;  %s66_s25 = int_to_ptr.vmem [resolvable:$true] %s65_s25 }
   0x4   :  { %s30_s22 = sshll.u32 %s20513_s21, 4  ;;  %s31_s22 = int_to_ptr.vmem [resolvable:$true] %s30_s22 }
   0x5   :  { %s20417_s26 = scalar_lea.vmem %s31_s22, 14336  ;;  %p20422_p1 = scmp.lt.s32.totalorder %s31_s22, %s31_s22 }
   0x6   :  { %p20418_p0 = scmp.ne.s32.totalorder %s31_s22, %s20417_s26  ;;  %p20423_p2 = scmp.lt.s32.totalorder %s20417_s26, %s20417_s26 }
   0x8   :  { %p20424_p3 = por %p20423_p2, %p20422_p1 }
   0xa   :  { %p20425_p4 = pnand %p20424_p3, %p20418_p0 }
   0xc   :  { %20428 = shalt.err (!%p20425_p4)
}
   0xd   :  { %s20514_s27 = smov 128   ;;  %s20515_s28 = smov 8  }
   0xe   :  { %36 = dma.hbm_to_vmem [thread:$0]  %s25839_s1, 14336, %s31_s22, [#allocation7], %s20514_s27, %s20514_s27, %s20515_s28  }
   0xf   :  { %s20429_s7 = scalar_lea.vmem %s66_s25, 16  ;;  %p20434_p6 = scmp.lt.s32.totalorder %s66_s25, %s66_s25 }
  0x10   :  { %p20430_p5 = scmp.ne.s32.totalorder %s66_s25, %s20429_s7  ;;  %p20435_p7 = scmp.lt.s32.totalorder %s20429_s7, %s20429_s7 }
  0x12   :  { %p20436_p8 = por %p20435_p7, %p20434_p6 }
  0x14   :  { %p20437_p9 = pnand %p20436_p8, %p20430_p5 }
  0x16   :  { %20440 = shalt.err (!%p20437_p9)
}
  0x17   :  { %s20516_s4 = smov [#allocation10]   ;;  %s20517_s8 = smov [#allocation3]  }
  0x18   :  { %68 = dma.vmem_to_smem %s66_s25, 16, %s20516_s4, [#allocation11]  }
  0x19   :  { %s21_s9 = sshll.u32 %s20517_s8, 4  ;;  %s20518_s10 = smov [#allocation8]   ;;  %s22_s9 = int_to_ptr.vmem [resolvable:$true] %s21_s9 }
  0x1a   :  { %s42_s11 = sshll.u32 %s20518_s10, 4  ;;  %s20449_s12 = scalar_lea.vmem %s22_s9, 32  ;;  %s43_s11 = int_to_ptr.vmem [resolvable:$true] %s42_s11 }
  0x1b   :  { %p20450_p10 = scmp.ne.s32.totalorder %s22_s9, %s20449_s12  ;;  %p20454_p11 = scmp.lt.s32.totalorder %s22_s9, %s22_s9 }
  0x1c   :  { %p20455_p12 = scmp.lt.s32.totalorder %s20449_s12, %s20449_s12 }
  0x1e   :  { %p20456_p13 = por %p20455_p12, %p20454_p11 }
  0x20   :  { %p20457_p0 = pnand %p20456_p13, %p20450_p10 }
  0x22   :  { %20460 = shalt.err (!%p20457_p0)
}
  0x23   :  { %24 = dma.hbm_to_vmem [thread:$0]  %s25838_s0, 32, %s22_s9, [#allocation4]  }
  0x24   :  { %s20469_s14 = scalar_lea.vmem %s43_s11, 448  ;;  %p20474_p2 = scmp.lt.s32.totalorder %s43_s11, %s43_s11 }
  0x25   :  { %p20470_p1 = scmp.ne.s32.totalorder %s43_s11, %s20469_s14  ;;  %p20475_p3 = scmp.lt.s32.totalorder %s20469_s14, %s20469_s14 }
  0x27   :  { %p20476_p4 = por %p20475_p3, %p20474_p2 }
  0x29   :  { %p20477_p5 = pnand %p20476_p4, %p20470_p1 }
  0x2b   :  { %20480 = shalt.err (!%p20477_p5)
}
  0x2c   :  { %s20519_s15 = smov 16   ;;  %s20520_s16 = smov 1  }
  0x2d   :  { %48 = dma.hbm_to_vmem [thread:$0]  %s25840_s2, 448, %s43_s11, [#allocation7], %s20519_s15, %s20519_s15, %s20520_s16  }
  0x2e   :  { %s55_s21 = sshll.u32 %s25841_s3, 4  ;;  %s75_s23 = sshll.u32 %s25843_s5, 4  ;;  %s56_s21 = int_to_ptr.vmem [resolvable:$true] %s55_s21  ;;  %s76_s23 = int_to_ptr.vmem [resolvable:$true] %s75_s23 }
  0x2f   :  { %s20481_s24 = scalar_lea.vmem %s56_s21, 16  ;;  %p20486_p7 = scmp.lt.s32.totalorder %s56_s21, %s56_s21 }
  0x30   :  { %p20482_p6 = scmp.ne.s32.totalorder %s56_s21, %s20481_s24  ;;  %p20487_p8 = scmp.lt.s32.totalorder %s20481_s24, %s20481_s24 }
  0x32   :  { %p20488_p9 = por %p20487_p8, %p20486_p7 }
  0x34   :  { %p20489_p10 = pnand %p20488_p9, %p20482_p6 }
  0x36   :  { %20492 = shalt.err (!%p20489_p10)
}
  0x37   :  { %s20521_s25 = smov [#allocation9]   ;;  %s20493_s2 = scalar_lea.vmem %s76_s23, 16 }
  0x38   :  { %58 = dma.vmem_to_smem %s56_s21, 16, %s20521_s25, [#allocation5]  }
  0x39   :  { %p20494_p11 = scmp.ne.s32.totalorder %s76_s23, %s20493_s2  ;;  %p20498_p12 = scmp.lt.s32.totalorder %s76_s23, %s76_s23 }
  0x3a   :  { %p20499_p13 = scmp.lt.s32.totalorder %s20493_s2, %s20493_s2 }
  0x3c   :  { %p20500_p0 = por %p20499_p13, %p20498_p12 }
  0x3e   :  { %p20501_p1 = pnand %p20500_p0, %p20494_p11 }
  0x40   :  { %20504 = shalt.err (!%p20501_p1)
}
  0x41   :  { %s20522_s3 = smov [#allocation12]  }
  0x42   :  { %78 = dma.vmem_to_smem %s76_s23, 16, %s20522_s3, [#allocation11]  }
  0x43   :  { %20505 = dma.done.wait [#allocation4], 32  }
  0x44   :  { %20506 = vsyncadd [#allocation4], 4294967264 }
  0x45   :  { %20507 = dma.done.wait [#allocation7], 14784  }
  0x46   :  { %20508 = vsyncadd [#allocation7], 4294952512 }
  0x47   :  { %20509 = dma.done.wait [#allocation5], 16  }
  0x48   :  { %20510 = vsyncadd [#allocation5], 4294967280 }
  0x49   :  { %20511 = dma.done.wait [#allocation11], 32  }
  0x4a   :  { %20512 = vsyncadd [#allocation11], 4294967264 }
  0x4b   :  { %97 = sfence }
  0x4c   :  { %v111_v0 = vld [vmem:[#allocation6 + $0x18] sm:$0xff]  ;;  %v110_v1 = vld [vmem:[#allocation6 + $0x10] sm:$0xff]  ;;  %v109_v2 = vld [vmem:[#allocation6 + $0x8] sm:$0xff]  ;;  %vm98_vm0 = vcmask 261120   ;;  %v25852_v3 = vmov 0.0   ;;  %vm20524_vm1 = vmmov 0  }
  0x4d   :  { %18535 = vmatprep.subr.mxu0 %v25852_v3  ;;  %v20585_v4 = vand.u32 4294901760, %v111_v0  ;;  %v20587_v5 = vand.u32 4294901760, %v110_v1  ;;  %v20589_v6 = vand.u32 4294901760, %v109_v2  ;;  %18546 = vmatprep.subr.mxu1 %v25852_v3  ;;  %v108_v7 = vld [vmem:[#allocation6] sm:$0xff]  ;;  %v107_v8 = vld [vmem:[#allocation3] sm:$0x3] }
  0x4e   :  { %99 = vst.msk [vmem:[#allocation2] sm:$0xff] %vm98_vm0, %v25852_v3  ;;  %100 = vst.msk [vmem:[#allocation2 + $0x8] sm:$0xff] %vm98_vm0, %v25852_v3  ;;  %v20608_v9 = vand.u32 4294901760, %v108_v7  ;;  %18543 = vmatprep.mubr.msk.f32.mxu0 %vm20524_vm1, %v25852_v3  ;;  %v120_v10 = vsel %vm98_vm0, %v107_v8, 0  ;;  %18554 = vmatprep.mubr.msk.f32.mxu1 %vm20524_vm1, %v25852_v3  ;;  %v654_v32 = vld [vmem:[#allocation6 + $0x38] sm:$0xff]  ;;  %v653_v34 = vld [vmem:[#allocation6 + $0x30] sm:$0xff] }
  0x4f   :  { %101 = vst.msk [vmem:[#allocation2 + $0x10] sm:$0xff] %vm98_vm0, %v25852_v3  ;;  %102 = vst.msk [vmem:[#allocation2 + $0x18] sm:$0xff] %vm98_vm0, %v25852_v3  ;;  %18536 = vmatpush3.msra.mxu0 %v20585_v4  ;;  %v227_v11 = vsub.f32 %v111_v0, %v20585_v4  ;;  %v20617_v12 = vand.u32 4294901760, %v120_v10  ;;  %v234_v13 = vsub.f32 %v110_v1, %v20587_v5  ;;  %v20661_v33 = vand.u32 4294901760, %v654_v32  ;;  %v652_v35 = vld [vmem:[#allocation6 + $0x28] sm:$0xff]  ;;  %v651_v38 = vld [vmem:[#allocation6 + $0x20] sm:$0xff] }
  0x50   :  { %103 = vst.msk [vmem:[#allocation2 + $0x20] sm:$0xff] %vm98_vm0, %v25852_v3  ;;  %104 = vst.msk [vmem:[#allocation2 + $0x28] sm:$0xff] %vm98_vm0, %v25852_v3  ;;  %v20621_v14 = vsub.f32 %v109_v2, %v20589_v6  ;;  %18537 = vmatprep.subr.mxu0 %v25852_v3  ;;  %v20625_v15 = vsub.f32 %v108_v7, %v20608_v9  ;;  %v20669_v36 = vand.u32 4294901760, %v653_v34  ;;  %v20677_v39 = vand.u32 4294901760, %v652_v35  ;;  %v1194_v56 = vld [vmem:[#allocation6 + $0x58] sm:$0xff]  ;;  %v1193_v58 = vld [vmem:[#allocation6 + $0x50] sm:$0xff] }
  0x51   :  { %105 = vst.msk [vmem:[#allocation2 + $0x30] sm:$0xff] %vm98_vm0, %v25852_v3  ;;  %106 = vst.msk [vmem:[#allocation2 + $0x38] sm:$0xff] %vm98_vm0, %v25852_v3  ;;  %18538 = vmatpush3.msra.mxu0 %v20587_v5  ;;  %v228_v16 = vand.u32 4294901760, %v227_v11  ;;  %v20629_v17 = vsub.f32 %v120_v10, %v20617_v12  ;;  %v235_v18 = vand.u32 4294901760, %v234_v13  ;;  %v20674_v37 = vsub.f32 %v654_v32, %v20661_v33  ;;  %v1192_v59 = vld [vmem:[#allocation6 + $0x48] sm:$0xff]  ;;  %v1191_v62 = vld [vmem:[#allocation6 + $0x40] sm:$0xff] }
  0x52   :  { %v242_v19 = vand.u32 4294901760, %v20621_v14  ;;  %18539 = vmatprep.subr.mxu0 %v25852_v3  ;;  %v249_v20 = vand.u32 4294901760, %v20625_v15  ;;  %v20685_v40 = vsub.f32 %v653_v34, %v20669_v36  ;;  %v20687_v41 = vand.u32 4294901760, %v651_v38  ;;  %s20526_s5 = smov 2   ;;  %s22807_s26 = sld [smem:[#allocation9 + $0x17]] }
  0x53   :  { %18540 = vmatpush3.msra.mxu0 %v20589_v6  ;;  %v229_v21 = vsub.f32 %v227_v11, %v228_v16  ;;  %v20636_v22 = vand.u32 4294901760, %v20629_v17  ;;  %v236_v23 = vsub.f32 %v234_v13, %v235_v18  ;;  %v769_v42 = vand.u32 4294901760, %v20674_v37  ;;  %s22828_s27 = sld [smem:[#allocation9 + $0x16]]  ;;  %s20527_s29 = smov 127  }
  0x54   :  { %v243_v24 = vsub.f32 %v20621_v14, %v242_v19  ;;  %18541 = vmatprep.subr.mxu0 %v25852_v3  ;;  %v250_v28 = vsub.f32 %v20625_v15, %v249_v20  ;;  %v20694_v43 = vsub.f32 %v652_v35, %v20677_v39  ;;  %v20703_v44 = vsub.f32 %v651_v38, %v20687_v41  ;;  %s22865_s28 = sld [smem:[#allocation9 + $0x15]]  ;;  %s20528_s7 = smov 126  }
  0x55   :  { %18542 = vmatpush3.msra.mxu0 %v20608_v9  ;;  %v230_v25 = vand.u32 4294901760, %v229_v21  ;;  %v194_v26 = vsub.f32 %v20629_v17, %v20636_v22  ;;  %v237_v27 = vand.u32 4294901760, %v236_v23  ;;  %v776_v45 = vand.u32 4294901760, %v20685_v40  ;;  %v1733_v21 = vld [vmem:[#allocation6 + $0x70] sm:$0xff]  ;;  %v1732_v23 = vld [vmem:[#allocation6 + $0x68] sm:$0xff]  ;;  %s22894_s30 = sld [smem:[#allocation9 + $0x14]] }
  0x56   :  { %18557 = vmatprep.subr.mxu0 %v25852_v3  ;;  %v244_v30 = vand.u32 4294901760, %v243_v24  ;;  %v251_v31 = vand.u32 4294901760, %v250_v28  ;;  %v770_v46 = vsub.f32 %v20674_v37, %v769_v42  ;;  %v783_v47 = vand.u32 4294901760, %v20694_v43  ;;  %s20529_s4 = smov 125   ;;  %s20530_s8 = smov 124  }
  0x57   :  { %18547 = vmatpush3.msra.mxu1 %v230_v25  ;;  %v20647_v29 = vand.u32 4294901760, %v194_v26  ;;  %v777_v48 = vsub.f32 %v20685_v40, %v776_v45  ;;  %v790_v49 = vand.u32 4294901760, %v20703_v44  ;;  %v20757_v57 = vand.u32 4294901760, %v1194_v56  ;;  %v1731_v26 = vld [vmem:[#allocation6 + $0x60] sm:$0xff]  ;;  %s23041_s9 = sld [smem:[#allocation9 + $0x12]] }
  0x58   :  { %18548 = vmatprep.subr.mxu1 %v25852_v3  ;;  %v771_v50 = vand.u32 4294901760, %v770_v46  ;;  %v784_v51 = vsub.f32 %v20694_v43, %v783_v47  ;;  %v20767_v60 = vand.u32 4294901760, %v1193_v58  ;;  %v20777_v63 = vand.u32 4294901760, %v1192_v59  ;;  %s23068_s10 = sld [smem:[#allocation9 + $0x11]] }
  0x59   :  { %18544 = vmatmul.mubr.f32.vlgmr.msra.gmra.mxu0 %v20647_v29  ;;  %18549 = vmatpush3.msra.mxu1 %v237_v27  ;;  %v778_v52 = vand.u32 4294901760, %v777_v48  ;;  %v791_v53 = vsub.f32 %v20703_v44, %v790_v49  ;;  %v20772_v61 = vsub.f32 %v1194_v56, %v20757_v57  ;;  %v20787_v1 = vand.u32 4294901760, %v1191_v62  ;;  %v2272_v48 = vld [vmem:[#allocation6 + $0x88] sm:$0xff]  ;;  %s17654_s11 = sld [smem:[#allocation9 + $0x10]] }
  0x5a   :  { %18558 = vmatpush3.msra.mxu0 %v227_v11  ;;  %18550 = vmatprep.subr.mxu1 %v25852_v3  ;;  %v785_v54 = vand.u32 4294901760, %v784_v51  ;;  %v20785_v0 = vsub.f32 %v1193_v58, %v20767_v60  ;;  %v20869_v24 = vand.u32 4294901760, %v1733_v21  ;;  %v20879_v27 = vand.u32 4294901760, %v1732_v23  ;;  %v2271_v51 = vld [vmem:[#allocation6 + $0x80] sm:$0xff]  ;;  %s23109_s12 = sld [smem:[#allocation9 + $0xf]] }
  0x5b   :  { %18559 = vmatprep.subr.mxu0 %v25852_v3  ;;  %18551 = vmatpush3.msra.mxu1 %v244_v30  ;;  %v792_v55 = vand.u32 4294901760, %v791_v53  ;;  %v1309_v2 = vand.u32 4294901760, %v20772_v61  ;;  %v20889_v30 = vand.u32 4294901760, %v1731_v26  ;;  %vm647_vm7 = vcmask 237584   ;;  %s17657_s1 = sld [smem:[#allocation9 + $0xd]] }
  0x5c   :  { %18560 = vmatpush3.msra.mxu0 %v234_v13  ;;  %18552 = vmatprep.subr.mxu1 %v25852_v3  ;;  %v20887_v28 = vsub.f32 %v1733_v21, %v20869_v24  ;;  %v20898_v32 = vsub.f32 %v1732_v23, %v20879_v27  ;;  %s23281_s13 = sld [smem:[#allocation9 + $0xc]] }
  0x5d   :  { %18561 = vmatprep.subr.mxu0 %v25852_v3  ;;  %18553 = vmatpush3.msra.mxu1 %v251_v31  ;;  %v1310_v7 = vsub.f32 %v20772_v61, %v1309_v2  ;;  %s23318_s14 = sld [smem:[#allocation9 + $0xb]] }
  0x5e   :  { %18562 = vmatpush3.msra.mxu0 %v20621_v14  ;;  %18555 = vmatmul.mubr.f32.vlgmr.msra.gmra.mxu1 %v20617_v12  ;;  %v1856_v34 = vand.u32 4294901760, %v20887_v28  ;;  %s23351_s15 = sld [smem:[#allocation9 + $0xa]] }
  0x5f   :  { %18563 = vmatprep.subr.mxu0 %v25852_v3  ;;  %18568 = vmatprep.subr.mxu1 %v25852_v3  ;;  %v1311_v11 = vand.u32 4294901760, %v1310_v7  ;;  %s23510_s16 = sld [smem:[#allocation9 + $0x8]] }
  0x60   :  { %18564 = vmatpush3.msra.mxu0 %v20625_v15  ;;  %18569 = vmatpush3.msra.mxu1 %v20585_v4  ;;  %s23552_s17 = sld [smem:[#allocation9 + $0x7]] }
  0x61   :  { %18565 = vmatprep.mubr.msk.f32.mxu0 %vm20524_vm1, %v25852_v3  ;;  %18570 = vmatprep.subr.mxu1 %v25852_v3  ;;  %s23574_s18 = sld [smem:[#allocation9 + $0x6]] }
  0x62   :  { %18579 = vmatprep.subr.mxu0 %v25852_v3  ;;  %18566 = vmatmul.mubr.f32.vlgmr.msra.gmra.mxu0 %v20629_v17  ;;  %s23604_s19 = sld [smem:[#allocation9 + $0x5]] }
  0x63   :  { %18571 = vmatpush3.msra.mxu1 %v20587_v5  ;;  %18580 = vmatpush3.msra.mxu0 %v228_v16  ;;  %s17667_s20 = sld [smem:[#allocation9 + $0x3]] }
  0x64   :  { %18572 = vmatprep.subr.mxu1 %v25852_v3  ;;  %18581 = vmatprep.subr.mxu0 %v25852_v3  ;;  %s17668_s21 = sld [smem:[#allocation9 + $0x2]] }
  0x65   :  { %18573 = vmatpush3.msra.mxu1 %v20589_v6  ;;  %18582 = vmatpush3.msra.mxu0 %v235_v18  ;;  %s23766_s22 = sld [smem:[#allocation9 + $0x1]] }
  0x66   :  { %18574 = vmatprep.subr.mxu1 %v25852_v3  ;;  %18583 = vmatprep.subr.mxu0 %v25852_v3  ;;  %s23780_s0 = sld [smem:[#allocation9]] }
  0x67   :  { %18575 = vmatpush3.msra.mxu1 %v20608_v9  ;;  %18576 = vmatprep.mubr.msk.f32.mxu1 %vm20524_vm1, %v25852_v3  ;;  %s17646_s23 = sld [smem:[#allocation9 + $0x18]] }
  0x68   :  { %18584 = vmatpush3.msra.mxu0 %v242_v19  ;;  %18577 = vmatmul.mubr.f32.vlgmr.msra.gmra.mxu1 %v20636_v22  ;;  %v1734_v19 = vld [vmem:[#allocation6 + $0x78] sm:$0xff]  ;;  %s24083_s24 = sld [smem:[#allocation9 + $0x13]] }
  0x69   :  { %18585 = vmatprep.subr.mxu0 %v25852_v3  ;;  %18590 = vmatprep.subr.mxu1 %v25852_v3  ;;  %s17656_s25 = sld [smem:[#allocation9 + $0xe]] }
  0x6a   :  { %18586 = vmatpush3.msra.mxu0 %v249_v20  ;;  %18587 = vmatprep.mubr.msk.f32.mxu0 %vm20524_vm1, %v25852_v3  ;;  %v20859_v20 = vand.u32 4294901760, %v1734_v19  ;;  %s17661_s2 = sld [smem:[#allocation9 + $0x9]] }
  0x6b   :  { %18591 = vmatpush3.msra.mxu1 %v20585_v4  ;;  %18588 = vmatmul.mubr.f32.vlgmr.msra.gmra.mxu0 %v20617_v12  ;;  %v20796_v4 = vsub.f32 %v1192_v59, %v20777_v63  ;;  %s17666_s3 = sld [smem:[#allocation9 + $0x4]] }
  0x6c   :  { %18592 = vmatprep.subr.mxu1 %v25852_v3  ;;  %18601 = vmatprep.subr.mxu0 %v25852_v3  ;;  %v20874_v25 = vsub.f32 %v1734_v19, %v20859_v20 }
  0x6d   :  { %18593 = vmatpush3.msra.mxu1 %v20587_v5  ;;  %18602 = vmatpush3.msra.mxu0 %v20661_v33  ;;  %v20805_v5 = vsub.f32 %v1191_v62, %v20787_v1  ;;  %v1323_v8 = vand.u32 4294901760, %v20796_v4 }
  0x6e   :  { %18594 = vmatprep.subr.mxu1 %v25852_v3  ;;  %18603 = vmatprep.subr.mxu0 %v25852_v3  ;;  %v1849_v31 = vand.u32 4294901760, %v20874_v25 }
  0x6f   :  { %18595 = vmatpush3.msra.mxu1 %v20589_v6  ;;  %18604 = vmatpush3.msra.mxu0 %v20669_v36  ;;  %v1316_v6 = vand.u32 4294901760, %v20785_v0  ;;  %v1330_v10 = vand.u32 4294901760, %v20805_v5  ;;  %v1324_v13 = vsub.f32 %v20796_v4, %v1323_v8 }
  0x70   :  { %18596 = vmatprep.subr.mxu1 %v25852_v3  ;;  %18605 = vmatprep.subr.mxu0 %v25852_v3  ;;  %v1850_v35 = vsub.f32 %v20874_v25, %v1849_v31 }
  0x71   :  { %18597 = vmatpush3.msra.mxu1 %v20608_v9  ;;  %18598 = vmatprep.mubr.msk.f32.mxu1 %vm20524_vm1, %v25852_v3  ;;  %v1317_v9 = vsub.f32 %v20785_v0, %v1316_v6  ;;  %v1331_v15 = vsub.f32 %v20805_v5, %v1330_v10  ;;  %v1325_v16 = vand.u32 4294901760, %v1324_v13  ;;  %v2811_v13 = vld [vmem:[#allocation6 + $0xa0] sm:$0xff] }
  0x72   :  { %18606 = vmatpush3.msra.mxu0 %v20677_v39  ;;  %18599 = vmatmul.mubr.f32.vlgmr.msra.gmra.mxu1 %v20617_v12 }
  0x73   :  { %18607 = vmatprep.subr.mxu0 %v25852_v3  ;;  %18612 = vmatprep.subr.mxu1 %v25852_v3  ;;  %v1318_v14 = vand.u32 4294901760, %v1317_v9  ;;  %v1332_v18 = vand.u32 4294901760, %v1331_v15  ;;  %v2812_v9 = vld [vmem:[#allocation6 + $0xa8] sm:$0xff] }
  0x74   :  { %18608 = vmatpush3.msra.mxu0 %v20687_v41  ;;  %18613 = vmatpush3.msra.mxu1 %v771_v50 }
  0x75   :  { %18609 = vmatprep.mubr.msk.f32.mxu0 %vm20524_vm1, %v25852_v3  ;;  %18614 = vmatprep.subr.mxu1 %v25852_v3 }
  0x76   :  { %18623 = vmatprep.subr.mxu0 %v25852_v3  ;;  %18610 = vmatmul.mubr.f32.vlgmr.msra.gmra.mxu0 %v20647_v29 }
  0x77   :  { %18615 = vmatpush3.msra.mxu1 %v778_v52  ;;  %18624 = vmatpush3.msra.mxu0 %v20674_v37  ;;  %v1857_v37 = vsub.f32 %v20887_v28, %v1856_v34  ;;  %v20981_v52 = vand.u32 4294901760, %v2272_v48 }
  0x78   :  { %18616 = vmatprep.subr.mxu1 %v25852_v3  ;;  %18625 = vmatprep.subr.mxu0 %v25852_v3 }
  0x79   :  { %18617 = vmatpush3.msra.mxu1 %v785_v54  ;;  %18626 = vmatpush3.msra.mxu0 %v20685_v40  ;;  %v20991_v54 = vand.u32 4294901760, %v2271_v51  ;;  %v21000_v56 = vsub.f32 %v2272_v48, %v20981_v52 }
  0x7a   :  { %18618 = vmatprep.subr.mxu1 %v25852_v3  ;;  %18627 = vmatprep.subr.mxu0 %v25852_v3 }
  0x7b   :  { %18619 = vmatpush3.msra.mxu1 %v792_v55  ;;  %18620 = vmatprep.mubr.msk.f32.mxu1 %vm20524_vm1, %v25852_v3 }
  0x7c   :  { %18628 = vmatpush3.msra.mxu0 %v20694_v43  ;;  %18621 = vmatmul.mubr.f32.vlgmr.msra.gmra.mxu1 %v20617_v12 }
  0x7d   :  { %18629 = vmatprep.subr.mxu0 %v25852_v3  ;;  %18634 = vmatprep.subr.mxu1 %v25852_v3 }
  0x7e   :  { %18630 = vmatpush3.msra.mxu0 %v20703_v44  ;;  %18635 = vmatpush3.msra.mxu1 %v20661_v33 }
  0x7f   :  { %18631 = vmatprep.mubr.msk.f32.mxu0 %vm20524_vm1, %v25852_v3  ;;  %18636 = vmatprep.subr.mxu1 %v25852_v3 }
  0x80   :  { %18645 = vmatprep.subr.mxu0 %v25852_v3  ;;  %18632 = vmatmul.mubr.f32.vlgmr.msra.gmra.mxu0 %v20629_v17 }
  0x81   :  { %18637 = vmatpush3.msra.mxu1 %v20669_v36  ;;  %18646 = vmatpush3.msra.mxu0 %v769_v42 }
  0x82   :  { %18638 = vmatprep.subr.mxu1 %v25852_v3  ;;  %18647 = vmatprep.subr.mxu0 %v25852_v3 }
  0x83   :  { %18639 = vmatpush3.msra.mxu1 %v20677_v39  ;;  %18648 = vmatpush3.msra.mxu0 %v776_v45  ;;  %v2274_v45 = vld [vmem:[#allocation6 + $0x98] sm:$0xff] }
  0x84   :  { %18640 = vmatprep.subr.mxu1 %v25852_v3  ;;  %18649 = vmatprep.subr.mxu0 %v25852_v3  ;;  %v20961_v46 = vand.u32 4294901760, %v2274_v45 }
  0x85   :  { %18641 = vmatpush3.msra.mxu1 %v20687_v41  ;;  %18642 = vmatprep.mubr.msk.f32.mxu1 %vm20524_vm1, %v25852_v3 }
  0x86   :  { %18650 = vmatpush3.msra.mxu0 %v783_v47  ;;  %18643 = vmatmul.mubr.f32.vlgmr.msra.gmra.mxu1 %v20636_v22  ;;  %v2273_v47 = vld [vmem:[#allocation6 + $0x90] sm:$0xff]  ;;  %v20976_v50 = vsub.f32 %v2274_v45, %v20961_v46 }
  0x87   :  { %18651 = vmatprep.subr.mxu0 %v25852_v3  ;;  %18656 = vmatprep.subr.mxu1 %v25852_v3 }
  0x88   :  { %18652 = vmatpush3.msra.mxu0 %v790_v49  ;;  %18653 = vmatprep.mubr.msk.f32.mxu0 %vm20524_vm1, %v25852_v3  ;;  %v20971_v49 = vand.u32 4294901760, %v2273_v47  ;;  %v2389_v55 = vand.u32 4294901760, %v20976_v50 }
  0x89   :  { %18657 = vmatpush3.msra.mxu1 %v20661_v33  ;;  %18654 = vmatmul.mubr.f32.vlgmr.msra.gmra.mxu0 %v20617_v12  ;;  %v20907_v33 = vsub.f32 %v1731_v26, %v20889_v30 }
  0x8a   :  { %18658 = vmatprep.subr.mxu1 %v25852_v3  ;;  %18667 = vmatprep.subr.mxu0 %v25852_v3  ;;  %v20989_v53 = vsub.f32 %v2273_v47, %v20971_v49  ;;  %v2390_v59 = vsub.f32 %v20976_v50, %v2389_v55 }
  0x8b   :  { %18659 = vmatpush3.msra.mxu1 %v20669_v36  ;;  %18668 = vmatpush3.msra.mxu0 %v20757_v57  ;;  %v1863_v36 = vand.u32 4294901760, %v20898_v32  ;;  %v1870_v38 = vand.u32 4294901760, %v20907_v33 }
  0x8c   :  { %18660 = vmatprep.subr.mxu1 %v25852_v3  ;;  %18669 = vmatprep.subr.mxu0 %v25852_v3  ;;  %v2396_v58 = vand.u32 4294901760, %v20989_v53 }
  0x8d   :  { %18661 = vmatpush3.msra.mxu1 %v20677_v39  ;;  %18670 = vmatpush3.msra.mxu0 %v20767_v60  ;;  %v1851_v39 = vand.u32 4294901760, %v1850_v35  ;;  %v1864_v40 = vsub.f32 %v20898_v32, %v1863_v36  ;;  %v1871_v42 = vsub.f32 %v20907_v33, %v1870_v38 }
  0x8e   :  { %18662 = vmatprep.subr.mxu1 %v25852_v3  ;;  %18671 = vmatprep.subr.mxu0 %v25852_v3 }
  0x8f   :  { %18663 = vmatpush3.msra.mxu1 %v20687_v41  ;;  %18664 = vmatprep.mubr.msk.f32.mxu1 %vm20524_vm1, %v25852_v3  ;;  %v1858_v41 = vand.u32 4294901760, %v1857_v37  ;;  %v1865_v43 = vand.u32 4294901760, %v1864_v40  ;;  %v1872_v44 = vand.u32 4294901760, %v1871_v42  ;;  %v3352_v37 = vld [vmem:[#allocation6 + $0xc8] sm:$0xff]  ;;  %v3351_v40 = vld [vmem:[#allocation6 + $0xc0] sm:$0xff] }
  0x90   :  { %18672 = vmatpush3.msra.mxu0 %v20777_v63  ;;  %18665 = vmatmul.mubr.f32.vlgmr.msra.gmra.mxu1 %v20617_v12 }
  0x91   :  { %18673 = vmatprep.subr.mxu0 %v25852_v3  ;;  %18678 = vmatprep.subr.mxu1 %v25852_v3 }
  0x92   :  { %18674 = vmatpush3.msra.mxu0 %v20787_v1  ;;  %18679 = vmatpush3.msra.mxu1 %v1311_v11 }
  0x93   :  { %18675 = vmatprep.mubr.msk.f32.mxu0 %vm20524_vm1, %v25852_v3  ;;  %18680 = vmatprep.subr.mxu1 %v25852_v3 }
  0x94   :  { %18689 = vmatprep.subr.mxu0 %v25852_v3  ;;  %18676 = vmatmul.mubr.f32.vlgmr.msra.gmra.mxu0 %v20647_v29 }
  0x95   :  { %18681 = vmatpush3.msra.mxu1 %v1318_v14  ;;  %18690 = vmatpush3.msra.mxu0 %v20772_v61  ;;  %v2397_v61 = vsub.f32 %v20989_v53, %v2396_v58  ;;  %v21083_v14 = vand.u32 4294901760, %v2812_v9 }
  0x96   :  { %18682 = vmatprep.subr.mxu1 %v25852_v3  ;;  %18691 = vmatprep.subr.mxu0 %v25852_v3 }
  0x97   :  { %18683 = vmatpush3.msra.mxu1 %v1325_v16  ;;  %18692 = vmatpush3.msra.mxu0 %v20785_v0  ;;  %v21093_v16 = vand.u32 4294901760, %v2811_v13  ;;  %v21102_v19 = vsub.f32 %v2812_v9, %v21083_v14 }
  0x98   :  { %18684 = vmatprep.subr.mxu1 %v25852_v3  ;;  %18693 = vmatprep.subr.mxu0 %v25852_v3 }
  0x99   :  { %18685 = vmatpush3.msra.mxu1 %v1332_v18  ;;  %18686 = vmatprep.mubr.msk.f32.mxu1 %vm20524_vm1, %v25852_v3 }
  0x9a   :  { %18694 = vmatpush3.msra.mxu0 %v20796_v4  ;;  %18687 = vmatmul.mubr.f32.vlgmr.msra.gmra.mxu1 %v20617_v12 }
  0x9b   :  { %18695 = vmatprep.subr.mxu0 %v25852_v3  ;;  %18700 = vmatprep.subr.mxu1 %v25852_v3 }
  0x9c   :  { %18696 = vmatpush3.msra.mxu0 %v20805_v5  ;;  %18701 = vmatpush3.msra.mxu1 %v20757_v57 }
  0x9d   :  { %18697 = vmatprep.mubr.msk.f32.mxu0 %vm20524_vm1, %v25852_v3  ;;  %18702 = vmatprep.subr.mxu1 %v25852_v3 }
  0x9e   :  { %18711 = vmatprep.subr.mxu0 %v25852_v3  ;;  %18698 = vmatmul.mubr.f32.vlgmr.msra.gmra.mxu0 %v20629_v17 }
  0x9f   :  { %18703 = vmatpush3.msra.mxu1 %v20767_v60  ;;  %18712 = vmatpush3.msra.mxu0 %v1309_v2 }
  0xa0   :  { %18704 = vmatprep.subr.mxu1 %v25852_v3  ;;  %18713 = vmatprep.subr.mxu0 %v25852_v3 }
  0xa1   :  { %18705 = vmatpush3.msra.mxu1 %v20777_v63  ;;  %18714 = vmatpush3.msra.mxu0 %v1316_v6  ;;  %v2814_v6 = vld [vmem:[#allocation6 + $0xb8] sm:$0xff] }
  0xa2   :  { %18706 = vmatprep.subr.mxu1 %v25852_v3  ;;  %18715 = vmatprep.subr.mxu0 %v25852_v3  ;;  %v21063_v7 = vand.u32 4294901760, %v2814_v6 }
  0xa3   :  { %18707 = vmatpush3.msra.mxu1 %v20787_v1  ;;  %18708 = vmatprep.mubr.msk.f32.mxu1 %vm20524_vm1, %v25852_v3 }
  0xa4   :  { %18716 = vmatpush3.msra.mxu0 %v1323_v8  ;;  %18709 = vmatmul.mubr.f32.vlgmr.msra.gmra.mxu1 %v20636_v22  ;;  %v2813_v8 = vld [vmem:[#allocation6 + $0xb0] sm:$0xff]  ;;  %v21078_v11 = vsub.f32 %v2814_v6, %v21063_v7 }
  0xa5   :  { %18717 = vmatprep.subr.mxu0 %v25852_v3  ;;  %18722 = vmatprep.subr.mxu1 %v25852_v3 }
  0xa6   :  { %18718 = vmatpush3.msra.mxu0 %v1330_v10  ;;  %18719 = vmatprep.mubr.msk.f32.mxu0 %vm20524_vm1, %v25852_v3  ;;  %v21073_v10 = vand.u32 4294901760, %v2813_v8  ;;  %v2929_v18 = vand.u32 4294901760, %v21078_v11 }
  0xa7   :  { %18723 = vmatpush3.msra.mxu1 %v20757_v57  ;;  %18720 = vmatmul.mubr.f32.vlgmr.msra.gmra.mxu0 %v20617_v12  ;;  %v21009_v57 = vsub.f32 %v2271_v51, %v20991_v54 }
  0xa8   :  { %18724 = vmatprep.subr.mxu1 %v25852_v3  ;;  %18733 = vmatprep.subr.mxu0 %v25852_v3  ;;  %v21091_v15 = vsub.f32 %v2813_v8, %v21073_v10  ;;  %v2930_v23 = vsub.f32 %v21078_v11, %v2929_v18 }
  0xa9   :  { %18725 = vmatpush3.msra.mxu1 %v20767_v60  ;;  %18734 = vmatpush3.msra.mxu0 %v20859_v20  ;;  %v2403_v60 = vand.u32 4294901760, %v21000_v56  ;;  %v2410_v62 = vand.u32 4294901760, %v21009_v57 }
  0xaa   :  { %18726 = vmatprep.subr.mxu1 %v25852_v3  ;;  %18735 = vmatprep.subr.mxu0 %v25852_v3  ;;  %v2936_v21 = vand.u32 4294901760, %v21091_v15 }
  0xab   :  { %18727 = vmatpush3.msra.mxu1 %v20777_v63  ;;  %18736 = vmatpush3.msra.mxu0 %v20869_v24  ;;  %v2391_v63 = vand.u32 4294901760, %v2390_v59  ;;  %v2404_v0 = vsub.f32 %v21000_v56, %v2403_v60  ;;  %v2411_v2 = vsub.f32 %v21009_v57, %v2410_v62 }
  0xac   :  { %18728 = vmatprep.subr.mxu1 %v25852_v3  ;;  %18737 = vmatprep.subr.mxu0 %v25852_v3 }
  0xad   :  { %18729 = vmatpush3.msra.mxu1 %v20787_v1  ;;  %18730 = vmatprep.mubr.msk.f32.mxu1 %vm20524_vm1, %v25852_v3  ;;  %v2398_v1 = vand.u32 4294901760, %v2397_v61  ;;  %v2405_v4 = vand.u32 4294901760, %v2404_v0  ;;  %v2412_v5 = vand.u32 4294901760, %v2411_v2  ;;  %v3892_v61 = vld [vmem:[#allocation6 + $0xe8] sm:$0xff]  ;;  %v3891_v0 = vld [vmem:[#allocation6 + $0xe0] sm:$0xff] }
  0xae   :  { %18738 = vmatpush3.msra.mxu0 %v20879_v27  ;;  %18731 = vmatmul.mubr.f32.vlgmr.msra.gmra.mxu1 %v20617_v12  ;;  %v21287_v2 = vand.u32 4294901760, %v3892_v61  ;;  %v21297_v6 = vand.u32 4294901760, %v3891_v0 }
  0xaf   :  { %18739 = vmatprep.subr.mxu0 %v25852_v3  ;;  %18744 = vmatprep.subr.mxu1 %v25852_v3 }
  0xb0   :  { %18740 = vmatpush3.msra.mxu0 %v20889_v30  ;;  %18745 = vmatpush3.msra.mxu1 %v1851_v39 }
  0xb1   :  { %18741 = vmatprep.mubr.msk.f32.mxu0 %vm20524_vm1, %v25852_v3  ;;  %18746 = vmatprep.subr.mxu1 %v25852_v3 }
  0xb2   :  { %18755 = vmatprep.subr.mxu0 %v25852_v3  ;;  %18742 = vmatmul.mubr.f32.vlgmr.msra.gmra.mxu0 %v20647_v29 }
  0xb3   :  { %18747 = vmatpush3.msra.mxu1 %v1858_v41  ;;  %18756 = vmatpush3.msra.mxu0 %v20874_v25  ;;  %v2937_v25 = vsub.f32 %v21091_v15, %v2936_v21  ;;  %v21185_v41 = vand.u32 4294901760, %v3352_v37 }
  0xb4   :  { %18748 = vmatprep.subr.mxu1 %v25852_v3  ;;  %18757 = vmatprep.subr.mxu0 %v25852_v3 }
  0xb5   :  { %18749 = vmatpush3.msra.mxu1 %v1865_v43  ;;  %18758 = vmatpush3.msra.mxu0 %v20887_v28  ;;  %v21195_v43 = vand.u32 4294901760, %v3351_v40  ;;  %v21204_v45 = vsub.f32 %v3352_v37, %v21185_v41 }
  0xb6   :  { %18750 = vmatprep.subr.mxu1 %v25852_v3  ;;  %18759 = vmatprep.subr.mxu0 %v25852_v3 }
  0xb7   :  { %18751 = vmatpush3.msra.mxu1 %v1872_v44  ;;  %18752 = vmatprep.mubr.msk.f32.mxu1 %vm20524_vm1, %v25852_v3 }
  0xb8   :  { %18760 = vmatpush3.msra.mxu0 %v20898_v32  ;;  %18753 = vmatmul.mubr.f32.vlgmr.msra.gmra.mxu1 %v20617_v12 }
  0xb9   :  { %18761 = vmatprep.subr.mxu0 %v25852_v3  ;;  %18766 = vmatprep.subr.mxu1 %v25852_v3 }
  0xba   :  { %18762 = vmatpush3.msra.mxu0 %v20907_v33  ;;  %18767 = vmatpush3.msra.mxu1 %v20859_v20 }
  0xbb   :  { %18763 = vmatprep.mubr.msk.f32.mxu0 %vm20524_vm1, %v25852_v3  ;;  %18768 = vmatprep.subr.mxu1 %v25852_v3 }
  0xbc   :  { %18777 = vmatprep.subr.mxu0 %v25852_v3  ;;  %18764 = vmatmul.mubr.f32.vlgmr.msra.gmra.mxu0 %v20629_v17 }
  0xbd   :  { %18769 = vmatpush3.msra.mxu1 %v20869_v24  ;;  %18778 = vmatpush3.msra.mxu0 %v1849_v31 }
  0xbe   :  { %18770 = vmatprep.subr.mxu1 %v25852_v3  ;;  %18779 = vmatprep.subr.mxu0 %v25852_v3 }
  0xbf   :  { %18771 = vmatpush3.msra.mxu1 %v20879_v27  ;;  %18780 = vmatpush3.msra.mxu0 %v1856_v34  ;;  %v3354_v34 = vld [vmem:[#allocation6 + $0xd8] sm:$0xff] }
  0xc0   :  { %18772 = vmatprep.subr.mxu1 %v25852_v3  ;;  %18781 = vmatprep.subr.mxu0 %v25852_v3  ;;  %v21165_v35 = vand.u32 4294901760, %v3354_v34 }
  0xc1   :  { %18773 = vmatpush3.msra.mxu1 %v20889_v30  ;;  %18774 = vmatprep.mubr.msk.f32.mxu1 %vm20524_vm1, %v25852_v3 }
  0xc2   :  { %18782 = vmatpush3.msra.mxu0 %v1863_v36  ;;  %18775 = vmatmul.mubr.f32.vlgmr.msra.gmra.mxu1 %v20636_v22  ;;  %v3353_v36 = vld [vmem:[#allocation6 + $0xd0] sm:$0xff]  ;;  %v21180_v39 = vsub.f32 %v3354_v34, %v21165_v35 }
  0xc3   :  { %18783 = vmatprep.subr.mxu0 %v25852_v3  ;;  %18788 = vmatprep.subr.mxu1 %v25852_v3 }
  0xc4   :  { %18784 = vmatpush3.msra.mxu0 %v1870_v38  ;;  %18785 = vmatprep.mubr.msk.f32.mxu0 %vm20524_vm1, %v25852_v3  ;;  %v21175_v38 = vand.u32 4294901760, %v3353_v36  ;;  %v3469_v44 = vand.u32 4294901760, %v21180_v39 }
  0xc5   :  { %18789 = vmatpush3.msra.mxu1 %v20859_v20  ;;  %18786 = vmatmul.mubr.f32.vlgmr.msra.gmra.mxu0 %v20617_v12  ;;  %v21111_v20 = vsub.f32 %v2811_v13, %v21093_v16  ;;  %v21315_v13 = vsub.f32 %v3891_v0, %v21297_v6 }
  0xc6   :  { %18790 = vmatprep.subr.mxu1 %v25852_v3  ;;  %18799 = vmatprep.subr.mxu0 %v25852_v3  ;;  %v21193_v42 = vsub.f32 %v3353_v36, %v21175_v38  ;;  %v3470_v48 = vsub.f32 %v21180_v39, %v3469_v44  ;;  %v4434_v36 = vld [vmem:[#allocation6 + $0x118] sm:$0xff] }
  0xc7   :  { %18791 = vmatpush3.msra.mxu1 %v20869_v24  ;;  %18800 = vmatpush3.msra.mxu0 %v20961_v46  ;;  %v2943_v24 = vand.u32 4294901760, %v21102_v19  ;;  %v2950_v26 = vand.u32 4294901760, %v21111_v20  ;;  %v21377_v37 = vand.u32 4294901760, %v4434_v36 }
  0xc8   :  { %18792 = vmatprep.subr.mxu1 %v25852_v3  ;;  %18801 = vmatprep.subr.mxu0 %v25852_v3  ;;  %v3476_v47 = vand.u32 4294901760, %v21193_v42 }
  0xc9   :  { %18793 = vmatpush3.msra.mxu1 %v20879_v27  ;;  %18802 = vmatpush3.msra.mxu0 %v20971_v49  ;;  %v2931_v27 = vand.u32 4294901760, %v2930_v23  ;;  %v2944_v28 = vsub.f32 %v21102_v19, %v2943_v24  ;;  %v2951_v31 = vsub.f32 %v21111_v20, %v2950_v26  ;;  %v4030_v23 = vand.u32 4294901760, %v21315_v13 }
  0xca   :  { %18794 = vmatprep.subr.mxu1 %v25852_v3  ;;  %18803 = vmatprep.subr.mxu0 %v25852_v3 }
  0xcb   :  { %18795 = vmatpush3.msra.mxu1 %v20889_v30  ;;  %18796 = vmatprep.mubr.msk.f32.mxu1 %vm20524_vm1, %v25852_v3  ;;  %v2938_v30 = vand.u32 4294901760, %v2937_v25  ;;  %v2945_v32 = vand.u32 4294901760, %v2944_v28  ;;  %v2952_v33 = vand.u32 4294901760, %v2951_v31  ;;  %v4031_v28 = vsub.f32 %v21315_v13, %v4030_v23 }
  0xcc   :  { %18804 = vmatpush3.msra.mxu0 %v20981_v52  ;;  %18797 = vmatmul.mubr.f32.vlgmr.msra.gmra.mxu1 %v20617_v12 }
  0xcd   :  { %18805 = vmatprep.subr.mxu0 %v25852_v3  ;;  %18810 = vmatprep.subr.mxu1 %v25852_v3 }
  0xce   :  { %18806 = vmatpush3.msra.mxu0 %v20991_v54  ;;  %18811 = vmatpush3.msra.mxu1 %v2391_v63 }
  0xcf   :  { %18807 = vmatprep.mubr.msk.f32.mxu0 %vm20524_vm1, %v25852_v3  ;;  %18812 = vmatprep.subr.mxu1 %v25852_v3 }
  0xd0   :  { %18821 = vmatprep.subr.mxu0 %v25852_v3  ;;  %18808 = vmatmul.mubr.f32.vlgmr.msra.gmra.mxu0 %v20647_v29 }
  0xd1   :  { %18813 = vmatpush3.msra.mxu1 %v2398_v1  ;;  %18822 = vmatpush3.msra.mxu0 %v20976_v50  ;;  %v3477_v50 = vsub.f32 %v21193_v42, %v3476_v47  ;;  %v17618_v1 = vld [vmem:[#allocation8] ss:$0 sm:$0xff] }
  0xd2   :  { %18814 = vmatprep.subr.mxu1 %v25852_v3  ;;  %18823 = vmatprep.subr.mxu0 %v25852_v3 }
  0xd3   :  { %18815 = vmatpush3.msra.mxu1 %v2405_v4  ;;  %18824 = vmatpush3.msra.mxu0 %v20989_v53 }
  0xd4   :  { %18816 = vmatprep.subr.mxu1 %v25852_v3  ;;  %18825 = vmatprep.subr.mxu0 %v25852_v3 }
  0xd5   :  { %18817 = vmatpush3.msra.mxu1 %v2412_v5  ;;  %18818 = vmatprep.mubr.msk.f32.mxu1 %vm20524_vm1, %v25852_v3 }
  0xd6   :  { %18826 = vmatpush3.msra.mxu0 %v21000_v56  ;;  %18819 = vmatmul.mubr.f32.vlgmr.msra.gmra.mxu1 %v20617_v12 }
  0xd7   :  { %18827 = vmatprep.subr.mxu0 %v25852_v3  ;;  %18832 = vmatprep.subr.mxu1 %v25852_v3 }
  0xd8   :  { %18828 = vmatpush3.msra.mxu0 %v21009_v57  ;;  %18833 = vmatpush3.msra.mxu1 %v20961_v46 }
  0xd9   :  { %18829 = vmatprep.mubr.msk.f32.mxu0 %vm20524_vm1, %v25852_v3  ;;  %18834 = vmatprep.subr.mxu1 %v25852_v3 }
  0xda   :  { %18843 = vmatprep.subr.mxu0 %v25852_v3  ;;  %18830 = vmatmul.mubr.f32.vlgmr.msra.gmra.mxu0 %v20629_v17 }
  0xdb   :  { %18835 = vmatpush3.msra.mxu1 %v20971_v49  ;;  %18844 = vmatpush3.msra.mxu0 %v2389_v55 }
  0xdc   :  { %18836 = vmatprep.subr.mxu1 %v25852_v3  ;;  %18845 = vmatprep.subr.mxu0 %v25852_v3 }
  0xdd   :  { %18837 = vmatpush3.msra.mxu1 %v20981_v52  ;;  %18846 = vmatpush3.msra.mxu0 %v2396_v58  ;;  %v3894_v58 = vld [vmem:[#allocation6 + $0xf8] sm:$0xff] }
  0xde   :  { %18838 = vmatprep.subr.mxu1 %v25852_v3  ;;  %18847 = vmatprep.subr.mxu0 %v25852_v3  ;;  %v21267_v59 = vand.u32 4294901760, %v3894_v58 }
  0xdf   :  { %18839 = vmatpush3.msra.mxu1 %v20991_v54  ;;  %18840 = vmatprep.mubr.msk.f32.mxu1 %vm20524_vm1, %v25852_v3 }
  0xe0   :  { %18848 = vmatpush3.msra.mxu0 %v2403_v60  ;;  %18841 = vmatmul.mubr.f32.vlgmr.msra.gmra.mxu1 %v20636_v22  ;;  %v3893_v60 = vld [vmem:[#allocation6 + $0xf0] sm:$0xff]  ;;  %v21282_v63 = vsub.f32 %v3894_v58, %v21267_v59 }
  0xe1   :  { %18849 = vmatprep.subr.mxu0 %v25852_v3  ;;  %18854 = vmatprep.subr.mxu1 %v25852_v3 }
  0xe2   :  { %18850 = vmatpush3.msra.mxu0 %v2410_v62  ;;  %18851 = vmatprep.mubr.msk.f32.mxu0 %vm20524_vm1, %v25852_v3  ;;  %v21277_v62 = vand.u32 4294901760, %v3893_v60  ;;  %v4009_v9 = vand.u32 4294901760, %v21282_v63 }
  0xe3   :  { %18855 = vmatpush3.msra.mxu1 %v20961_v46  ;;  %18852 = vmatmul.mubr.f32.vlgmr.msra.gmra.mxu0 %v20617_v12  ;;  %v21213_v46 = vsub.f32 %v3351_v40, %v21195_v43  ;;  %v4432_v40 = vld [vmem:[#allocation6 + $0x108] sm:$0xff] }
  0xe4   :  { %18856 = vmatprep.subr.mxu1 %v25852_v3  ;;  %18865 = vmatprep.subr.mxu0 %v25852_v3  ;;  %v21295_v5 = vsub.f32 %v3893_v60, %v21277_v62 }
  0xe5   :  { %18857 = vmatpush3.msra.mxu1 %v20971_v49  ;;  %18866 = vmatpush3.msra.mxu0 %v21063_v7  ;;  %v3483_v49 = vand.u32 4294901760, %v21204_v45  ;;  %v3490_v51 = vand.u32 4294901760, %v21213_v46 }
  0xe6   :  { %18858 = vmatprep.subr.mxu1 %v25852_v3  ;;  %18867 = vmatprep.subr.mxu0 %v25852_v3 }
  0xe7   :  { %18859 = vmatpush3.msra.mxu1 %v20981_v52  ;;  %18868 = vmatpush3.msra.mxu0 %v21073_v10  ;;  %v3471_v52 = vand.u32 4294901760, %v3470_v48  ;;  %v3484_v53 = vsub.f32 %v21204_v45, %v3483_v49  ;;  %v3491_v55 = vsub.f32 %v21213_v46, %v3490_v51 }
  0xe8   :  { %18860 = vmatprep.subr.mxu1 %v25852_v3  ;;  %18869 = vmatprep.subr.mxu0 %v25852_v3 }
  0xe9   :  { %18861 = vmatpush3.msra.mxu1 %v20991_v54  ;;  %18862 = vmatprep.mubr.msk.f32.mxu1 %vm20524_vm1, %v25852_v3  ;;  %v3478_v54 = vand.u32 4294901760, %v3477_v50  ;;  %v3485_v56 = vand.u32 4294901760, %v3484_v53  ;;  %v3492_v57 = vand.u32 4294901760, %v3491_v55 }
  0xea   :  { %18870 = vmatpush3.msra.mxu0 %v21083_v14  ;;  %18863 = vmatmul.mubr.f32.vlgmr.msra.gmra.mxu1 %v20617_v12 }
  0xeb   :  { %18871 = vmatprep.subr.mxu0 %v25852_v3  ;;  %18876 = vmatprep.subr.mxu1 %v25852_v3 }
  0xec   :  { %18872 = vmatpush3.msra.mxu0 %v21093_v16  ;;  %18877 = vmatpush3.msra.mxu1 %v2931_v27 }
  0xed   :  { %18873 = vmatprep.mubr.msk.f32.mxu0 %vm20524_vm1, %v25852_v3  ;;  %18878 = vmatprep.subr.mxu1 %v25852_v3 }
  0xee   :  { %18887 = vmatprep.subr.mxu0 %v25852_v3  ;;  %18874 = vmatmul.mubr.f32.vlgmr.msra.gmra.mxu0 %v20647_v29 }
  0xef   :  { %18879 = vmatpush3.msra.mxu1 %v2938_v30  ;;  %18888 = vmatpush3.msra.mxu0 %v21078_v11 }
  0xf0   :  { %18880 = vmatprep.subr.mxu1 %v25852_v3  ;;  %18889 = vmatprep.subr.mxu0 %v25852_v3 }
  0xf1   :  { %18881 = vmatpush3.msra.mxu1 %v2945_v32  ;;  %18890 = vmatpush3.msra.mxu0 %v21091_v15 }
  0xf2   :  { %18882 = vmatprep.subr.mxu1 %v25852_v3  ;;  %18891 = vmatprep.subr.mxu0 %v25852_v3 }
  0xf3   :  { %18883 = vmatpush3.msra.mxu1 %v2952_v33  ;;  %18884 = vmatprep.mubr.msk.f32.mxu1 %vm20524_vm1, %v25852_v3  ;;  %v4032_v33 = vand.u32 4294901760, %v4031_v28  ;;  %v17620_v28 = vld [vmem:[#allocation8 + $0x2] ss:$0 sm:$0xff] }
  0xf4   :  { %18892 = vmatpush3.msra.mxu0 %v21102_v19  ;;  %18885 = vmatmul.mubr.f32.vlgmr.msra.gmra.mxu1 %v20617_v12 }
  0xf5   :  { %18893 = vmatprep.subr.mxu0 %v25852_v3  ;;  %18898 = vmatprep.subr.mxu1 %v25852_v3 }
  0xf6   :  { %18894 = vmatpush3.msra.mxu0 %v21111_v20  ;;  %18899 = vmatpush3.msra.mxu1 %v21063_v7 }
  0xf7   :  { %18895 = vmatprep.mubr.msk.f32.mxu0 %vm20524_vm1, %v25852_v3  ;;  %18900 = vmatprep.subr.mxu1 %v25852_v3 }
  0xf8   :  { %18909 = vmatprep.subr.mxu0 %v25852_v3  ;;  %18896 = vmatmul.mubr.f32.vlgmr.msra.gmra.mxu0 %v20629_v17 }
  0xf9   :  { %18901 = vmatpush3.msra.mxu1 %v21073_v10  ;;  %18910 = vmatpush3.msra.mxu0 %v2929_v18 }
  0xfa   :  { %18902 = vmatprep.subr.mxu1 %v25852_v3  ;;  %18911 = vmatprep.subr.mxu0 %v25852_v3 }
  0xfb   :  { %18903 = vmatpush3.msra.mxu1 %v21083_v14  ;;  %18912 = vmatpush3.msra.mxu0 %v2936_v21 }
  0xfc   :  { %18904 = vmatprep.subr.mxu1 %v25852_v3  ;;  %18913 = vmatprep.subr.mxu0 %v25852_v3 }
  0xfd   :  { %18905 = vmatpush3.msra.mxu1 %v21093_v16  ;;  %18906 = vmatprep.mubr.msk.f32.mxu1 %vm20524_vm1, %v25852_v3 }
  0xfe   :  { %18914 = vmatpush3.msra.mxu0 %v2943_v24  ;;  %18907 = vmatmul.mubr.f32.vlgmr.msra.gmra.mxu1 %v20636_v22 }
  0xff   :  { %18915 = vmatprep.subr.mxu0 %v25852_v3  ;;  %18920 = vmatprep.subr.mxu1 %v25852_v3 }
 0x100   :  { %18916 = vmatpush3.msra.mxu0 %v2950_v26  ;;  %18917 = vmatprep.mubr.msk.f32.mxu0 %vm20524_vm1, %v25852_v3 }
 0x101   :  { %18921 = vmatpush3.msra.mxu1 %v21063_v7  ;;  %18918 = vmatmul.mubr.f32.vlgmr.msra.gmra.mxu0 %v20617_v12 }
 0x102   :  { %18922 = vmatprep.subr.mxu1 %v25852_v3  ;;  %18931 = vmatprep.subr.mxu0 %v25852_v3 }
 0x103   :  { %18923 = vmatpush3.msra.mxu1 %v21073_v10  ;;  %18932 = vmatpush3.msra.mxu0 %v21165_v35  ;;  %v21306_v10 = vsub.f32 %v3892_v61, %v21287_v2 }
 0x104   :  { %18924 = vmatprep.subr.mxu1 %v25852_v3  ;;  %18933 = vmatprep.subr.mxu0 %v25852_v3 }
 0x105   :  { %18925 = vmatpush3.msra.mxu1 %v21083_v14  ;;  %18934 = vmatpush3.msra.mxu0 %v21175_v38  ;;  %v4016_v14 = vand.u32 4294901760, %v21295_v5  ;;  %v4023_v19 = vand.u32 4294901760, %v21306_v10 }
 0x106   :  { %18926 = vmatprep.subr.mxu1 %v25852_v3  ;;  %18935 = vmatprep.subr.mxu0 %v25852_v3 }
 0x107   :  { %18927 = vmatpush3.msra.mxu1 %v21093_v16  ;;  %18928 = vmatprep.mubr.msk.f32.mxu1 %vm20524_vm1, %v25852_v3  ;;  %v4010_v16 = vsub.f32 %v21282_v63, %v4009_v9  ;;  %v4017_v21 = vsub.f32 %v21295_v5, %v4016_v14  ;;  %v4024_v26 = vsub.f32 %v21306_v10, %v4023_v19 }
 0x108   :  { %18936 = vmatpush3.msra.mxu0 %v21185_v41  ;;  %18929 = vmatmul.mubr.f32.vlgmr.msra.gmra.mxu1 %v20617_v12 }
 0x109   :  { %18937 = vmatprep.subr.mxu0 %v25852_v3  ;;  %18942 = vmatprep.subr.mxu1 %v25852_v3  ;;  %v4011_v24 = vand.u32 4294901760, %v4010_v16  ;;  %v4018_v27 = vand.u32 4294901760, %v4017_v21  ;;  %v4025_v31 = vand.u32 4294901760, %v4024_v26  ;;  %v4973_v16 = vld [vmem:[#allocation6 + $0x130] sm:$0xff] }
 0x10a   :  { %18938 = vmatpush3.msra.mxu0 %v21195_v43  ;;  %18943 = vmatpush3.msra.mxu1 %v3471_v52  ;;  %v21496_v21 = vand.u32 4294901760, %v4973_v16 }
 0x10b   :  { %18939 = vmatprep.mubr.msk.f32.mxu0 %vm20524_vm1, %v25852_v3  ;;  %18944 = vmatprep.subr.mxu1 %v25852_v3 }
 0x10c   :  { %18953 = vmatprep.subr.mxu0 %v25852_v3  ;;  %18940 = vmatmul.mubr.f32.vlgmr.msra.gmra.mxu0 %v20647_v29 }
 0x10d   :  { %18945 = vmatpush3.msra.mxu1 %v3478_v54  ;;  %18954 = vmatpush3.msra.mxu0 %v21180_v39 }
 0x10e   :  { %18946 = vmatprep.subr.mxu1 %v25852_v3  ;;  %18955 = vmatprep.subr.mxu0 %v25852_v3 }
 0x10f   :  { %18947 = vmatpush3.msra.mxu1 %v3485_v56  ;;  %18956 = vmatpush3.msra.mxu0 %v21193_v42 }
 0x110   :  { %18948 = vmatprep.subr.mxu1 %v25852_v3  ;;  %18957 = vmatprep.subr.mxu0 %v25852_v3 }
 0x111   :  { %18949 = vmatpush3.msra.mxu1 %v3492_v57  ;;  %18950 = vmatprep.mubr.msk.f32.mxu1 %vm20524_vm1, %v25852_v3 }
 0x112   :  { %18958 = vmatpush3.msra.mxu0 %v21204_v45  ;;  %18951 = vmatmul.mubr.f32.vlgmr.msra.gmra.mxu1 %v20617_v12  ;;  %v17619_v45 = vld [vmem:[#allocation8 + $0x1] ss:$0 sm:$0xff] }
 0x113   :  { %18959 = vmatprep.subr.mxu0 %v25852_v3  ;;  %18964 = vmatprep.subr.mxu1 %v25852_v3 }
 0x114   :  { %18960 = vmatpush3.msra.mxu0 %v21213_v46  ;;  %18965 = vmatpush3.msra.mxu1 %v21165_v35 }
 0x115   :  { %18961 = vmatprep.mubr.msk.f32.mxu0 %vm20524_vm1, %v25852_v3  ;;  %18966 = vmatprep.subr.mxu1 %v25852_v3 }
 0x116   :  { %18975 = vmatprep.subr.mxu0 %v25852_v3  ;;  %18962 = vmatmul.mubr.f32.vlgmr.msra.gmra.mxu0 %v20629_v17 }
 0x117   :  { %18967 = vmatpush3.msra.mxu1 %v21175_v38  ;;  %18976 = vmatpush3.msra.mxu0 %v3469_v44  ;;  %v4431_v44 = vld [vmem:[#allocation6 + $0x100] sm:$0xff] }
 0x118   :  { %18968 = vmatprep.subr.mxu1 %v25852_v3  ;;  %18977 = vmatprep.subr.mxu0 %v25852_v3  ;;  %v21409_v50 = vand.u32 4294901760, %v4431_v44 }
 0x119   :  { %18969 = vmatpush3.msra.mxu1 %v21185_v41  ;;  %18978 = vmatpush3.msra.mxu0 %v3476_v47  ;;  %v197_v4 = vpop.f32.mrf.mxu0  ;;  %v21399_v47 = vand.u32 4294901760, %v4432_v40 }
 0x11a   :  { %18970 = vmatprep.subr.mxu1 %v25852_v3  ;;  %18979 = vmatprep.subr.mxu0 %v25852_v3  ;;  %v198_v7 = vadd.f32 %v17618_v1, %v197_v4  ;;  %v21427_v55 = vsub.f32 %v4431_v44, %v21409_v50 }
 0x11b   :  { %18971 = vmatpush3.msra.mxu1 %v21195_v43  ;;  %18972 = vmatprep.mubr.msk.f32.mxu1 %vm20524_vm1, %v25852_v3  ;;  %v18545_v8 = vpop.f32.mrf.mxu0  ;;  %v21418_v53 = vsub.f32 %v4432_v40, %v21399_v47 }
 0x11c   :  { %18980 = vmatpush3.msra.mxu0 %v3483_v49  ;;  %18973 = vmatmul.mubr.f32.vlgmr.msra.gmra.mxu1 %v20636_v22  ;;  %v4570_v0 = vand.u32 4294901760, %v21427_v55 }
 0x11d   :  { %18981 = vmatprep.subr.mxu0 %v25852_v3  ;;  %18986 = vmatprep.subr.mxu1 %v25852_v3 }
 0x11e   :  { %18982 = vmatpush3.msra.mxu0 %v3490_v51  ;;  %18983 = vmatprep.mubr.msk.f32.mxu0 %vm20524_vm1, %v25852_v3  ;;  %v288_v11 = vpop.f32.mrf.mxu1 }
 0x11f   :  { %18987 = vmatpush3.msra.mxu1 %v21165_v35  ;;  %18984 = vmatmul.mubr.f32.vlgmr.msra.gmra.mxu0 %v20617_v12  ;;  %v21318_v15 = vadd.f32 %v288_v11, %v198_v7 }
 0x120   :  { %18988 = vmatprep.subr.mxu1 %v25852_v3  ;;  %18997 = vmatprep.subr.mxu0 %v25852_v3  ;;  %v18556_v18 = vpop.f32.mrf.mxu1 }
 0x121   :  { %18989 = vmatpush3.msra.mxu1 %v21175_v38  ;;  %18998 = vmatpush3.msra.mxu0 %v21267_v59  ;;  %v4433_v38 = vld [vmem:[#allocation6 + $0x110] sm:$0xff] }
 0x122   :  { %18990 = vmatprep.subr.mxu1 %v25852_v3  ;;  %18999 = vmatprep.subr.mxu0 %v25852_v3  ;;  %v21330_v20 = vpop.f32.mrf.mxu0  ;;  %v21389_v42 = vand.u32 4294901760, %v4433_v38 }
 0x123   :  { %18991 = vmatpush3.msra.mxu1 %v21185_v41  ;;  %19000 = vmatpush3.msra.mxu0 %v21277_v62 }
 0x124   :  { %18992 = vmatprep.subr.mxu1 %v25852_v3  ;;  %19001 = vmatprep.subr.mxu0 %v25852_v3  ;;  %v18567_v25 = vpop.f32.mrf.mxu0  ;;  %v21407_v49 = vsub.f32 %v4433_v38, %v21389_v42 }
 0x125   :  { %18993 = vmatpush3.msra.mxu1 %v21195_v43  ;;  %18994 = vmatprep.mubr.msk.f32.mxu1 %vm20524_vm1, %v25852_v3  ;;  %v21394_v43 = vsub.f32 %v4434_v36, %v21377_v37  ;;  %v369_v25 = vadd.f32 %v21330_v20, %v21318_v15  ;;  %v21517_v20 = vsub.f32 %v4973_v16, %v21496_v21 }
 0x126   :  { %19002 = vmatpush3.msra.mxu0 %v21287_v2  ;;  %18995 = vmatmul.mubr.f32.vlgmr.msra.gmra.mxu1 %v20617_v12  ;;  %v4556_v56 = vand.u32 4294901760, %v21407_v49 }
 0x127   :  { %19003 = vmatprep.subr.mxu0 %v25852_v3  ;;  %19008 = vmatprep.subr.mxu1 %v25852_v3  ;;  %v4549_v52 = vand.u32 4294901760, %v21394_v43 }
 0x128   :  { %19004 = vmatpush3.msra.mxu0 %v21297_v6  ;;  %19009 = vmatpush3.msra.mxu1 %v4011_v24  ;;  %v21354_v30 = vpop.f32.mrf.mxu1 }
 0x129   :  { %19005 = vmatprep.mubr.msk.f32.mxu0 %vm20524_vm1, %v25852_v3  ;;  %19010 = vmatprep.subr.mxu1 %v25852_v3  ;;  %v4550_v58 = vsub.f32 %v21394_v43, %v4549_v52  ;;  %v446_v15 = vadd.f32 %v21354_v30, %v369_v25 }
 0x12a   :  { %19019 = vmatprep.subr.mxu0 %v25852_v3  ;;  %19006 = vmatmul.mubr.f32.vlgmr.msra.gmra.mxu0 %v20647_v29  ;;  %v18578_v32 = vpop.f32.mrf.mxu1 }
 0x12b   :  { %19011 = vmatpush3.msra.mxu1 %v4018_v27  ;;  %19020 = vmatpush3.msra.mxu0 %v21282_v63  ;;  %v21362_v34 = vpop.f32.mrf.mxu0  ;;  %v4557_v63 = vsub.f32 %v21407_v49, %v4556_v56  ;;  %v4551_v1 = vand.u32 4294901760, %v4550_v58  ;;  %v4971_v27 = vld [vmem:[#allocation6 + $0x120] sm:$0xff] }
 0x12c   :  { %19012 = vmatprep.subr.mxu1 %v25852_v3  ;;  %19021 = vmatprep.subr.mxu0 %v25852_v3  ;;  %v529_v40 = vadd.f32 %v21362_v34, %v446_v15  ;;  %v17621_v15 = vld [vmem:[#allocation8 + $0x3] ss:$0 sm:$0xff] }
 0x12d   :  { %19013 = vmatpush3.msra.mxu1 %v4025_v31  ;;  %19022 = vmatpush3.msra.mxu0 %v21295_v5  ;;  %v18589_v35 = vpop.f32.mrf.mxu0  ;;  %v4558_v5 = vand.u32 4294901760, %v4557_v63 }
 0x12e   :  { %19014 = vmatprep.subr.mxu1 %v25852_v3  ;;  %19023 = vmatprep.subr.mxu0 %v25852_v3  ;;  %v21522_v35 = vand.u32 4294901760, %v4971_v27 }
 0x12f   :  { %19015 = vmatpush3.msra.mxu1 %v4032_v33  ;;  %19016 = vmatprep.mubr.msk.f32.mxu1 %vm20524_vm1, %v25852_v3 }
 0x130   :  { %19024 = vmatpush3.msra.mxu0 %v21306_v10  ;;  %19017 = vmatmul.mubr.f32.vlgmr.msra.gmra.mxu1 %v20617_v12  ;;  %v21542_v44 = vsub.f32 %v4971_v27, %v21522_v35  ;;  %v5512_v27 = vld [vmem:[#allocation6 + $0x148] sm:$0xff] }
 0x131   :  { %19025 = vmatprep.subr.mxu0 %v25852_v3  ;;  %19030 = vmatprep.subr.mxu1 %v25852_v3 }
 0x132   :  { %19026 = vmatpush3.msra.mxu0 %v21315_v13  ;;  %19031 = vmatpush3.msra.mxu1 %v21267_v59  ;;  %v21379_v39 = vpop.f32.mrf.mxu1 }
 0x133   :  { %19027 = vmatprep.mubr.msk.f32.mxu0 %vm20524_vm1, %v25852_v3  ;;  %19032 = vmatprep.subr.mxu1 %v25852_v3  ;;  %v604_v34 = vadd.f32 %v21379_v39, %v529_v40 }
 0x134   :  { %19041 = vmatprep.subr.mxu0 %v25852_v3  ;;  %19028 = vmatmul.mubr.f32.vlgmr.msra.gmra.mxu0 %v20629_v17  ;;  %v18600_v41 = vpop.f32.mrf.mxu1 }
 0x135   :  { %19033 = vmatpush3.msra.mxu1 %v21277_v62  ;;  %19042 = vmatpush3.msra.mxu0 %v4009_v9  ;;  %v5096_v41 = vand.u32 4294901760, %v21517_v20  ;;  %vm607_vm2 = vcmp.ge.f32.partialorder %v604_v34, 0.0 }
 0x136   :  { %19034 = vmatprep.subr.mxu1 %v25852_v3  ;;  %19043 = vmatprep.subr.mxu0 %v25852_v3  ;;  %v738_v46 = vpop.f32.mrf.mxu0 }
 0x137   :  { %19035 = vmatpush3.msra.mxu1 %v21287_v2  ;;  %19044 = vmatpush3.msra.mxu0 %v4016_v14  ;;  %v739_v51 = vadd.f32 %v17619_v45, %v738_v46  ;;  %v4974_v14 = vld [vmem:[#allocation6 + $0x138] sm:$0xff]  ;;  %v20525_v45 = vmov 1966171168   ;;  %v5097_v39 = vsub.f32 %v21517_v20, %v5096_v41 }
 0x138   :  { %19036 = vmatprep.subr.mxu1 %v25852_v3  ;;  %19045 = vmatprep.subr.mxu0 %v25852_v3  ;;  %v18611_v48 = vpop.f32.mrf.mxu0  ;;  %v21487_v18 = vand.u32 4294901760, %v4974_v14  ;;  %v612_v46 = vunpack.c.l.s4 %v20525_v45 }
 0x139   :  { %19037 = vmatpush3.msra.mxu1 %v21297_v6  ;;  %19038 = vmatprep.mubr.msk.f32.mxu1 %vm20524_vm1, %v25852_v3  ;;  %v614_v48 = vlaneseq }
 0x13a   :  { %19046 = vmatpush3.msra.mxu0 %v4023_v19  ;;  %19039 = vmatmul.mubr.f32.vlgmr.msra.gmra.mxu1 %v20636_v22  ;;  %v21506_v26 = vsub.f32 %v4974_v14, %v21487_v18 }
 0x13b   :  { %19047 = vmatprep.subr.mxu0 %v25852_v3  ;;  %19052 = vmatprep.subr.mxu1 %v25852_v3 }
 0x13c   :  { %19048 = vmatpush3.msra.mxu0 %v4030_v23  ;;  %19049 = vmatprep.mubr.msk.f32.mxu0 %vm20524_vm1, %v25852_v3  ;;  %v829_v54 = vpop.f32.mrf.mxu1  ;;  %v4972_v23 = vld [vmem:[#allocation6 + $0x128] sm:$0xff]  ;;  %v5089_v38 = vand.u32 4294901760, %v21506_v26 }
 0x13d   :  { %19053 = vmatpush3.msra.mxu1 %v21267_v59  ;;  %19050 = vmatmul.mubr.f32.vlgmr.msra.gmra.mxu0 %v20617_v12  ;;  %v830_v57 = vadd.f32 %v829_v54, %v739_v51  ;;  %v4563_v59 = vand.u32 4294901760, %v21418_v53  ;;  %v21511_v32 = vand.u32 4294901760, %v4972_v23  ;;  %v613_v54 = vunpack.c.0.s8 %v612_v46 }
 0x13e   :  { %19054 = vmatprep.subr.mxu1 %v25852_v3  ;;  %19063 = vmatprep.subr.mxu0 %v25852_v3  ;;  %v18622_v60 = vpop.f32.mrf.mxu1 }
 0x13f   :  { %19055 = vmatpush3.msra.mxu1 %v21277_v62  ;;  %19064 = vmatpush3.msra.mxu0 %v21377_v37  ;;  %v21531_v30 = vsub.f32 %v4972_v23, %v21511_v32  ;;  %v5098_v60 = vand.u32 4294901760, %v5097_v39 }
 0x140   :  { %19056 = vmatprep.subr.mxu1 %v25852_v3  ;;  %19065 = vmatprep.subr.mxu0 %v25852_v3  ;;  %v909_v61 = vpop.f32.mrf.mxu0 }
 0x141   :  { %19057 = vmatpush3.msra.mxu1 %v21287_v2  ;;  %19066 = vmatpush3.msra.mxu0 %v21389_v42  ;;  %v21446_v62 = vadd.f32 %v909_v61, %v830_v57  ;;  %v4564_v2 = vsub.f32 %v21418_v53, %v4563_v59 }
 0x142   :  { %19058 = vmatprep.subr.mxu1 %v25852_v3  ;;  %19067 = vmatprep.subr.mxu0 %v25852_v3  ;;  %v18633_v4 = vpop.f32.mrf.mxu0 }
 0x143   :  { %19059 = vmatpush3.msra.mxu1 %v21297_v6  ;;  %19060 = vmatprep.mubr.msk.f32.mxu1 %vm20524_vm1, %v25852_v3  ;;  %v4571_v6 = vsub.f32 %v21427_v55, %v4570_v0  ;;  %v4565_v8 = vand.u32 4294901760, %v4564_v2 }
 0x144   :  { %19068 = vmatpush3.msra.mxu0 %v21399_v47  ;;  %19061 = vmatmul.mubr.f32.vlgmr.msra.gmra.mxu1 %v20617_v12 }
 0x145   :  { %19069 = vmatprep.subr.mxu0 %v25852_v3  ;;  %19074 = vmatprep.subr.mxu1 %v25852_v3  ;;  %v4572_v10 = vand.u32 4294901760, %v4571_v6 }
 0x146   :  { %19070 = vmatpush3.msra.mxu0 %v21409_v50  ;;  %19075 = vmatpush3.msra.mxu1 %v4551_v1  ;;  %v21464_v7 = vpop.f32.mrf.mxu1 }
 0x147   :  { %19071 = vmatprep.mubr.msk.f32.mxu0 %vm20524_vm1, %v25852_v3  ;;  %19076 = vmatprep.subr.mxu1 %v25852_v3 }
 0x148   :  { %19085 = vmatprep.subr.mxu0 %v25852_v3  ;;  %19072 = vmatmul.mubr.f32.vlgmr.msra.gmra.mxu0 %v20647_v29  ;;  %v18644_v9 = vpop.f32.mrf.mxu1 }
 0x149   :  { %19077 = vmatpush3.msra.mxu1 %v4558_v5  ;;  %19086 = vmatpush3.msra.mxu0 %v21394_v43  ;;  %v21472_v11 = vpop.f32.mrf.mxu0 }
 0x14a   :  { %19078 = vmatprep.subr.mxu1 %v25852_v3  ;;  %19087 = vmatprep.subr.mxu0 %v25852_v3 }
 0x14b   :  { %19079 = vmatpush3.msra.mxu1 %v4565_v8  ;;  %19088 = vmatpush3.msra.mxu0 %v21407_v49  ;;  %v18655_v13 = vpop.f32.mrf.mxu0 }
 0x14c   :  { %19080 = vmatprep.subr.mxu1 %v25852_v3  ;;  %19089 = vmatprep.subr.mxu0 %v25852_v3 }
 0x14d   :  { %19081 = vmatpush3.msra.mxu1 %v4572_v10  ;;  %19082 = vmatprep.mubr.msk.f32.mxu1 %vm20524_vm1, %v25852_v3  ;;  %v5514_v10 = vld [vmem:[#allocation6 + $0x158] sm:$0xff] }
 0x14e   :  { %19090 = vmatpush3.msra.mxu0 %v21418_v53  ;;  %19083 = vmatmul.mubr.f32.vlgmr.msra.gmra.mxu1 %v20617_v12  ;;  %v21616_v23 = vand.u32 4294901760, %v5514_v10 }
 0x14f   :  { %19091 = vmatprep.subr.mxu0 %v25852_v3  ;;  %19096 = vmatprep.subr.mxu1 %v25852_v3 }
 0x150   :  { %19092 = vmatpush3.msra.mxu0 %v21427_v55  ;;  %19097 = vmatpush3.msra.mxu1 %v21377_v37  ;;  %v21489_v19 = vpop.f32.mrf.mxu1  ;;  %v615_v55 = vshrl.u32 %v614_v48, 7 }
 0x151   :  { %19093 = vmatprep.mubr.msk.f32.mxu0 %vm20524_vm1, %v25852_v3  ;;  %19098 = vmatprep.subr.mxu1 %v25852_v3 }
 0x152   :  { %19107 = vmatprep.subr.mxu0 %v25852_v3  ;;  %19094 = vmatmul.mubr.f32.vlgmr.msra.gmra.mxu0 %v20629_v17  ;;  %v18666_v24 = vpop.f32.mrf.mxu1  ;;  %v21602_v9 = vsub.s32 0, %v615_v55 }
 0x153   :  { %19099 = vmatpush3.msra.mxu1 %v21389_v42  ;;  %19108 = vmatpush3.msra.mxu0 %v4549_v52  ;;  %v5103_v52 = vand.u32 4294901760, %v21531_v30  ;;  %v5513_v24 = vld [vmem:[#allocation6 + $0x150] sm:$0xff] }
 0x154   :  { %19100 = vmatprep.subr.mxu1 %v25852_v3  ;;  %19109 = vmatprep.subr.mxu0 %v25852_v3  ;;  %v1278_v31 = vpop.f32.mrf.mxu0 }
 0x155   :  { %19101 = vmatpush3.msra.mxu1 %v21399_v47  ;;  %19110 = vmatpush3.msra.mxu0 %v4556_v56  ;;  %v1279_v36 = vadd.f32 %v17620_v28, %v1278_v31  ;;  %v608_v56 = vmul.f32 0.01, %v604_v34  ;;  %v21626_v31 = vand.u32 4294901760, %v5513_v24 }
 0x156   :  { %19102 = vmatprep.subr.mxu1 %v25852_v3  ;;  %19111 = vmatprep.subr.mxu0 %v25852_v3  ;;  %v18677_v33 = vpop.f32.mrf.mxu0 }
 0x157   :  { %19103 = vmatpush3.msra.mxu1 %v21409_v50  ;;  %19104 = vmatprep.mubr.msk.f32.mxu1 %vm20524_vm1, %v25852_v3  ;;  %v609_v61 = vsel %vm607_vm2, %v604_v34, %v608_v56 }
 0x158   :  { %19112 = vmatpush3.msra.mxu0 %v4563_v59  ;;  %19105 = vmatmul.mubr.f32.vlgmr.msra.gmra.mxu1 %v20636_v22  ;;  %v21580_v59 = vsub.s32 %v613_v54, %v615_v55 }
 0x159   :  { %19113 = vmatprep.subr.mxu0 %v25852_v3  ;;  %19118 = vmatprep.subr.mxu1 %v25852_v3 }
 0x15a   :  { %19114 = vmatpush3.msra.mxu0 %v4570_v0  ;;  %19115 = vmatprep.mubr.msk.f32.mxu0 %vm20524_vm1, %v25852_v3  ;;  %v1369_v43 = vpop.f32.mrf.mxu1  ;;  %v617_v2 = vrot.slane %v609_v61, %v21580_v59 }
 0x15b   :  { %19119 = vmatpush3.msra.mxu1 %v21377_v37  ;;  %19116 = vmatmul.mubr.f32.vlgmr.msra.gmra.mxu0 %v20617_v12  ;;  %v21544_v49 = vadd.f32 %v1369_v43, %v1279_v36  ;;  %v5090_v37 = vsub.f32 %v21506_v26, %v5089_v38  ;;  %v21631_v36 = vsub.f32 %v5514_v10, %v21616_v23 }
 0x15c   :  { %19120 = vmatprep.subr.mxu1 %v25852_v3  ;;  %19129 = vmatprep.subr.mxu0 %v25852_v3  ;;  %v18688_v51 = vpop.f32.mrf.mxu1  ;;  %v625_v8 = vrot.slane %v617_v2, %v21580_v59  ;;  %v618_v13 = vcombine.high %v617_v2, %v617_v2  ;;  %v987_v43 = vadd.f32 %v21464_v7, %v21446_v62  ;;  %v6054_v2 = vld [vmem:[#allocation6 + $0x178] sm:$0xff] }
 0x15d   :  { %19121 = vmatpush3.msra.mxu1 %v21389_v42  ;;  %19130 = vmatpush3.msra.mxu0 %v21487_v18  ;;  %v5110_v42 = vand.u32 4294901760, %v21542_v44  ;;  %v5091_v57 = vand.u32 4294901760, %v5090_v37  ;;  %v5629_v62 = vand.u32 4294901760, %v21631_v36 }
 0x15e   :  { %19122 = vmatprep.subr.mxu1 %v25852_v3  ;;  %19131 = vmatprep.subr.mxu0 %v25852_v3  ;;  %v21557_v53 = vpop.f32.mrf.mxu0  ;;  %v636_v16 = vrot.slane %v625_v8, %v21602_v9  ;;  %v632_v28 = vrot.slane %v618_v13, %v21580_v59  ;;  %v1070_v48 = vadd.f32 %v21472_v11, %v987_v43  ;;  %v21735_v13 = vand.u32 4294901760, %v6054_v2 }
 0x15f   :  { %19123 = vmatpush3.msra.mxu1 %v21399_v47  ;;  %19132 = vmatpush3.msra.mxu0 %v21496_v21  ;;  %v5104_v47 = vsub.f32 %v21531_v30, %v5103_v52  ;;  %v5630_v11 = vsub.f32 %v21631_v36, %v5629_v62 }
 0x160   :  { %19124 = vmatprep.subr.mxu1 %v25852_v3  ;;  %19133 = vmatprep.subr.mxu0 %v25852_v3  ;;  %v18699_v58 = vpop.f32.mrf.mxu0 }
 0x161   :  { %19125 = vmatpush3.msra.mxu1 %v21409_v50  ;;  %19126 = vmatprep.mubr.msk.f32.mxu1 %vm20524_vm1, %v25852_v3  ;;  %v5111_v50 = vsub.f32 %v21542_v44, %v5110_v42  ;;  %v5105_v0 = vand.u32 4294901760, %v5104_v47  ;;  %v5631_v55 = vand.u32 4294901760, %v5630_v11 }
 0x162   :  { %19134 = vmatpush3.msra.mxu0 %v21511_v32  ;;  %19127 = vmatmul.mubr.f32.vlgmr.msra.gmra.mxu1 %v20617_v12 }
 0x163   :  { %19135 = vmatprep.subr.mxu0 %v25852_v3  ;;  %19140 = vmatprep.subr.mxu1 %v25852_v3  ;;  %v5112_v4 = vand.u32 4294901760, %v5111_v50 }
 0x164   :  { %19136 = vmatpush3.msra.mxu0 %v21522_v35  ;;  %19141 = vmatpush3.msra.mxu1 %v5091_v57  ;;  %v21583_v63 = vpop.f32.mrf.mxu1 }
 0x165   :  { %19137 = vmatprep.mubr.msk.f32.mxu0 %vm20524_vm1, %v25852_v3  ;;  %19142 = vmatprep.subr.mxu1 %v25852_v3 }
 0x166   :  { %19151 = vmatprep.subr.mxu0 %v25852_v3  ;;  %19138 = vmatmul.mubr.f32.vlgmr.msra.gmra.mxu0 %v20647_v29  ;;  %v18710_v1 = vpop.f32.mrf.mxu1 }
 0x167   :  { %19143 = vmatpush3.msra.mxu1 %v5098_v60  ;;  %19152 = vmatpush3.msra.mxu0 %v21506_v26  ;;  %v21592_v5 = vpop.f32.mrf.mxu0  ;;  %v5511_v26 = vld [vmem:[#allocation6 + $0x140] sm:$0xff] }
 0x168   :  { %19144 = vmatprep.subr.mxu1 %v25852_v3  ;;  %19153 = vmatprep.subr.mxu0 %v25852_v3  ;;  %v21650_v46 = vand.u32 4294901760, %v5511_v26 }
 0x169   :  { %19145 = vmatpush3.msra.mxu1 %v5105_v0  ;;  %19154 = vmatpush3.msra.mxu0 %v21517_v20  ;;  %v18721_v6 = vpop.f32.mrf.mxu0  ;;  %v640_v20 = vrot.slane %v632_v28, %v21602_v9 }
 0x16a   :  { %19146 = vmatprep.subr.mxu1 %v25852_v3  ;;  %19155 = vmatprep.subr.mxu0 %v25852_v3  ;;  %v21670_v37 = vsub.f32 %v5511_v26, %v21650_v46  ;;  %v6053_v6 = vld [vmem:[#allocation6 + $0x170] sm:$0xff]  ;;  %v17622_v26 = vld [vmem:[#allocation8 + $0x4] ss:$0 sm:$0xff] }
 0x16b   :  { %19147 = vmatpush3.msra.mxu1 %v5112_v4  ;;  %19148 = vmatprep.mubr.msk.f32.mxu1 %vm20524_vm1, %v25852_v3  ;;  %v21745_v28 = vand.u32 4294901760, %v6053_v6 }
 0x16c   :  { %19156 = vmatpush3.msra.mxu0 %v21531_v30  ;;  %19149 = vmatmul.mubr.f32.vlgmr.msra.gmra.mxu1 %v20617_v12 }
 0x16d   :  { %19157 = vmatprep.subr.mxu0 %v25852_v3  ;;  %19162 = vmatprep.subr.mxu1 %v25852_v3 }
 0x16e   :  { %19158 = vmatpush3.msra.mxu0 %v21542_v44  ;;  %19163 = vmatpush3.msra.mxu1 %v21487_v18  ;;  %v21610_v14 = vpop.f32.mrf.mxu1  ;;  %v1145_v44 = vadd.f32 %v21489_v19, %v1070_v48 }
 0x16f   :  { %19159 = vmatprep.mubr.msk.f32.mxu0 %vm20524_vm1, %v25852_v3  ;;  %19164 = vmatprep.subr.mxu1 %v25852_v3 }
 0x170   :  { %19173 = vmatprep.subr.mxu0 %v25852_v3  ;;  %19160 = vmatmul.mubr.f32.vlgmr.msra.gmra.mxu0 %v20629_v17  ;;  %v18732_v25 = vpop.f32.mrf.mxu1  ;;  %v1149_v54 = vmul.f32 0.01, %v1145_v44  ;;  %vm1148_vm3 = vcmp.ge.f32.partialorder %v1145_v44, 0.0 }
 0x171   :  { %19165 = vmatpush3.msra.mxu1 %v21496_v21  ;;  %19174 = vmatpush3.msra.mxu0 %v5089_v38  ;;  %v21636_v38 = vand.u32 4294901760, %v5512_v27  ;;  %v6052_v25 = vld [vmem:[#allocation6 + $0x168] sm:$0xff] }
 0x172   :  { %19166 = vmatprep.subr.mxu1 %v25852_v3  ;;  %19175 = vmatprep.subr.mxu0 %v25852_v3  ;;  %v1818_v33 = vpop.f32.mrf.mxu0  ;;  %v1150_v58 = vsel %vm1148_vm3, %v1145_v44, %v1149_v54  ;;  %v21757_v43 = vand.u32 4294901760, %v6052_v25 }
 0x173   :  { %641 = vrot.lane.b32.xlu0 %v636_v16, %s20526_s5  ;;  %19167 = vmatpush3.msra.mxu1 %v21511_v32  ;;  %v1819_v45 = vadd.f32 %v17621_v15, %v1818_v33  ;;  %v21658_v7 = vsub.f32 %v5512_v27, %v21636_v38  ;;  %v1158_v0 = vrot.slane %v1150_v58, %v21580_v59  ;;  %v6051_v33 = vld [vmem:[#allocation6 + $0x160] sm:$0xff] }
 0x174   :  { %19176 = vmatpush3.msra.mxu0 %v5096_v41  ;;  %19168 = vmatprep.subr.mxu1 %v25852_v3  ;;  %v18743_v40 = vpop.f32.mrf.mxu0  ;;  %v21648_v41 = vsub.f32 %v5513_v24, %v21626_v31  ;;  %v1450_v16 = vadd.f32 %v21557_v53, %v21544_v49  ;;  %v21779_v48 = vsub.f32 %v6052_v25, %v21757_v43 }
 0x175   :  { %19177 = vmatprep.subr.mxu0 %v25852_v3  ;;  %19169 = vmatpush3.msra.mxu1 %v21522_v35  ;;  %v1166_v4 = vrot.slane %v1158_v0, %v21580_v59  ;;  %v1159_v10 = vcombine.high %v1158_v0, %v1158_v0  ;;  %v21755_v40 = vsub.f32 %v6054_v2, %v21735_v13  ;;  %v6594_v2 = vld [vmem:[#allocation6 + $0x198] sm:$0xff] }
 0x176   :  { %19170 = vmatprep.mubr.msk.f32.mxu1 %vm20524_vm1, %v25852_v3  ;;  %19178 = vmatpush3.msra.mxu0 %v5103_v52  ;;  %v5636_v51 = vand.u32 4294901760, %v21648_v41  ;;  %v1527_v15 = vadd.f32 %v21583_v63, %v1450_v16  ;;  %v21765_v63 = vsub.f32 %v6053_v6, %v21745_v28  ;;  %v6593_v16 = vld [vmem:[#allocation6 + $0x190] sm:$0xff]  ;;  %v21857_v25 = vand.u32 4294901760, %v6594_v2 }
 0x177   :  { %19171 = vmatmul.mubr.f32.vlgmr.msra.gmra.mxu1 %v20636_v22  ;;  %19179 = vmatprep.subr.mxu0 %v25852_v3  ;;  %v1177_v24 = vrot.slane %v1166_v4, %v21602_v9  ;;  %v1173_v53 = vrot.slane %v1159_v10, %v21580_v59 }
 0x178   :  { %19184 = vmatprep.subr.mxu1 %v25852_v3  ;;  %643 = vrot.lane.b32.xlu0 %v640_v20, %s20526_s5  ;;  %v1909_v30 = vpop.f32.mrf.mxu1  ;;  %v5637_v19 = vsub.f32 %v21648_v41, %v5636_v51 }
 0x179   :  { %19180 = vmatpush3.msra.mxu0 %v5110_v42  ;;  %19181 = vmatprep.mubr.msk.f32.mxu0 %vm20524_vm1, %v25852_v3  ;;  %v21665_v34 = vadd.f32 %v1909_v30, %v1819_v45  ;;  %v21767_v45 = vand.u32 4294901760, %v6051_v33  ;;  %v6169_v30 = vand.u32 4294901760, %v21755_v40 }
 0x17a   :  { %19185 = vmatpush3.msra.mxu1 %v21487_v18  ;;  %19182 = vmatmul.mubr.f32.vlgmr.msra.gmra.mxu0 %v20617_v12  ;;  %v18754_v52 = vpop.f32.mrf.mxu1  ;;  %v5643_v18 = vand.u32 4294901760, %v21658_v7  ;;  %v5638_v56 = vand.u32 4294901760, %v5637_v19 }
 0x17b   :  { %19186 = vmatprep.subr.mxu1 %v25852_v3  ;;  %19195 = vmatprep.subr.mxu0 %v25852_v3  ;;  %v21788_v52 = vsub.f32 %v6051_v33, %v21767_v45 }
 0x17c   :  { %19187 = vmatpush3.msra.mxu1 %v21496_v21  ;;  %19196 = vmatpush3.msra.mxu0 %v21616_v23  ;;  %v21682_v39 = vpop.f32.mrf.mxu0  ;;  %v5650_v21 = vand.u32 4294901760, %v21670_v37 }
 0x17d   :  { %19188 = vmatprep.subr.mxu1 %v25852_v3  ;;  %19197 = vmatprep.subr.mxu0 %v25852_v3  ;;  %v1990_v33 = vadd.f32 %v21682_v39, %v21665_v34  ;;  %v21875_v39 = vsub.f32 %v6594_v2, %v21857_v25 }
 0x17e   :  { %19189 = vmatpush3.msra.mxu1 %v21511_v32  ;;  %19198 = vmatpush3.msra.mxu0 %v21626_v31  ;;  %v18765_v42 = vpop.f32.mrf.mxu0  ;;  %v5644_v32 = vsub.f32 %v21658_v7, %v5643_v18 }
 0x17f   :  { %19190 = vmatprep.subr.mxu1 %v25852_v3  ;;  %19199 = vmatprep.subr.mxu0 %v25852_v3 }
 0x180   :  { %19191 = vmatpush3.msra.mxu1 %v21522_v35  ;;  %19192 = vmatprep.mubr.msk.f32.mxu1 %vm20524_vm1, %v25852_v3  ;;  %v5651_v35 = vsub.f32 %v21670_v37, %v5650_v21  ;;  %v5645_v47 = vand.u32 4294901760, %v5644_v32 }
 0x181   :  { %19200 = vmatpush3.msra.mxu0 %v21636_v38  ;;  %19193 = vmatmul.mubr.f32.vlgmr.msra.gmra.mxu1 %v20617_v12 }
 0x182   :  { %19201 = vmatprep.subr.mxu0 %v25852_v3  ;;  %19206 = vmatprep.subr.mxu1 %v25852_v3  ;;  %v21707_v57 = vpop.f32.mrf.mxu1  ;;  %v5652_v61 = vand.u32 4294901760, %v5651_v35 }
 0x183   :  { %19202 = vmatpush3.msra.mxu0 %v21650_v46  ;;  %19207 = vmatpush3.msra.mxu1 %v5631_v55  ;;  %v2067_v34 = vadd.f32 %v21707_v57, %v1990_v33 }
 0x184   :  { %19203 = vmatprep.mubr.msk.f32.mxu0 %vm20524_vm1, %v25852_v3  ;;  %19208 = vmatprep.subr.mxu1 %v25852_v3  ;;  %v18776_v60 = vpop.f32.mrf.mxu1 }
 0x185   :  { %19217 = vmatprep.subr.mxu0 %v25852_v3  ;;  %19204 = vmatmul.mubr.f32.vlgmr.msra.gmra.mxu0 %v20647_v29  ;;  %v21715_v50 = vpop.f32.mrf.mxu0 }
 0x186   :  { %19209 = vmatpush3.msra.mxu1 %v5638_v56  ;;  %19218 = vmatpush3.msra.mxu0 %v21631_v36 }
 0x187   :  { %19210 = vmatprep.subr.mxu1 %v25852_v3  ;;  %19219 = vmatprep.subr.mxu0 %v25852_v3  ;;  %v18787_v1 = vpop.f32.mrf.mxu0 }
 0x188   :  { %19211 = vmatpush3.msra.mxu1 %v5645_v47  ;;  %19220 = vmatpush3.msra.mxu0 %v21648_v41  ;;  %v1181_v41 = vrot.slane %v1173_v53, %v21602_v9  ;;  %v17623_v53 = vld [vmem:[#allocation8 + $0x5] ss:$0 sm:$0xff] }
 0x189   :  { %19212 = vmatprep.subr.mxu1 %v25852_v3  ;;  %19221 = vmatprep.subr.mxu0 %v25852_v3 }
 0x18a   :  { %19213 = vmatpush3.msra.mxu1 %v5652_v61  ;;  %19214 = vmatprep.mubr.msk.f32.mxu1 %vm20524_vm1, %v25852_v3 }
 0x18b   :  { %19222 = vmatpush3.msra.mxu0 %v21658_v7  ;;  %19215 = vmatmul.mubr.f32.vlgmr.msra.gmra.mxu1 %v20617_v12  ;;  %v6176_v7 = vand.u32 4294901760, %v21765_v63 }
 0x18c   :  { %19223 = vmatprep.subr.mxu0 %v25852_v3  ;;  %19228 = vmatprep.subr.mxu1 %v25852_v3  ;;  %v21731_v8 = vpop.f32.mrf.mxu1 }
 0x18d   :  { %19224 = vmatpush3.msra.mxu0 %v21670_v37  ;;  %19229 = vmatpush3.msra.mxu1 %v21616_v23 }
 0x18e   :  { %19225 = vmatprep.mubr.msk.f32.mxu0 %vm20524_vm1, %v25852_v3  ;;  %19230 = vmatprep.subr.mxu1 %v25852_v3  ;;  %v18798_v27 = vpop.f32.mrf.mxu1 }
 0x18f   :  { %19239 = vmatprep.subr.mxu0 %v25852_v3  ;;  %19226 = vmatmul.mubr.f32.vlgmr.msra.gmra.mxu0 %v20629_v17  ;;  %v6592_v27 = vld [vmem:[#allocation6 + $0x188] sm:$0xff] }
 0x190   :  { %19231 = vmatpush3.msra.mxu1 %v21626_v31  ;;  %19240 = vmatpush3.msra.mxu0 %v5629_v62  ;;  %v2358_v49 = vpop.f32.mrf.mxu0  ;;  %v1610_v62 = vadd.f32 %v21592_v5, %v1527_v15 }
 0x191   :  { %19232 = vmatprep.subr.mxu1 %v25852_v3  ;;  %19241 = vmatprep.subr.mxu0 %v25852_v3  ;;  %v2359_v20 = vadd.f32 %v17622_v26, %v2358_v49  ;;  %v21866_v49 = vand.u32 4294901760, %v6593_v16 }
 0x192   :  { %1182 = vrot.lane.b32.xlu1 %v1177_v24, %s20526_s5  ;;  %19233 = vmatpush3.msra.mxu1 %v21636_v38  ;;  %v18809_v36 = vpop.f32.mrf.mxu0 }
 0x193   :  { %19242 = vmatpush3.msra.mxu0 %v5636_v51  ;;  %19234 = vmatprep.subr.mxu1 %v25852_v3  ;;  %v1685_v51 = vadd.f32 %v21610_v14, %v1610_v62  ;;  %v6170_v14 = vsub.f32 %v21755_v40, %v6169_v30  ;;  %v6591_v62 = vld [vmem:[#allocation6 + $0x180] sm:$0xff] }
 0x194   :  { %19243 = vmatprep.subr.mxu0 %v25852_v3  ;;  %19235 = vmatpush3.msra.mxu1 %v21650_v46  ;;  %v21889_v57 = vand.u32 4294901760, %v6591_v62 }
 0x195   :  { %19236 = vmatprep.mubr.msk.f32.mxu1 %vm20524_vm1, %v25852_v3  ;;  %19244 = vmatpush3.msra.mxu0 %v5643_v18  ;;  %v6183_v18 = vand.u32 4294901760, %v21779_v48  ;;  %v1689_v37 = vmul.f32 0.01, %v1685_v51  ;;  %vm1688_vm4 = vcmp.ge.f32.partialorder %v1685_v51, 0.0 }
 0x196   :  { %19237 = vmatmul.mubr.f32.vlgmr.msra.gmra.mxu1 %v20636_v22  ;;  %19245 = vmatprep.subr.mxu0 %v25852_v3  ;;  %v2449_v5 = vpop.f32.mrf.mxu1 }
 0x197   :  { %19250 = vmatprep.subr.mxu1 %v25852_v3  ;;  %1184 = vrot.lane.b32.xlu1 %v1181_v41, %s20526_s5  ;;  %v2450_v44 = vadd.f32 %v2449_v5, %v2359_v20  ;;  %v6184_v55 = vsub.f32 %v21779_v48, %v6183_v18  ;;  %v1690_v32 = vsel %vm1688_vm4, %v1685_v51, %v1689_v37  ;;  %v21877_v20 = vand.u32 4294901760, %v6592_v27 }
 0x198   :  { %19246 = vmatpush3.msra.mxu0 %v5650_v21  ;;  %19247 = vmatprep.mubr.msk.f32.mxu0 %vm20524_vm1, %v25852_v3  ;;  %v18820_v11 = vpop.f32.mrf.mxu1  ;;  %v6190_v21 = vand.u32 4294901760, %v21788_v52  ;;  %v1698_v58 = vrot.slane %v1690_v32, %v21580_v59  ;;  %v21884_v51 = vsub.f32 %v6593_v16, %v21866_v49 }
 0x199   :  { %19251 = vmatpush3.msra.mxu1 %v21616_v23  ;;  %19248 = vmatmul.mubr.f32.vlgmr.msra.gmra.mxu0 %v20617_v12  ;;  %v6177_v23 = vsub.f32 %v21765_v63, %v6176_v7  ;;  %v6185_v47 = vand.u32 4294901760, %v6184_v55  ;;  %v6709_v11 = vand.u32 4294901760, %v21875_v39 }
 0x19a   :  { %19252 = vmatprep.subr.mxu1 %v25852_v3  ;;  %19261 = vmatprep.subr.mxu0 %v25852_v3  ;;  %v2529_v19 = vpop.f32.mrf.mxu0  ;;  %v1699_v0 = vcombine.high %v1698_v58, %v1698_v58  ;;  %v1706_v4 = vrot.slane %v1698_v58, %v21580_v59  ;;  %v6716_v37 = vand.u32 4294901760, %v21884_v51 }
 0x19b   :  { %19253 = vmatpush3.msra.mxu1 %v21626_v31  ;;  %19258 = vmatprep.mubr.msk.f32.mxu1 %vm20524_vm1, %v25852_v3  ;;  %v21809_v42 = vadd.f32 %v2529_v19, %v2450_v44  ;;  %v6171_v31 = vand.u32 4294901760, %v6170_v14  ;;  %v6178_v56 = vand.u32 4294901760, %v6177_v23  ;;  %v2150_v44 = vadd.f32 %v21715_v50, %v2067_v34 }
 0x19c   :  { %19254 = vmatprep.subr.mxu1 %v25852_v3  ;;  %19262 = vmatpush3.msra.mxu0 %v21735_v13  ;;  %v18831_v54 = vpop.f32.mrf.mxu0  ;;  %v1713_v6 = vrot.slane %v1699_v0, %v21580_v59  ;;  %v1717_v10 = vrot.slane %v1706_v4, %v21602_v9  ;;  %v21897_v14 = vsub.f32 %v6592_v27, %v21877_v20 }
 0x19d   :  { %19255 = vmatpush3.msra.mxu1 %v21636_v38  ;;  %19263 = vmatprep.subr.mxu0 %v25852_v3  ;;  %v6191_v38 = vsub.f32 %v21788_v52, %v6190_v21  ;;  %v21909_v19 = vsub.f32 %v6591_v62, %v21889_v57 }
 0x19e   :  { %19256 = vmatprep.subr.mxu1 %v25852_v3  ;;  %19264 = vmatpush3.msra.mxu0 %v21745_v28  ;;  %v1721_v26 = vrot.slane %v1713_v6, %v21602_v9 }
 0x19f   :  { %19257 = vmatpush3.msra.mxu1 %v21650_v46  ;;  %19265 = vmatprep.subr.mxu0 %v25852_v3  ;;  %v6192_v60 = vand.u32 4294901760, %v6191_v38 }
 0x1a0   :  { %19259 = vmatmul.mubr.f32.vlgmr.msra.gmra.mxu1 %v20617_v12  ;;  %19272 = vmatprep.subr.mxu1 %v25852_v3  ;;  %v21827_v35 = vpop.f32.mrf.mxu1 }
 0x1a1   :  { %19273 = vmatpush3.msra.mxu1 %v6171_v31  ;;  %19266 = vmatpush3.msra.mxu0 %v21757_v43  ;;  %v2607_v34 = vadd.f32 %v21827_v35, %v21809_v42 }
 0x1a2   :  { %19274 = vmatprep.subr.mxu1 %v25852_v3  ;;  %19267 = vmatprep.subr.mxu0 %v25852_v3  ;;  %v18842_v46 = vpop.f32.mrf.mxu1 }
 0x1a3   :  { %19275 = vmatpush3.msra.mxu1 %v6178_v56  ;;  %19268 = vmatpush3.msra.mxu0 %v21767_v45  ;;  %v21834_v61 = vpop.f32.mrf.mxu0 }
 0x1a4   :  { %19276 = vmatprep.subr.mxu1 %v25852_v3  ;;  %19269 = vmatprep.mubr.msk.f32.mxu0 %vm20524_vm1, %v25852_v3  ;;  %v2690_v35 = vadd.f32 %v21834_v61, %v2607_v34 }
 0x1a5   :  { %19277 = vmatpush3.msra.mxu1 %v6185_v47  ;;  %19283 = vmatprep.subr.mxu0 %v25852_v3  ;;  %v18853_v1 = vpop.f32.mrf.mxu0 }
 0x1a6   :  { %19278 = vmatprep.subr.mxu1 %v25852_v3  ;;  %19270 = vmatmul.mubr.f32.vlgmr.msra.gmra.mxu0 %v20647_v29  ;;  %v7134_v1 = vld [vmem:[#allocation6 + $0x1b8] sm:$0xff] }
 0x1a7   :  { %19279 = vmatpush3.msra.mxu1 %v6192_v60  ;;  %19284 = vmatpush3.msra.mxu0 %v21755_v40  ;;  %v21979_v16 = vand.u32 4294901760, %v7134_v1 }
 0x1a8   :  { %19280 = vmatprep.mubr.msk.f32.mxu1 %vm20524_vm1, %v25852_v3  ;;  %19285 = vmatprep.subr.mxu0 %v25852_v3 }
 0x1a9   :  { %19294 = vmatprep.subr.mxu1 %v25852_v3  ;;  %19281 = vmatmul.mubr.f32.vlgmr.msra.gmra.mxu1 %v20617_v12  ;;  %v21996_v62 = vsub.f32 %v7134_v1, %v21979_v16 }
 0x1aa   :  { %19286 = vmatpush3.msra.mxu0 %v21765_v63  ;;  %19295 = vmatpush3.msra.mxu1 %v21735_v13  ;;  %v21853_v24 = vpop.f32.mrf.mxu1 }
 0x1ab   :  { %19287 = vmatprep.subr.mxu0 %v25852_v3  ;;  %19296 = vmatprep.subr.mxu1 %v25852_v3 }
 0x1ac   :  { %19288 = vmatpush3.msra.mxu0 %v21779_v48  ;;  %19297 = vmatpush3.msra.mxu1 %v21745_v28  ;;  %v18864_v15 = vpop.f32.mrf.mxu1 }
 0x1ad   :  { %19289 = vmatprep.subr.mxu0 %v25852_v3  ;;  %19298 = vmatprep.subr.mxu1 %v25852_v3  ;;  %v7132_v15 = vld [vmem:[#allocation6 + $0x1a8] sm:$0xff] }
 0x1ae   :  { %1722 = vrot.lane.b32.xlu0 %v1717_v10, %s20526_s5  ;;  %19290 = vmatpush3.msra.mxu0 %v21788_v52  ;;  %v2898_v36 = vpop.f32.mrf.mxu0  ;;  %v7133_v10 = vld [vmem:[#allocation6 + $0x1b0] sm:$0xff] }
 0x1af   :  { %19299 = vmatpush3.msra.mxu1 %v21757_v43  ;;  %19291 = vmatprep.mubr.msk.f32.mxu0 %vm20524_vm1, %v25852_v3  ;;  %v2899_v5 = vadd.f32 %v17623_v53, %v2898_v36  ;;  %v17624_v53 = vld [vmem:[#allocation8 + $0x6] ss:$0 sm:$0xff] }
 0x1b0   :  { %19300 = vmatprep.subr.mxu1 %v25852_v3  ;;  %19305 = vmatprep.subr.mxu0 %v25852_v3  ;;  %v18875_v41 = vpop.f32.mrf.mxu0 }
 0x1b1   :  { %1724 = vrot.lane.b32.xlu1 %v1721_v26, %s20526_s5  ;;  %19292 = vmatmul.mubr.f32.vlgmr.msra.gmra.mxu0 %v20629_v17  ;;  %v21986_v26 = vand.u32 4294901760, %v7133_v10  ;;  %v21998_v41 = vand.u32 4294901760, %v7132_v15 }
 0x1b2   :  { %19301 = vmatpush3.msra.mxu1 %v21767_v45  ;;  %19306 = vmatpush3.msra.mxu0 %v6169_v30  ;;  %v2225_v30 = vadd.f32 %v21731_v8, %v2150_v44  ;;  %v6710_v8 = vsub.f32 %v21875_v39, %v6709_v11 }
 0x1b3   :  { %19302 = vmatprep.mubr.msk.f32.mxu1 %vm20524_vm1, %v25852_v3  ;;  %19307 = vmatprep.subr.mxu0 %v25852_v3 }
 0x1b4   :  { %19316 = vmatprep.subr.mxu1 %v25852_v3  ;;  %19303 = vmatmul.mubr.f32.vlgmr.msra.gmra.mxu1 %v20636_v22  ;;  %v2989_v40 = vpop.f32.mrf.mxu1  ;;  %v2229_v48 = vmul.f32 0.01, %v2225_v30  ;;  %vm2228_vm5 = vcmp.ge.f32.partialorder %v2225_v30, 0.0 }
 0x1b5   :  { %19308 = vmatpush3.msra.mxu0 %v6176_v7  ;;  %19317 = vmatpush3.msra.mxu1 %v21735_v13  ;;  %v2990_v50 = vadd.f32 %v2989_v40, %v2899_v5  ;;  %v6723_v13 = vand.u32 4294901760, %v21897_v14  ;;  %v7131_v5 = vld [vmem:[#allocation6 + $0x1a0] sm:$0xff] }
 0x1b6   :  { %19309 = vmatprep.subr.mxu0 %v25852_v3  ;;  %19318 = vmatprep.subr.mxu1 %v25852_v3  ;;  %v18886_v23 = vpop.f32.mrf.mxu1  ;;  %v22010_v42 = vand.u32 4294901760, %v7131_v5 }
 0x1b7   :  { %19310 = vmatpush3.msra.mxu0 %v6183_v18  ;;  %19319 = vmatpush3.msra.mxu1 %v21745_v28  ;;  %v6717_v28 = vsub.f32 %v21884_v51, %v6716_v37  ;;  %v6730_v18 = vand.u32 4294901760, %v21909_v19  ;;  %v6724_v52 = vsub.f32 %v21897_v14, %v6723_v13  ;;  %v22018_v23 = vsub.f32 %v7132_v15, %v21998_v41  ;;  %v7672_v15 = vld [vmem:[#allocation6 + $0x1c8] sm:$0xff] }
 0x1b8   :  { %19311 = vmatprep.subr.mxu0 %v25852_v3  ;;  %19320 = vmatprep.subr.mxu1 %v25852_v3  ;;  %v3069_v63 = vpop.f32.mrf.mxu0 }
 0x1b9   :  { %19312 = vmatpush3.msra.mxu0 %v6190_v21  ;;  %19321 = vmatpush3.msra.mxu1 %v21757_v43  ;;  %v21926_v7 = vadd.f32 %v3069_v63, %v2990_v50  ;;  %v6711_v43 = vand.u32 4294901760, %v6710_v8  ;;  %v2230_v21 = vsel %vm2228_vm5, %v2225_v30, %v2229_v48  ;;  %v6718_v31 = vand.u32 4294901760, %v6717_v28 }
 0x1ba   :  { %19313 = vmatprep.mubr.msk.f32.mxu0 %vm20524_vm1, %v25852_v3  ;;  %19322 = vmatprep.subr.mxu1 %v25852_v3  ;;  %v18897_v54 = vpop.f32.mrf.mxu0  ;;  %v6731_v55 = vsub.f32 %v21909_v19, %v6730_v18  ;;  %v2238_v56 = vrot.slane %v2230_v21, %v21580_v59  ;;  %v22005_v30 = vsub.f32 %v7133_v10, %v21986_v26  ;;  %v7249_v50 = vand.u32 4294901760, %v21996_v62 }
 0x1bb   :  { %19327 = vmatprep.subr.mxu0 %v25852_v3  ;;  %19314 = vmatmul.mubr.f32.vlgmr.msra.gmra.mxu0 %v20617_v12  ;;  %v22030_v48 = vsub.f32 %v7131_v5, %v22010_v42 }
 0x1bc   :  { %19323 = vmatpush3.msra.mxu1 %v21767_v45  ;;  %19328 = vmatpush3.msra.mxu0 %v21857_v25  ;;  %v6725_v45 = vand.u32 4294901760, %v6724_v52  ;;  %v6732_v47 = vand.u32 4294901760, %v6731_v55  ;;  %v2239_v60 = vcombine.high %v2238_v56, %v2238_v56  ;;  %v2246_v0 = vrot.slane %v2238_v56, %v21580_v59 }
 0x1bd   :  { %19324 = vmatprep.mubr.msk.f32.mxu1 %vm20524_vm1, %v25852_v3  ;;  %19329 = vmatprep.subr.mxu0 %v25852_v3  ;;  %v7256_v61 = vand.u32 4294901760, %v22005_v30  ;;  %v7270_v28 = vand.u32 4294901760, %v22030_v48 }
 0x1be   :  { %19338 = vmatprep.subr.mxu1 %v25852_v3  ;;  %19325 = vmatmul.mubr.f32.vlgmr.msra.gmra.mxu1 %v20617_v12  ;;  %v21947_v32 = vpop.f32.mrf.mxu1  ;;  %v2253_v4 = vrot.slane %v2239_v60, %v21580_v59  ;;  %v2257_v6 = vrot.slane %v2246_v0, %v21602_v9  ;;  %v7674_v60 = vld [vmem:[#allocation6 + $0x1d8] sm:$0xff] }
 0x1bf   :  { %19330 = vmatpush3.msra.mxu0 %v21866_v49  ;;  %19339 = vmatpush3.msra.mxu1 %v6711_v43  ;;  %v7271_v52 = vsub.f32 %v22030_v48, %v7270_v28 }
 0x1c0   :  { %19331 = vmatprep.subr.mxu0 %v25852_v3  ;;  %19340 = vmatprep.subr.mxu1 %v25852_v3  ;;  %v18908_v38 = vpop.f32.mrf.mxu1  ;;  %v2261_v33 = vrot.slane %v2253_v4, %v21602_v9 }
 0x1c1   :  { %19332 = vmatpush3.msra.mxu0 %v21877_v20  ;;  %19341 = vmatpush3.msra.mxu1 %v6718_v31  ;;  %v21954_v58 = vpop.f32.mrf.mxu0 }
 0x1c2   :  { %19333 = vmatprep.subr.mxu0 %v25852_v3  ;;  %19342 = vmatprep.subr.mxu1 %v25852_v3 }
 0x1c3   :  { %19334 = vmatpush3.msra.mxu0 %v21889_v57  ;;  %19343 = vmatpush3.msra.mxu1 %v6725_v45  ;;  %v18919_v46 = vpop.f32.mrf.mxu0  ;;  %v7272_v45 = vand.u32 4294901760, %v7271_v52 }
 0x1c4   :  { %19335 = vmatprep.mubr.msk.f32.mxu0 %vm20524_vm1, %v25852_v3  ;;  %19344 = vmatprep.subr.mxu1 %v25852_v3 }
 0x1c5   :  { %19349 = vmatprep.subr.mxu0 %v25852_v3  ;;  %19336 = vmatmul.mubr.f32.vlgmr.msra.gmra.mxu0 %v20647_v29 }
 0x1c6   :  { %19345 = vmatpush3.msra.mxu1 %v6732_v47  ;;  %19350 = vmatpush3.msra.mxu0 %v21875_v39 }
 0x1c7   :  { %19346 = vmatprep.mubr.msk.f32.mxu1 %vm20524_vm1, %v25852_v3  ;;  %19351 = vmatprep.subr.mxu0 %v25852_v3 }
 0x1c8   :  { %19360 = vmatprep.subr.mxu1 %v25852_v3  ;;  %19347 = vmatmul.mubr.f32.vlgmr.msra.gmra.mxu1 %v20617_v12  ;;  %v21972_v2 = vpop.f32.mrf.mxu1 }
 0x1c9   :  { %19352 = vmatpush3.msra.mxu0 %v21884_v51  ;;  %19361 = vmatpush3.msra.mxu1 %v21857_v25 }
 0x1ca   :  { %19353 = vmatprep.subr.mxu0 %v25852_v3  ;;  %19362 = vmatprep.subr.mxu1 %v25852_v3  ;;  %v18930_v27 = vpop.f32.mrf.mxu1 }
 0x1cb   :  { %19354 = vmatpush3.msra.mxu0 %v21897_v14  ;;  %19363 = vmatpush3.msra.mxu1 %v21866_v49  ;;  %v22101_v27 = vand.u32 4294901760, %v7674_v60 }
 0x1cc   :  { %19355 = vmatprep.subr.mxu0 %v25852_v3  ;;  %19364 = vmatprep.subr.mxu1 %v25852_v3  ;;  %v3438_v36 = vpop.f32.mrf.mxu0 }
 0x1cd   :  { %2262 = vrot.lane.b32.xlu0 %v2257_v6, %s20526_s5  ;;  %19356 = vmatpush3.msra.mxu0 %v21909_v19  ;;  %v3439_v40 = vadd.f32 %v17624_v53, %v3438_v36  ;;  %v7673_v6 = vld [vmem:[#allocation6 + $0x1d0] sm:$0xff]  ;;  %v17625_v53 = vld [vmem:[#allocation8 + $0x7] ss:$0 sm:$0xff] }
 0x1ce   :  { %19365 = vmatpush3.msra.mxu1 %v21877_v20  ;;  %19357 = vmatprep.mubr.msk.f32.mxu0 %vm20524_vm1, %v25852_v3  ;;  %v18941_v44 = vpop.f32.mrf.mxu0  ;;  %v22108_v5 = vand.u32 4294901760, %v7673_v6 }
 0x1cf   :  { %19366 = vmatprep.subr.mxu1 %v25852_v3  ;;  %19371 = vmatprep.subr.mxu0 %v25852_v3 }
 0x1d0   :  { %2264 = vrot.lane.b32.xlu1 %v2261_v33, %s20526_s5  ;;  %19358 = vmatmul.mubr.f32.vlgmr.msra.gmra.mxu0 %v20629_v17 }
 0x1d1   :  { %19367 = vmatpush3.msra.mxu1 %v21889_v57  ;;  %19372 = vmatpush3.msra.mxu0 %v6709_v11  ;;  %v2765_v11 = vadd.f32 %v21853_v24, %v2690_v35  ;;  %v7263_v24 = vand.u32 4294901760, %v22018_v23  ;;  %v22119_v35 = vsub.f32 %v7674_v60, %v22101_v27  ;;  %v8214_v60 = vld [vmem:[#allocation6 + $0x1f8] sm:$0xff] }
 0x1d2   :  { %19368 = vmatprep.mubr.msk.f32.mxu1 %vm20524_vm1, %v25852_v3  ;;  %19373 = vmatprep.subr.mxu0 %v25852_v3  ;;  %v3529_v8 = vpop.f32.mrf.mxu1 }
 0x1d3   :  { %19382 = vmatprep.subr.mxu1 %v25852_v3  ;;  %19369 = vmatmul.mubr.f32.vlgmr.msra.gmra.mxu1 %v20636_v22  ;;  %v3530_v39 = vadd.f32 %v3529_v8, %v3439_v40  ;;  %v2769_v14 = vmul.f32 0.01, %v2765_v11  ;;  %vm2768_vm6 = vcmp.ge.f32.partialorder %v2765_v11, 0.0  ;;  %v3147_v40 = vadd.f32 %v21947_v32, %v21926_v7 }
 0x1d4   :  { %19374 = vmatpush3.msra.mxu0 %v6716_v37  ;;  %19383 = vmatpush3.msra.mxu1 %v21857_v25  ;;  %v18952_v63 = vpop.f32.mrf.mxu1  ;;  %v7250_v25 = vsub.f32 %v21996_v62, %v7249_v50  ;;  %v22121_v8 = vand.u32 4294901760, %v7672_v15 }
 0x1d5   :  { %19375 = vmatprep.subr.mxu0 %v25852_v3  ;;  %19384 = vmatprep.subr.mxu1 %v25852_v3  ;;  %v22128_v63 = vsub.f32 %v7673_v6, %v22108_v5 }
 0x1d6   :  { %19376 = vmatpush3.msra.mxu0 %v6723_v13  ;;  %19385 = vmatpush3.msra.mxu1 %v21866_v49  ;;  %v3609_v51 = vpop.f32.mrf.mxu0  ;;  %v7257_v49 = vsub.f32 %v22005_v30, %v7256_v61  ;;  %v7251_v19 = vand.u32 4294901760, %v7250_v25  ;;  %v3230_v25 = vadd.f32 %v21954_v58, %v3147_v40 }
 0x1d7   :  { %19377 = vmatprep.subr.mxu0 %v25852_v3  ;;  %19386 = vmatprep.subr.mxu1 %v25852_v3  ;;  %v22041_v37 = vadd.f32 %v3609_v51, %v3530_v39  ;;  %v7671_v39 = vld [vmem:[#allocation6 + $0x1c0] sm:$0xff]  ;;  %v7789_v51 = vand.u32 4294901760, %v22119_v35  ;;  %v7796_v58 = vand.u32 4294901760, %v22128_v63 }
 0x1d8   :  { %19378 = vmatpush3.msra.mxu0 %v6730_v18  ;;  %19387 = vmatpush3.msra.mxu1 %v21877_v20  ;;  %v18963_v13 = vpop.f32.mrf.mxu0  ;;  %v7264_v20 = vsub.f32 %v22018_v23, %v7263_v24  ;;  %v2770_v18 = vsel %vm2768_vm6, %v2765_v11, %v2769_v14  ;;  %v7258_v54 = vand.u32 4294901760, %v7257_v49  ;;  %v22133_v7 = vand.u32 4294901760, %v7671_v39 }
 0x1d9   :  { %19379 = vmatprep.mubr.msk.f32.mxu0 %vm20524_vm1, %v25852_v3  ;;  %19388 = vmatprep.subr.mxu1 %v25852_v3  ;;  %v2778_v31 = vrot.slane %v2770_v18, %v21580_v59  ;;  %v22141_v14 = vsub.f32 %v7672_v15, %v22121_v8  ;;  %v22224_v15 = vand.u32 4294901760, %v8214_v60 }
 0x1da   :  { %19393 = vmatprep.subr.mxu0 %v25852_v3  ;;  %19380 = vmatmul.mubr.f32.vlgmr.msra.gmra.mxu0 %v20617_v12  ;;  %v22153_v13 = vsub.f32 %v7671_v39, %v22133_v7 }
 0x1db   :  { %19389 = vmatpush3.msra.mxu1 %v21889_v57  ;;  %19394 = vmatpush3.msra.mxu0 %v21979_v16  ;;  %v7265_v57 = vand.u32 4294901760, %v7264_v20  ;;  %v2779_v38 = vcombine.high %v2778_v31, %v2778_v31  ;;  %v2786_v47 = vrot.slane %v2778_v31, %v21580_v59 }
 0x1dc   :  { %19390 = vmatprep.mubr.msk.f32.mxu1 %vm20524_vm1, %v25852_v3  ;;  %19395 = vmatprep.subr.mxu0 %v25852_v3  ;;  %v22063_v43 = vpop.f32.mrf.mxu1 }
 0x1dd   :  { %19404 = vmatprep.subr.mxu1 %v25852_v3  ;;  %19391 = vmatmul.mubr.f32.vlgmr.msra.gmra.mxu1 %v20617_v12  ;;  %v2793_v1 = vrot.slane %v2779_v38, %v21580_v59  ;;  %v2797_v4 = vrot.slane %v2786_v47, %v21602_v9 }
 0x1de   :  { %19396 = vmatpush3.msra.mxu0 %v21986_v26  ;;  %19405 = vmatpush3.msra.mxu1 %v7251_v19  ;;  %v18974_v21 = vpop.f32.mrf.mxu1 }
 0x1df   :  { %19397 = vmatprep.subr.mxu0 %v25852_v3  ;;  %19406 = vmatprep.subr.mxu1 %v25852_v3  ;;  %v22074_v55 = vpop.f32.mrf.mxu0  ;;  %v2801_v34 = vrot.slane %v2793_v1, %v21602_v9 }
 0x1e0   :  { %19398 = vmatpush3.msra.mxu0 %v21998_v41  ;;  %19407 = vmatpush3.msra.mxu1 %v7258_v54 }
 0x1e1   :  { %19399 = vmatprep.subr.mxu0 %v25852_v3  ;;  %19408 = vmatprep.subr.mxu1 %v25852_v3  ;;  %v18985_v56 = vpop.f32.mrf.mxu0 }
 0x1e2   :  { %19400 = vmatpush3.msra.mxu0 %v22010_v42  ;;  %19409 = vmatpush3.msra.mxu1 %v7265_v57 }
 0x1e3   :  { %19401 = vmatprep.mubr.msk.f32.mxu0 %vm20524_vm1, %v25852_v3  ;;  %19410 = vmatprep.subr.mxu1 %v25852_v3 }
 0x1e4   :  { %19415 = vmatprep.subr.mxu0 %v25852_v3  ;;  %19402 = vmatmul.mubr.f32.vlgmr.msra.gmra.mxu0 %v20647_v29 }
 0x1e5   :  { %19411 = vmatpush3.msra.mxu1 %v7272_v45  ;;  %19416 = vmatpush3.msra.mxu0 %v21996_v62  ;;  %v642_v46 = vpop.permute.xlu0 %641 }
 0x1e6   :  { %19412 = vmatprep.mubr.msk.f32.mxu1 %vm20524_vm1, %v25852_v3  ;;  %19417 = vmatprep.subr.mxu0 %v25852_v3  ;;  %648 = vst.msk [vmem:[#allocation2 + $0x2] sm:$0x1] %vm647_vm7, %v642_v46  ;;  %v22091_v0 = vpop.f32.mrf.mxu1 }
 0x1e7   :  { %19426 = vmatprep.subr.mxu1 %v25852_v3  ;;  %19413 = vmatmul.mubr.f32.vlgmr.msra.gmra.mxu1 %v20617_v12 }
 0x1e8   :  { %19418 = vmatpush3.msra.mxu0 %v22005_v30  ;;  %19427 = vmatpush3.msra.mxu1 %v21979_v16  ;;  %v18996_v10 = vpop.f32.mrf.mxu1 }
 0x1e9   :  { %19419 = vmatprep.subr.mxu0 %v25852_v3  ;;  %19428 = vmatprep.subr.mxu1 %v25852_v3  ;;  %v8213_v10 = vld [vmem:[#allocation6 + $0x1f0] sm:$0xff] }
 0x1ea   :  { %19420 = vmatpush3.msra.mxu0 %v22018_v23  ;;  %19429 = vmatpush3.msra.mxu1 %v21986_v26  ;;  %v644_v33 = vpop.permute.xlu0 %643  ;;  %v3978_v36 = vpop.f32.mrf.mxu0  ;;  %v7797_v23 = vsub.f32 %v22128_v63, %v7796_v58  ;;  %v22231_v40 = vand.u32 4294901760, %v8213_v10 }
 0x1eb   :  { %19421 = vmatprep.subr.mxu0 %v25852_v3  ;;  %19430 = vmatprep.subr.mxu1 %v25852_v3  ;;  %649 = vst.msk [vmem:[#allocation2 + $0x22] sm:$0x1] %vm647_vm7, %v644_v33  ;;  %v3979_v11 = vadd.f32 %v17625_v53, %v3978_v36  ;;  %v17626_v33 = vld [vmem:[#allocation8 + $0x8] ss:$0 sm:$0xff] }
 0x1ec   :  { %2802 = vrot.lane.b32.xlu0 %v2797_v4, %s20526_s5  ;;  %19422 = vmatpush3.msra.mxu0 %v22030_v48  ;;  %v19007_v44 = vpop.f32.mrf.mxu0  ;;  %v7798_v18 = vand.u32 4294901760, %v7797_v23  ;;  %v8212_v36 = vld [vmem:[#allocation6 + $0x1e8] sm:$0xff] }
 0x1ed   :  { %19431 = vmatpush3.msra.mxu1 %v21998_v41  ;;  %19423 = vmatprep.mubr.msk.f32.mxu0 %vm20524_vm1, %v25852_v3 }
 0x1ee   :  { %19432 = vmatprep.subr.mxu1 %v25852_v3  ;;  %19437 = vmatprep.subr.mxu0 %v25852_v3 }
 0x1ef   :  { %2804 = vrot.lane.b32.xlu1 %v2801_v34, %s20526_s5  ;;  %19424 = vmatmul.mubr.f32.vlgmr.msra.gmra.mxu0 %v20629_v17 }
 0x1f0   :  { %19433 = vmatpush3.msra.mxu1 %v22010_v42  ;;  %19438 = vmatpush3.msra.mxu0 %v7249_v50  ;;  %v4069_v32 = vpop.f32.mrf.mxu1  ;;  %v3305_v50 = vadd.f32 %v21972_v2, %v3230_v25  ;;  %v7803_v2 = vand.u32 4294901760, %v22141_v14  ;;  %v22242_v25 = vsub.f32 %v8214_v60, %v22224_v15 }
 0x1f1   :  { %19434 = vmatprep.mubr.msk.f32.mxu1 %vm20524_vm1, %v25852_v3  ;;  %19439 = vmatprep.subr.mxu0 %v25852_v3  ;;  %v4070_v49 = vadd.f32 %v4069_v32, %v3979_v11  ;;  %v3687_v32 = vadd.f32 %v22063_v43, %v22041_v37 }
 0x1f2   :  { %19448 = vmatprep.subr.mxu1 %v25852_v3  ;;  %19435 = vmatmul.mubr.f32.vlgmr.msra.gmra.mxu1 %v20636_v22  ;;  %v19018_v62 = vpop.f32.mrf.mxu1  ;;  %vm3308_vm8 = vcmp.ge.f32.partialorder %v3305_v50, 0.0 }
 0x1f3   :  { %19440 = vmatpush3.msra.mxu0 %v7256_v61  ;;  %19449 = vmatpush3.msra.mxu1 %v21979_v16  ;;  %v7790_v16 = vsub.f32 %v22119_v35, %v7789_v51  ;;  %v8211_v62 = vld [vmem:[#allocation6 + $0x1e0] sm:$0xff] }
 0x1f4   :  { %19441 = vmatprep.subr.mxu0 %v25852_v3  ;;  %19450 = vmatprep.subr.mxu1 %v25852_v3  ;;  %v4149_v19 = vpop.f32.mrf.mxu0  ;;  %v22256_v37 = vand.u32 4294901760, %v8211_v62 }
 0x1f5   :  { %19442 = vmatpush3.msra.mxu0 %v7263_v24  ;;  %19451 = vmatpush3.msra.mxu1 %v21986_v26  ;;  %v22162_v30 = vadd.f32 %v4149_v19, %v4070_v49  ;;  %v3309_v26 = vmul.f32 0.01, %v3305_v50  ;;  %v7810_v24 = vand.u32 4294901760, %v22153_v13  ;;  %v7791_v48 = vand.u32 4294901760, %v7790_v16 }
 0x1f6   :  { %19443 = vmatprep.subr.mxu0 %v25852_v3  ;;  %19452 = vmatprep.subr.mxu1 %v25852_v3  ;;  %v19029_v61 = vpop.f32.mrf.mxu0  ;;  %v22244_v49 = vand.u32 4294901760, %v8212_v36  ;;  %v3770_v16 = vadd.f32 %v22074_v55, %v3687_v32 }
 0x1f7   :  { %19444 = vmatpush3.msra.mxu0 %v7270_v28  ;;  %19445 = vmatprep.mubr.msk.f32.mxu0 %vm20524_vm1, %v25852_v3  ;;  %v7804_v28 = vsub.f32 %v22141_v14, %v7803_v2  ;;  %v3310_v20 = vsel %vm3308_vm8, %v3305_v50, %v3309_v26  ;;  %v7811_v54 = vsub.f32 %v22153_v13, %v7810_v24  ;;  %v8329_v61 = vand.u32 4294901760, %v22242_v25 }
 0x1f8   :  { %19453 = vmatpush3.msra.mxu1 %v21998_v41  ;;  %19446 = vmatmul.mubr.f32.vlgmr.msra.gmra.mxu0 %v20617_v12  ;;  %v3318_v21 = vrot.slane %v3310_v20, %v21580_v59  ;;  %v22251_v50 = vsub.f32 %v8213_v10, %v22231_v40  ;;  %v22264_v26 = vsub.f32 %v8212_v36, %v22244_v49  ;;  %v17627_v36 = vld [vmem:[#allocation8 + $0x9] ss:$0 sm:$0xff] }
 0x1f9   :  { %19454 = vmatprep.subr.mxu1 %v25852_v3  ;;  %19459 = vmatprep.subr.mxu0 %v25852_v3  ;;  %v7805_v52 = vand.u32 4294901760, %v7804_v28  ;;  %v7812_v45 = vand.u32 4294901760, %v7811_v54 }
 0x1fa   :  { %19455 = vmatpush3.msra.mxu1 %v22010_v42  ;;  %19456 = vmatprep.mubr.msk.f32.mxu1 %vm20524_vm1, %v25852_v3  ;;  %v22184_v41 = vpop.f32.mrf.mxu1  ;;  %v3319_v56 = vcombine.high %v3318_v21, %v3318_v21  ;;  %v3326_v38 = vrot.slane %v3318_v21, %v21580_v59 }
 0x1fb   :  { %19460 = vmatpush3.msra.mxu0 %v22101_v27  ;;  %19457 = vmatmul.mubr.f32.vlgmr.msra.gmra.mxu1 %v20617_v12 }
 0x1fc   :  { %19461 = vmatprep.subr.mxu0 %v25852_v3  ;;  %19470 = vmatprep.subr.mxu1 %v25852_v3  ;;  %v19040_v42 = vpop.f32.mrf.mxu1  ;;  %v3333_v1 = vrot.slane %v3319_v56, %v21580_v59  ;;  %v3337_v6 = vrot.slane %v3326_v38, %v21602_v9 }
 0x1fd   :  { %19462 = vmatpush3.msra.mxu0 %v22108_v5  ;;  %19471 = vmatpush3.msra.mxu1 %v7791_v48  ;;  %v22194_v57 = vpop.f32.mrf.mxu0  ;;  %v22276_v48 = vsub.f32 %v8211_v62, %v22256_v37 }
 0x1fe   :  { %19463 = vmatprep.subr.mxu0 %v25852_v3  ;;  %19472 = vmatprep.subr.mxu1 %v25852_v3  ;;  %v3341_v44 = vrot.slane %v3333_v1, %v21602_v9 }
 0x1ff   :  { %19464 = vmatpush3.msra.mxu0 %v22121_v8  ;;  %19473 = vmatpush3.msra.mxu1 %v7798_v18  ;;  %v19051_v31 = vpop.f32.mrf.mxu0 }
 0x200   :  { %19465 = vmatprep.subr.mxu0 %v25852_v3  ;;  %19474 = vmatprep.subr.mxu1 %v25852_v3 }
 0x201   :  { %19466 = vmatpush3.msra.mxu0 %v22133_v7  ;;  %19475 = vmatpush3.msra.mxu1 %v7805_v52 }
 0x202   :  { %19467 = vmatprep.mubr.msk.f32.mxu0 %vm20524_vm1, %v25852_v3  ;;  %19476 = vmatprep.subr.mxu1 %v25852_v3 }
 0x203   :  { %19481 = vmatprep.subr.mxu0 %v25852_v3  ;;  %19468 = vmatmul.mubr.f32.vlgmr.msra.gmra.mxu0 %v20647_v29 }
 0x204   :  { %19477 = vmatpush3.msra.mxu1 %v7812_v45  ;;  %19482 = vmatpush3.msra.mxu0 %v22119_v35  ;;  %v1183_v47 = vpop.permute.xlu1 %1182  ;;  %v22210_v46 = vpop.f32.mrf.mxu1  ;;  %v3845_v35 = vadd.f32 %v22091_v0, %v3770_v16  ;;  %v8330_v0 = vsub.f32 %v22242_v25, %v8329_v61 }
 0x205   :  { %19478 = vmatprep.mubr.msk.f32.mxu1 %vm20524_vm1, %v25852_v3  ;;  %19483 = vmatprep.subr.mxu0 %v25852_v3  ;;  %1188 = vst.msk [vmem:[#allocation2 + $0x3] sm:$0x1] %vm647_vm7, %v1183_v47 }
 0x206   :  { %19492 = vmatprep.subr.mxu1 %v25852_v3  ;;  %19479 = vmatmul.mubr.f32.vlgmr.msra.gmra.mxu1 %v20617_v12  ;;  %v19062_v4 = vpop.f32.mrf.mxu1  ;;  %vm3848_vm9 = vcmp.ge.f32.partialorder %v3845_v35, 0.0 }
 0x207   :  { %19484 = vmatpush3.msra.mxu0 %v22128_v63  ;;  %19493 = vmatpush3.msra.mxu1 %v22101_v27  ;;  %v8754_v4 = vld [vmem:[#allocation6 + $0x218] sm:$0xff] }
 0x208   :  { %19485 = vmatprep.subr.mxu0 %v25852_v3  ;;  %19494 = vmatprep.subr.mxu1 %v25852_v3  ;;  %v4518_v53 = vpop.f32.mrf.mxu0 }
 0x209   :  { %19486 = vmatpush3.msra.mxu0 %v22141_v14  ;;  %19495 = vmatpush3.msra.mxu1 %v22108_v5  ;;  %v1185_v34 = vpop.permute.xlu1 %1184  ;;  %v4519_v11 = vadd.f32 %v17626_v33, %v4518_v53  ;;  %v3849_v14 = vmul.f32 0.01, %v3845_v35  ;;  %v8753_v53 = vld [vmem:[#allocation6 + $0x210] sm:$0xff] }
 0x20a   :  { %19487 = vmatprep.subr.mxu0 %v25852_v3  ;;  %19496 = vmatprep.subr.mxu1 %v25852_v3  ;;  %1189 = vst.msk [vmem:[#allocation2 + $0x23] sm:$0x1] %vm647_vm7, %v1185_v34  ;;  %v19073_v39 = vpop.f32.mrf.mxu0  ;;  %v22353_v62 = vand.u32 4294901760, %v8753_v53 }
 0x20b   :  { %3342 = vrot.lane.b32.xlu0 %v3337_v6, %s20526_s5  ;;  %19488 = vmatpush3.msra.mxu0 %v22153_v13  ;;  %v8331_v13 = vand.u32 4294901760, %v8330_v0  ;;  %v3850_v20 = vsel %vm3848_vm9, %v3845_v35, %v3849_v14  ;;  %v8752_v39 = vld [vmem:[#allocation6 + $0x208] sm:$0xff]  ;;  %v8751_v35 = vld [vmem:[#allocation6 + $0x200] sm:$0xff] }
 0x20c   :  { %19497 = vmatpush3.msra.mxu1 %v22121_v8  ;;  %19489 = vmatprep.mubr.msk.f32.mxu0 %vm20524_vm1, %v25852_v3  ;;  %v3858_v21 = vrot.slane %v3850_v20, %v21580_v59 }
 0x20d   :  { %19498 = vmatprep.subr.mxu1 %v25852_v3  ;;  %19503 = vmatprep.subr.mxu0 %v25852_v3 }
 0x20e   :  { %3344 = vrot.lane.b32.xlu1 %v3341_v44, %s20526_s5  ;;  %19490 = vmatmul.mubr.f32.vlgmr.msra.gmra.mxu0 %v20629_v17  ;;  %v4609_v19 = vpop.f32.mrf.mxu1  ;;  %v3859_v38 = vcombine.high %v3858_v21, %v3858_v21  ;;  %v3866_v47 = vrot.slane %v3858_v21, %v21580_v59  ;;  %v22346_v44 = vand.u32 4294901760, %v8754_v4 }
 0x20f   :  { %19499 = vmatpush3.msra.mxu1 %v22133_v7  ;;  %19504 = vmatpush3.msra.mxu0 %v7789_v51  ;;  %v4610_v43 = vadd.f32 %v4609_v19, %v4519_v11  ;;  %v8336_v51 = vand.u32 4294901760, %v22251_v50 }
 0x210   :  { %19500 = vmatprep.mubr.msk.f32.mxu1 %vm20524_vm1, %v25852_v3  ;;  %19505 = vmatprep.subr.mxu0 %v25852_v3  ;;  %v19084_v23 = vpop.f32.mrf.mxu1  ;;  %v3873_v10 = vrot.slane %v3859_v38, %v21580_v59  ;;  %v3877_v33 = vrot.slane %v3866_v47, %v21602_v9  ;;  %v22363_v16 = vsub.f32 %v8754_v4, %v22346_v44  ;;  %v9294_v4 = vld [vmem:[#allocation6 + $0x238] sm:$0xff] }
 0x211   :  { %19514 = vmatprep.subr.mxu1 %v25852_v3  ;;  %19501 = vmatmul.mubr.f32.vlgmr.msra.gmra.mxu1 %v20636_v22  ;;  %v22365_v23 = vand.u32 4294901760, %v8752_v39 }
 0x212   :  { %19506 = vmatpush3.msra.mxu0 %v7796_v58  ;;  %19515 = vmatpush3.msra.mxu1 %v22101_v27  ;;  %v4689_v55 = vpop.f32.mrf.mxu0  ;;  %v8343_v27 = vand.u32 4294901760, %v22264_v26  ;;  %v8350_v58 = vand.u32 4294901760, %v22276_v48  ;;  %v3881_v32 = vrot.slane %v3873_v10, %v21602_v9  ;;  %v8869_v14 = vand.u32 4294901760, %v22363_v16 }
 0x213   :  { %19507 = vmatprep.subr.mxu0 %v25852_v3  ;;  %19516 = vmatprep.subr.mxu1 %v25852_v3  ;;  %v4690_v28 = vadd.f32 %v4689_v55, %v4610_v43  ;;  %v4227_v43 = vadd.f32 %v22184_v41, %v22162_v30  ;;  %v22377_v30 = vand.u32 4294901760, %v8751_v35 }
 0x214   :  { %19508 = vmatpush3.msra.mxu0 %v7803_v2  ;;  %19517 = vmatpush3.msra.mxu1 %v22108_v5  ;;  %v19095_v63 = vpop.f32.mrf.mxu0  ;;  %v8337_v5 = vsub.f32 %v22251_v50, %v8336_v51  ;;  %v8344_v2 = vsub.f32 %v22264_v26, %v8343_v27 }
 0x215   :  { %19509 = vmatprep.subr.mxu0 %v25852_v3  ;;  %19518 = vmatprep.subr.mxu1 %v25852_v3  ;;  %v4310_v63 = vadd.f32 %v22194_v57, %v4227_v43 }
 0x216   :  { %19510 = vmatpush3.msra.mxu0 %v7810_v24  ;;  %19511 = vmatprep.mubr.msk.f32.mxu0 %vm20524_vm1, %v25852_v3  ;;  %v8338_v18 = vand.u32 4294901760, %v8337_v5  ;;  %v8345_v52 = vand.u32 4294901760, %v8344_v2  ;;  %v22385_v5 = vsub.f32 %v8752_v39, %v22365_v23  ;;  %v22397_v2 = vsub.f32 %v8751_v35, %v22377_v30 }
 0x217   :  { %19519 = vmatpush3.msra.mxu1 %v22121_v8  ;;  %19512 = vmatmul.mubr.f32.vlgmr.msra.gmra.mxu0 %v20617_v12  ;;  %v22467_v39 = vand.u32 4294901760, %v9294_v4 }
 0x218   :  { %19520 = vmatprep.subr.mxu1 %v25852_v3  ;;  %19525 = vmatprep.subr.mxu0 %v25852_v3  ;;  %v4766_v24 = vpop.f32.mrf.mxu1 }
 0x219   :  { %19521 = vmatpush3.msra.mxu1 %v22133_v7  ;;  %19522 = vmatprep.mubr.msk.f32.mxu1 %vm20524_vm1, %v25852_v3  ;;  %v22305_v8 = vadd.f32 %v4766_v24, %v4690_v28  ;;  %v8351_v7 = vsub.f32 %v22276_v48, %v8350_v58  ;;  %v22372_v28 = vsub.f32 %v8753_v53, %v22353_v62  ;;  %v9293_v53 = vld [vmem:[#allocation6 + $0x230] sm:$0xff] }
 0x21a   :  { %19526 = vmatpush3.msra.mxu0 %v22224_v15  ;;  %19523 = vmatmul.mubr.f32.vlgmr.msra.gmra.mxu1 %v20617_v12  ;;  %v19106_v54 = vpop.f32.mrf.mxu1  ;;  %v22474_v43 = vand.u32 4294901760, %v9293_v53 }
 0x21b   :  { %19527 = vmatprep.subr.mxu0 %v25852_v3  ;;  %19536 = vmatprep.subr.mxu1 %v25852_v3  ;;  %v22314_v42 = vpop.f32.mrf.mxu0  ;;  %v8352_v45 = vand.u32 4294901760, %v8351_v7 }
 0x21c   :  { %19528 = vmatpush3.msra.mxu0 %v22231_v40  ;;  %19537 = vmatpush3.msra.mxu1 %v8331_v13  ;;  %v8876_v13 = vand.u32 4294901760, %v22372_v28 }
 0x21d   :  { %19529 = vmatprep.subr.mxu0 %v25852_v3  ;;  %19538 = vmatprep.subr.mxu1 %v25852_v3  ;;  %v19117_v31 = vpop.f32.mrf.mxu0 }
 0x21e   :  { %19530 = vmatpush3.msra.mxu0 %v22244_v49  ;;  %19539 = vmatpush3.msra.mxu1 %v8338_v18 }
 0x21f   :  { %19531 = vmatprep.subr.mxu0 %v25852_v3  ;;  %19540 = vmatprep.subr.mxu1 %v25852_v3 }
 0x220   :  { %19532 = vmatpush3.msra.mxu0 %v22256_v37  ;;  %19541 = vmatpush3.msra.mxu1 %v8345_v52  ;;  %v1723_v56 = vpop.permute.xlu0 %1722 }
 0x221   :  { %19533 = vmatprep.mubr.msk.f32.mxu0 %vm20524_vm1, %v25852_v3  ;;  %19542 = vmatprep.subr.mxu1 %v25852_v3  ;;  %1728 = vst.msk [vmem:[#allocation2 + $0x4] sm:$0x1] %vm647_vm7, %v1723_v56 }
 0x222   :  { %19547 = vmatprep.subr.mxu0 %v25852_v3  ;;  %19534 = vmatmul.mubr.f32.vlgmr.msra.gmra.mxu0 %v20647_v29  ;;  %v22331_v60 = vpop.f32.mrf.mxu1 }
 0x223   :  { %19543 = vmatpush3.msra.mxu1 %v8352_v45  ;;  %19548 = vmatpush3.msra.mxu0 %v22242_v25  ;;  %v1725_v1 = vpop.permute.xlu1 %1724 }
 0x224   :  { %19544 = vmatprep.mubr.msk.f32.mxu1 %vm20524_vm1, %v25852_v3  ;;  %19549 = vmatprep.subr.mxu0 %v25852_v3  ;;  %1729 = vst.msk [vmem:[#allocation2 + $0x24] sm:$0x1] %vm647_vm7, %v1725_v1  ;;  %v19128_v6 = vpop.f32.mrf.mxu1 }
 0x225   :  { %19558 = vmatprep.subr.mxu1 %v25852_v3  ;;  %19545 = vmatmul.mubr.f32.vlgmr.msra.gmra.mxu1 %v20617_v12 }
 0x226   :  { %19550 = vmatpush3.msra.mxu0 %v22251_v50  ;;  %19559 = vmatpush3.msra.mxu1 %v22224_v15  ;;  %v5058_v34 = vpop.f32.mrf.mxu0 }
 0x227   :  { %19551 = vmatprep.subr.mxu0 %v25852_v3  ;;  %19560 = vmatprep.subr.mxu1 %v25852_v3  ;;  %v5059_v19 = vadd.f32 %v17627_v36, %v5058_v34  ;;  %v17628_v36 = vld [vmem:[#allocation8 + $0xa] ss:$0 sm:$0xff] }
 0x228   :  { %19552 = vmatpush3.msra.mxu0 %v22264_v26  ;;  %19561 = vmatpush3.msra.mxu1 %v22231_v40  ;;  %v19139_v11 = vpop.f32.mrf.mxu0  ;;  %v8890_v26 = vand.u32 4294901760, %v22397_v2 }
 0x229   :  { %19553 = vmatprep.subr.mxu0 %v25852_v3  ;;  %19562 = vmatprep.subr.mxu1 %v25852_v3  ;;  %v9292_v11 = vld [vmem:[#allocation6 + $0x228] sm:$0xff] }
 0x22a   :  { %3882 = vrot.lane.b32.xlu0 %v3877_v33, %s20526_s5  ;;  %19554 = vmatpush3.msra.mxu0 %v22276_v48 }
 0x22b   :  { %19563 = vmatpush3.msra.mxu1 %v22244_v49  ;;  %19555 = vmatprep.mubr.msk.f32.mxu0 %vm20524_vm1, %v25852_v3 }
 0x22c   :  { %19564 = vmatprep.subr.mxu1 %v25852_v3  ;;  %19569 = vmatprep.subr.mxu0 %v25852_v3  ;;  %v5149_v55 = vpop.f32.mrf.mxu1 }
 0x22d   :  { %3884 = vrot.lane.b32.xlu1 %v3881_v32, %s20526_s5  ;;  %19556 = vmatmul.mubr.f32.vlgmr.msra.gmra.mxu0 %v20629_v17  ;;  %v5150_v0 = vadd.f32 %v5149_v55, %v5059_v19  ;;  %v22482_v55 = vsub.f32 %v9294_v4, %v22467_v39 }
 0x22e   :  { %19565 = vmatpush3.msra.mxu1 %v22256_v37  ;;  %19570 = vmatpush3.msra.mxu0 %v8329_v61  ;;  %v19150_v41 = vpop.f32.mrf.mxu1  ;;  %v4385_v61 = vadd.f32 %v22210_v46, %v4310_v63  ;;  %v8870_v46 = vsub.f32 %v22363_v16, %v8869_v14 }
 0x22f   :  { %19566 = vmatprep.mubr.msk.f32.mxu1 %vm20524_vm1, %v25852_v3  ;;  %19571 = vmatprep.subr.mxu0 %v25852_v3  ;;  %v9291_v41 = vld [vmem:[#allocation6 + $0x220] sm:$0xff] }
 0x230   :  { %19580 = vmatprep.subr.mxu1 %v25852_v3  ;;  %19567 = vmatmul.mubr.f32.vlgmr.msra.gmra.mxu1 %v20636_v22  ;;  %v5229_v25 = vpop.f32.mrf.mxu0  ;;  %v4389_v50 = vmul.f32 0.01, %v4385_v61  ;;  %vm4388_vm10 = vcmp.ge.f32.partialorder %v4385_v61, 0.0 }
 0x231   :  { %19572 = vmatpush3.msra.mxu0 %v8336_v51  ;;  %19581 = vmatpush3.msra.mxu1 %v22224_v15  ;;  %v5230_v57 = vadd.f32 %v5229_v25, %v5150_v0  ;;  %v8883_v15 = vand.u32 4294901760, %v22385_v5  ;;  %v8871_v51 = vand.u32 4294901760, %v8870_v46  ;;  %v22484_v0 = vand.u32 4294901760, %v9292_v11 }
 0x232   :  { %19573 = vmatprep.subr.mxu0 %v25852_v3  ;;  %19582 = vmatprep.subr.mxu1 %v25852_v3  ;;  %v19161_v24 = vpop.f32.mrf.mxu0  ;;  %v22491_v25 = vsub.f32 %v9293_v53, %v22474_v43  ;;  %v4850_v46 = vadd.f32 %v22314_v42, %v22305_v8  ;;  %v17629_v53 = vld [vmem:[#allocation8 + $0xb] ss:$0 sm:$0xff] }
 0x233   :  { %19574 = vmatpush3.msra.mxu0 %v8343_v27  ;;  %19583 = vmatpush3.msra.mxu1 %v22231_v40  ;;  %v8877_v40 = vsub.f32 %v22372_v28, %v8876_v13  ;;  %v8884_v48 = vsub.f32 %v22385_v5, %v8883_v15 }
 0x234   :  { %19575 = vmatprep.subr.mxu0 %v25852_v3  ;;  %19584 = vmatprep.subr.mxu1 %v25852_v3 }
 0x235   :  { %19576 = vmatpush3.msra.mxu0 %v8350_v58  ;;  %19577 = vmatprep.mubr.msk.f32.mxu0 %vm20524_vm1, %v25852_v3  ;;  %v4390_v58 = vsel %vm4388_vm10, %v4385_v61, %v4389_v50  ;;  %v8878_v20 = vand.u32 4294901760, %v8877_v40  ;;  %v8885_v7 = vand.u32 4294901760, %v8884_v48  ;;  %v9409_v50 = vand.u32 4294901760, %v22482_v55 }
 0x236   :  { %19585 = vmatpush3.msra.mxu1 %v22244_v49  ;;  %19578 = vmatmul.mubr.f32.vlgmr.msra.gmra.mxu0 %v20617_v12  ;;  %v4398_v52 = vrot.slane %v4390_v58, %v21580_v59  ;;  %v22505_v40 = vsub.f32 %v9292_v11, %v22484_v0 }
 0x237   :  { %19586 = vmatprep.subr.mxu1 %v25852_v3  ;;  %19591 = vmatprep.subr.mxu0 %v25852_v3  ;;  %v5306_v27 = vpop.f32.mrf.mxu1 }
 0x238   :  { %19587 = vmatpush3.msra.mxu1 %v22256_v37  ;;  %19588 = vmatprep.mubr.msk.f32.mxu1 %vm20524_vm1, %v25852_v3  ;;  %v22426_v49 = vadd.f32 %v5306_v27, %v5230_v57  ;;  %v8891_v37 = vsub.f32 %v22397_v2, %v8890_v26  ;;  %v4399_v56 = vcombine.high %v4398_v52, %v4398_v52  ;;  %v22496_v57 = vand.u32 4294901760, %v9291_v41 }
 0x239   :  { %19592 = vmatpush3.msra.mxu0 %v22346_v44  ;;  %19589 = vmatmul.mubr.f32.vlgmr.msra.gmra.mxu1 %v20617_v12  ;;  %v19172_v18 = vpop.f32.mrf.mxu1  ;;  %v4406_v38 = vrot.slane %v4398_v52, %v21580_v59 }
 0x23a   :  { %19593 = vmatprep.subr.mxu0 %v25852_v3  ;;  %19602 = vmatprep.subr.mxu1 %v25852_v3  ;;  %v22435_v54 = vpop.f32.mrf.mxu0  ;;  %v8892_v31 = vand.u32 4294901760, %v8891_v37  ;;  %v4413_v10 = vrot.slane %v4399_v56, %v21580_v59  ;;  %v22517_v42 = vsub.f32 %v9291_v41, %v22496_v57 }
 0x23b   :  { %19594 = vmatpush3.msra.mxu0 %v22353_v62  ;;  %19603 = vmatpush3.msra.mxu1 %v8871_v51  ;;  %v4417_v33 = vrot.slane %v4406_v38, %v21602_v9  ;;  %v9416_v51 = vand.u32 4294901760, %v22491_v25 }
 0x23c   :  { %19595 = vmatprep.subr.mxu0 %v25852_v3  ;;  %19604 = vmatprep.subr.mxu1 %v25852_v3  ;;  %v19183_v21 = vpop.f32.mrf.mxu0  ;;  %v4421_v19 = vrot.slane %v4413_v10, %v21602_v9 }
 0x23d   :  { %19596 = vmatpush3.msra.mxu0 %v22365_v23  ;;  %19605 = vmatpush3.msra.mxu1 %v8878_v20 }
 0x23e   :  { %19597 = vmatprep.subr.mxu0 %v25852_v3  ;;  %19606 = vmatprep.subr.mxu1 %v25852_v3 }
 0x23f   :  { %19598 = vmatpush3.msra.mxu0 %v22377_v30  ;;  %19607 = vmatpush3.msra.mxu1 %v8885_v7  ;;  %v2263_v45 = vpop.permute.xlu0 %2262 }
 0x240   :  { %19599 = vmatprep.mubr.msk.f32.mxu0 %vm20524_vm1, %v25852_v3  ;;  %19608 = vmatprep.subr.mxu1 %v25852_v3  ;;  %2268 = vst.msk [vmem:[#allocation2 + $0x5] sm:$0x1] %vm647_vm7, %v2263_v45 }
 0x241   :  { %19613 = vmatprep.subr.mxu0 %v25852_v3  ;;  %19600 = vmatmul.mubr.f32.vlgmr.msra.gmra.mxu0 %v20647_v29  ;;  %v22452_v47 = vpop.f32.mrf.mxu1 }
 0x242   :  { %19609 = vmatpush3.msra.mxu1 %v8892_v31  ;;  %19614 = vmatpush3.msra.mxu0 %v22363_v16  ;;  %v2265_v1 = vpop.permute.xlu1 %2264 }
 0x243   :  { %19610 = vmatprep.mubr.msk.f32.mxu1 %vm20524_vm1, %v25852_v3  ;;  %19615 = vmatprep.subr.mxu0 %v25852_v3  ;;  %2269 = vst.msk [vmem:[#allocation2 + $0x25] sm:$0x1] %vm647_vm7, %v2265_v1  ;;  %v19194_v6 = vpop.f32.mrf.mxu1  ;;  %v9834_v1 = vld [vmem:[#allocation6 + $0x258] sm:$0xff] }
 0x244   :  { %19624 = vmatprep.subr.mxu1 %v25852_v3  ;;  %19611 = vmatmul.mubr.f32.vlgmr.msra.gmra.mxu1 %v20617_v12 }
 0x245   :  { %19616 = vmatpush3.msra.mxu0 %v22372_v28  ;;  %19625 = vmatpush3.msra.mxu1 %v22346_v44  ;;  %v5598_v34 = vpop.f32.mrf.mxu0 }
 0x246   :  { %19617 = vmatprep.subr.mxu0 %v25852_v3  ;;  %19626 = vmatprep.subr.mxu1 %v25852_v3  ;;  %v5599_v35 = vadd.f32 %v17628_v36, %v5598_v34  ;;  %v22587_v36 = vand.u32 4294901760, %v9834_v1  ;;  %v9832_v34 = vld [vmem:[#allocation6 + $0x248] sm:$0xff] }
 0x247   :  { %19618 = vmatpush3.msra.mxu0 %v22385_v5  ;;  %19627 = vmatpush3.msra.mxu1 %v22353_v62  ;;  %v19205_v32 = vpop.f32.mrf.mxu0  ;;  %v9430_v5 = vand.u32 4294901760, %v22517_v42 }
 0x248   :  { %19619 = vmatprep.subr.mxu0 %v25852_v3  ;;  %19628 = vmatprep.subr.mxu1 %v25852_v3 }
 0x249   :  { %4422 = vrot.lane.b32.xlu0 %v4417_v33, %s20526_s5  ;;  %19620 = vmatpush3.msra.mxu0 %v22397_v2  ;;  %v9833_v33 = vld [vmem:[#allocation6 + $0x250] sm:$0xff] }
 0x24a   :  { %19629 = vmatpush3.msra.mxu1 %v22365_v23  ;;  %19621 = vmatprep.mubr.msk.f32.mxu0 %vm20524_vm1, %v25852_v3 }
 0x24b   :  { %19630 = vmatprep.subr.mxu1 %v25852_v3  ;;  %19635 = vmatprep.subr.mxu0 %v25852_v3  ;;  %v5689_v63 = vpop.f32.mrf.mxu1 }
 0x24c   :  { %4424 = vrot.lane.b32.xlu1 %v4421_v19, %s20526_s5  ;;  %19622 = vmatmul.mubr.f32.vlgmr.msra.gmra.mxu0 %v20629_v17  ;;  %v5690_v61 = vadd.f32 %v5689_v63, %v5599_v35  ;;  %v22594_v19 = vand.u32 4294901760, %v9833_v33  ;;  %v22602_v63 = vsub.f32 %v9834_v1, %v22587_v36 }
 0x24d   :  { %19631 = vmatpush3.msra.mxu1 %v22377_v30  ;;  %19636 = vmatpush3.msra.mxu0 %v8869_v14  ;;  %v19216_v24 = vpop.f32.mrf.mxu1  ;;  %v4925_v14 = vadd.f32 %v22331_v60, %v4850_v46  ;;  %v9410_v60 = vsub.f32 %v22482_v55, %v9409_v50 }
 0x24e   :  { %19632 = vmatprep.mubr.msk.f32.mxu1 %vm20524_vm1, %v25852_v3  ;;  %19637 = vmatprep.subr.mxu0 %v25852_v3  ;;  %v9831_v24 = vld [vmem:[#allocation6 + $0x240] sm:$0xff] }
 0x24f   :  { %19646 = vmatprep.subr.mxu1 %v25852_v3  ;;  %19633 = vmatmul.mubr.f32.vlgmr.msra.gmra.mxu1 %v20636_v22  ;;  %v5769_v16 = vpop.f32.mrf.mxu0  ;;  %v4929_v28 = vmul.f32 0.01, %v4925_v14  ;;  %vm4928_vm11 = vcmp.ge.f32.partialorder %v4925_v14, 0.0 }
 0x250   :  { %19638 = vmatpush3.msra.mxu0 %v8876_v13  ;;  %19647 = vmatpush3.msra.mxu1 %v22346_v44  ;;  %v5770_v8 = vadd.f32 %v5769_v16, %v5690_v61  ;;  %v9423_v44 = vand.u32 4294901760, %v22505_v40  ;;  %v9411_v13 = vand.u32 4294901760, %v9410_v60  ;;  %v22604_v61 = vand.u32 4294901760, %v9832_v34 }
 0x251   :  { %19639 = vmatprep.subr.mxu0 %v25852_v3  ;;  %19648 = vmatprep.subr.mxu1 %v25852_v3  ;;  %v19227_v48 = vpop.f32.mrf.mxu0  ;;  %v5390_v60 = vadd.f32 %v22435_v54, %v22426_v49 }
 0x252   :  { %19640 = vmatpush3.msra.mxu0 %v8883_v15  ;;  %19649 = vmatpush3.msra.mxu1 %v22353_v62  ;;  %v9417_v62 = vsub.f32 %v22491_v25, %v9416_v51  ;;  %v9424_v2 = vsub.f32 %v22505_v40, %v9423_v44  ;;  %v22616_v48 = vand.u32 4294901760, %v9831_v24 }
 0x253   :  { %19641 = vmatprep.subr.mxu0 %v25852_v3  ;;  %19650 = vmatprep.subr.mxu1 %v25852_v3 }
 0x254   :  { %19642 = vmatpush3.msra.mxu0 %v8890_v26  ;;  %19643 = vmatprep.mubr.msk.f32.mxu0 %vm20524_vm1, %v25852_v3  ;;  %v4930_v26 = vsel %vm4928_vm11, %v4925_v14, %v4929_v28  ;;  %v9418_v27 = vand.u32 4294901760, %v9417_v62  ;;  %v9425_v18 = vand.u32 4294901760, %v9424_v2  ;;  %v22611_v14 = vsub.f32 %v9833_v33, %v22594_v19 }
 0x255   :  { %19651 = vmatpush3.msra.mxu1 %v22365_v23  ;;  %19644 = vmatmul.mubr.f32.vlgmr.msra.gmra.mxu0 %v20617_v12  ;;  %v4938_v37 = vrot.slane %v4930_v26, %v21580_v59  ;;  %v9949_v28 = vand.u32 4294901760, %v22602_v63  ;;  %v22625_v62 = vsub.f32 %v9832_v34, %v22604_v61  ;;  %v22637_v49 = vsub.f32 %v9831_v24, %v22616_v48 }
 0x256   :  { %19652 = vmatprep.subr.mxu1 %v25852_v3  ;;  %19657 = vmatprep.subr.mxu0 %v25852_v3  ;;  %v5846_v15 = vpop.f32.mrf.mxu1 }
 0x257   :  { %19653 = vmatpush3.msra.mxu1 %v22377_v30  ;;  %19654 = vmatprep.mubr.msk.f32.mxu1 %vm20524_vm1, %v25852_v3  ;;  %v22546_v23 = vadd.f32 %v5846_v15, %v5770_v8  ;;  %v9431_v30 = vsub.f32 %v22517_v42, %v9430_v5  ;;  %v4939_v31 = vcombine.high %v4938_v37, %v4938_v37 }
 0x258   :  { %19658 = vmatpush3.msra.mxu0 %v22467_v39  ;;  %19655 = vmatmul.mubr.f32.vlgmr.msra.gmra.mxu1 %v20617_v12  ;;  %v19238_v58 = vpop.f32.mrf.mxu1  ;;  %v4946_v45 = vrot.slane %v4938_v37, %v21580_v59  ;;  %v9950_v54 = vsub.f32 %v22602_v63, %v9949_v28 }
 0x259   :  { %19659 = vmatprep.subr.mxu0 %v25852_v3  ;;  %19668 = vmatprep.subr.mxu1 %v25852_v3  ;;  %v22555_v20 = vpop.f32.mrf.mxu0  ;;  %v9432_v52 = vand.u32 4294901760, %v9431_v30  ;;  %v4953_v6 = vrot.slane %v4939_v31, %v21580_v59 }
 0x25a   :  { %19660 = vmatpush3.msra.mxu0 %v22474_v43  ;;  %19669 = vmatpush3.msra.mxu1 %v9411_v13  ;;  %v4957_v10 = vrot.slane %v4946_v45, %v21602_v9 }
 0x25b   :  { %19661 = vmatprep.subr.mxu0 %v25852_v3  ;;  %19670 = vmatprep.subr.mxu1 %v25852_v3  ;;  %v19249_v7 = vpop.f32.mrf.mxu0  ;;  %v4961_v32 = vrot.slane %v4953_v6, %v21602_v9  ;;  %v10374_v6 = vld [vmem:[#allocation6 + $0x278] sm:$0xff] }
 0x25c   :  { %19662 = vmatpush3.msra.mxu0 %v22484_v0  ;;  %19671 = vmatpush3.msra.mxu1 %v9418_v27  ;;  %v22703_v34 = vand.u32 4294901760, %v10374_v6 }
 0x25d   :  { %19663 = vmatprep.subr.mxu0 %v25852_v3  ;;  %19672 = vmatprep.subr.mxu1 %v25852_v3 }
 0x25e   :  { %19664 = vmatpush3.msra.mxu0 %v22496_v57  ;;  %19673 = vmatpush3.msra.mxu1 %v9425_v18  ;;  %v2803_v21 = vpop.permute.xlu0 %2802 }
 0x25f   :  { %19665 = vmatprep.mubr.msk.f32.mxu0 %vm20524_vm1, %v25852_v3  ;;  %19674 = vmatprep.subr.mxu1 %v25852_v3  ;;  %2808 = vst.msk [vmem:[#allocation2 + $0x6] sm:$0x1] %vm647_vm7, %v2803_v21 }
 0x260   :  { %19679 = vmatprep.subr.mxu0 %v25852_v3  ;;  %19666 = vmatmul.mubr.f32.vlgmr.msra.gmra.mxu0 %v20647_v29  ;;  %v22572_v56 = vpop.f32.mrf.mxu1 }
 0x261   :  { %19675 = vmatpush3.msra.mxu1 %v9432_v52  ;;  %19680 = vmatpush3.msra.mxu0 %v22482_v55  ;;  %v2805_v38 = vpop.permute.xlu1 %2804  ;;  %v5465_v55 = vadd.f32 %v22452_v47, %v5390_v60  ;;  %v9963_v47 = vand.u32 4294901760, %v22625_v62  ;;  %v10371_v60 = vld [vmem:[#allocation6 + $0x260] sm:$0xff] }
 0x262   :  { %19676 = vmatprep.mubr.msk.f32.mxu1 %vm20524_vm1, %v25852_v3  ;;  %19681 = vmatprep.subr.mxu0 %v25852_v3  ;;  %2809 = vst.msk [vmem:[#allocation2 + $0x26] sm:$0x1] %vm647_vm7, %v2805_v38  ;;  %v19260_v4 = vpop.f32.mrf.mxu1 }
 0x263   :  { %19690 = vmatprep.subr.mxu1 %v25852_v3  ;;  %19677 = vmatmul.mubr.f32.vlgmr.msra.gmra.mxu1 %v20617_v12  ;;  %vm5468_vm12 = vcmp.ge.f32.partialorder %v5465_v55, 0.0 }
 0x264   :  { %19682 = vmatpush3.msra.mxu0 %v22491_v25  ;;  %19691 = vmatpush3.msra.mxu1 %v22467_v39 }
 0x265   :  { %19683 = vmatprep.subr.mxu0 %v25852_v3  ;;  %19692 = vmatprep.subr.mxu1 %v25852_v3 }
 0x266   :  { %19684 = vmatpush3.msra.mxu0 %v22505_v40  ;;  %19693 = vmatpush3.msra.mxu1 %v22474_v43  ;;  %v6138_v11 = vpop.f32.mrf.mxu0  ;;  %v5469_v40 = vmul.f32 0.01, %v5465_v55 }
 0x267   :  { %19685 = vmatprep.subr.mxu0 %v25852_v3  ;;  %19694 = vmatprep.subr.mxu1 %v25852_v3  ;;  %v6139_v35 = vadd.f32 %v17629_v53, %v6138_v11  ;;  %v10373_v53 = vld [vmem:[#allocation6 + $0x270] sm:$0xff]  ;;  %v10372_v11 = vld [vmem:[#allocation6 + $0x268] sm:$0xff] }
 0x268   :  { %4962 = vrot.lane.b32.xlu0 %v4957_v10, %s20526_s5  ;;  %19686 = vmatpush3.msra.mxu0 %v22517_v42  ;;  %v19271_v41 = vpop.f32.mrf.mxu0  ;;  %v9951_v42 = vand.u32 4294901760, %v9950_v54  ;;  %v5470_v15 = vsel %vm5468_vm12, %v5465_v55, %v5469_v40  ;;  %v22710_v24 = vand.u32 4294901760, %v10373_v53  ;;  %v22732_v40 = vand.u32 4294901760, %v10371_v60 }
 0x269   :  { %19695 = vmatpush3.msra.mxu1 %v22484_v0  ;;  %19687 = vmatprep.mubr.msk.f32.mxu0 %vm20524_vm1, %v25852_v3  ;;  %v6229_v46 = vpop.f32.mrf.mxu1  ;;  %v5478_v58 = vrot.slane %v5470_v15, %v21580_v59 }
 0x26a   :  { %19696 = vmatprep.subr.mxu1 %v25852_v3  ;;  %19701 = vmatprep.subr.mxu0 %v25852_v3  ;;  %v6230_v16 = vadd.f32 %v6229_v46, %v6139_v35 }
 0x26b   :  { %4964 = vrot.lane.b32.xlu1 %v4961_v32, %s20526_s5  ;;  %19688 = vmatmul.mubr.f32.vlgmr.msra.gmra.mxu0 %v20629_v17  ;;  %v19282_v8 = vpop.f32.mrf.mxu1  ;;  %v5479_v21 = vcombine.high %v5478_v58, %v5478_v58  ;;  %v5486_v45 = vrot.slane %v5478_v58, %v21580_v59  ;;  %v17630_v32 = vld [vmem:[#allocation8 + $0xc] ss:$0 sm:$0xff] }
 0x26c   :  { %19697 = vmatpush3.msra.mxu1 %v22496_v57  ;;  %19702 = vmatpush3.msra.mxu0 %v9409_v50  ;;  %v9956_v50 = vand.u32 4294901760, %v22611_v14  ;;  %v22720_v8 = vand.u32 4294901760, %v10372_v11 }
 0x26d   :  { %19698 = vmatprep.mubr.msk.f32.mxu1 %vm20524_vm1, %v25852_v3  ;;  %19703 = vmatprep.subr.mxu0 %v25852_v3  ;;  %v5493_v10 = vrot.slane %v5479_v21, %v21580_v59  ;;  %v5497_v33 = vrot.slane %v5486_v45, %v21602_v9 }
 0x26e   :  { %19712 = vmatprep.subr.mxu1 %v25852_v3  ;;  %19699 = vmatmul.mubr.f32.vlgmr.msra.gmra.mxu1 %v20636_v22 }
 0x26f   :  { %19704 = vmatpush3.msra.mxu0 %v9416_v51  ;;  %19713 = vmatpush3.msra.mxu1 %v22467_v39  ;;  %v5501_v41 = vrot.slane %v5493_v10, %v21602_v9 }
 0x270   :  { %19705 = vmatprep.subr.mxu0 %v25852_v3  ;;  %19714 = vmatprep.subr.mxu1 %v25852_v3 }
 0x271   :  { %19706 = vmatpush3.msra.mxu0 %v9423_v44  ;;  %19715 = vmatpush3.msra.mxu1 %v22474_v43  ;;  %v6309_v39 = vpop.f32.mrf.mxu0  ;;  %v9957_v43 = vsub.f32 %v22611_v14, %v9956_v50  ;;  %v9970_v44 = vand.u32 4294901760, %v22637_v49 }
 0x272   :  { %19707 = vmatprep.subr.mxu0 %v25852_v3  ;;  %19716 = vmatprep.subr.mxu1 %v25852_v3  ;;  %v6310_v25 = vadd.f32 %v6309_v39, %v6230_v16  ;;  %v22718_v16 = vsub.f32 %v10374_v6, %v22703_v34  ;;  %v22727_v39 = vsub.f32 %v10373_v53, %v22710_v24  ;;  %v17631_v53 = vld [vmem:[#allocation8 + $0xd] ss:$0 sm:$0xff] }
 0x273   :  { %19708 = vmatpush3.msra.mxu0 %v9430_v5  ;;  %19709 = vmatprep.mubr.msk.f32.mxu0 %vm20524_vm1, %v25852_v3  ;;  %v19293_v51 = vpop.f32.mrf.mxu0  ;;  %v9964_v5 = vsub.f32 %v22625_v62, %v9963_v47  ;;  %v9958_v26 = vand.u32 4294901760, %v9957_v43  ;;  %v9971_v27 = vsub.f32 %v22637_v49, %v9970_v44 }
 0x274   :  { %19717 = vmatpush3.msra.mxu1 %v22484_v0  ;;  %19710 = vmatmul.mubr.f32.vlgmr.msra.gmra.mxu0 %v20617_v12  ;;  %v6386_v13 = vpop.f32.mrf.mxu1  ;;  %v5930_v51 = vadd.f32 %v22555_v20, %v22546_v23  ;;  %v22753_v23 = vsub.f32 %v10371_v60, %v22732_v40 }
 0x275   :  { %19718 = vmatprep.subr.mxu1 %v25852_v3  ;;  %19723 = vmatprep.subr.mxu0 %v25852_v3  ;;  %v6387_v2 = vadd.f32 %v6386_v13, %v6310_v25  ;;  %v9972_v18 = vand.u32 4294901760, %v9971_v27  ;;  %v10489_v13 = vand.u32 4294901760, %v22718_v16 }
 0x276   :  { %19719 = vmatpush3.msra.mxu1 %v22496_v57  ;;  %19720 = vmatprep.mubr.msk.f32.mxu1 %vm20524_vm1, %v25852_v3  ;;  %v19304_v0 = vpop.f32.mrf.mxu1  ;;  %v9965_v57 = vand.u32 4294901760, %v9964_v5 }
 0x277   :  { %19724 = vmatpush3.msra.mxu0 %v22587_v36  ;;  %19721 = vmatmul.mubr.f32.vlgmr.msra.gmra.mxu1 %v20617_v12  ;;  %v10490_v20 = vsub.f32 %v22718_v16, %v10489_v13 }
 0x278   :  { %19725 = vmatprep.subr.mxu0 %v25852_v3  ;;  %19734 = vmatprep.subr.mxu1 %v25852_v3 }
 0x279   :  { %19726 = vmatpush3.msra.mxu0 %v22594_v19  ;;  %19735 = vmatpush3.msra.mxu1 %v9951_v42  ;;  %v22741_v42 = vsub.f32 %v10372_v11, %v22720_v8  ;;  %v10913_v11 = vld [vmem:[#allocation6 + $0x290] sm:$0xff] }
 0x27a   :  { %19727 = vmatprep.subr.mxu0 %v25852_v3  ;;  %19736 = vmatprep.subr.mxu1 %v25852_v3 }
 0x27b   :  { %19728 = vmatpush3.msra.mxu0 %v22604_v61  ;;  %19737 = vmatpush3.msra.mxu1 %v9958_v26  ;;  %v6469_v30 = vpop.f32.mrf.mxu0 }
 0x27c   :  { %19729 = vmatprep.subr.mxu0 %v25852_v3  ;;  %19738 = vmatprep.subr.mxu1 %v25852_v3  ;;  %v6470_v37 = vadd.f32 %v6469_v30, %v6387_v2 }
 0x27d   :  { %19730 = vmatpush3.msra.mxu0 %v22616_v48  ;;  %19739 = vmatpush3.msra.mxu1 %v9965_v57  ;;  %v3343_v7 = vpop.permute.xlu0 %3342  ;;  %v19315_v52 = vpop.f32.mrf.mxu0 }
 0x27e   :  { %19731 = vmatprep.mubr.msk.f32.mxu0 %vm20524_vm1, %v25852_v3  ;;  %19740 = vmatprep.subr.mxu1 %v25852_v3  ;;  %3348 = vst.msk [vmem:[#allocation2 + $0x7] sm:$0x1] %vm647_vm7, %v3343_v7  ;;  %v6544_v31 = vpop.f32.mrf.mxu1 }
 0x27f   :  { %19745 = vmatprep.subr.mxu0 %v25852_v3  ;;  %19732 = vmatmul.mubr.f32.vlgmr.msra.gmra.mxu0 %v20647_v29  ;;  %v22688_v38 = vadd.f32 %v6544_v31, %v6470_v37 }
 0x280   :  { %19741 = vmatpush3.msra.mxu1 %v9972_v18  ;;  %19746 = vmatpush3.msra.mxu0 %v22602_v63  ;;  %v3345_v1 = vpop.permute.xlu1 %3344  ;;  %v19326_v4 = vpop.f32.mrf.mxu1  ;;  %v6005_v63 = vadd.f32 %v22572_v56, %v5930_v51  ;;  %v10503_v56 = vand.u32 4294901760, %v22741_v42 }
 0x281   :  { %19742 = vmatprep.mubr.msk.f32.mxu1 %vm20524_vm1, %v25852_v3  ;;  %19747 = vmatprep.subr.mxu0 %v25852_v3  ;;  %3349 = vst.msk [vmem:[#allocation2 + $0x27] sm:$0x1] %vm647_vm7, %v3345_v1  ;;  %v10914_v4 = vld [vmem:[#allocation6 + $0x298] sm:$0xff]  ;;  %vm6548_vm14 = vcmp.ge.f32.partialorder %v22688_v38, 0.0 }
 0x282   :  { %19756 = vmatprep.subr.mxu1 %v25852_v3  ;;  %19743 = vmatmul.mubr.f32.vlgmr.msra.gmra.mxu1 %v20617_v12  ;;  %vm6008_vm13 = vcmp.ge.f32.partialorder %v6005_v63, 0.0 }
 0x283   :  { %19748 = vmatpush3.msra.mxu0 %v22611_v14  ;;  %19757 = vmatpush3.msra.mxu1 %v22587_v36 }
 0x284   :  { %19749 = vmatprep.subr.mxu0 %v25852_v3  ;;  %19758 = vmatprep.subr.mxu1 %v25852_v3 }
 0x285   :  { %19750 = vmatpush3.msra.mxu0 %v22625_v62  ;;  %19759 = vmatpush3.msra.mxu1 %v22594_v19  ;;  %v6678_v35 = vpop.f32.mrf.mxu0  ;;  %v6009_v62 = vmul.f32 0.01, %v6005_v63 }
 0x286   :  { %19751 = vmatprep.subr.mxu0 %v25852_v3  ;;  %19760 = vmatprep.subr.mxu1 %v25852_v3  ;;  %v6679_v55 = vadd.f32 %v17630_v32, %v6678_v35 }
 0x287   :  { %5502 = vrot.lane.b32.xlu0 %v5497_v33, %s20526_s5  ;;  %19752 = vmatpush3.msra.mxu0 %v22637_v49  ;;  %v19337_v46 = vpop.f32.mrf.mxu0  ;;  %v10504_v49 = vsub.f32 %v22741_v42, %v10503_v56  ;;  %v6010_v0 = vsel %vm6008_vm13, %v6005_v63, %v6009_v62  ;;  %v22821_v33 = vand.u32 4294901760, %v10914_v4 }
 0x288   :  { %19761 = vmatpush3.msra.mxu1 %v22604_v61  ;;  %19753 = vmatprep.mubr.msk.f32.mxu0 %vm20524_vm1, %v25852_v3  ;;  %v6769_v54 = vpop.f32.mrf.mxu1  ;;  %v6018_v27 = vrot.slane %v6010_v0, %v21580_v59 }
 0x289   :  { %19762 = vmatprep.subr.mxu1 %v25852_v3  ;;  %19767 = vmatprep.subr.mxu0 %v25852_v3  ;;  %v6770_v43 = vadd.f32 %v6769_v54, %v6679_v55  ;;  %v22835_v55 = vld [vmem:[#allocation2] sm:$0xff]  ;;  %v22838_v54 = vstv %s22807_s26  ;;  %s15230_s26 = sld [smem:[#allocation12]] }
 0x28a   :  { %5504 = vrot.lane.b32.xlu1 %v5501_v41, %s20526_s5  ;;  %19754 = vmatmul.mubr.f32.vlgmr.msra.gmra.mxu0 %v20629_v17  ;;  %v19348_v25 = vpop.f32.mrf.mxu1  ;;  %v6019_v7 = vcombine.high %v6018_v27, %v6018_v27  ;;  %v6026_v21 = vrot.slane %v6018_v27, %v21580_v59  ;;  %v10912_v41 = vld [vmem:[#allocation6 + $0x288] sm:$0xff]  ;;  %25965 = vst [vmem:[#allocation17_spill] sm:$0xff] %v22838_v54 }
 0x28b   :  { %19763 = vmatpush3.msra.mxu1 %v22616_v48  ;;  %19768 = vmatpush3.msra.mxu0 %v9949_v28  ;;  %v10496_v28 = vand.u32 4294901760, %v22727_v39  ;;  %v22841_v25 = vsub.f32 %v10914_v4, %v22821_v33  ;;  %v15259_v62 = vmul.f32 %v22838_v54, %v22835_v55 }
 0x28c   :  { %19764 = vmatprep.mubr.msk.f32.mxu1 %vm20524_vm1, %v25852_v3  ;;  %19769 = vmatprep.subr.mxu0 %v25852_v3  ;;  %v6033_v6 = vrot.slane %v6019_v7, %v21580_v59  ;;  %v6037_v10 = vrot.slane %v6026_v21, %v21602_v9 }
 0x28d   :  { %19778 = vmatprep.subr.mxu1 %v25852_v3  ;;  %19765 = vmatmul.mubr.f32.vlgmr.msra.gmra.mxu1 %v20636_v22 }
 0x28e   :  { %19770 = vmatpush3.msra.mxu0 %v9956_v50  ;;  %19779 = vmatpush3.msra.mxu1 %v22587_v36  ;;  %v6041_v35 = vrot.slane %v6033_v6, %v21602_v9 }
 0x28f   :  { %19771 = vmatprep.subr.mxu0 %v25852_v3  ;;  %19780 = vmatprep.subr.mxu1 %v25852_v3 }
 0x290   :  { %19772 = vmatpush3.msra.mxu0 %v9963_v47  ;;  %19781 = vmatpush3.msra.mxu1 %v22594_v19  ;;  %v6849_v36 = vpop.f32.mrf.mxu0  ;;  %v10497_v19 = vsub.f32 %v22727_v39, %v10496_v28  ;;  %v10510_v47 = vand.u32 4294901760, %v22753_v23 }
 0x291   :  { %19773 = vmatprep.subr.mxu0 %v25852_v3  ;;  %19782 = vmatprep.subr.mxu1 %v25852_v3  ;;  %v6850_v14 = vadd.f32 %v6849_v36, %v6770_v43  ;;  %v22843_v43 = vand.u32 4294901760, %v10913_v11  ;;  %v10911_v36 = vld [vmem:[#allocation6 + $0x280] sm:$0xff] }
 0x292   :  { %19774 = vmatpush3.msra.mxu0 %v9970_v44  ;;  %19783 = vmatpush3.msra.mxu1 %v22604_v61  ;;  %v19359_v50 = vpop.f32.mrf.mxu0  ;;  %v10491_v61 = vand.u32 4294901760, %v10490_v20  ;;  %v10498_v15 = vand.u32 4294901760, %v10497_v19  ;;  %v10511_v26 = vsub.f32 %v22753_v23, %v10510_v47  ;;  %v22849_v20 = vand.u32 4294901760, %v10912_v41 }
 0x293   :  { %19775 = vmatprep.mubr.msk.f32.mxu0 %vm20524_vm1, %v25852_v3  ;;  %19784 = vmatprep.subr.mxu1 %v25852_v3  ;;  %v6926_v5 = vpop.f32.mrf.mxu1  ;;  %v22860_v19 = vsub.f32 %v10913_v11, %v22843_v43  ;;  %v11029_v50 = vand.u32 4294901760, %v22841_v25  ;;  %v22954_v11 = vld [vmem:[#allocation2 + $0x20] sm:$0xff] }
 0x294   :  { %19789 = vmatprep.subr.mxu0 %v25852_v3  ;;  %19776 = vmatmul.mubr.f32.vlgmr.msra.gmra.mxu0 %v20617_v12  ;;  %v6927_v44 = vadd.f32 %v6926_v5, %v6850_v14  ;;  %v10512_v58 = vand.u32 4294901760, %v10511_v26  ;;  %v22876_v5 = vsub.f32 %v10912_v41, %v22849_v20  ;;  %v11454_v41 = vld [vmem:[#allocation6 + $0x2b8] sm:$0xff] }
 0x295   :  { %19785 = vmatpush3.msra.mxu1 %v22616_v48  ;;  %19790 = vmatpush3.msra.mxu0 %v22703_v34  ;;  %v19370_v2 = vpop.f32.mrf.mxu1  ;;  %v10505_v48 = vand.u32 4294901760, %v10504_v49 }
 0x296   :  { %19786 = vmatprep.mubr.msk.f32.mxu1 %vm20524_vm1, %v25852_v3  ;;  %19791 = vmatprep.subr.mxu0 %v25852_v3 }
 0x297   :  { %19800 = vmatprep.subr.mxu1 %v25852_v3  ;;  %19787 = vmatmul.mubr.f32.vlgmr.msra.gmra.mxu1 %v20617_v12 }
 0x298   :  { %19792 = vmatpush3.msra.mxu0 %v22710_v24  ;;  %19801 = vmatpush3.msra.mxu1 %v10491_v61 }
 0x299   :  { %19793 = vmatprep.subr.mxu0 %v25852_v3  ;;  %19802 = vmatprep.subr.mxu1 %v25852_v3 }
 0x29a   :  { %19794 = vmatpush3.msra.mxu0 %v22720_v8  ;;  %19803 = vmatpush3.msra.mxu1 %v10498_v15  ;;  %v7009_v57 = vpop.f32.mrf.mxu0 }
 0x29b   :  { %19795 = vmatprep.subr.mxu0 %v25852_v3  ;;  %19804 = vmatprep.subr.mxu1 %v25852_v3  ;;  %v7010_v30 = vadd.f32 %v7009_v57, %v6927_v44 }
 0x29c   :  { %19796 = vmatpush3.msra.mxu0 %v22732_v40  ;;  %19805 = vmatpush3.msra.mxu1 %v10505_v48  ;;  %v3883_v18 = vpop.permute.xlu0 %3882  ;;  %v19381_v37 = vpop.f32.mrf.mxu0 }
 0x29d   :  { %19797 = vmatprep.mubr.msk.f32.mxu0 %vm20524_vm1, %v25852_v3  ;;  %19806 = vmatprep.subr.mxu1 %v25852_v3  ;;  %3888 = vst.msk [vmem:[#allocation2 + $0x8] sm:$0x1] %vm647_vm7, %v3883_v18  ;;  %v7084_v52 = vpop.f32.mrf.mxu1 }
 0x29e   :  { %19811 = vmatprep.subr.mxu0 %v25852_v3  ;;  %19798 = vmatmul.mubr.f32.vlgmr.msra.gmra.mxu0 %v20647_v29  ;;  %v22804_v31 = vadd.f32 %v7084_v52, %v7010_v30  ;;  %v6549_v30 = vmul.f32 0.01, %v22688_v38 }
 0x29f   :  { %19807 = vmatpush3.msra.mxu1 %v10512_v58  ;;  %19812 = vmatpush3.msra.mxu0 %v22718_v16  ;;  %v3885_v45 = vpop.permute.xlu1 %3884  ;;  %v19392_v1 = vpop.f32.mrf.mxu1  ;;  %v22867_v16 = vand.u32 4294901760, %v10911_v36 }
 0x2a0   :  { %19808 = vmatprep.mubr.msk.f32.mxu1 %vm20524_vm1, %v25852_v3  ;;  %19813 = vmatprep.subr.mxu0 %v25852_v3  ;;  %3889 = vst.msk [vmem:[#allocation2 + $0x28] sm:$0x1] %vm647_vm7, %v3885_v45  ;;  %v6550_v6 = vsel %vm6548_vm14, %v22688_v38, %v6549_v30  ;;  %vm7088_vm15 = vcmp.ge.f32.partialorder %v22804_v31, 0.0 }
 0x2a1   :  { %19822 = vmatprep.subr.mxu1 %v25852_v3  ;;  %19809 = vmatmul.mubr.f32.vlgmr.msra.gmra.mxu1 %v20617_v12  ;;  %v22892_v49 = vsub.f32 %v10911_v36, %v22867_v16  ;;  %v22958_v38 = vrot.slane %v6550_v6, %v21580_v59 }
 0x2a2   :  { %19814 = vmatpush3.msra.mxu0 %v22727_v39  ;;  %19823 = vmatpush3.msra.mxu1 %v22703_v34  ;;  %v11030_v39 = vsub.f32 %v22841_v25, %v11029_v50 }
 0x2a3   :  { %19815 = vmatprep.subr.mxu0 %v25852_v3  ;;  %19824 = vmatprep.subr.mxu1 %v25852_v3  ;;  %v11050_v0 = vand.u32 4294901760, %v22892_v49 }
 0x2a4   :  { %19816 = vmatpush3.msra.mxu0 %v22741_v42  ;;  %19825 = vmatpush3.msra.mxu1 %v22710_v24  ;;  %v7218_v32 = vpop.f32.mrf.mxu0 }
 0x2a5   :  { %19817 = vmatprep.subr.mxu0 %v25852_v3  ;;  %19826 = vmatprep.subr.mxu1 %v25852_v3  ;;  %v7219_v46 = vadd.f32 %v17631_v53, %v7218_v32  ;;  %v11051_v57 = vsub.f32 %v22892_v49, %v11050_v0  ;;  %v17632_v32 = vld [vmem:[#allocation8 + $0xe] ss:$0 sm:$0xff] }
 0x2a6   :  { %6042 = vrot.lane.b32.xlu0 %v6037_v10, %s20526_s5  ;;  %19818 = vmatpush3.msra.mxu0 %v22753_v23  ;;  %v19403_v60 = vpop.f32.mrf.mxu0 }
 0x2a7   :  { %19827 = vmatpush3.msra.mxu1 %v22720_v8  ;;  %19819 = vmatprep.mubr.msk.f32.mxu0 %vm20524_vm1, %v25852_v3  ;;  %v7309_v51 = vpop.f32.mrf.mxu1  ;;  %v11052_v1 = vand.u32 4294901760, %v11051_v57  ;;  %v6559_v60 = vcombine.high %v22958_v38, %v22958_v38 }
 0x2a8   :  { %19828 = vmatprep.subr.mxu1 %v25852_v3  ;;  %19833 = vmatprep.subr.mxu0 %v25852_v3  ;;  %v7310_v63 = vadd.f32 %v7309_v51, %v7219_v46  ;;  %v11453_v51 = vld [vmem:[#allocation6 + $0x2b0] sm:$0xff] }
 0x2a9   :  { %6044 = vrot.lane.b32.xlu1 %v6041_v35, %s20526_s5  ;;  %19820 = vmatmul.mubr.f32.vlgmr.msra.gmra.mxu0 %v20629_v17  ;;  %v19414_v14 = vpop.f32.mrf.mxu1  ;;  %v15263_v35 = vmul.f32 %v22838_v54, %v22954_v11 }
 0x2aa   :  { %19829 = vmatpush3.msra.mxu1 %v22732_v40  ;;  %19834 = vmatpush3.msra.mxu0 %v10489_v13  ;;  %v22873_v13 = vstv %s22828_s27  ;;  %v22980_v14 = vand.u32 4294901760, %v11454_v41  ;;  %s17672_s27 = sld [smem:[#allocation10 + $0x17]] }
 0x2ab   :  { %19830 = vmatprep.mubr.msk.f32.mxu1 %vm20524_vm1, %v25852_v3  ;;  %19835 = vmatprep.subr.mxu0 %v25852_v3  ;;  %25966 = vst [vmem:[#allocation18_spill] sm:$0xff] %v22873_v13  ;;  %v15309_v61 = vmul.f32 %v22873_v13, %v22835_v55  ;;  %v15313_v36 = vmul.f32 %v22873_v13, %v22954_v11 }
 0x2ac   :  { %19844 = vmatprep.subr.mxu1 %v25852_v3  ;;  %19831 = vmatmul.mubr.f32.vlgmr.msra.gmra.mxu1 %v20636_v22 }
 0x2ad   :  { %19836 = vmatpush3.msra.mxu0 %v10496_v28  ;;  %19845 = vmatpush3.msra.mxu1 %v22703_v34  ;;  %v11036_v34 = vand.u32 4294901760, %v22860_v19 }
 0x2ae   :  { %15275 = vrot.lane.b32.xlu0 %v15259_v62, %s20527_s29  ;;  %19837 = vmatprep.subr.mxu0 %v25852_v3 }
 0x2af   :  { %19846 = vmatprep.subr.mxu1 %v25852_v3  ;;  %19838 = vmatpush3.msra.mxu0 %v10503_v56  ;;  %v7389_v28 = vpop.f32.mrf.mxu0  ;;  %v11043_v56 = vand.u32 4294901760, %v22876_v5  ;;  %v11037_v2 = vsub.f32 %v22860_v19, %v11036_v34 }
 0x2b0   :  { %19847 = vmatpush3.msra.mxu1 %v22710_v24  ;;  %19839 = vmatprep.subr.mxu0 %v25852_v3  ;;  %v7390_v42 = vadd.f32 %v7389_v28, %v7310_v63 }
 0x2b1   :  { %19848 = vmatprep.subr.mxu1 %v25852_v3  ;;  %19840 = vmatpush3.msra.mxu0 %v10510_v47  ;;  %v19425_v24 = vpop.f32.mrf.mxu0  ;;  %v22911_v47 = vstv %s22865_s28  ;;  %v11044_v26 = vsub.f32 %v22876_v5, %v11043_v56  ;;  %v11038_v27 = vand.u32 4294901760, %v11037_v2  ;;  %s17673_s28 = sld [smem:[#allocation10 + $0x16]] }
 0x2b2   :  { %19849 = vmatpush3.msra.mxu1 %v22720_v8  ;;  %15325 = vrot.lane.b32.xlu0 %v15309_v61, %s20528_s7  ;;  %v7466_v44 = vpop.f32.mrf.mxu1  ;;  %v11031_v8 = vand.u32 4294901760, %v11030_v39  ;;  %25967 = vst [vmem:[#allocation19_spill] sm:$0xff] %v22911_v47  ;;  %v15359_v48 = vmul.f32 %v22911_v47, %v22835_v55  ;;  %v11452_v39 = vld [vmem:[#allocation6 + $0x2a8] sm:$0xff]  ;;  %v6573_v61 = vrot.slane %v6559_v60, %v21580_v59 }
 0x2b3   :  { %19841 = vmatprep.mubr.msk.f32.mxu0 %vm20524_vm1, %v25852_v3  ;;  %19850 = vmatprep.subr.mxu1 %v25852_v3  ;;  %v7467_v23 = vadd.f32 %v7466_v44, %v7390_v42  ;;  %v11045_v18 = vand.u32 4294901760, %v11044_v26  ;;  %v22987_v42 = vand.u32 4294901760, %v11453_v51  ;;  %v22995_v44 = vsub.f32 %v11454_v41, %v22980_v14 }
 0x2b4   :  { %19855 = vmatprep.subr.mxu0 %v25852_v3  ;;  %19842 = vmatmul.mubr.f32.vlgmr.msra.gmra.mxu0 %v20617_v12  ;;  %v19436_v15 = vpop.f32.mrf.mxu1  ;;  %v22997_v2 = vand.u32 4294901760, %v11452_v39  ;;  %v15363_v26 = vmul.f32 %v22911_v47, %v22954_v11 }
 0x2b5   :  { %19851 = vmatpush3.msra.mxu1 %v22732_v40  ;;  %19856 = vmatpush3.msra.mxu0 %v22821_v33  ;;  %v22928_v40 = vstv %s22894_s30  ;;  %v23007_v15 = vsub.f32 %v11453_v51, %v22987_v42  ;;  %v23099_v51 = vstv %s23068_s10  ;;  %s17674_s30 = sld [smem:[#allocation10 + $0x15]] }
 0x2b6   :  { %19852 = vmatprep.mubr.msk.f32.mxu1 %vm20524_vm1, %v25852_v3  ;;  %19857 = vmatprep.subr.mxu0 %v25852_v3  ;;  %25968 = vst [vmem:[#allocation20_spill] sm:$0xff] %v22928_v40  ;;  %v15409_v52 = vmul.f32 %v22928_v40, %v22835_v55  ;;  %v15413_v30 = vmul.f32 %v22928_v40, %v22954_v11  ;;  %v23079_v11 = vstv %s23041_s9  ;;  %25970 = vst [vmem:[#allocation22_spill] sm:$0xff] %v23099_v51  ;;  %s17675_s9 = sld [smem:[#allocation10 + $0x14]] }
 0x2b7   :  { %19866 = vmatprep.subr.mxu1 %v25852_v3  ;;  %19853 = vmatmul.mubr.f32.vlgmr.msra.gmra.mxu1 %v20617_v12  ;;  %25969 = vst [vmem:[#allocation21_spill] sm:$0xff] %v23079_v11  ;;  %s17677_s10 = sld [smem:[#allocation10 + $0x12]] }
 0x2b8   :  { %19858 = vmatpush3.msra.mxu0 %v22843_v43  ;;  %19867 = vmatpush3.msra.mxu1 %v11031_v8  ;;  %v7549_v58 = vpop.f32.mrf.mxu0  ;;  %v6581_v8 = vrot.slane %v6573_v61, %v21602_v9 }
 0x2b9   :  { %15375 = vrot.lane.b32.xlu0 %v15359_v48, %s20529_s4  ;;  %19859 = vmatprep.subr.mxu0 %v25852_v3  ;;  %v7550_v37 = vadd.f32 %v7549_v58, %v7467_v23  ;;  %v11451_v23 = vld [vmem:[#allocation6 + $0x2a0] sm:$0xff] }
 0x2ba   :  { %19868 = vmatprep.subr.mxu1 %v25852_v3  ;;  %19860 = vmatpush3.msra.mxu0 %v22849_v20  ;;  %v19447_v7 = vpop.f32.mrf.mxu0  ;;  %v23013_v48 = vand.u32 4294901760, %v11451_v23 }
 0x2bb   :  { %19869 = vmatpush3.msra.mxu1 %v11038_v27  ;;  %19861 = vmatprep.subr.mxu0 %v25852_v3  ;;  %v4423_v21 = vpop.permute.xlu0 %4422  ;;  %v7624_v45 = vpop.f32.mrf.mxu1 }
 0x2bc   :  { %19870 = vmatprep.subr.mxu1 %v25852_v3  ;;  %19862 = vmatpush3.msra.mxu0 %v22867_v16  ;;  %4428 = vst.msk [vmem:[#allocation2 + $0x9] sm:$0x1] %vm647_vm7, %v4423_v21  ;;  %v22945_v4 = vadd.f32 %v7624_v45, %v7550_v37  ;;  %v6566_v37 = vrot.slane %v22958_v38, %v21580_v59 }
 0x2bd   :  { %19871 = vmatpush3.msra.mxu1 %v11045_v18  ;;  %15425 = vrot.lane.b32.xlu0 %v15409_v52, %s20530_s8  ;;  %v19458_v10 = vpop.f32.mrf.mxu1 }
 0x2be   :  { %19863 = vmatprep.mubr.msk.f32.mxu0 %vm20524_vm1, %v25852_v3  ;;  %19872 = vmatprep.subr.mxu1 %v25852_v3  ;;  %v4425_v53 = vpop.permute.xlu1 %4424  ;;  %v6577_v21 = vrot.slane %v6566_v37, %v21602_v9  ;;  %vm7628_vm0 = vcmp.ge.f32.partialorder %v22945_v4, 0.0 }
 0x2bf   :  { %19877 = vmatprep.subr.mxu0 %v25852_v3  ;;  %19864 = vmatmul.mubr.f32.vlgmr.msra.gmra.mxu0 %v20647_v29  ;;  %4429 = vst.msk [vmem:[#allocation2 + $0x29] sm:$0x1] %vm647_vm7, %v4425_v53  ;;  %v23076_v53 = vld [vmem:[#allocation2 + $0x1] sm:$0xff] }
 0x2c0   :  { %19873 = vmatpush3.msra.mxu1 %v11052_v1  ;;  %19878 = vmatpush3.msra.mxu0 %v22841_v25  ;;  %v11569_v25 = vand.u32 4294901760, %v22995_v44 }
 0x2c1   :  { %19874 = vmatprep.mubr.msk.f32.mxu1 %vm20524_vm1, %v25852_v3  ;;  %19879 = vmatprep.subr.mxu0 %v25852_v3 }
 0x2c2   :  { %19888 = vmatprep.subr.mxu1 %v25852_v3  ;;  %19875 = vmatmul.mubr.f32.vlgmr.msra.gmra.mxu1 %v20617_v12  ;;  %v11570_v18 = vsub.f32 %v22995_v44, %v11569_v25 }
 0x2c3   :  { %19880 = vmatpush3.msra.mxu0 %v22860_v19  ;;  %19889 = vmatpush3.msra.mxu1 %v22821_v33  ;;  %v7758_v46 = vpop.f32.mrf.mxu0  ;;  %v11576_v19 = vand.u32 4294901760, %v23007_v15 }
 0x2c4   :  { %15283 = vrot.lane.b32.xlu0 %v15263_v35, %s20527_s29  ;;  %19881 = vmatprep.subr.mxu0 %v25852_v3  ;;  %v7759_v55 = vadd.f32 %v17632_v32, %v7758_v46  ;;  %v15485_v46 = vmul.f32 %v23079_v11, %v23076_v53 }
 0x2c5   :  { %19890 = vmatprep.subr.mxu1 %v25852_v3  ;;  %19882 = vmatpush3.msra.mxu0 %v22876_v5  ;;  %v19469_v63 = vpop.f32.mrf.mxu0  ;;  %v11577_v7 = vsub.f32 %v23007_v15, %v11576_v19 }
 0x2c6   :  { %19891 = vmatpush3.msra.mxu1 %v22843_v43  ;;  %19883 = vmatprep.subr.mxu0 %v25852_v3  ;;  %v7849_v62 = vpop.f32.mrf.mxu1  ;;  %v17633_v63 = vld [vmem:[#allocation8 + $0xf] ss:$0 sm:$0xff] }
 0x2c7   :  { %19892 = vmatprep.subr.mxu1 %v25852_v3  ;;  %19884 = vmatpush3.msra.mxu0 %v22892_v49  ;;  %v7850_v28 = vadd.f32 %v7849_v62, %v7759_v55  ;;  %v11578_v45 = vand.u32 4294901760, %v11577_v7  ;;  %v15535_v62 = vmul.f32 %v23099_v51, %v23076_v53  ;;  %v11991_v7 = vld [vmem:[#allocation6 + $0x2c0] sm:$0xff] }
 0x2c8   :  { %19893 = vmatpush3.msra.mxu1 %v22849_v20  ;;  %15333 = vrot.lane.b32.xlu0 %v15313_v36, %s20528_s7  ;;  %v19480_v24 = vpop.f32.mrf.mxu1 }
 0x2c9   :  { %19885 = vmatprep.mubr.msk.f32.mxu0 %vm20524_vm1, %v25852_v3  ;;  %19894 = vmatprep.subr.mxu1 %v25852_v3  ;;  %v23115_v24 = vstv %s17654_s11  ;;  %s17678_s11 = sld [smem:[#allocation10 + $0x11]] }
 0x2ca   :  { %19899 = vmatprep.subr.mxu0 %v25852_v3  ;;  %19886 = vmatmul.mubr.f32.vlgmr.msra.gmra.mxu0 %v20629_v17  ;;  %25971 = vst [vmem:[#allocation23_spill] sm:$0xff] %v23115_v24 }
 0x2cb   :  { %19895 = vmatpush3.msra.mxu1 %v22867_v16  ;;  %19900 = vmatpush3.msra.mxu0 %v11029_v50  ;;  %v23020_v50 = vsub.f32 %v11452_v39, %v22997_v2  ;;  %v11994_v39 = vld [vmem:[#allocation6 + $0x2d8] sm:$0xff] }
 0x2cc   :  { %19896 = vmatprep.mubr.msk.f32.mxu1 %vm20524_vm1, %v25852_v3  ;;  %19901 = vmatprep.subr.mxu0 %v25852_v3 }
 0x2cd   :  { %19910 = vmatprep.subr.mxu1 %v25852_v3  ;;  %19897 = vmatmul.mubr.f32.vlgmr.msra.gmra.mxu1 %v20636_v22  ;;  %v11583_v5 = vand.u32 4294901760, %v23020_v50 }
 0x2ce   :  { %19902 = vmatpush3.msra.mxu0 %v11036_v34  ;;  %19911 = vmatpush3.msra.mxu1 %v22821_v33  ;;  %v7929_v27 = vpop.f32.mrf.mxu0  ;;  %v23031_v33 = vsub.f32 %v11451_v23, %v23013_v48 }
 0x2cf   :  { %15383 = vrot.lane.b32.xlu0 %v15363_v26, %s20529_s4  ;;  %19903 = vmatprep.subr.mxu0 %v25852_v3  ;;  %v7930_v57 = vadd.f32 %v7929_v27, %v7850_v28  ;;  %v11993_v26 = vld [vmem:[#allocation6 + $0x2d0] sm:$0xff] }
 0x2d0   :  { %19912 = vmatprep.subr.mxu1 %v25852_v3  ;;  %6584 = vrot.lane.b32.xlu1 %v6581_v8, %s20526_s5  ;;  %v19491_v34 = vpop.f32.mrf.mxu0  ;;  %v11590_v49 = vand.u32 4294901760, %v23031_v33  ;;  %v23119_v8 = vand.u32 4294901760, %v11994_v39 }
 0x2d1   :  { %19904 = vmatpush3.msra.mxu0 %v11043_v56  ;;  %19913 = vmatpush3.msra.mxu1 %v22843_v43  ;;  %v8006_v58 = vpop.f32.mrf.mxu1  ;;  %v15585_v34 = vmul.f32 %v23115_v24, %v23076_v53 }
 0x2d2   :  { %19905 = vmatprep.subr.mxu0 %v25852_v3  ;;  %19914 = vmatprep.subr.mxu1 %v25852_v3  ;;  %v8007_v43 = vadd.f32 %v8006_v58, %v7930_v57  ;;  %v11591_v1 = vsub.f32 %v23031_v33, %v11590_v49  ;;  %v11992_v58 = vld [vmem:[#allocation6 + $0x2c8] sm:$0xff] }
 0x2d3   :  { %19906 = vmatpush3.msra.mxu0 %v11050_v0  ;;  %19915 = vmatpush3.msra.mxu1 %v22849_v20  ;;  %v19502_v56 = vpop.f32.mrf.mxu1  ;;  %v11571_v20 = vand.u32 4294901760, %v11570_v18  ;;  %v11584_v0 = vsub.f32 %v23020_v50, %v11583_v5  ;;  %v23135_v18 = vsub.f32 %v11994_v39, %v23119_v8  ;;  %v23143_v37 = vand.u32 4294901760, %v11992_v58 }
 0x2d4   :  { %15433 = vrot.lane.b32.xlu0 %v15413_v30, %s20530_s8  ;;  %19907 = vmatprep.mubr.msk.f32.mxu0 %vm20524_vm1, %v25852_v3  ;;  %v11592_v60 = vand.u32 4294901760, %v11591_v1  ;;  %v23129_v30 = vand.u32 4294901760, %v11993_v26  ;;  %v23141_v56 = vstv %s23109_s12  ;;  %s17679_s12 = sld [smem:[#allocation10 + $0x10]] }
 0x2d5   :  { %19916 = vmatprep.subr.mxu1 %v25852_v3  ;;  %19921 = vmatprep.subr.mxu0 %v25852_v3  ;;  %v11585_v10 = vand.u32 4294901760, %v11584_v0  ;;  %25972 = vst [vmem:[#allocation24_spill] sm:$0xff] %v23141_v56 }
 0x2d6   :  { %19908 = vmatmul.mubr.f32.vlgmr.msra.gmra.mxu0 %v20617_v12  ;;  %19917 = vmatpush3.msra.mxu1 %v22867_v16 }
 0x2d7   :  { %19922 = vmatpush3.msra.mxu0 %v22980_v14  ;;  %19918 = vmatprep.mubr.msk.f32.mxu1 %vm20524_vm1, %v25852_v3  ;;  %v8089_v52 = vpop.f32.mrf.mxu0 }
 0x2d8   :  { %19923 = vmatprep.subr.mxu0 %v25852_v3  ;;  %19932 = vmatprep.subr.mxu1 %v25852_v3  ;;  %v8090_v16 = vadd.f32 %v8089_v52, %v8007_v43  ;;  %v7089_v43 = vmul.f32 0.01, %v22804_v31  ;;  %v15635_v52 = vmul.f32 %v23141_v56, %v23076_v53 }
 0x2d9   :  { %19919 = vmatmul.mubr.f32.vlgmr.msra.gmra.mxu1 %v20617_v12  ;;  %19924 = vmatpush3.msra.mxu0 %v22987_v42  ;;  %v19513_v6 = vpop.f32.mrf.mxu0 }
 0x2da   :  { %19933 = vmatpush3.msra.mxu1 %v11571_v20  ;;  %6582 = vrot.lane.b32.xlu0 %v6577_v21, %s20526_s5  ;;  %v4963_v38 = vpop.permute.xlu0 %4962  ;;  %v8164_v32 = vpop.f32.mrf.mxu1  ;;  %v23153_v20 = vsub.f32 %v11993_v26, %v23129_v30  ;;  %v12109_v21 = vand.u32 4294901760, %v23135_v18  ;;  %v23171_v6 = vld [vmem:[#allocation2 + $0x21] sm:$0xff] }
 0x2db   :  { %19925 = vmatprep.subr.mxu0 %v25852_v3  ;;  %19934 = vmatprep.subr.mxu1 %v25852_v3  ;;  %4968 = vst.msk [vmem:[#allocation2 + $0xa] sm:$0x1] %vm647_vm7, %v4963_v38  ;;  %v23084_v35 = vadd.f32 %v8164_v32, %v8090_v16  ;;  %v23167_v16 = vand.u32 4294901760, %v11991_v7  ;;  %v15489_v38 = vmul.f32 %v23079_v11, %v23171_v6 }
 0x2dc   :  { %19926 = vmatpush3.msra.mxu0 %v22997_v2  ;;  %19935 = vmatpush3.msra.mxu1 %v11578_v45  ;;  %v19524_v41 = vpop.f32.mrf.mxu1 }
 0x2dd   :  { %19927 = vmatprep.subr.mxu0 %v25852_v3  ;;  %19936 = vmatprep.subr.mxu1 %v25852_v3  ;;  %v4965_v55 = vpop.permute.xlu1 %4964  ;;  %v23190_v32 = vsub.f32 %v11991_v7, %v23167_v16  ;;  %v17634_v7 = vld [vmem:[#allocation8 + $0x10] ss:$0 sm:$0xff]  ;;  %vm8168_vm2 = vcmp.ge.f32.partialorder %v23084_v35, 0.0 }
 0x2de   :  { %19928 = vmatpush3.msra.mxu0 %v23013_v48  ;;  %19937 = vmatpush3.msra.mxu1 %v11585_v10  ;;  %4969 = vst.msk [vmem:[#allocation2 + $0x2a] sm:$0x1] %vm647_vm7, %v4965_v55 }
 0x2df   :  { %15501 = vrot.lane.b32.xlu0 %v15485_v46, %s20527_s29  ;;  %19929 = vmatprep.mubr.msk.f32.mxu0 %vm20524_vm1, %v25852_v3  ;;  %v12130_v46 = vand.u32 4294901760, %v23190_v32 }
 0x2e0   :  { %19938 = vmatprep.subr.mxu1 %v25852_v3  ;;  %19943 = vmatprep.subr.mxu0 %v25852_v3 }
 0x2e1   :  { %19930 = vmatmul.mubr.f32.vlgmr.msra.gmra.mxu0 %v20647_v29  ;;  %19939 = vmatpush3.msra.mxu1 %v11592_v60  ;;  %v12131_v26 = vsub.f32 %v23190_v32, %v12130_v46 }
 0x2e2   :  { %19944 = vmatpush3.msra.mxu0 %v22995_v44  ;;  %19940 = vmatprep.mubr.msk.f32.mxu1 %vm20524_vm1, %v25852_v3  ;;  %v8298_v36 = vpop.f32.mrf.mxu0  ;;  %v7090_v44 = vsel %vm7088_vm15, %v22804_v31, %v7089_v43  ;;  %v12116_v31 = vand.u32 4294901760, %v23153_v20  ;;  %vm16426_vm15 = vcmask 244752  }
 0x2e3   :  { %19945 = vmatprep.subr.mxu0 %v25852_v3  ;;  %19954 = vmatprep.subr.mxu1 %v25852_v3  ;;  %v8299_v28 = vadd.f32 %v17633_v63, %v8298_v36  ;;  %v12132_v43 = vand.u32 4294901760, %v12131_v26 }
 0x2e4   :  { %19941 = vmatmul.mubr.f32.vlgmr.msra.gmra.mxu1 %v20617_v12  ;;  %19946 = vmatpush3.msra.mxu0 %v23007_v15  ;;  %v19535_v61 = vpop.f32.mrf.mxu0 }
 0x2e5   :  { %19955 = vmatpush3.msra.mxu1 %v22980_v14  ;;  %15551 = vrot.lane.b32.xlu0 %v15535_v62, %s20528_s7  ;;  %v8389_v23 = vpop.f32.mrf.mxu1 }
 0x2e6   :  { %19947 = vmatprep.subr.mxu0 %v25852_v3  ;;  %19956 = vmatprep.subr.mxu1 %v25852_v3  ;;  %v8390_v27 = vadd.f32 %v8389_v23, %v8299_v28 }
 0x2e7   :  { %19948 = vmatpush3.msra.mxu0 %v23020_v50  ;;  %19957 = vmatpush3.msra.mxu1 %v22987_v42  ;;  %v19546_v57 = vpop.f32.mrf.mxu1 }
 0x2e8   :  { %19949 = vmatprep.subr.mxu0 %v25852_v3  ;;  %19958 = vmatprep.subr.mxu1 %v25852_v3 }
 0x2e9   :  { %19950 = vmatpush3.msra.mxu0 %v23031_v33  ;;  %19959 = vmatpush3.msra.mxu1 %v22997_v2 }
 0x2ea   :  { %15601 = vrot.lane.b32.xlu0 %v15585_v34, %s20529_s4  ;;  %19951 = vmatprep.mubr.msk.f32.mxu0 %vm20524_vm1, %v25852_v3  ;;  %v15589_v34 = vmul.f32 %v23115_v24, %v23171_v6 }
 0x2eb   :  { %19960 = vmatprep.subr.mxu1 %v25852_v3  ;;  %19965 = vmatprep.subr.mxu0 %v25852_v3 }
 0x2ec   :  { %19952 = vmatmul.mubr.f32.vlgmr.msra.gmra.mxu0 %v20629_v17  ;;  %19961 = vmatpush3.msra.mxu1 %v23013_v48 }
 0x2ed   :  { %19966 = vmatpush3.msra.mxu0 %v11569_v25  ;;  %19962 = vmatprep.mubr.msk.f32.mxu1 %vm20524_vm1, %v25852_v3  ;;  %v8469_v0 = vpop.f32.mrf.mxu0  ;;  %v23165_v25 = vsub.f32 %v11992_v58, %v23143_v37 }
 0x2ee   :  { %19967 = vmatprep.subr.mxu0 %v25852_v3  ;;  %19976 = vmatprep.subr.mxu1 %v25852_v3  ;;  %v8470_v45 = vadd.f32 %v8469_v0, %v8390_v27 }
 0x2ef   :  { %19963 = vmatmul.mubr.f32.vlgmr.msra.gmra.mxu1 %v20636_v22  ;;  %19968 = vmatpush3.msra.mxu0 %v11576_v19  ;;  %v19557_v1 = vpop.f32.mrf.mxu0  ;;  %v23177_v19 = vrot.slane %v7090_v44, %v21580_v59  ;;  %v12123_v50 = vand.u32 4294901760, %v23165_v25 }
 0x2f0   :  { %19977 = vmatpush3.msra.mxu1 %v22980_v14  ;;  %15651 = vrot.lane.b32.xlu0 %v15635_v52, %s20530_s8  ;;  %v8546_v10 = vpop.f32.mrf.mxu1  ;;  %v12110_v14 = vsub.f32 %v23135_v18, %v12109_v21 }
 0x2f1   :  { %19969 = vmatprep.subr.mxu0 %v25852_v3  ;;  %19978 = vmatprep.subr.mxu1 %v25852_v3  ;;  %v8547_v15 = vadd.f32 %v8546_v10, %v8470_v45  ;;  %v7099_v33 = vcombine.high %v23177_v19, %v23177_v19  ;;  %v7106_v1 = vrot.slane %v23177_v19, %v21580_v59 }
 0x2f2   :  { %19970 = vmatpush3.msra.mxu0 %v11583_v5  ;;  %19979 = vmatpush3.msra.mxu1 %v22987_v42  ;;  %v19568_v53 = vpop.f32.mrf.mxu1  ;;  %v12117_v42 = vsub.f32 %v23153_v20, %v12116_v31  ;;  %v7629_v5 = vmul.f32 0.01, %v22945_v4  ;;  %v12111_v41 = vand.u32 4294901760, %v12110_v14 }
 0x2f3   :  { %19971 = vmatprep.subr.mxu0 %v25852_v3  ;;  %19980 = vmatprep.subr.mxu1 %v25852_v3  ;;  %v7113_v28 = vrot.slane %v7099_v33, %v21580_v59  ;;  %v7117_v19 = vrot.slane %v7106_v1, %v21602_v9  ;;  %v12532_v33 = vld [vmem:[#allocation6 + $0x2e8] sm:$0xff] }
 0x2f4   :  { %19972 = vmatpush3.msra.mxu0 %v11590_v49  ;;  %19981 = vmatpush3.msra.mxu1 %v22997_v2  ;;  %v12124_v49 = vsub.f32 %v23165_v25, %v12123_v50  ;;  %v12118_v63 = vand.u32 4294901760, %v12117_v42  ;;  %v7630_v39 = vsel %vm7628_vm0, %v22945_v4, %v7629_v5 }
 0x2f5   :  { %15509 = vrot.lane.b32.xlu0 %v15489_v38, %s20527_s29  ;;  %19973 = vmatprep.mubr.msk.f32.mxu0 %vm20524_vm1, %v25852_v3  ;;  %v23235_v57 = vrot.slane %v7630_v39, %v21580_v59  ;;  %v7121_v58 = vrot.slane %v7113_v28, %v21602_v9  ;;  %v12534_v38 = vld [vmem:[#allocation6 + $0x2f8] sm:$0xff] }
 0x2f6   :  { %19982 = vmatprep.subr.mxu1 %v25852_v3  ;;  %19987 = vmatprep.subr.mxu0 %v25852_v3  ;;  %v8629_v2 = vpop.f32.mrf.mxu0  ;;  %v12125_v23 = vand.u32 4294901760, %v12124_v49 }
 0x2f7   :  { %19974 = vmatmul.mubr.f32.vlgmr.msra.gmra.mxu0 %v20617_v12  ;;  %19983 = vmatpush3.msra.mxu1 %v23013_v48  ;;  %v8630_v60 = vadd.f32 %v8629_v2, %v8547_v15  ;;  %v15539_v48 = vmul.f32 %v23099_v51, %v23171_v6  ;;  %v7639_v0 = vcombine.high %v23235_v57, %v23235_v57 }
 0x2f8   :  { %19988 = vmatpush3.msra.mxu0 %v23119_v8  ;;  %19984 = vmatprep.mubr.msk.f32.mxu1 %vm20524_vm1, %v25852_v3  ;;  %v19579_v55 = vpop.f32.mrf.mxu0  ;;  %v15639_v15 = vmul.f32 %v23141_v56, %v23171_v6  ;;  %v12533_v6 = vld [vmem:[#allocation6 + $0x2f0] sm:$0xff] }
 0x2f9   :  { %19989 = vmatprep.subr.mxu0 %v25852_v3  ;;  %19998 = vmatprep.subr.mxu1 %v25852_v3  ;;  %v5503_v36 = vpop.permute.xlu0 %5502  ;;  %v8704_v62 = vpop.f32.mrf.mxu1  ;;  %v7653_v14 = vrot.slane %v7639_v0, %v21580_v59  ;;  %v23285_v2 = vand.u32 4294901760, %v12533_v6  ;;  %v23296_v55 = vstv %s17657_s1  ;;  %s17680_s1 = sld [smem:[#allocation10 + $0xf]] }
 0x2fa   :  { %19985 = vmatmul.mubr.f32.vlgmr.msra.gmra.mxu1 %v20617_v12  ;;  %19990 = vmatpush3.msra.mxu0 %v23129_v30  ;;  %5508 = vst.msk [vmem:[#allocation2 + $0xb] sm:$0x1] %vm647_vm7, %v5503_v36  ;;  %v23226_v61 = vadd.f32 %v8704_v62, %v8630_v60  ;;  %v23294_v60 = vld [vmem:[#allocation2 + $0x2] sm:$0xff]  ;;  %25973 = vst [vmem:[#allocation25_spill] sm:$0xff] %v23296_v55 }
 0x2fb   :  { %19999 = vmatpush3.msra.mxu1 %v12111_v41  ;;  %15559 = vrot.lane.b32.xlu0 %v15539_v48, %s20528_s7  ;;  %v19590_v27 = vpop.f32.mrf.mxu1  ;;  %v7661_v5 = vrot.slane %v7653_v14, %v21602_v9  ;;  %v23277_v41 = vand.u32 4294901760, %v12534_v38  ;;  %v12531_v36 = vld [vmem:[#allocation6 + $0x2e0] sm:$0xff]  ;;  %v23310_v39 = vsub.f32 %v12533_v6, %v23285_v2 }
 0x2fc   :  { %19991 = vmatprep.subr.mxu0 %v25852_v3  ;;  %20000 = vmatprep.subr.mxu1 %v25852_v3  ;;  %v5505_v4 = vpop.permute.xlu1 %5504  ;;  %vm8708_vm3 = vcmp.ge.f32.partialorder %v23226_v61, 0.0 }
 0x2fd   :  { %19992 = vmatpush3.msra.mxu0 %v23143_v37  ;;  %20001 = vmatpush3.msra.mxu1 %v12118_v63  ;;  %5509 = vst.msk [vmem:[#allocation2 + $0x2b] sm:$0x1] %vm647_vm7, %v5505_v4  ;;  %v23299_v48 = vsub.f32 %v12534_v38, %v23277_v41  ;;  %v23301_v63 = vand.u32 4294901760, %v12532_v33  ;;  %v23332_v4 = vstv %s23281_s13  ;;  %v23396_v38 = vstv %s23351_s15  ;;  %s17682_s13 = sld [smem:[#allocation10 + $0xd]] }
 0x2fe   :  { %19993 = vmatprep.subr.mxu0 %v25852_v3  ;;  %20002 = vmatprep.subr.mxu1 %v25852_v3  ;;  %25974 = vst [vmem:[#allocation26_spill] sm:$0xff] %v23332_v4  ;;  %25976 = vst [vmem:[#allocation28_spill] sm:$0xff] %v23396_v38  ;;  %v15861_v6 = vmul.f32 %v23396_v38, %v23294_v60  ;;  %s17684_s15 = sld [smem:[#allocation10 + $0xb]] }
 0x2ff   :  { %19994 = vmatpush3.msra.mxu0 %v23167_v16  ;;  %20003 = vmatpush3.msra.mxu1 %v12125_v23  ;;  %v15711_v23 = vmul.f32 %v23296_v55, %v23294_v60  ;;  %v23327_v26 = vsub.f32 %v12532_v33, %v23301_v63 }
 0x300   :  { %15609 = vrot.lane.b32.xlu0 %v15589_v34, %s20529_s4  ;;  %19995 = vmatprep.mubr.msk.f32.mxu0 %vm20524_vm1, %v25852_v3  ;;  %v12656_v34 = vand.u32 4294901760, %v23310_v39 }
 0x301   :  { %20004 = vmatprep.subr.mxu1 %v25852_v3  ;;  %20009 = vmatprep.subr.mxu0 %v25852_v3  ;;  %v8838_v52 = vpop.f32.mrf.mxu0 }
 0x302   :  { %7124 = vrot.lane.b32.xlu1 %v7121_v58, %s20526_s5  ;;  %19996 = vmatmul.mubr.f32.vlgmr.msra.gmra.mxu0 %v20647_v29  ;;  %v8839_v45 = vadd.f32 %v17634_v7, %v8838_v52 }
 0x303   :  { %20005 = vmatpush3.msra.mxu1 %v12132_v43  ;;  %20010 = vmatpush3.msra.mxu0 %v23135_v18  ;;  %v19601_v44 = vpop.f32.mrf.mxu0  ;;  %v23320_v18 = vand.u32 4294901760, %v12531_v36  ;;  %v8169_v43 = vmul.f32 0.01, %v23084_v35 }
 0x304   :  { %20006 = vmatprep.mubr.msk.f32.mxu1 %vm20524_vm1, %v25852_v3  ;;  %20011 = vmatprep.subr.mxu0 %v25852_v3  ;;  %v8929_v10 = vpop.f32.mrf.mxu1 }
 0x305   :  { %20020 = vmatprep.subr.mxu1 %v25852_v3  ;;  %20007 = vmatmul.mubr.f32.vlgmr.msra.gmra.mxu1 %v20617_v12  ;;  %v23265_v53 = vadd.f32 %v8929_v10, %v8839_v45  ;;  %v8170_v10 = vsel %vm8168_vm2, %v23084_v35, %v8169_v43  ;;  %v17635_v35 = vld [vmem:[#allocation8 + $0x11] ss:$0 sm:$0xff] }
 0x306   :  { %20012 = vmatpush3.msra.mxu0 %v23153_v20  ;;  %20021 = vmatpush3.msra.mxu1 %v23119_v8  ;;  %v19612_v42 = vpop.f32.mrf.mxu1  ;;  %v23341_v20 = vsub.f32 %v12531_v36, %v23320_v18 }
 0x307   :  { %15659 = vrot.lane.b32.xlu0 %v15639_v15, %s20530_s8  ;;  %20013 = vmatprep.subr.mxu0 %v25852_v3  ;;  %v23401_v42 = vrot.slane %v8170_v10, %v21580_v59  ;;  %v13072_v10 = vld [vmem:[#allocation6 + $0x308] sm:$0xff] }
 0x308   :  { %20022 = vmatprep.subr.mxu1 %v25852_v3  ;;  %20014 = vmatpush3.msra.mxu0 %v23165_v25  ;;  %v12663_v25 = vand.u32 4294901760, %v23327_v26 }
 0x309   :  { %20023 = vmatpush3.msra.mxu1 %v23129_v30  ;;  %20015 = vmatprep.subr.mxu0 %v25852_v3 }
 0x30a   :  { %20024 = vmatprep.subr.mxu1 %v25852_v3  ;;  %20016 = vmatpush3.msra.mxu0 %v23190_v32  ;;  %v23368_v32 = vstv %s23318_s14  ;;  %v12664_v52 = vsub.f32 %v23327_v26, %v12663_v25  ;;  %s17683_s14 = sld [smem:[#allocation10 + $0xc]] }
 0x30b   :  { %20025 = vmatpush3.msra.mxu1 %v23143_v37  ;;  %7122 = vrot.lane.b32.xlu0 %v7117_v19, %s20526_s5  ;;  %25975 = vst [vmem:[#allocation27_spill] sm:$0xff] %v23368_v32 }
 0x30c   :  { %20017 = vmatprep.mubr.msk.f32.mxu0 %vm20524_vm1, %v25852_v3  ;;  %20026 = vmatprep.subr.mxu1 %v25852_v3  ;;  %v23290_v49 = vpop.f32.mrf.mxu0  ;;  %v12665_v14 = vand.u32 4294901760, %v12664_v52  ;;  %v13073_v52 = vld [vmem:[#allocation6 + $0x310] sm:$0xff] }
 0x30d   :  { %20031 = vmatprep.subr.mxu0 %v25852_v3  ;;  %7664 = vrot.lane.b32.xlu1 %v7661_v5, %s20526_s5 }
 0x30e   :  { %20018 = vmatmul.mubr.f32.vlgmr.msra.gmra.mxu0 %v20629_v17  ;;  %20027 = vmatpush3.msra.mxu1 %v23167_v16  ;;  %v19623_v62 = vpop.f32.mrf.mxu0 }
 0x30f   :  { %20032 = vmatpush3.msra.mxu0 %v12109_v21  ;;  %20028 = vmatprep.mubr.msk.f32.mxu1 %vm20524_vm1, %v25852_v3  ;;  %v23312_v28 = vpop.f32.mrf.mxu1  ;;  %v12649_v21 = vand.u32 4294901760, %v23299_v48 }
 0x310   :  { %20033 = vmatprep.subr.mxu0 %v25852_v3  ;;  %20042 = vmatprep.subr.mxu1 %v25852_v3 }
 0x311   :  { %20029 = vmatmul.mubr.f32.vlgmr.msra.gmra.mxu1 %v20636_v22  ;;  %20034 = vmatpush3.msra.mxu0 %v12116_v31  ;;  %v19634_v27 = vpop.f32.mrf.mxu1  ;;  %v12650_v31 = vsub.f32 %v23299_v48, %v12649_v21 }
 0x312   :  { %20043 = vmatpush3.msra.mxu1 %v23119_v8  ;;  %15727 = vrot.lane.b32.xlu0 %v15711_v23, %s20527_s29  ;;  %v15761_v8 = vmul.f32 %v23332_v4, %v23294_v60  ;;  %v23416_v23 = vld [vmem:[#allocation2 + $0x22] sm:$0xff] }
 0x313   :  { %20035 = vmatprep.subr.mxu0 %v25852_v3  ;;  %20044 = vmatprep.subr.mxu1 %v25852_v3  ;;  %v12651_v0 = vand.u32 4294901760, %v12650_v31 }
 0x314   :  { %20036 = vmatpush3.msra.mxu0 %v12123_v50  ;;  %20045 = vmatpush3.msra.mxu1 %v23129_v30  ;;  %v12657_v50 = vsub.f32 %v23310_v39, %v12656_v34 }
 0x315   :  { %20037 = vmatprep.subr.mxu0 %v25852_v3  ;;  %20046 = vmatprep.subr.mxu1 %v25852_v3  ;;  %v23353_v30 = vpop.f32.mrf.mxu0 }
 0x316   :  { %20038 = vmatpush3.msra.mxu0 %v12130_v46  ;;  %20047 = vmatpush3.msra.mxu1 %v23143_v37  ;;  %v12670_v37 = vand.u32 4294901760, %v23341_v20  ;;  %v12658_v44 = vand.u32 4294901760, %v12657_v50 }
 0x317   :  { %15777 = vrot.lane.b32.xlu0 %v15761_v8, %s20528_s7  ;;  %20039 = vmatprep.mubr.msk.f32.mxu0 %vm20524_vm1, %v25852_v3  ;;  %v19645_v58 = vpop.f32.mrf.mxu0 }
 0x318   :  { %20048 = vmatprep.subr.mxu1 %v25852_v3  ;;  %20053 = vmatprep.subr.mxu0 %v25852_v3  ;;  %v6043_v46 = vpop.permute.xlu0 %6042  ;;  %v23371_v7 = vpop.f32.mrf.mxu1  ;;  %v12671_v15 = vsub.f32 %v23341_v20, %v12670_v37  ;;  %v15715_v58 = vmul.f32 %v23296_v55, %v23416_v23 }
 0x319   :  { %20040 = vmatmul.mubr.f32.vlgmr.msra.gmra.mxu0 %v20617_v12  ;;  %20049 = vmatpush3.msra.mxu1 %v23167_v16  ;;  %6048 = vst.msk [vmem:[#allocation2 + $0xc] sm:$0x1] %vm647_vm7, %v6043_v46  ;;  %v15811_v16 = vmul.f32 %v23368_v32, %v23294_v60  ;;  %v8179_v60 = vcombine.high %v23401_v42, %v23401_v42  ;;  %v13074_v46 = vld [vmem:[#allocation6 + $0x318] sm:$0xff] }
 0x31a   :  { %20054 = vmatpush3.msra.mxu0 %v23277_v41  ;;  %20050 = vmatprep.mubr.msk.f32.mxu1 %vm20524_vm1, %v25852_v3  ;;  %v19656_v45 = vpop.f32.mrf.mxu1  ;;  %v12672_v19 = vand.u32 4294901760, %v12671_v15 }
 0x31b   :  { %20055 = vmatprep.subr.mxu0 %v25852_v3  ;;  %20064 = vmatprep.subr.mxu1 %v25852_v3  ;;  %v6045_v1 = vpop.permute.xlu1 %6044  ;;  %v8193_v43 = vrot.slane %v8179_v60, %v21580_v59  ;;  %v15765_v45 = vmul.f32 %v23332_v4, %v23416_v23 }
 0x31c   :  { %20051 = vmatmul.mubr.f32.vlgmr.msra.gmra.mxu1 %v20617_v12  ;;  %20056 = vmatpush3.msra.mxu0 %v23285_v2  ;;  %6049 = vst.msk [vmem:[#allocation2 + $0x2c] sm:$0x1] %vm647_vm7, %v6045_v1 }
 0x31d   :  { %20065 = vmatpush3.msra.mxu1 %v12651_v0  ;;  %15827 = vrot.lane.b32.xlu0 %v15811_v16, %s20529_s4  ;;  %v23439_v0 = vand.u32 4294901760, %v13074_v46  ;;  %v8201_v16 = vrot.slane %v8193_v43, %v21602_v9 }
 0x31e   :  { %20057 = vmatprep.subr.mxu0 %v25852_v3  ;;  %20066 = vmatprep.subr.mxu1 %v25852_v3 }
 0x31f   :  { %20058 = vmatpush3.msra.mxu0 %v23301_v63  ;;  %20067 = vmatpush3.msra.mxu1 %v12658_v44 }
 0x320   :  { %20059 = vmatprep.subr.mxu0 %v25852_v3  ;;  %20068 = vmatprep.subr.mxu1 %v25852_v3  ;;  %v23408_v5 = vpop.permute.xlu0 %15275  ;;  %v9378_v33 = vpop.f32.mrf.mxu0 }
 0x321   :  { %20060 = vmatpush3.msra.mxu0 %v23320_v18  ;;  %20069 = vmatpush3.msra.mxu1 %v12665_v14  ;;  %v9379_v36 = vadd.f32 %v17635_v35, %v9378_v33  ;;  %v23455_v14 = vand.u32 4294901760, %v13073_v52  ;;  %v23466_v33 = vand.u32 4294901760, %v13072_v10 }
 0x322   :  { %15877 = vrot.lane.b32.xlu0 %v15861_v6, %s20530_s8  ;;  %20061 = vmatprep.mubr.msk.f32.mxu0 %vm20524_vm1, %v25852_v3  ;;  %v19667_v62 = vpop.f32.mrf.mxu0  ;;  %v23460_v6 = vsub.f32 %v13074_v46, %v23439_v0 }
 0x323   :  { %20070 = vmatprep.subr.mxu1 %v25852_v3  ;;  %20075 = vmatprep.subr.mxu0 %v25852_v3  ;;  %v9469_v27 = vpop.f32.mrf.mxu1 }
 0x324   :  { %20062 = vmatmul.mubr.f32.vlgmr.msra.gmra.mxu0 %v20647_v29  ;;  %20071 = vmatpush3.msra.mxu1 %v12672_v19  ;;  %v9470_v8 = vadd.f32 %v9469_v27, %v9379_v36  ;;  %v23424_v31 = vpop.permute.xlu0 %15325  ;;  %v13071_v36 = vld [vmem:[#allocation6 + $0x300] sm:$0xff]  ;;  %v23477_v27 = vsub.f32 %v13073_v52, %v23455_v14  ;;  %v8709_v52 = vmul.f32 0.01, %v23226_v61 }
 0x325   :  { %20076 = vmatpush3.msra.mxu0 %v23299_v48  ;;  %20072 = vmatprep.mubr.msk.f32.mxu1 %vm20524_vm1, %v25852_v3  ;;  %v19678_v50 = vpop.f32.mrf.mxu1  ;;  %v13189_v48 = vand.u32 4294901760, %v23460_v6 }
 0x326   :  { %20077 = vmatprep.subr.mxu0 %v25852_v3  ;;  %20086 = vmatprep.subr.mxu1 %v25852_v3  ;;  %v23490_v50 = vsub.f32 %v13072_v10, %v23466_v33  ;;  %v13196_v43 = vand.u32 4294901760, %v23477_v27 }
 0x327   :  { %20073 = vmatmul.mubr.f32.vlgmr.msra.gmra.mxu1 %v20617_v12  ;;  %20078 = vmatpush3.msra.mxu0 %v23310_v39  ;;  %v13190_v39 = vsub.f32 %v23460_v6, %v13189_v48 }
 0x328   :  { %20087 = vmatpush3.msra.mxu1 %v23277_v41  ;;  %15735 = vrot.lane.b32.xlu0 %v15715_v58, %s20527_s29 }
 0x329   :  { %20079 = vmatprep.subr.mxu0 %v25852_v3  ;;  %20088 = vmatprep.subr.mxu1 %v25852_v3 }
 0x32a   :  { %20080 = vmatpush3.msra.mxu0 %v23327_v26  ;;  %20089 = vmatpush3.msra.mxu1 %v23285_v2 }
 0x32b   :  { %20081 = vmatprep.subr.mxu0 %v25852_v3  ;;  %20090 = vmatprep.subr.mxu1 %v25852_v3  ;;  %v23446_v44 = vpop.permute.xlu0 %15375  ;;  %v9549_v1 = vpop.f32.mrf.mxu0 }
 0x32c   :  { %20082 = vmatpush3.msra.mxu0 %v23341_v20  ;;  %20091 = vmatpush3.msra.mxu1 %v23301_v63  ;;  %v23450_v15 = vadd.f32 %v9549_v1, %v9470_v8  ;;  %v15815_v8 = vmul.f32 %v23368_v32, %v23416_v23  ;;  %v7646_v20 = vrot.slane %v23235_v57, %v21580_v59 }
 0x32d   :  { %15785 = vrot.lane.b32.xlu0 %v15765_v45, %s20528_s7  ;;  %20083 = vmatprep.mubr.msk.f32.mxu0 %vm20524_vm1, %v25852_v3  ;;  %v19689_v35 = vpop.f32.mrf.mxu0  ;;  %v8710_v1 = vsel %vm8708_vm3, %v23226_v61, %v8709_v52 }
 0x32e   :  { %20092 = vmatprep.subr.mxu1 %v25852_v3  ;;  %20097 = vmatprep.subr.mxu0 %v25852_v3  ;;  %v23462_v19 = vpop.f32.mrf.mxu1  ;;  %v17636_v35 = vld [vmem:[#allocation8 + $0x12] ss:$0 sm:$0xff] }
 0x32f   :  { %8204 = vrot.lane.b32.xlu1 %v8201_v16, %s20526_s5  ;;  %20084 = vmatmul.mubr.f32.vlgmr.msra.gmra.mxu0 %v20629_v17  ;;  %v23471_v62 = vpop.permute.xlu0 %15425 }
 0x330   :  { %20093 = vmatpush3.msra.mxu1 %v23320_v18  ;;  %20098 = vmatpush3.msra.mxu0 %v12649_v21  ;;  %v19700_v60 = vpop.f32.mrf.mxu1  ;;  %v23484_v21 = vand.u32 4294901760, %v13071_v36 }
 0x331   :  { %20094 = vmatprep.mubr.msk.f32.mxu1 %vm20524_vm1, %v25852_v3  ;;  %20099 = vmatprep.subr.mxu0 %v25852_v3 }
 0x332   :  { %20108 = vmatprep.subr.mxu1 %v25852_v3  ;;  %20095 = vmatmul.mubr.f32.vlgmr.msra.gmra.mxu1 %v20636_v22 }
 0x333   :  { %20100 = vmatpush3.msra.mxu0 %v12656_v34  ;;  %20109 = vmatpush3.msra.mxu1 %v23277_v41  ;;  %v15865_v41 = vmul.f32 %v23396_v38, %v23416_v23  ;;  %v23508_v34 = vsub.f32 %v13071_v36, %v23484_v21  ;;  %v9010_v23 = vadd.f32 %v23290_v49, %v23265_v53  ;;  %v23558_v36 = vstv %s23510_s16  ;;  %s17685_s16 = sld [smem:[#allocation10 + $0xa]] }
 0x334   :  { %15835 = vrot.lane.b32.xlu0 %v15815_v8, %s20529_s4  ;;  %20101 = vmatprep.subr.mxu0 %v25852_v3  ;;  %v23494_v58 = vpop.f32.mrf.mxu0  ;;  %v13197_v53 = vsub.f32 %v23477_v27, %v13196_v43  ;;  %25977 = vst [vmem:[#allocation29_spill] sm:$0xff] %v23558_v36  ;;  %v25987_v38 = vmov 0.0  }
 0x335   :  { %20110 = vmatprep.subr.mxu1 %v25852_v3  ;;  %20102 = vmatpush3.msra.mxu0 %v12663_v25  ;;  %v9087_v45 = vadd.f32 %v23312_v28, %v9010_v23  ;;  %v23555_v28 = vld [vmem:[#allocation2 + $0x3] sm:$0xff] }
 0x336   :  { %20111 = vmatpush3.msra.mxu1 %v23285_v2  ;;  %20103 = vmatprep.subr.mxu0 %v25852_v3  ;;  %v23512_v26 = vpop.permute.xlu0 %15283  ;;  %v19711_v25 = vpop.f32.mrf.mxu0  ;;  %v13203_v2 = vand.u32 4294901760, %v23490_v50  ;;  %v13198_v10 = vand.u32 4294901760, %v13197_v53  ;;  %v15937_v23 = vmul.f32 %v23558_v36, %v23555_v28 }
 0x337   :  { %20112 = vmatprep.subr.mxu1 %v25852_v3  ;;  %20104 = vmatpush3.msra.mxu0 %v12670_v37  ;;  %v23520_v46 = vpop.f32.mrf.mxu1  ;;  %v25845_v37 = vand.u32 4294901760, %v23508_v34  ;;  %v9170_v8 = vadd.f32 %v23353_v30, %v9087_v45 }
 0x338   :  { %20113 = vmatpush3.msra.mxu1 %v23301_v63  ;;  %15885 = vrot.lane.b32.xlu0 %v15865_v41, %s20530_s8  ;;  %v13191_v63 = vand.u32 4294901760, %v13190_v39  ;;  %v13204_v57 = vsub.f32 %v23490_v50, %v13203_v2  ;;  %v23567_v39 = vrot.slane %v8710_v1, %v21580_v59 }
 0x339   :  { %20105 = vmatprep.mubr.msk.f32.mxu0 %vm20524_vm1, %v25852_v3  ;;  %20114 = vmatprep.subr.mxu1 %v25852_v3  ;;  %v19722_v49 = vpop.f32.mrf.mxu1  ;;  %v13211_v61 = vsub.f32 %v23508_v34, %v25845_v37 }
 0x33a   :  { %20119 = vmatprep.subr.mxu0 %v25852_v3  ;;  %20106 = vmatmul.mubr.f32.vlgmr.msra.gmra.mxu0 %v20617_v12  ;;  %v23543_v16 = vpop.permute.xlu0 %15333  ;;  %v13205_v60 = vand.u32 4294901760, %v13204_v57  ;;  %v8719_v45 = vcombine.high %v23567_v39, %v23567_v39 }
 0x33b   :  { %20115 = vmatpush3.msra.mxu1 %v23320_v18  ;;  %20120 = vmatpush3.msra.mxu0 %v23439_v0  ;;  %v7657_v18 = vrot.slane %v7646_v20, %v21602_v9  ;;  %v13212_v20 = vand.u32 4294901760, %v13211_v61 }
 0x33c   :  { %20116 = vmatprep.mubr.msk.f32.mxu1 %vm20524_vm1, %v25852_v3  ;;  %20121 = vmatprep.subr.mxu0 %v25852_v3  ;;  %v8733_v61 = vrot.slane %v8719_v45, %v21580_v59 }
 0x33d   :  { %20130 = vmatprep.subr.mxu1 %v25852_v3  ;;  %20117 = vmatmul.mubr.f32.vlgmr.msra.gmra.mxu1 %v20617_v12 }
 0x33e   :  { %20122 = vmatpush3.msra.mxu0 %v23455_v14  ;;  %20131 = vmatpush3.msra.mxu1 %v13191_v63  ;;  %v9245_v63 = vadd.f32 %v23371_v7, %v9170_v8  ;;  %v13614_v8 = vld [vmem:[#allocation6 + $0x338] sm:$0xff] }
 0x33f   :  { %7662 = vrot.lane.b32.xlu0 %v7657_v18, %s20526_s5  ;;  %20123 = vmatprep.subr.mxu0 %v25852_v3  ;;  %v9918_v41 = vpop.f32.mrf.mxu0  ;;  %v23591_v18 = vstv %s23552_s17  ;;  %s17671_s17 = sld [smem:[#allocation10 + $0x18]] }
 0x340   :  { %20132 = vmatprep.subr.mxu1 %v25852_v3  ;;  %20124 = vmatpush3.msra.mxu0 %v23466_v33  ;;  %v9919_v25 = vadd.f32 %v17636_v35, %v9918_v41  ;;  %25978 = vst [vmem:[#allocation30_spill] sm:$0xff] %v23591_v18  ;;  %v15987_v35 = vmul.f32 %v23591_v18, %v23555_v28  ;;  %vm9248_vm4 = vcmp.ge.f32.partialorder %v9245_v63, 0.0 }
 0x341   :  { %20133 = vmatpush3.msra.mxu1 %v13198_v10  ;;  %20125 = vmatprep.subr.mxu0 %v25852_v3  ;;  %v23576_v52 = vpop.permute.xlu0 %15383  ;;  %v19733_v30 = vpop.f32.mrf.mxu0  ;;  %v9249_v10 = vmul.f32 0.01, %v9245_v63 }
 0x342   :  { %20134 = vmatprep.subr.mxu1 %v25852_v3  ;;  %20126 = vmatpush3.msra.mxu0 %v23484_v21  ;;  %v6585_v53 = vpop.permute.xlu1 %6584  ;;  %v10009_v49 = vpop.f32.mrf.mxu1 }
 0x343   :  { %20135 = vmatpush3.msra.mxu1 %v13205_v60  ;;  %15953 = vrot.lane.b32.xlu0 %v15937_v23, %s20527_s29  ;;  %6589 = vst.msk [vmem:[#allocation2 + $0x2d] sm:$0x1] %vm647_vm7, %v6585_v53  ;;  %v10010_v57 = vadd.f32 %v10009_v49, %v9919_v25  ;;  %v23609_v60 = vstv %s23574_s18  ;;  %v9250_v25 = vsel %vm9248_vm4, %v9245_v63, %v9249_v10  ;;  %v23620_v53 = vand.u32 4294901760, %v13614_v8  ;;  %v13613_v49 = vld [vmem:[#allocation6 + $0x330] sm:$0xff]  ;;  %v13612_v10 = vld [vmem:[#allocation6 + $0x328] sm:$0xff]  ;;  %s17676_s18 = sld [smem:[#allocation10 + $0x13]] }
 0x344   :  { %20127 = vmatprep.mubr.msk.f32.mxu0 %vm20524_vm1, %v25852_v3  ;;  %20136 = vmatprep.subr.mxu1 %v25852_v3  ;;  %v19744_v1 = vpop.f32.mrf.mxu1  ;;  %25979 = vst [vmem:[#allocation31_spill] sm:$0xff] %v23609_v60  ;;  %v16037_v30 = vmul.f32 %v23609_v60, %v23555_v28 }
 0x345   :  { %20141 = vmatprep.subr.mxu0 %v25852_v3  ;;  %20128 = vmatmul.mubr.f32.vlgmr.msra.gmra.mxu0 %v20647_v29 }
 0x346   :  { %20137 = vmatpush3.msra.mxu1 %v13212_v20  ;;  %20142 = vmatpush3.msra.mxu0 %v23460_v6  ;;  %v23594_v7 = vpop.permute.xlu0 %15433  ;;  %v8741_v20 = vrot.slane %v8733_v61, %v21602_v9  ;;  %v23633_v61 = vand.u32 4294901760, %v13613_v49  ;;  %v23665_v6 = vld [vmem:[#allocation2 + $0x23] sm:$0xff] }
 0x347   :  { %20138 = vmatprep.mubr.msk.f32.mxu1 %vm20524_vm1, %v25852_v3  ;;  %20143 = vmatprep.subr.mxu0 %v25852_v3 }
 0x348   :  { %20152 = vmatprep.subr.mxu1 %v25852_v3  ;;  %20139 = vmatmul.mubr.f32.vlgmr.msra.gmra.mxu1 %v20617_v12 }
 0x349   :  { %20144 = vmatpush3.msra.mxu0 %v23477_v27  ;;  %20153 = vmatpush3.msra.mxu1 %v23439_v0 }
 0x34a   :  { %16003 = vrot.lane.b32.xlu0 %v15987_v35, %s20528_s7  ;;  %20145 = vmatprep.subr.mxu0 %v25852_v3  ;;  %v10089_v41 = vpop.f32.mrf.mxu0 }
 0x34b   :  { %20154 = vmatprep.subr.mxu1 %v25852_v3  ;;  %20146 = vmatpush3.msra.mxu0 %v23490_v50  ;;  %v10090_v23 = vadd.f32 %v10089_v41, %v10010_v57  ;;  %v23628_v57 = vrot.slane %v9250_v25, %v21580_v59  ;;  %v23645_v25 = vand.u32 4294901760, %v13612_v10 }
 0x34c   :  { %20155 = vmatpush3.msra.mxu1 %v23455_v14  ;;  %20147 = vmatprep.subr.mxu0 %v25852_v3  ;;  %v6583_v45 = vpop.permute.xlu0 %6582  ;;  %v19755_v1 = vpop.f32.mrf.mxu0 }
 0x34d   :  { %20156 = vmatprep.subr.mxu1 %v25852_v3  ;;  %20148 = vmatpush3.msra.mxu0 %v23508_v34  ;;  %6588 = vst.msk [vmem:[#allocation2 + $0xd] sm:$0x1] %vm647_vm7, %v6583_v45  ;;  %v10166_v63 = vpop.f32.mrf.mxu1  ;;  %v23638_v45 = vstv %s23604_s19  ;;  %s17681_s19 = sld [smem:[#allocation10 + $0xe]] }
 0x34e   :  { %20157 = vmatpush3.msra.mxu1 %v23466_v33  ;;  %16053 = vrot.lane.b32.xlu0 %v16037_v30, %s20529_s4  ;;  %v10167_v35 = vadd.f32 %v10166_v63, %v10090_v23  ;;  %25980 = vst [vmem:[#allocation32_spill] sm:$0xff] %v23638_v45  ;;  %v23641_v30 = vsub.f32 %v13614_v8, %v23620_v53  ;;  %v13611_v23 = vld [vmem:[#allocation6 + $0x320] sm:$0xff] }
 0x34f   :  { %20149 = vmatprep.mubr.msk.f32.mxu0 %vm20524_vm1, %v25852_v3  ;;  %20158 = vmatprep.subr.mxu1 %v25852_v3  ;;  %v19766_v41 = vpop.f32.mrf.mxu1  ;;  %v16087_v8 = vmul.f32 %v23638_v45, %v23555_v28  ;;  %v23660_v63 = vsub.f32 %v13613_v49, %v23633_v61  ;;  %v23673_v28 = vsub.f32 %v13612_v10, %v23645_v25 }
 0x350   :  { %20163 = vmatprep.subr.mxu0 %v25852_v3  ;;  %8744 = vrot.lane.b32.xlu1 %v8741_v20, %s20526_s5  ;;  %v9259_v20 = vcombine.high %v23628_v57, %v23628_v57  ;;  %v23668_v41 = vand.u32 4294901760, %v13611_v23 }
 0x351   :  { %20150 = vmatmul.mubr.f32.vlgmr.msra.gmra.mxu0 %v20629_v17  ;;  %20159 = vmatpush3.msra.mxu1 %v23484_v21  ;;  %v23647_v1 = vpop.permute.xlu0 %15501 }
 0x352   :  { %20164 = vmatpush3.msra.mxu0 %v13189_v48  ;;  %20160 = vmatprep.mubr.msk.f32.mxu1 %vm20524_vm1, %v25852_v3  ;;  %v25846_v48 = vand.u32 4294901760, %v23641_v30  ;;  %v9273_v27 = vrot.slane %v9259_v20, %v21580_v59  ;;  %v23692_v50 = vsub.f32 %v13611_v23, %v23668_v41  ;;  %v25848_v20 = vand.u32 4294901760, %v23673_v28 }
 0x353   :  { %20165 = vmatprep.subr.mxu0 %v25852_v3  ;;  %20174 = vmatprep.subr.mxu1 %v25852_v3 }
 0x354   :  { %20161 = vmatmul.mubr.f32.vlgmr.msra.gmra.mxu1 %v20636_v22  ;;  %20166 = vmatpush3.msra.mxu0 %v13196_v43  ;;  %v10249_v37 = vpop.f32.mrf.mxu0 }
 0x355   :  { %20175 = vmatpush3.msra.mxu1 %v23439_v0  ;;  %16103 = vrot.lane.b32.xlu0 %v16087_v8, %s20530_s8  ;;  %v10250_v49 = vadd.f32 %v10249_v37, %v10167_v35  ;;  %v15941_v0 = vmul.f32 %v23558_v36, %v23665_v6  ;;  %v25849_v8 = vand.u32 4294901760, %v23660_v63  ;;  %v13730_v35 = vsub.f32 %v23641_v30, %v25846_v48 }
 0x356   :  { %20167 = vmatprep.subr.mxu0 %v25852_v3  ;;  %20176 = vmatprep.subr.mxu1 %v25852_v3  ;;  %v19777_v43 = vpop.f32.mrf.mxu0  ;;  %v9281_v48 = vrot.slane %v9273_v27, %v21602_v9  ;;  %v25847_v27 = vand.u32 4294901760, %v23692_v50  ;;  %v23824_v36 = vstv %s23780_s0  ;;  %s17689_s0 = sld [smem:[#allocation10 + $0x6]] }
 0x357   :  { %20168 = vmatpush3.msra.mxu0 %v13203_v2  ;;  %20177 = vmatpush3.msra.mxu1 %v23455_v14  ;;  %v23684_v10 = vpop.permute.xlu0 %15551  ;;  %v10324_v37 = vpop.f32.mrf.mxu1  ;;  %v25981_v2 = vand.u32 4294901760, %v23508_v34  ;;  %v13737_v34 = vsub.f32 %v23660_v63, %v25849_v8  ;;  %v13731_v23 = vand.u32 4294901760, %v13730_v35  ;;  %25986 = vst [vmem:[#allocation36_spill] sm:$0xff] %v23824_v36 }
 0x358   :  { %20169 = vmatprep.subr.mxu0 %v25852_v3  ;;  %20178 = vmatprep.subr.mxu1 %v25852_v3  ;;  %v23694_v14 = vadd.f32 %v10324_v37, %v10250_v49  ;;  %v9627_v49 = vadd.f32 %v23462_v19, %v23450_v15  ;;  %v17637_v37 = vld [vmem:[#allocation8 + $0x13] ss:$0 sm:$0xff] }
 0x359   :  { %20170 = vmatpush3.msra.mxu0 %v25981_v2  ;;  %20171 = vmatprep.mubr.msk.f32.mxu0 %vm20524_vm1, %v25852_v3  ;;  %v19788_v43 = vpop.f32.mrf.mxu1  ;;  %v13738_v15 = vand.u32 4294901760, %v13737_v34  ;;  %v16041_v2 = vmul.f32 %v23609_v60, %v23665_v6 }
 0x35a   :  { %20179 = vmatpush3.msra.mxu1 %v23466_v33  ;;  %15961 = vrot.lane.b32.xlu0 %v15941_v0, %s20527_s29  ;;  %v15991_v33 = vmul.f32 %v23591_v18, %v23665_v6  ;;  %v9710_v43 = vadd.f32 %v23494_v58, %v9627_v49  ;;  %v16091_v49 = vmul.f32 %v23638_v45, %v23665_v6  ;;  %vm10328_vm6 = vcmp.ge.f32.partialorder %v23694_v14, 0.0 }
 0x35b   :  { %20172 = vmatmul.mubr.f32.vlgmr.msra.gmra.mxu0 %v20617_v12  ;;  %20180 = vmatprep.subr.mxu1 %v25852_v3 }
 0x35c   :  { %20181 = vmatpush3.msra.mxu1 %v23484_v21  ;;  %20182 = vmatprep.mubr.msk.f32.mxu1 %vm20524_vm1, %v25852_v3  ;;  %v23717_v0 = vpop.permute.xlu0 %15601  ;;  %v13744_v21 = vsub.f32 %v23673_v28, %v25848_v20 }
 0x35d   :  { %20183 = vmatmul.mubr.f32.vlgmr.msra.gmra.mxu1 %v20617_v12  ;;  %20185 = vmatprep.subr.mxu0 %v25852_v3 }
 0x35e   :  { %16011 = vrot.lane.b32.xlu0 %v15991_v33, %s20528_s7  ;;  %9284 = vrot.lane.b32.xlu1 %v9281_v48, %s20526_s5  ;;  %v10458_v35 = vpop.f32.mrf.mxu0  ;;  %v13751_v33 = vsub.f32 %v23692_v50, %v25847_v27  ;;  %v13745_v34 = vand.u32 4294901760, %v13744_v21 }
 0x35f   :  { %20186 = vmatpush3.msra.mxu0 %v23620_v53  ;;  %20196 = vmatprep.subr.mxu1 %v25852_v3  ;;  %v10459_v19 = vadd.f32 %v17637_v37, %v10458_v35 }
 0x360   :  { %20187 = vmatprep.subr.mxu0 %v25852_v3  ;;  %20197 = vmatpush3.msra.mxu1 %v13731_v23  ;;  %v19799_v48 = vpop.f32.mrf.mxu0  ;;  %v13752_v21 = vand.u32 4294901760, %v13751_v33 }
 0x361   :  { %20188 = vmatpush3.msra.mxu0 %v23633_v61  ;;  %20198 = vmatprep.subr.mxu1 %v25852_v3  ;;  %v10549_v37 = vpop.f32.mrf.mxu1  ;;  %v8186_v48 = vrot.slane %v23401_v42, %v21580_v59 }
 0x362   :  { %16061 = vrot.lane.b32.xlu0 %v16041_v2, %s20529_s4  ;;  %20189 = vmatprep.subr.mxu0 %v25852_v3  ;;  %v23739_v35 = vpop.permute.xlu0 %15651  ;;  %v10550_v23 = vadd.f32 %v10549_v37, %v10459_v19  ;;  %v9785_v2 = vadd.f32 %v23520_v46, %v9710_v43  ;;  %v23761_v19 = vstv %s17667_s20  ;;  %s17686_s20 = sld [smem:[#allocation10 + $0x9]] }
 0x363   :  { %20190 = vmatpush3.msra.mxu0 %v23645_v25  ;;  %20199 = vmatpush3.msra.mxu1 %v13738_v15  ;;  %v19810_v58 = vpop.f32.mrf.mxu1  ;;  %v8197_v6 = vrot.slane %v8186_v48, %v21602_v9  ;;  %v23759_v15 = vld [vmem:[#allocation2 + $0x4] sm:$0xff]  ;;  %25982 = vst [vmem:[#allocation33_spill] sm:$0xff] %v23761_v19  ;;  %v23776_v48 = vstv %s17668_s21  ;;  %s17687_s21 = sld [smem:[#allocation10 + $0x8]] }
 0x364   :  { %20191 = vmatprep.subr.mxu0 %v25852_v3  ;;  %20200 = vmatprep.subr.mxu1 %v25852_v3  ;;  %v9789_v46 = vmul.f32 0.01, %v9785_v2  ;;  %vm9788_vm5 = vcmp.ge.f32.partialorder %v9785_v2, 0.0  ;;  %v16163_v37 = vmul.f32 %v23761_v19, %v23759_v15  ;;  %25983 = vst [vmem:[#allocation34_spill] sm:$0xff] %v23776_v48 }
 0x365   :  { %20192 = vmatpush3.msra.mxu0 %v23668_v41  ;;  %20201 = vmatpush3.msra.mxu1 %v13745_v34 }
 0x366   :  { %16111 = vrot.lane.b32.xlu0 %v16091_v49, %s20530_s8  ;;  %20193 = vmatprep.mubr.msk.f32.mxu0 %vm20524_vm1, %v25852_v3  ;;  %v9790_v58 = vsel %vm9788_vm5, %v9785_v2, %v9789_v46 }
 0x367   :  { %20202 = vmatprep.subr.mxu1 %v25852_v3  ;;  %20207 = vmatprep.subr.mxu0 %v25852_v3  ;;  %v23755_v42 = vpop.permute.xlu0 %15509  ;;  %v23787_v46 = vrot.slane %v9790_v58, %v21580_v59  ;;  %v14152_v58 = vld [vmem:[#allocation6 + $0x348] sm:$0xff] }
 0x368   :  { %20194 = vmatmul.mubr.f32.vlgmr.msra.gmra.mxu0 %v20647_v29  ;;  %20203 = vmatpush3.msra.mxu1 %v13752_v21  ;;  %v23821_v45 = vand.u32 4294901760, %v14152_v58 }
 0x369   :  { %20208 = vmatpush3.msra.mxu0 %v23641_v30  ;;  %20204 = vmatprep.mubr.msk.f32.mxu1 %vm20524_vm1, %v25852_v3  ;;  %v10629_v43 = vpop.f32.mrf.mxu0 }
 0x36a   :  { %8202 = vrot.lane.b32.xlu0 %v8197_v6, %s20526_s5  ;;  %20209 = vmatprep.subr.mxu0 %v25852_v3  ;;  %v10630_v33 = vadd.f32 %v10629_v43, %v10550_v23  ;;  %v14154_v23 = vld [vmem:[#allocation6 + $0x358] sm:$0xff]  ;;  %v14153_v43 = vld [vmem:[#allocation6 + $0x350] sm:$0xff] }
 0x36b   :  { %20218 = vmatprep.subr.mxu1 %v25852_v3  ;;  %20205 = vmatmul.mubr.f32.vlgmr.msra.gmra.mxu1 %v20617_v12  ;;  %v19821_v34 = vpop.f32.mrf.mxu0 }
 0x36c   :  { %20210 = vmatpush3.msra.mxu0 %v23660_v63  ;;  %20219 = vmatpush3.msra.mxu1 %v23620_v53  ;;  %v10706_v49 = vpop.f32.mrf.mxu1  ;;  %v16213_v34 = vmul.f32 %v23776_v48, %v23759_v15 }
 0x36d   :  { %20211 = vmatprep.subr.mxu0 %v25852_v3  ;;  %20220 = vmatprep.subr.mxu1 %v25852_v3  ;;  %v23782_v21 = vpop.permute.xlu0 %15559  ;;  %v10707_v6 = vadd.f32 %v10706_v49, %v10630_v33  ;;  %v23795_v33 = vand.u32 4294901760, %v14154_v23  ;;  %v23805_v49 = vand.u32 4294901760, %v14153_v43 }
 0x36e   :  { %16179 = vrot.lane.b32.xlu0 %v16163_v37, %s20527_s29  ;;  %20212 = vmatpush3.msra.mxu0 %v23673_v28  ;;  %v19832_v2 = vpop.f32.mrf.mxu1  ;;  %v23798_v37 = vstv %s23766_s22  ;;  %s17688_s22 = sld [smem:[#allocation10 + $0x7]] }
 0x36f   :  { %20221 = vmatpush3.msra.mxu1 %v23633_v61  ;;  %20213 = vmatprep.subr.mxu0 %v25852_v3  ;;  %25984 = vst [vmem:[#allocation35_spill] sm:$0xff] %v23798_v37  ;;  %v9799_v2 = vcombine.high %v23787_v46, %v23787_v46  ;;  %v16263_v20 = vmul.f32 %v23798_v37, %v23759_v15 }
 0x370   :  { %20222 = vmatprep.subr.mxu1 %v25852_v3  ;;  %20214 = vmatpush3.msra.mxu0 %v23692_v50  ;;  %v23819_v8 = vsub.f32 %v14154_v23, %v23795_v33 }
 0x371   :  { %20223 = vmatpush3.msra.mxu1 %v23645_v25  ;;  %20215 = vmatprep.mubr.msk.f32.mxu0 %vm20524_vm1, %v25852_v3  ;;  %v9813_v4 = vrot.slane %v9799_v2, %v21580_v59 }
 0x372   :  { %16229 = vrot.lane.b32.xlu0 %v16213_v34, %s20528_s7  ;;  %20224 = vmatprep.subr.mxu1 %v25852_v3  ;;  %v23811_v27 = vpop.permute.xlu0 %15609  ;;  %v25985_v34 = vand.u32 4294901760, %v23641_v30  ;;  %v23833_v30 = vsub.f32 %v14153_v43, %v23805_v49  ;;  %v25989_v43 = vand.u32 4294901760, %v23673_v28 }
 0x373   :  { %20229 = vmatprep.subr.mxu0 %v25852_v3  ;;  %20216 = vmatmul.mubr.f32.vlgmr.msra.gmra.mxu0 %v20629_v17  ;;  %v14151_v3 = vld [vmem:[#allocation6 + $0x340] sm:$0xff] }
 0x374   :  { %20225 = vmatpush3.msra.mxu1 %v23668_v41  ;;  %20230 = vmatpush3.msra.mxu0 %v25985_v34  ;;  %v7125_v60 = vpop.permute.xlu1 %7124  ;;  %v10789_v18 = vpop.f32.mrf.mxu0  ;;  %v25988_v34 = vand.u32 4294901760, %v23660_v63  ;;  %v23839_v55 = vand.u32 4294901760, %v14151_v3  ;;  %v23851_v63 = vld [vmem:[#allocation2 + $0x24] sm:$0xff] }
 0x375   :  { %20226 = vmatprep.mubr.msk.f32.mxu1 %vm20524_vm1, %v25987_v38  ;;  %20231 = vmatprep.subr.mxu0 %v25987_v38  ;;  %7129 = vst.msk [vmem:[#allocation2 + $0x2e] sm:$0x1] %vm647_vm7, %v7125_v60  ;;  %v10790_v32 = vadd.f32 %v10789_v18, %v10707_v6  ;;  %v16313_v18 = vmul.f32 %v23824_v36, %v23759_v15  ;;  %v14269_v60 = vand.u32 4294901760, %v23819_v8 }
 0x376   :  { %16279 = vrot.lane.b32.xlu0 %v16263_v20, %s20529_s4  ;;  %20240 = vmatprep.subr.mxu1 %v25987_v38  ;;  %v19843_v23 = vpop.f32.mrf.mxu0  ;;  %v23847_v20 = vsub.f32 %v14152_v58, %v23821_v45  ;;  %v16167_v28 = vmul.f32 %v23761_v19, %v23851_v63  ;;  %v25990_v58 = vand.u32 4294901760, %v23692_v50 }
 0x377   :  { %20227 = vmatmul.mubr.f32.vlgmr.msra.gmra.mxu1 %v20636_v22  ;;  %20232 = vmatpush3.msra.mxu0 %v25988_v34  ;;  %v10864_v56 = vpop.f32.mrf.mxu1 }
 0x378   :  { %20241 = vmatpush3.msra.mxu1 %v23620_v53  ;;  %20233 = vmatprep.subr.mxu0 %v25987_v38  ;;  %v23849_v6 = vadd.f32 %v10864_v56, %v10790_v32  ;;  %v25870_v53 = vand.u32 4294901760, %v23833_v30  ;;  %v9821_v56 = vrot.slane %v9813_v4, %v21602_v9  ;;  %v23865_v32 = vsub.f32 %v14151_v3, %v23839_v55  ;;  %v17638_v4 = vld [vmem:[#allocation8 + $0x14] ss:$0 sm:$0xff] }
 0x379   :  { %20242 = vmatprep.subr.mxu1 %v25987_v38  ;;  %20234 = vmatpush3.msra.mxu0 %v25989_v43  ;;  %v23856_v2 = vpop.permute.xlu0 %15659  ;;  %v19854_v23 = vpop.f32.mrf.mxu1  ;;  %v25872_v34 = vand.u32 4294901760, %v23847_v20 }
 0x37a   :  { %16329 = vrot.lane.b32.xlu0 %v16313_v18, %s20530_s8  ;;  %20243 = vmatpush3.msra.mxu1 %v23633_v61  ;;  %v14270_v61 = vsub.f32 %v23819_v8, %v14269_v60  ;;  %v25871_v50 = vand.u32 4294901760, %v23865_v32  ;;  %v16217_v23 = vmul.f32 %v23776_v48, %v23851_v63  ;;  %vm10868_vm8 = vcmp.ge.f32.partialorder %v23849_v6, 0.0 }
 0x37b   :  { %20235 = vmatprep.subr.mxu0 %v25987_v38  ;;  %20244 = vmatprep.subr.mxu1 %v25987_v38 }
 0x37c   :  { %20236 = vmatpush3.msra.mxu0 %v25990_v58  ;;  %20245 = vmatpush3.msra.mxu1 %v23645_v25  ;;  %v14277_v25 = vsub.f32 %v23833_v30, %v25870_v53  ;;  %v14284_v58 = vsub.f32 %v23847_v20, %v25872_v34 }
 0x37d   :  { %20237 = vmatprep.mubr.msk.f32.mxu0 %vm20524_vm1, %v25987_v38  ;;  %20246 = vmatprep.subr.mxu1 %v25987_v38  ;;  %v7123_v3 = vpop.permute.xlu0 %7122 }
 0x37e   :  { %16187 = vrot.lane.b32.xlu0 %v16167_v28, %s20527_s29  ;;  %20251 = vmatprep.subr.mxu0 %v25987_v38  ;;  %7128 = vst.msk [vmem:[#allocation2 + $0xe] sm:$0x1] %vm647_vm7, %v7123_v3  ;;  %v14271_v28 = vand.u32 4294901760, %v14270_v61  ;;  %v14291_v61 = vsub.f32 %v23865_v32, %v25871_v50 }
 0x37f   :  { %9824 = vrot.lane.b32.xlu1 %v9821_v56, %s20526_s5  ;;  %20238 = vmatmul.mubr.f32.vlgmr.msra.gmra.mxu0 %v20617_v12  ;;  %v7665_v18 = vpop.permute.xlu1 %7664  ;;  %v10998_v43 = vpop.f32.mrf.mxu0 }
 0x380   :  { %20247 = vmatpush3.msra.mxu1 %v23668_v41  ;;  %20252 = vmatpush3.msra.mxu0 %v23795_v33  ;;  %7669 = vst.msk [vmem:[#allocation2 + $0x2f] sm:$0x1] %vm647_vm7, %v7665_v18  ;;  %v10999_v56 = vadd.f32 %v17638_v4, %v10998_v43  ;;  %v14278_v41 = vand.u32 4294901760, %v14277_v25  ;;  %v16267_v18 = vmul.f32 %v23798_v37, %v23851_v63  ;;  %v14285_v43 = vand.u32 4294901760, %v14284_v58 }
 0x381   :  { %20248 = vmatprep.mubr.msk.f32.mxu1 %vm20524_vm1, %v25987_v38  ;;  %20253 = vmatprep.subr.mxu0 %v25987_v38  ;;  %v19865_v3 = vpop.f32.mrf.mxu0  ;;  %v8726_v58 = vrot.slane %v23567_v39, %v21580_v59 }
 0x382   :  { %16237 = vrot.lane.b32.xlu0 %v16217_v23, %s20528_s7  ;;  %20262 = vmatprep.subr.mxu1 %v25987_v38  ;;  %v11089_v53 = vpop.f32.mrf.mxu1 }
 0x383   :  { %20249 = vmatmul.mubr.f32.vlgmr.msra.gmra.mxu1 %v20617_v12  ;;  %20254 = vmatpush3.msra.mxu0 %v23805_v49  ;;  %v11090_v4 = vadd.f32 %v11089_v53, %v10999_v56  ;;  %v14292_v53 = vand.u32 4294901760, %v14291_v61  ;;  %v9266_v61 = vrot.slane %v23628_v57, %v21580_v59  ;;  %v14693_v57 = vld [vmem:[#allocation6 + $0x370] sm:$0xff] }
 0x384   :  { %20263 = vmatpush3.msra.mxu1 %v14271_v28  ;;  %20255 = vmatprep.subr.mxu0 %v25987_v38  ;;  %v23909_v23 = vpop.permute.xlu0 %15727  ;;  %v19876_v25 = vpop.f32.mrf.mxu1  ;;  %v16317_v28 = vmul.f32 %v23824_v36, %v23851_v63 }
 0x385   :  { %20264 = vmatprep.subr.mxu1 %v25987_v38  ;;  %20256 = vmatpush3.msra.mxu0 %v23821_v45 }
 0x386   :  { %16287 = vrot.lane.b32.xlu0 %v16267_v18, %s20529_s4  ;;  %20265 = vmatpush3.msra.mxu1 %v14278_v41  ;;  %v8737_v18 = vrot.slane %v8726_v58, %v21602_v9  ;;  %v9277_v58 = vrot.slane %v9266_v61, %v21602_v9 }
 0x387   :  { %20257 = vmatprep.subr.mxu0 %v25987_v38  ;;  %20266 = vmatprep.subr.mxu1 %v25987_v38 }
 0x388   :  { %20258 = vmatpush3.msra.mxu0 %v23839_v55  ;;  %20267 = vmatpush3.msra.mxu1 %v14285_v43  ;;  %v14694_v43 = vld [vmem:[#allocation6 + $0x378] sm:$0xff] }
 0x389   :  { %20259 = vmatprep.mubr.msk.f32.mxu0 %vm20524_vm1, %v25987_v38  ;;  %20268 = vmatprep.subr.mxu1 %v25987_v38  ;;  %v23924_v56 = vpop.permute.xlu0 %15777 }
 0x38a   :  { %16337 = vrot.lane.b32.xlu0 %v16317_v28, %s20530_s8  ;;  %20273 = vmatprep.subr.mxu0 %v25987_v38  ;;  %v11169_v3 = vpop.f32.mrf.mxu0 }
 0x38b   :  { %20260 = vmatmul.mubr.f32.vlgmr.msra.gmra.mxu0 %v20647_v29  ;;  %20269 = vmatpush3.msra.mxu1 %v14292_v53  ;;  %v11170_v41 = vadd.f32 %v11169_v3, %v11090_v4  ;;  %v23946_v3 = vand.u32 4294901760, %v14694_v43 }
 0x38c   :  { %20274 = vmatpush3.msra.mxu0 %v23819_v8  ;;  %20270 = vmatprep.mubr.msk.f32.mxu1 %vm20524_vm1, %v25987_v38  ;;  %v19887_v39 = vpop.f32.mrf.mxu0  ;;  %v25991_v8 = vand.u32 4294901760, %v23833_v30 }
 0x38d   :  { %20275 = vmatprep.subr.mxu0 %v25987_v38  ;;  %20284 = vmatprep.subr.mxu1 %v25987_v38  ;;  %v11246_v25 = vpop.f32.mrf.mxu1  ;;  %v9806_v39 = vrot.slane %v23787_v46, %v21580_v59  ;;  %v23962_v61 = vsub.f32 %v14694_v43, %v23946_v3  ;;  %v14691_v46 = vld [vmem:[#allocation6 + $0x360] sm:$0xff] }
 0x38e   :  { %20271 = vmatmul.mubr.f32.vlgmr.msra.gmra.mxu1 %v20617_v12  ;;  %20276 = vmatpush3.msra.mxu0 %v23833_v30  ;;  %v11247_v4 = vadd.f32 %v11246_v25, %v11170_v41  ;;  %v14692_v41 = vld [vmem:[#allocation6 + $0x368] sm:$0xff]  ;;  %v23980_v34 = vand.u32 4294901760, %v14691_v46 }
 0x38f   :  { %20285 = vmatpush3.msra.mxu1 %v23795_v33  ;;  %8742 = vrot.lane.b32.xlu0 %v8737_v18, %s20526_s5  ;;  %v23941_v53 = vpop.permute.xlu0 %15827  ;;  %v19898_v28 = vpop.f32.mrf.mxu1  ;;  %v23954_v18 = vand.u32 4294901760, %v14693_v57  ;;  %v23964_v25 = vand.u32 4294901760, %v14692_v41  ;;  %v14809_v37 = vand.u32 4294901760, %v23962_v61 }
 0x390   :  { %20277 = vmatprep.subr.mxu0 %v25987_v38  ;;  %20286 = vmatprep.subr.mxu1 %v25987_v38 }
 0x391   :  { %20278 = vmatpush3.msra.mxu0 %v23847_v20  ;;  %20287 = vmatpush3.msra.mxu1 %v23805_v49  ;;  %v23974_v50 = vsub.f32 %v14693_v57, %v23954_v18 }
 0x392   :  { %20279 = vmatprep.subr.mxu0 %v25987_v38  ;;  %20288 = vmatprep.subr.mxu1 %v25987_v38 }
 0x393   :  { %20280 = vmatpush3.msra.mxu0 %v23865_v32  ;;  %20289 = vmatpush3.msra.mxu1 %v23821_v45 }
 0x394   :  { %9282 = vrot.lane.b32.xlu0 %v9277_v58, %s20526_s5  ;;  %20281 = vmatprep.mubr.msk.f32.mxu0 %vm20524_vm1, %v25987_v38  ;;  %v23966_v28 = vpop.permute.xlu0 %15877  ;;  %v9817_v58 = vrot.slane %v9806_v39, %v21602_v9  ;;  %v23986_v39 = vsub.f32 %v14692_v41, %v23964_v25  ;;  %v24001_v41 = vsub.f32 %v14691_v46, %v23980_v34  ;;  %v17639_v46 = vld [vmem:[#allocation8 + $0x15] ss:$0 sm:$0xff] }
 0x395   :  { %20290 = vmatprep.subr.mxu1 %v25987_v38  ;;  %20295 = vmatprep.subr.mxu0 %v25987_v38 }
 0x396   :  { %20282 = vmatmul.mubr.f32.vlgmr.msra.gmra.mxu0 %v20629_v17  ;;  %20291 = vmatpush3.msra.mxu1 %v23839_v55  ;;  %v11329_v43 = vpop.f32.mrf.mxu0 }
 0x397   :  { %20296 = vmatpush3.msra.mxu0 %v14269_v60  ;;  %20292 = vmatprep.mubr.msk.f32.mxu1 %vm20524_vm1, %v25987_v38  ;;  %v11330_v36 = vadd.f32 %v11329_v43, %v11247_v4  ;;  %v25880_v4 = vand.u32 4294901760, %v23974_v50 }
 0x398   :  { %20297 = vmatprep.subr.mxu0 %v25987_v38  ;;  %20306 = vmatprep.subr.mxu1 %v25987_v38  ;;  %v19909_v57 = vpop.f32.mrf.mxu0 }
 0x399   :  { %20293 = vmatmul.mubr.f32.vlgmr.msra.gmra.mxu1 %v20636_v22  ;;  %20298 = vmatpush3.msra.mxu0 %v25991_v8  ;;  %v11404_v60 = vpop.f32.mrf.mxu1  ;;  %v25992_v57 = vand.u32 4294901760, %v23847_v20  ;;  %v14817_v20 = vsub.f32 %v23974_v50, %v25880_v4 }
 0x39a   :  { %20307 = vmatpush3.msra.mxu1 %v23795_v33  ;;  %9822 = vrot.lane.b32.xlu0 %v9817_v58, %s20526_s5  ;;  %v23994_v43 = vpop.permute.xlu0 %15735  ;;  %v23996_v48 = vadd.f32 %v11404_v60, %v11330_v36  ;;  %v14810_v33 = vsub.f32 %v23962_v61, %v14809_v37  ;;  %v25879_v36 = vand.u32 4294901760, %v23986_v39  ;;  %v25993_v58 = vand.u32 4294901760, %v23865_v32 }
 0x39b   :  { %20299 = vmatprep.subr.mxu0 %v25987_v38  ;;  %20308 = vmatprep.subr.mxu1 %v25987_v38  ;;  %v19920_v30 = vpop.f32.mrf.mxu1 }
 0x39c   :  { %20300 = vmatpush3.msra.mxu0 %v25992_v57  ;;  %20309 = vmatpush3.msra.mxu1 %v23805_v49  ;;  %v14830_v49 = vand.u32 4294901760, %v24001_v41  ;;  %v14811_v32 = vand.u32 4294901760, %v14810_v33  ;;  %v14818_v57 = vand.u32 4294901760, %v14817_v20 }
 0x39d   :  { %20301 = vmatprep.subr.mxu0 %v25987_v38  ;;  %20310 = vmatprep.subr.mxu1 %v25987_v38 }
 0x39e   :  { %20302 = vmatpush3.msra.mxu0 %v25993_v58  ;;  %20311 = vmatpush3.msra.mxu1 %v23821_v45  ;;  %v14824_v45 = vsub.f32 %v23986_v39, %v25879_v36 }
 0x39f   :  { %20303 = vmatprep.mubr.msk.f32.mxu0 %vm20524_vm1, %v25987_v38  ;;  %20312 = vmatprep.subr.mxu1 %v25987_v38  ;;  %v24027_v8 = vpop.permute.xlu0 %15785 }
 0x3a0   :  { %20317 = vmatprep.subr.mxu0 %v25987_v38  ;;  %20304 = vmatmul.mubr.f32.vlgmr.msra.gmra.mxu0 %v20617_v12  ;;  %v14825_v36 = vand.u32 4294901760, %v14824_v45 }
 0x3a1   :  { %20313 = vmatpush3.msra.mxu1 %v23839_v55  ;;  %20318 = vmatpush3.msra.mxu0 %v23946_v3  ;;  %v8205_v60 = vpop.permute.xlu1 %8204  ;;  %v11538_v30 = vpop.f32.mrf.mxu0  ;;  %v14831_v55 = vsub.f32 %v24001_v41, %v14830_v49 }
 0x3a2   :  { %20314 = vmatprep.mubr.msk.f32.mxu1 %vm20524_vm1, %v25987_v38  ;;  %20319 = vmatprep.subr.mxu0 %v25987_v38  ;;  %8209 = vst.msk [vmem:[#allocation2 + $0x30] sm:$0x1] %vm647_vm7, %v8205_v60  ;;  %v11539_v33 = vadd.f32 %v17639_v46, %v11538_v30 }
 0x3a3   :  { %20328 = vmatprep.subr.mxu1 %v25987_v38  ;;  %20315 = vmatmul.mubr.f32.vlgmr.msra.gmra.mxu1 %v20617_v12  ;;  %v19931_v58 = vpop.f32.mrf.mxu0  ;;  %v14832_v30 = vand.u32 4294901760, %v14831_v55 }
 0x3a4   :  { %20320 = vmatpush3.msra.mxu0 %v23954_v18  ;;  %20329 = vmatpush3.msra.mxu1 %v14811_v32  ;;  %v11629_v4 = vpop.f32.mrf.mxu1  ;;  %v10329_v32 = vmul.f32 0.01, %v23694_v14 }
 0x3a5   :  { %20321 = vmatprep.subr.mxu0 %v25987_v38  ;;  %20330 = vmatprep.subr.mxu1 %v25987_v38  ;;  %v11630_v20 = vadd.f32 %v11629_v4, %v11539_v33 }
 0x3a6   :  { %20322 = vmatpush3.msra.mxu0 %v23964_v25  ;;  %20331 = vmatpush3.msra.mxu1 %v14818_v57  ;;  %v24044_v46 = vpop.permute.xlu0 %15835  ;;  %v19942_v60 = vpop.f32.mrf.mxu1 }
 0x3a7   :  { %20323 = vmatprep.subr.mxu0 %v25987_v38  ;;  %20332 = vmatprep.subr.mxu1 %v25987_v38  ;;  %v24074_v60 = vstv %s17646_s23  ;;  %s17690_s23 = sld [smem:[#allocation10 + $0x5]] }
 0x3a8   :  { %20324 = vmatpush3.msra.mxu0 %v23980_v34  ;;  %20333 = vmatpush3.msra.mxu1 %v14825_v36  ;;  %v10330_v36 = vsel %vm10328_vm6, %v23694_v14, %v10329_v32  ;;  %v10869_v32 = vmul.f32 0.01, %v23849_v6 }
 0x3a9   :  { %20325 = vmatprep.mubr.msk.f32.mxu0 %vm20524_vm1, %v25987_v38  ;;  %20334 = vmatprep.subr.mxu1 %v25987_v38  ;;  %v10338_v33 = vrot.slane %v10330_v36, %v21580_v59  ;;  %v20401_v36 = vld [vmem:[#allocation2] sm:$0xff] }
 0x3aa   :  { %20339 = vmatprep.subr.mxu0 %v25987_v38  ;;  %20326 = vmatmul.mubr.f32.vlgmr.msra.gmra.mxu0 %v20647_v29  ;;  %v24057_v4 = vpop.permute.xlu0 %15885 }
 0x3ab   :  { %20335 = vmatpush3.msra.mxu1 %v14832_v30  ;;  %20340 = vmatpush3.msra.mxu0 %v23962_v61  ;;  %v10339_v30 = vcombine.high %v10338_v33, %v10338_v33  ;;  %v10346_v61 = vrot.slane %v10338_v33, %v21580_v59 }
 0x3ac   :  { %20336 = vmatprep.mubr.msk.f32.mxu1 %vm20524_vm1, %v25987_v38  ;;  %20341 = vmatprep.subr.mxu0 %v25987_v38  ;;  %v11709_v45 = vpop.f32.mrf.mxu0 }
 0x3ad   :  { %20350 = vmatprep.subr.mxu1 %v25987_v38  ;;  %20337 = vmatmul.mubr.f32.vlgmr.msra.gmra.mxu1 %v20617_v12  ;;  %v11710_v57 = vadd.f32 %v11709_v45, %v11630_v20  ;;  %v15241_v45 = vmul.f32 %v20401_v36, %v24074_v60 }
 0x3ae   :  { %20342 = vmatpush3.msra.mxu0 %v23974_v50  ;;  %20351 = vmatpush3.msra.mxu1 %v23946_v3  ;;  %v19953_v29 = vpop.f32.mrf.mxu0 }
 0x3af   :  { %20343 = vmatprep.subr.mxu0 %v25987_v38  ;;  %20352 = vmatprep.subr.mxu1 %v25987_v38  ;;  %v11786_v55 = vpop.f32.mrf.mxu1  ;;  %v15299_v29 = vadd.f32 %v23408_v5, %v15241_v45 }
 0x3b0   :  { %20344 = vmatpush3.msra.mxu0 %v23986_v39  ;;  %20353 = vmatpush3.msra.mxu1 %v23954_v18  ;;  %v11787_v14 = vadd.f32 %v11786_v55, %v11710_v57  ;;  %v10870_v55 = vsel %vm10868_vm8, %v23849_v6, %v10869_v32  ;;  %vm17600_vm8 = vcmask 228352  }
 0x3b1   :  { %20345 = vmatprep.subr.mxu0 %v25987_v38  ;;  %20354 = vmatprep.subr.mxu1 %v25987_v38  ;;  %v7663_v58 = vpop.permute.xlu0 %7662  ;;  %v19964_v20 = vpop.f32.mrf.mxu1  ;;  %v15349_v5 = vadd.f32 %v23424_v31, %v15299_v29  ;;  %v24113_v6 = vrot.slane %v10870_v55, %v21580_v59 }
 0x3b2   :  { %20346 = vmatpush3.msra.mxu0 %v24001_v41  ;;  %20355 = vmatpush3.msra.mxu1 %v23964_v25  ;;  %7668 = vst.msk [vmem:[#allocation2 + $0xf] sm:$0x1] %vm647_vm7, %v7663_v58  ;;  %v20402_v41 = vld [vmem:[#allocation2 + $0x1] sm:$0xff] }
 0x3b3   :  { %20347 = vmatprep.mubr.msk.f32.mxu0 %vm20524_vm1, %v25987_v38  ;;  %20356 = vmatprep.subr.mxu1 %v25987_v38  ;;  %v10886_v32 = vrot.slane %v24113_v6, %v21580_v59 }
 0x3b4   :  { %20361 = vmatprep.subr.mxu0 %v25987_v38  ;;  %20348 = vmatmul.mubr.f32.vlgmr.msra.gmra.mxu0 %v20629_v17  ;;  %v10353_v17 = vrot.slane %v10339_v30, %v21580_v59  ;;  %v25995_v30 = vand.u32 4294901760, %v23986_v39 }
 0x3b5   :  { %20357 = vmatpush3.msra.mxu1 %v23980_v34  ;;  %20362 = vmatpush3.msra.mxu0 %v14809_v37  ;;  %v24095_v57 = vpop.permute.xlu0 %15953  ;;  %v25994_v37 = vand.u32 4294901760, %v23974_v50 }
 0x3b6   :  { %20358 = vmatprep.mubr.msk.f32.mxu1 %vm20524_vm1, %v25987_v38  ;;  %20363 = vmatprep.subr.mxu0 %v25987_v38  ;;  %v10361_v31 = vrot.slane %v10353_v17, %v21602_v9 }
 0x3b7   :  { %20372 = vmatprep.subr.mxu1 %v25987_v38  ;;  %20359 = vmatmul.mubr.f32.vlgmr.msra.gmra.mxu1 %v20636_v22  ;;  %v11869_v58 = vpop.f32.mrf.mxu0 }
 0x3b8   :  { %20364 = vmatpush3.msra.mxu0 %v25994_v37  ;;  %20373 = vmatpush3.msra.mxu1 %v23946_v3  ;;  %v11870_v20 = vadd.f32 %v11869_v58, %v11787_v14  ;;  %v15399_v3 = vadd.f32 %v23446_v44, %v15349_v5  ;;  %v24122_v14 = vstv %s24083_s24  ;;  %v10357_v44 = vrot.slane %v10346_v61, %v21602_v9  ;;  %s17692_s24 = sld [smem:[#allocation10 + $0x3]] }
 0x3b9   :  { %20365 = vmatprep.subr.mxu0 %v25987_v38  ;;  %20374 = vmatprep.subr.mxu1 %v25987_v38  ;;  %v19975_v22 = vpop.f32.mrf.mxu0  ;;  %v24130_v39 = vld [vmem:[#allocation2 + $0x8] sm:$0xff] }
 0x3ba   :  { %20366 = vmatpush3.msra.mxu0 %v25995_v30  ;;  %20375 = vmatpush3.msra.mxu1 %v23954_v18  ;;  %v11944_v50 = vpop.f32.mrf.mxu1  ;;  %v15449_v45 = vadd.f32 %v23471_v62, %v15399_v3  ;;  %v15260_v29 = vmul.f32 %v22838_v54, %v24130_v39  ;;  %v10897_v62 = vrot.slane %v10886_v32, %v21602_v9  ;;  %v24168_v3 = vstv %s17656_s25  ;;  %s17693_s25 = sld [smem:[#allocation10 + $0x2]] }
 0x3bb   :  { %20367 = vmatprep.subr.mxu0 %v25987_v38  ;;  %20376 = vmatprep.subr.mxu1 %v25987_v38  ;;  %v24119_v33 = vadd.f32 %v11944_v50, %v11870_v20  ;;  %v15310_v20 = vmul.f32 %v22873_v13, %v24130_v39 }
 0x3bc   :  { %20368 = vmatpush3.msra.mxu0 %v14830_v49  ;;  %20369 = vmatprep.mubr.msk.f32.mxu0 %vm20524_vm1, %v25987_v38  ;;  %v24128_v18 = vpop.permute.xlu0 %16003  ;;  %v19986_v36 = vpop.f32.mrf.mxu1  ;;  %v15467_v49 = vmul.f32 %v20402_v41, %v24122_v14 }
 0x3bd   :  { %20377 = vmatpush3.msra.mxu1 %v23964_v25  ;;  %20370 = vmatmul.mubr.f32.vlgmr.msra.gmra.mxu0 %v20617_v12  ;;  %v20404_v36 = vld [vmem:[#allocation2 + $0x2] sm:$0xff]  ;;  %vm11948_vm10 = vcmp.ge.f32.partialorder %v24119_v33, 0.0 }
 0x3be   :  { %20378 = vmatprep.subr.mxu1 %v25987_v38  ;;  %20380 = vmatprep.mubr.msk.f32.mxu1 %vm20524_vm1, %v25987_v38  ;;  %v15475_v25 = vadd.f32 %v15467_v49, %v15449_v45  ;;  %vm11408_vm1 = vcmp.ge.f32.partialorder %v23996_v48, 0.0 }
 0x3bf   :  { %20379 = vmatpush3.msra.mxu1 %v23980_v34  ;;  %10364 = vrot.lane.b32.xlu1 %v10361_v31, %s20526_s5 }
 0x3c0   :  { %20381 = vmatmul.mubr.f32.vlgmr.msra.gmra.mxu1 %v20617_v12  ;;  %10362 = vrot.lane.b32.xlu0 %v10357_v44, %s20526_s5  ;;  %v24149_v17 = vpop.permute.xlu0 %16053  ;;  %v15525_v34 = vadd.f32 %v23647_v1, %v15475_v25  ;;  %v20403_v12 = vld [vmem:[#allocation2 + $0x20] sm:$0xff]  ;;  %v15360_v44 = vmul.f32 %v22911_v47, %v24130_v39 }
 0x3c1   :  { %v15245_v37 = vmul.f32 %v20403_v12, %v24074_v60 }
 0x3c2   :  { %v8745_v38 = vpop.permute.xlu1 %8744  ;;  %v24151_v55 = vpop.f32.mrf.mxu0  ;;  %v15575_v61 = vadd.f32 %v23684_v10, %v15525_v34 }
 0x3c3   :  { %15277 = vrot.lane.b32.xlu1 %v15260_v29, %s20527_s29  ;;  %8749 = vst.msk [vmem:[#allocation2 + $0x31] sm:$0x1] %vm647_vm7, %v8745_v38  ;;  %v15303_v22 = vadd.f32 %v23512_v26, %v15245_v37  ;;  %v15693_v26 = vmul.f32 %v20404_v36, %v24168_v3  ;;  %v20405_v29 = vld [vmem:[#allocation2 + $0x21] sm:$0xff] }
 0x3c4   :  { %10902 = vrot.lane.b32.xlu0 %v10897_v62, %s20526_s5  ;;  %v19997_v58 = vpop.f32.mrf.mxu0  ;;  %v15625_v1 = vadd.f32 %v23717_v0, %v15575_v61 }
 0x3c5   :  { %v24161_v5 = vpop.f32.mrf.mxu1  ;;  %v15353_v31 = vadd.f32 %v23543_v16, %v15303_v22  ;;  %v15410_v16 = vmul.f32 %v22928_v40, %v24130_v39  ;;  %v24200_v22 = vstv %s17661_s2  ;;  %s17694_s2 = sld [smem:[#allocation10 + $0x1]] }
 0x3c6   :  { %v15675_v10 = vadd.f32 %v23739_v35, %v15625_v1  ;;  %v24182_v35 = vld [vmem:[#allocation2 + $0x28] sm:$0xff] }
 0x3c7   :  { %15327 = vrot.lane.b32.xlu1 %v15310_v20, %s20528_s7  ;;  %v24166_v30 = vpop.permute.xlu0 %16103  ;;  %v20008_v50 = vpop.f32.mrf.mxu1  ;;  %v15403_v32 = vadd.f32 %v23576_v52, %v15353_v31  ;;  %v15471_v52 = vmul.f32 %v20405_v29, %v24122_v14  ;;  %v15264_v58 = vmul.f32 %v22838_v54, %v24182_v35  ;;  %v15314_v31 = vmul.f32 %v22873_v13, %v24182_v35 }
 0x3c8   :  { %v15701_v41 = vadd.f32 %v15693_v26, %v15675_v10 }
 0x3c9   :  { %v15453_v45 = vadd.f32 %v23594_v7, %v15403_v32 }
 0x3ca   :  { %v15751_v62 = vadd.f32 %v23909_v23, %v15701_v41 }
 0x3cb   :  { %15377 = vrot.lane.b32.xlu1 %v15360_v44, %s20529_s4  ;;  %v15479_v34 = vadd.f32 %v15471_v52, %v15453_v45  ;;  %v20406_v44 = vld [vmem:[#allocation2 + $0x3] sm:$0xff] }
 0x3cc   :  { %v24177_v0 = vpop.permute.xlu0 %15961  ;;  %v15801_v7 = vadd.f32 %v23924_v56, %v15751_v62 }
 0x3cd   :  { %v15529_v61 = vadd.f32 %v23755_v42, %v15479_v34  ;;  %v15919_v42 = vmul.f32 %v20406_v44, %v24200_v22 }
 0x3ce   :  { %v24184_v49 = vpop.f32.mrf.mxu0  ;;  %v15851_v23 = vadd.f32 %v23941_v53, %v15801_v7  ;;  %v10879_v53 = vcombine.high %v24113_v6, %v24113_v6 }
 0x3cf   :  { %15427 = vrot.lane.b32.xlu1 %v15410_v16, %s20530_s8  ;;  %v15579_v56 = vadd.f32 %v23782_v21, %v15529_v61 }
 0x3d0   :  { %v24189_v25 = vpop.permute.xlu0 %16011  ;;  %v9285_v38 = vpop.permute.xlu1 %9284  ;;  %v15901_v50 = vadd.f32 %v23966_v28, %v15851_v23  ;;  %v15364_v28 = vmul.f32 %v22911_v47, %v24182_v35  ;;  %v10893_v6 = vrot.slane %v10879_v53, %v21580_v59 }
 0x3d1   :  { %9289 = vst.msk [vmem:[#allocation2 + $0x32] sm:$0x1] %vm647_vm7, %v9285_v38  ;;  %v20019_v12 = vpop.f32.mrf.mxu0  ;;  %v24195_v37 = vpop.f32.mrf.mxu1  ;;  %v15629_v10 = vadd.f32 %v23811_v27, %v15579_v56  ;;  %v20407_v27 = vld [vmem:[#allocation2 + $0x22] sm:$0xff]  ;;  %v15414_v38 = vmul.f32 %v22928_v40, %v24182_v35 }
 0x3d2   :  { %v15927_v36 = vadd.f32 %v15919_v42, %v15901_v50  ;;  %v15697_v45 = vmul.f32 %v20407_v27, %v24168_v3  ;;  %v24234_v12 = vstv %s17666_s3  ;;  %v17641_v27 = vld [vmem:[#allocation8 + $0x17] ss:$0 sm:$0xff]  ;;  %s17517_s3 = sld [smem:[#allocation10]] }
 0x3d3   :  { %15285 = vrot.lane.b32.xlu1 %v15264_v58, %s20527_s29  ;;  %v20030_v20 = vpop.f32.mrf.mxu1  ;;  %v15679_v21 = vadd.f32 %v23856_v2, %v15629_v10  ;;  %v10901_v58 = vrot.slane %v10893_v6, %v21602_v9  ;;  %v16145_v50 = vmul.f32 %v24234_v12, %v23759_v15 }
 0x3d4   :  { %v24202_v1 = vpop.permute.xlu0 %16061  ;;  %v15977_v41 = vadd.f32 %v24095_v57, %v15927_v36  ;;  %v17640_v20 = vld [vmem:[#allocation8 + $0x16] ss:$0 sm:$0xff] }
 0x3d5   :  { %v15705_v2 = vadd.f32 %v15697_v45, %v15679_v21 }
 0x3d6   :  { %v16027_v62 = vadd.f32 %v24128_v18, %v15977_v41 }
 0x3d7   :  { %15335 = vrot.lane.b32.xlu1 %v15314_v31, %s20528_s7  ;;  %v15755_v7 = vadd.f32 %v23994_v43, %v15705_v2  ;;  %v12079_v31 = vadd.f32 %v17640_v20, %v24151_v55  ;;  %v24255_v2 = vstv %s15230_s26  ;;  %v25997_v20 = vld [vmem:[#allocation24_spill] sm:$0xff]  ;;  %s17691_s26 = sld [smem:[#allocation10 + $0x4]] }
 0x3d8   :  { %v24213_v32 = vpop.permute.xlu0 %16111  ;;  %v16077_v57 = vadd.f32 %v24149_v17, %v16027_v62  ;;  %25996 = vst [vmem:[#allocation37_spill] sm:$0xff] %v24255_v2 }
 0x3d9   :  { %v24218_v26 = vpop.f32.mrf.mxu0  ;;  %v15805_v23 = vadd.f32 %v24027_v8, %v15755_v7 }
 0x3da   :  { %v16127_v18 = vadd.f32 %v24166_v30, %v16077_v57 }
 0x3db   :  { %15385 = vrot.lane.b32.xlu1 %v15364_v28, %s20529_s4  ;;  %v20041_v16 = vpop.f32.mrf.mxu0  ;;  %v15855_v56 = vadd.f32 %v24044_v46, %v15805_v23  ;;  %v20408_v46 = vld [vmem:[#allocation2 + $0x23] sm:$0xff]  ;;  %v12170_v28 = vadd.f32 %v24161_v5, %v12079_v31  ;;  %v11409_v23 = vmul.f32 0.01, %v23996_v48 }
 0x3dc   :  { %v8203_v29 = vpop.permute.xlu0 %8202  ;;  %v24224_v52 = vpop.f32.mrf.mxu1  ;;  %v16153_v8 = vadd.f32 %v16145_v50, %v16127_v18  ;;  %v15923_v53 = vmul.f32 %v20408_v46, %v24200_v22  ;;  %v24271_v31 = vld [vmem:[#allocation2 + $0x29] sm:$0xff] }
 0x3dd   :  { %8208 = vst.msk [vmem:[#allocation2 + $0x10] sm:$0x1] %vm647_vm7, %v8203_v29  ;;  %v15905_v44 = vadd.f32 %v24057_v4, %v15855_v56 }
 0x3de   :  { %v20052_v34 = vpop.f32.mrf.mxu1 }
 0x3df   :  { %15435 = vrot.lane.b32.xlu1 %v15414_v38, %s20530_s8  ;;  %v15931_v55 = vadd.f32 %v15923_v53, %v15905_v44  ;;  %v12250_v38 = vadd.f32 %v24184_v49, %v12170_v28  ;;  %v16149_v44 = vmul.f32 %v24234_v12, %v23851_v63  ;;  %v15490_v53 = vmul.f32 %v23079_v11, %v24271_v31 }
 0x3e0   :  { %v16180_v61 = vpop.permute.xlu0 %16179 }
 0x3e1   :  { %v16203_v15 = vadd.f32 %v16180_v61, %v16153_v8  ;;  %v15981_v6 = vadd.f32 %v24177_v0, %v15931_v55  ;;  %v12327_v49 = vadd.f32 %v24195_v37, %v12250_v38  ;;  %v15540_v55 = vmul.f32 %v23099_v51, %v24271_v31 }
 0x3e3   :  { %10904 = vrot.lane.b32.xlu1 %v10901_v58, %s20526_s5  ;;  %v16031_v5 = vadd.f32 %v24189_v25, %v15981_v6 }
 0x3e4   :  { %v16230_v43 = vpop.permute.xlu0 %16229  ;;  %v24242_v17 = vld [vmem:[#allocation2 + $0x9] sm:$0xff]  ;;  %v12618_v10 = vpop.f32.mrf.mxu0 }
 0x3e5   :  { %v15486_v30 = vmul.f32 %v23079_v11, %v24242_v17  ;;  %v16253_v45 = vadd.f32 %v16230_v43, %v16203_v15  ;;  %v15536_v4 = vmul.f32 %v23099_v51, %v24242_v17  ;;  %v12619_v29 = vadd.f32 %v17641_v27, %v12618_v10 }
 0x3e6   :  { %v20063_v42 = vpop.f32.mrf.mxu0  ;;  %v15586_v7 = vmul.f32 %v23115_v24, %v24242_v17  ;;  %v16081_v57 = vadd.f32 %v24202_v1, %v16031_v5  ;;  %v15636_v56 = vmul.f32 %v25997_v20, %v24242_v17  ;;  %v12410_v15 = vadd.f32 %v24218_v26, %v12327_v49 }
 0x3e7   :  { %15503 = vrot.lane.b32.xlu1 %v15486_v30, %s20527_s29  ;;  %v12709_v21 = vpop.f32.mrf.mxu1  ;;  %v11949_v27 = vmul.f32 0.01, %v24119_v33 }
 0x3e8   :  { %v16280_v36 = vpop.permute.xlu0 %16279  ;;  %v12710_v0 = vadd.f32 %v12709_v21, %v12619_v29  ;;  %v16131_v25 = vadd.f32 %v24213_v32, %v16081_v57  ;;  %v11410_v32 = vsel %vm11408_vm1, %v23996_v48, %v11409_v23 }
 0x3e9   :  { %v20074_v41 = vpop.f32.mrf.mxu1  ;;  %v16303_v16 = vadd.f32 %v16280_v36, %v16253_v45  ;;  %v11418_v63 = vrot.slane %v11410_v32, %v21580_v59  ;;  %v12485_v45 = vadd.f32 %v24224_v52, %v12410_v15 }
 0x3ea   :  { %v16157_v46 = vadd.f32 %v16149_v44, %v16131_v25 }
 0x3eb   :  { %15553 = vrot.lane.b32.xlu1 %v15536_v4, %s20528_s7  ;;  %v11419_v6 = vcombine.high %v11418_v63, %v11418_v63  ;;  %v12489_v38 = vmul.f32 0.01, %v12485_v45  ;;  %vm12488_vm11 = vcmp.ge.f32.partialorder %v12485_v45, 0.0 }
 0x3ec   :  { %v16330_v62 = vpop.permute.xlu0 %16329 }
 0x3ed   :  { %v16353_v34 = vadd.f32 %v16330_v62, %v16303_v16  ;;  %v11950_v62 = vsel %vm11948_vm10, %v24119_v33, %v11949_v27  ;;  %v15640_v33 = vmul.f32 %v25997_v20, %v24271_v31  ;;  %v12490_v23 = vsel %vm12488_vm11, %v12485_v45, %v12489_v38 }
 0x3ee   :  { %v24549_v20 = vstv %s17680_s1 }
 0x3ef   :  { %v16362_v58 = vadd.f32 %v24255_v2, %v16353_v34  ;;  %15603 = vrot.lane.b32.xlu1 %v15586_v7, %s20529_s4  ;;  %v12789_v61 = vpop.f32.mrf.mxu0  ;;  %v15590_v34 = vmul.f32 %v23115_v24, %v24271_v31  ;;  %26020 = vst [vmem:[#allocation49_spill] sm:$0xff] %v24549_v20  ;;  %v24560_v24 = vstv %s17682_s13 }
 0x3f0   :  { %v16188_v18 = vpop.permute.xlu0 %16187  ;;  %v12790_v8 = vadd.f32 %v12789_v61, %v12710_v0  ;;  %v24298_v61 = vrot.slane %v11950_v62, %v21580_v59  ;;  %v26000_v62 = vld [vmem:[#allocation27_spill] sm:$0xff]  ;;  %26022 = vst [vmem:[#allocation51_spill] sm:$0xff] %v24560_v24 }
 0x3f1   :  { %vm16370_vm9 = vcmp.ge.f32.partialorder %v16362_v58, 0.0  ;;  %v16378_v1 = vmul.f32 0.01, %v16362_v58  ;;  %v9825_v50 = vpop.permute.xlu1 %9824  ;;  %v20085_v43 = vpop.f32.mrf.mxu0  ;;  %v16207_v21 = vadd.f32 %v16188_v18, %v16157_v46 }
 0x3f2   :  { %9829 = vst.msk [vmem:[#allocation2 + $0x33] sm:$0x1] %vm647_vm7, %v9825_v50  ;;  %v12866_v10 = vpop.f32.mrf.mxu1  ;;  %v11966_v43 = vrot.slane %v24298_v61, %v21580_v59 }
 0x3f3   :  { %15653 = vrot.lane.b32.xlu1 %v15636_v56, %s20530_s8  ;;  %v16386_v37 = vsel %vm16370_vm9, %v16362_v58, %v16378_v1  ;;  %v12867_v36 = vadd.f32 %v12866_v10, %v12790_v8  ;;  %v11433_v58 = vrot.slane %v11419_v6, %v21580_v59  ;;  %v11426_v56 = vrot.slane %v11418_v63, %v21580_v59 }
 0x3f4   :  { %v16238_v30 = vpop.permute.xlu0 %16237  ;;  %16402 = vrot.lane.b32.xlu0 %v16386_v37, %s20526_s5  ;;  %v20096_v42 = vpop.f32.mrf.mxu1  ;;  %v24309_v10 = vrot.slane %v12490_v23, %v21580_v59 }
 0x3f5   :  { %v16257_v48 = vadd.f32 %v16238_v30, %v16207_v21  ;;  %v11441_v50 = vrot.slane %v11433_v58, %v21602_v9  ;;  %v11437_v32 = vrot.slane %v11426_v56, %v21602_v9  ;;  %v17642_v21 = vld [vmem:[#allocation8 + $0x18] ss:$0 sm:$0xff] }
 0x3f6   :  { %v12506_v42 = vrot.slane %v24309_v10, %v21580_v59 }
 0x3f7   :  { %15511 = vrot.lane.b32.xlu1 %v15490_v53, %s20527_s29  ;;  %v11977_v53 = vrot.slane %v11966_v43, %v21602_v9 }
 0x3f8   :  { %v16288_v28 = vpop.permute.xlu0 %16287  ;;  %v12517_v45 = vrot.slane %v12506_v42, %v21602_v9 }
 0x3f9   :  { %v16307_v41 = vadd.f32 %v16288_v28, %v16257_v48 }
 0x3fa   :  { %v12949_v4 = vpop.f32.mrf.mxu0 }
 0x3fb   :  { %15561 = vrot.lane.b32.xlu1 %v15540_v55, %s20528_s7  ;;  %v12950_v26 = vadd.f32 %v12949_v4, %v12867_v36  ;;  %v25998_v36 = vld [vmem:[#allocation25_spill] sm:$0xff] }
 0x3fc   :  { %v16338_v16 = vpop.permute.xlu0 %16337  ;;  %v20107_v29 = vpop.f32.mrf.mxu0 }
 0x3fd   :  { %v16357_v5 = vadd.f32 %v16338_v16, %v16307_v41  ;;  %v13024_v7 = vpop.f32.mrf.mxu1  ;;  %v25999_v41 = vld [vmem:[#allocation26_spill] sm:$0xff] }
 0x3fe   :  { %v13025_v52 = vadd.f32 %v13024_v7, %v12950_v26 }
 0x3ff   :  { %v16366_v57 = vadd.f32 %v24255_v2, %v16357_v5  ;;  %15611 = vrot.lane.b32.xlu1 %v15590_v34, %s20529_s4  ;;  %v20118_v0 = vpop.f32.mrf.mxu1 }
 0x400   :  { %v13029_v25 = vmul.f32 0.01, %v13025_v52  ;;  %vm13028_vm13 = vcmp.ge.f32.partialorder %v13025_v52, 0.0  ;;  %v24343_v0 = vld [vmem:[#allocation2 + $0x2a] sm:$0xff] }
 0x401   :  { %v8743_v18 = vpop.permute.xlu0 %8742  ;;  %vm16374_vm12 = vcmp.ge.f32.partialorder %v16366_v57, 0.0  ;;  %v16382_v49 = vmul.f32 0.01, %v16366_v57  ;;  %v15716_v23 = vmul.f32 %v25998_v36, %v24343_v0 }
 0x402   :  { %8748 = vst.msk [vmem:[#allocation2 + $0x11] sm:$0x1] %vm647_vm7, %v8743_v18  ;;  %v13030_v44 = vsel %vm13028_vm13, %v13025_v52, %v13029_v25  ;;  %v26001_v52 = vld [vmem:[#allocation28_spill] sm:$0xff] }
 0x403   :  { %15661 = vrot.lane.b32.xlu1 %v15640_v33, %s20530_s8  ;;  %v16390_v1 = vsel %vm16374_vm12, %v16366_v57, %v16382_v49  ;;  %v24318_v46 = vrot.slane %v13030_v44, %v21580_v59  ;;  %vm16430_vm12 = vcmask 240656  }
 0x404   :  { %16410 = vrot.lane.b32.xlu0 %v16390_v1, %s20526_s5 }
 0x405   :  { %v13158_v37 = vpop.f32.mrf.mxu0  ;;  %v13046_v48 = vrot.slane %v24318_v46, %v21580_v59 }
 0x406   :  { %v9283_v8 = vpop.permute.xlu0 %9282  ;;  %v13159_v4 = vadd.f32 %v17642_v21, %v13158_v37 }
 0x407   :  { %9288 = vst.msk [vmem:[#allocation2 + $0x12] sm:$0x1] %vm647_vm7, %v9283_v8  ;;  %11444 = vrot.lane.b32.xlu1 %v11441_v50, %s20526_s5  ;;  %v20129_v30 = vpop.f32.mrf.mxu0  ;;  %v13057_v6 = vrot.slane %v13046_v48, %v21602_v9  ;;  %v15766_v50 = vmul.f32 %v25999_v41, %v24343_v0  ;;  %v15816_v8 = vmul.f32 %v26000_v62, %v24343_v0 }
 0x408   :  { %11442 = vrot.lane.b32.xlu0 %v11437_v32, %s20526_s5  ;;  %v13249_v15 = vpop.f32.mrf.mxu1  ;;  %v11959_v32 = vcombine.high %v24298_v61, %v24298_v61 }
 0x409   :  { %v24322_v63 = vld [vmem:[#allocation2 + $0xa] sm:$0xff]  ;;  %v13250_v16 = vadd.f32 %v13249_v15, %v13159_v4  ;;  %v26002_v4 = vld [vmem:[#allocation29_spill] sm:$0xff] }
 0x40a   :  { %v15712_v28 = vmul.f32 %v25998_v36, %v24322_v63  ;;  %v20140_v27 = vpop.f32.mrf.mxu1  ;;  %v15762_v26 = vmul.f32 %v25999_v41, %v24322_v63  ;;  %v15812_v38 = vmul.f32 %v26000_v62, %v24322_v63  ;;  %v15862_v57 = vmul.f32 %v26001_v52, %v24322_v63 }
 0x40b   :  { %v11973_v15 = vrot.slane %v11959_v32, %v21580_v59  ;;  %v24507_v62 = vstv %s17675_s9  ;;  %v24536_v36 = vstv %s17679_s12 }
 0x40c   :  { %v9823_v55 = vpop.permute.xlu0 %9822  ;;  %15729 = vrot.lane.b32.xlu1 %v15712_v28, %s20527_s29  ;;  %11982 = vrot.lane.b32.xlu0 %v11977_v53, %s20526_s5  ;;  %v15866_v53 = vmul.f32 %v26001_v52, %v24343_v0  ;;  %26014 = vst [vmem:[#allocation43_spill] sm:$0xff] %v24507_v62  ;;  %26018 = vst [vmem:[#allocation47_spill] sm:$0xff] %v24536_v36 }
 0x40d   :  { %9828 = vst.msk [vmem:[#allocation2 + $0x13] sm:$0x1] %vm647_vm7, %v9823_v55  ;;  %v11981_v61 = vrot.slane %v11973_v15, %v21602_v9 }
 0x40e   :  { %v24369_v48 = vld [vmem:[#allocation2 + $0xb] sm:$0xff] }
 0x410   :  { %15779 = vrot.lane.b32.xlu1 %v15762_v26, %s20528_s7  ;;  %12522 = vrot.lane.b32.xlu0 %v12517_v45, %s20526_s5  ;;  %v15938_v26 = vmul.f32 %v26002_v4, %v24369_v48 }
 0x411   :  { %v13329_v29 = vpop.f32.mrf.mxu0 }
 0x412   :  { %v13330_v34 = vadd.f32 %v13329_v29, %v13250_v16  ;;  %v26003_v16 = vld [vmem:[#allocation30_spill] sm:$0xff] }
 0x413   :  { %v20151_v5 = vpop.f32.mrf.mxu0  ;;  %v15988_v29 = vmul.f32 %v26003_v16, %v24369_v48 }
 0x414   :  { %15829 = vrot.lane.b32.xlu1 %v15812_v38, %s20529_s4  ;;  %13062 = vrot.lane.b32.xlu0 %v13057_v6, %s20526_s5  ;;  %v13406_v7 = vpop.f32.mrf.mxu1 }
 0x415   :  { %v13407_v33 = vadd.f32 %v13406_v7, %v13330_v34 }
 0x416   :  { %v20162_v58 = vpop.f32.mrf.mxu1 }
 0x418   :  { %15879 = vrot.lane.b32.xlu1 %v15862_v57, %s20530_s8  ;;  %v26004_v57 = vld [vmem:[#allocation31_spill] sm:$0xff] }
 0x419   :  { %v16038_v58 = vmul.f32 %v26004_v57, %v24369_v48 }
 0x41b   :  { %v13489_v18 = vpop.f32.mrf.mxu0 }
 0x41c   :  { %v13490_v49 = vadd.f32 %v13489_v18, %v13407_v33  ;;  %15737 = vrot.lane.b32.xlu1 %v15716_v23, %s20527_s29 }
 0x41d   :  { %v13564_v25 = vpop.f32.mrf.mxu1  ;;  %v20173_v56 = vpop.f32.mrf.mxu0 }
 0x41e   :  { %v13565_v1 = vadd.f32 %v13564_v25, %v13490_v49  ;;  %v26005_v25 = vld [vmem:[#allocation32_spill] sm:$0xff] }
 0x41f   :  { %v20184_v43 = vpop.f32.mrf.mxu1  ;;  %v16088_v56 = vmul.f32 %v26005_v25, %v24369_v48 }
 0x420   :  { %vm13568_vm14 = vcmp.ge.f32.partialorder %v13565_v1, 0.0  ;;  %v13569_v44 = vmul.f32 0.01, %v13565_v1  ;;  %15787 = vrot.lane.b32.xlu1 %v15766_v50, %s20528_s7 }
 0x422   :  { %v13570_v37 = vsel %vm13568_vm14, %v13565_v1, %v13569_v44  ;;  %v24390_v1 = vld [vmem:[#allocation2 + $0x2b] sm:$0xff] }
 0x423   :  { %v24357_v30 = vrot.slane %v13570_v37, %v21580_v59  ;;  %v15942_v43 = vmul.f32 %v26002_v4, %v24390_v1  ;;  %v15992_v32 = vmul.f32 %v26003_v16, %v24390_v1 }
 0x424   :  { %15837 = vrot.lane.b32.xlu1 %v15816_v8, %s20529_s4 }
 0x425   :  { %v13586_v42 = vrot.slane %v24357_v30, %v21580_v59 }
 0x427   :  { %v13597_v21 = vrot.slane %v13586_v42, %v21602_v9 }
 0x428   :  { %15887 = vrot.lane.b32.xlu1 %v15866_v53, %s20530_s8  ;;  %v13698_v28 = vpop.f32.mrf.mxu0 }
 0x429   :  { %13602 = vrot.lane.b32.xlu0 %v13597_v21, %s20526_s5  ;;  %v12499_v21 = vcombine.high %v24309_v10, %v24309_v10 }
 0x42a   :  { %v20195_v27 = vpop.f32.mrf.mxu0 }
 0x42b   :  { %v13789_v55 = vpop.f32.mrf.mxu1 }
 0x42c   :  { %11984 = vrot.lane.b32.xlu1 %v11981_v61, %s20526_s5  ;;  %v16042_v61 = vmul.f32 %v26004_v57, %v24390_v1 }
 0x42d   :  { %v20206_v45 = vpop.f32.mrf.mxu1 }
 0x42e   :  { %v16092_v45 = vmul.f32 %v26005_v25, %v24390_v1 }
 0x430   :  { %15955 = vrot.lane.b32.xlu1 %v15938_v26, %s20527_s29  ;;  %v12513_v26 = vrot.slane %v12499_v21, %v21580_v59 }
 0x431   :  { %v10365_v6 = vpop.permute.xlu1 %10364 }
 0x432   :  { %10369 = vst.msk [vmem:[#allocation2 + $0x34] sm:$0x1] %vm647_vm7, %v10365_v6  ;;  %v10363_v38 = vpop.permute.xlu0 %10362  ;;  %v17643_v6 = vld [vmem:[#allocation8 + $0x19] ss:$0 sm:$0xff] }
 0x433   :  { %10368 = vst.msk [vmem:[#allocation2 + $0x14] sm:$0x1] %vm647_vm7, %v10363_v38  ;;  %v13869_v5 = vpop.f32.mrf.mxu0 }
 0x434   :  { %16005 = vrot.lane.b32.xlu1 %v15988_v29, %s20528_s7 }
 0x435   :  { %v24380_v34 = vpop.permute.xlu1 %15277  ;;  %v20217_v7 = vpop.f32.mrf.mxu0 }
 0x436   :  { %v10903_v33 = vpop.permute.xlu0 %10902  ;;  %v13699_v7 = vadd.f32 %v17643_v6, %v13698_v28 }
 0x437   :  { %v13946_v23 = vpop.f32.mrf.mxu1  ;;  %10908 = vst.msk [vmem:[#allocation2 + $0x15] sm:$0x1] %vm647_vm7, %v10903_v33  ;;  %v17644_v33 = vld [vmem:[#allocation8 + $0x1a] ss:$0 sm:$0xff] }
 0x438   :  { %16055 = vrot.lane.b32.xlu1 %v16038_v58, %s20529_s4  ;;  %v12521_v58 = vrot.slane %v12513_v26, %v21602_v9  ;;  %v26006_v26 = vld [vmem:[#allocation34_spill] sm:$0xff] }
 0x439   :  { %v24386_v18 = vpop.permute.xlu1 %15327  ;;  %v20228_v49 = vpop.f32.mrf.mxu1 }
 0x43c   :  { %16105 = vrot.lane.b32.xlu1 %v16088_v56, %s20530_s8  ;;  %v24419_v56 = vld [vmem:[#allocation2 + $0xc] sm:$0xff] }
 0x43d   :  { %v24393_v50 = vpop.permute.xlu1 %15377  ;;  %v16164_v21 = vmul.f32 %v23761_v19, %v24419_v56  ;;  %v16214_v6 = vmul.f32 %v26006_v26, %v24419_v56 }
 0x43f   :  { %v14029_v44 = vpop.f32.mrf.mxu0 }
 0x440   :  { %15963 = vrot.lane.b32.xlu1 %v15942_v43, %s20527_s29 }
 0x441   :  { %v24398_v37 = vpop.permute.xlu1 %15427  ;;  %v20239_v8 = vpop.f32.mrf.mxu0 }
 0x443   :  { %v14104_v42 = vpop.f32.mrf.mxu1 }
 0x444   :  { %16013 = vrot.lane.b32.xlu1 %v15992_v32, %s20528_s7  ;;  %v13790_v32 = vadd.f32 %v13789_v55, %v13699_v7 }
 0x445   :  { %v24403_v53 = vpop.permute.xlu1 %15285  ;;  %v20250_v15 = vpop.f32.mrf.mxu1 }
 0x448   :  { %16063 = vrot.lane.b32.xlu1 %v16042_v61, %s20529_s4  ;;  %v13870_v61 = vadd.f32 %v13869_v5, %v13790_v32 }
 0x449   :  { %v24410_v27 = vpop.permute.xlu1 %15335 }
 0x44b   :  { %v14238_v29 = vpop.f32.mrf.mxu0 }
 0x44c   :  { %16113 = vrot.lane.b32.xlu1 %v16092_v45, %s20530_s8  ;;  %v14239_v15 = vadd.f32 %v17644_v33, %v14238_v29  ;;  %v26007_v33 = vld [vmem:[#allocation35_spill] sm:$0xff] }
 0x44d   :  { %v24416_v38 = vpop.permute.xlu1 %15385  ;;  %v20261_v10 = vpop.f32.mrf.mxu0 }
 0x44e   :  { %v14329_v49 = vpop.f32.mrf.mxu1 }
 0x44f   :  { %v14330_v45 = vadd.f32 %v14329_v49, %v14239_v15  ;;  %v26008_v15 = vld [vmem:[#allocation36_spill] sm:$0xff] }
 0x450   :  { %12524 = vrot.lane.b32.xlu1 %v12521_v58, %s20526_s5  ;;  %v20272_v43 = vpop.f32.mrf.mxu1 }
 0x451   :  { %v24422_v8 = vpop.permute.xlu1 %15435  ;;  %v13947_v43 = vadd.f32 %v13946_v23, %v13870_v61 }
 0x453   :  { %v14030_v5 = vadd.f32 %v14029_v44, %v13947_v43 }
 0x454   :  { %16181 = vrot.lane.b32.xlu1 %v16164_v21, %s20527_s29  ;;  %v16264_v21 = vmul.f32 %v26007_v33, %v24419_v56 }
 0x455   :  { %v10905_v28 = vpop.permute.xlu1 %10904  ;;  %v14105_v61 = vadd.f32 %v14104_v42, %v14030_v5 }
 0x456   :  { %10909 = vst.msk [vmem:[#allocation2 + $0x35] sm:$0x1] %vm647_vm7, %v10905_v28  ;;  %v14409_v10 = vpop.f32.mrf.mxu0  ;;  %v16314_v28 = vmul.f32 %v26008_v15, %v24419_v56 }
 0x457   :  { %v14410_v29 = vadd.f32 %v14409_v10, %v14330_v45  ;;  %v14109_v43 = vmul.f32 0.01, %v14105_v61  ;;  %vm14108_vm0 = vcmp.ge.f32.partialorder %v14105_v61, 0.0 }
 0x458   :  { %16231 = vrot.lane.b32.xlu1 %v16214_v6, %s20528_s7  ;;  %v20283_v58 = vpop.f32.mrf.mxu0  ;;  %v24440_v6 = vld [vmem:[#allocation2 + $0x2c] sm:$0xff] }
 0x459   :  { %v24431_v55 = vpop.permute.xlu1 %15503  ;;  %v14486_v7 = vpop.f32.mrf.mxu1  ;;  %26009 = vst [vmem:[#allocation38_spill] sm:$0xff] %v24440_v6  ;;  %v16218_v42 = vmul.f32 %v26006_v26, %v24440_v6  ;;  %v14110_v5 = vsel %vm14108_vm0, %v14105_v61, %v14109_v43 }
 0x45a   :  { %v14487_v32 = vadd.f32 %v14486_v7, %v14410_v29 }
 0x45b   :  { %v20294_v25 = vpop.f32.mrf.mxu1 }
 0x45c   :  { %16281 = vrot.lane.b32.xlu1 %v16264_v21, %s20529_s4  ;;  %v16168_v25 = vmul.f32 %v23761_v19, %v24440_v6 }
 0x45d   :  { %v24436_v49 = vpop.permute.xlu1 %15553 }
 0x460   :  { %16331 = vrot.lane.b32.xlu1 %v16314_v28, %s20530_s8  ;;  %v14569_v23 = vpop.f32.mrf.mxu0 }
 0x461   :  { %v24443_v45 = vpop.permute.xlu1 %15603  ;;  %v14570_v10 = vadd.f32 %v14569_v23, %v14487_v32 }
 0x462   :  { %v20305_v58 = vpop.f32.mrf.mxu0 }
 0x463   :  { %v14644_v44 = vpop.f32.mrf.mxu1  ;;  %v16268_v58 = vmul.f32 %v26007_v33, %v24440_v6  ;;  %v16318_v33 = vmul.f32 %v26008_v15, %v24440_v6 }
 0x464   :  { %16189 = vrot.lane.b32.xlu1 %v16168_v25, %s20527_s29  ;;  %v14645_v7 = vadd.f32 %v14644_v44, %v14570_v10  ;;  %v13039_v25 = vcombine.high %v24318_v46, %v24318_v46  ;;  %v17645_v44 = vld [vmem:[#allocation8 + $0x1b] ss:$0 sm:$0xff]  ;;  %v13579_v46 = vcombine.high %v24357_v30, %v24357_v30  ;;  %v24483_v30 = vstv %s17673_s28 }
 0x465   :  { %v24448_v29 = vpop.permute.xlu1 %15653  ;;  %v20316_v21 = vpop.f32.mrf.mxu1  ;;  %26012 = vst [vmem:[#allocation41_spill] sm:$0xff] %v24483_v30 }
 0x466   :  { %v16403_v28 = vpop.permute.xlu0 %16402  ;;  %v14649_v32 = vmul.f32 0.01, %v14645_v7  ;;  %vm14648_vm2 = vcmp.ge.f32.partialorder %v14645_v7, 0.0  ;;  %v24461_v21 = vrot.slane %v14110_v5, %v21580_v59  ;;  %v13053_v5 = vrot.slane %v13039_v25, %v21580_v59 }
 0x467   :  { %16427 = vst.msk [vmem:[#allocation2 + $0x2] sm:$0xff] %vm16426_vm15, %v16403_v28 }
 0x468   :  { %16239 = vrot.lane.b32.xlu1 %v16218_v42, %s20528_s7  ;;  %v24464_v42 = vstv %s17672_s27  ;;  %v14650_v61 = vsel %vm14648_vm2, %v14645_v7, %v14649_v32  ;;  %v14119_v7 = vcombine.high %v24461_v21, %v24461_v21  ;;  %s17670_s27 = sld [smem:[#allocation12 + $0x1]]  ;;  %vm17604_vm2 = vcmask 224256  }
 0x469   :  { %v24454_v23 = vpop.permute.xlu1 %15511  ;;  %26010 = vst [vmem:[#allocation39_spill] sm:$0xff] %v24464_v42  ;;  %v24480_v32 = vrot.slane %v14650_v61, %v21580_v59 }
 0x46a   :  { %v14778_v10 = vpop.f32.mrf.mxu0  ;;  %v14133_v4 = vrot.slane %v14119_v7, %v21580_v59 }
 0x46b   :  { %v14779_v19 = vadd.f32 %v17645_v44, %v14778_v10  ;;  %v13061_v44 = vrot.slane %v13053_v5, %v21602_v9  ;;  %v14659_v61 = vcombine.high %v24480_v32, %v24480_v32 }
 0x46c   :  { %16289 = vrot.lane.b32.xlu1 %v16268_v58, %s20529_s4  ;;  %v20327_v28 = vpop.f32.mrf.mxu0  ;;  %v14141_v7 = vrot.slane %v14133_v4, %v21602_v9 }
 0x46d   :  { %v14869_v43 = vpop.f32.mrf.mxu1  ;;  %v24466_v26 = vpop.permute.xlu1 %15561  ;;  %v14673_v41 = vrot.slane %v14659_v61, %v21580_v59  ;;  %v24519_v61 = vstv %s17677_s10 }
 0x46e   :  { %v24472_v57 = vld [vmem:[#allocation2] sm:$0xff]  ;;  %v14870_v25 = vadd.f32 %v14869_v43, %v14779_v19  ;;  %26016 = vst [vmem:[#allocation45_spill] sm:$0xff] %v24519_v61 }
 0x46f   :  { %26011 = vst [vmem:[#allocation40_spill] sm:$0xff] %v24472_v57  ;;  %v20338_v58 = vpop.f32.mrf.mxu1  ;;  %v16465_v28 = vmul.f32 %v24464_v42, %v24472_v57  ;;  %v16515_v15 = vmul.f32 %v24483_v30, %v24472_v57  ;;  %v14681_v4 = vrot.slane %v14673_v41, %v21602_v9  ;;  %v24528_v41 = vstv %s17678_s11 }
 0x470   :  { %16339 = vrot.lane.b32.xlu1 %v16318_v33, %s20530_s8  ;;  %v13593_v58 = vrot.slane %v13579_v46, %v21580_v59  ;;  %v24495_v33 = vstv %s17674_s30  ;;  %26017 = vst [vmem:[#allocation46_spill] sm:$0xff] %v24528_v41 }
 0x471   :  { %v24485_v10 = vpop.permute.xlu1 %15611  ;;  %16481 = vrot.lane.b32.xlu0 %v16465_v28, %s20527_s29  ;;  %26013 = vst [vmem:[#allocation42_spill] sm:$0xff] %v24495_v33 }
 0x472   :  { %v13601_v5 = vrot.slane %v13593_v58, %v21602_v9 }
 0x474   :  { %v14949_v16 = vpop.f32.mrf.mxu0  ;;  %13064 = vrot.lane.b32.xlu1 %v13061_v44, %s20526_s5  ;;  %v16565_v44 = vmul.f32 %v24495_v33, %v24472_v57 }
 0x475   :  { %v24498_v28 = vpop.permute.xlu1 %15661  ;;  %16531 = vrot.lane.b32.xlu0 %v16515_v15, %s20528_s7  ;;  %v14950_v19 = vadd.f32 %v14949_v16, %v14870_v25 }
 0x476   :  { %v20349_v43 = vpop.f32.mrf.mxu0  ;;  %v16411_v46 = vpop.permute.xlu0 %16410 }
 0x477   :  { %v15026_v52 = vpop.f32.mrf.mxu1  ;;  %16432 = vst.msk [vmem:[#allocation2 + $0x22] sm:$0xff] %vm16426_vm15, %v16411_v46  ;;  %v16615_v43 = vmul.f32 %v24507_v62, %v24472_v57  ;;  %v24517_v46 = vld [vmem:[#allocation2 + $0x1] sm:$0xff] }
 0x478   :  { %13604 = vrot.lane.b32.xlu1 %v13601_v5, %s20526_s5  ;;  %v15027_v25 = vadd.f32 %v15026_v52, %v14950_v19  ;;  %26015 = vst [vmem:[#allocation44_spill] sm:$0xff] %v24517_v46 }
 0x479   :  { %v20360_v16 = vpop.f32.mrf.mxu1  ;;  %v11445_v15 = vpop.permute.xlu1 %11444  ;;  %16581 = vrot.lane.b32.xlu0 %v16565_v44, %s20529_s4 }
 0x47a   :  { %11449 = vst.msk [vmem:[#allocation2 + $0x36] sm:$0x1] %vm647_vm7, %v11445_v15  ;;  %v11443_v58 = vpop.permute.xlu0 %11442  ;;  %v16691_v16 = vmul.f32 %v24519_v61, %v24517_v46 }
 0x47b   :  { %11448 = vst.msk [vmem:[#allocation2 + $0x16] sm:$0x1] %vm647_vm7, %v11443_v58 }
 0x47c   :  { %14144 = vrot.lane.b32.xlu1 %v14141_v7, %s20526_s5 }
 0x47d   :  { %v15109_v5 = vpop.f32.mrf.mxu0  ;;  %16631 = vrot.lane.b32.xlu0 %v16615_v43, %s20530_s8 }
 0x47e   :  { %v15110_v52 = vadd.f32 %v15109_v5, %v15027_v25  ;;  %v24522_v19 = vpop.permute.xlu1 %15729  ;;  %v11983_v44 = vpop.permute.xlu0 %11982 }
 0x47f   :  { %11988 = vst.msk [vmem:[#allocation2 + $0x17] sm:$0x1] %vm647_vm7, %v11983_v44  ;;  %v20371_v7 = vpop.f32.mrf.mxu0  ;;  %v16741_v44 = vmul.f32 %v24528_v41, %v24517_v46 }
 0x480   :  { %v15184_v15 = vpop.f32.mrf.mxu1  ;;  %14684 = vrot.lane.b32.xlu1 %v14681_v4, %s20526_s5 }
 0x481   :  { %v15185_v58 = vadd.f32 %v15184_v15, %v15110_v52  ;;  %16707 = vrot.lane.b32.xlu0 %v16691_v16, %s20527_s29 }
 0x482   :  { %v24531_v43 = vpop.permute.xlu1 %15779  ;;  %v12523_v25 = vpop.permute.xlu0 %12522 }
 0x483   :  { %vm15188_vm3 = vcmp.ge.f32.partialorder %v15185_v58, 0.0  ;;  %v15189_v5 = vmul.f32 0.01, %v15185_v58  ;;  %12528 = vst.msk [vmem:[#allocation2 + $0x18] sm:$0x1] %vm647_vm7, %v12523_v25  ;;  %v20382_v7 = vpop.f32.mrf.mxu1  ;;  %v16791_v25 = vmul.f32 %v24536_v36, %v24517_v46 }
 0x485   :  { %v15190_v4 = vsel %vm15188_vm3, %v15185_v58, %v15189_v5  ;;  %16757 = vrot.lane.b32.xlu0 %v16741_v44, %s20528_s7  ;;  %v16841_v44 = vmul.f32 %v24549_v20, %v24517_v46  ;;  %v24582_v46 = vstv %s17685_s16 }
 0x486   :  { %v24540_v52 = vrot.slane %v15190_v4, %v21580_v59  ;;  %v24542_v16 = vpop.permute.xlu1 %15829  ;;  %v13063_v15 = vpop.permute.xlu0 %13062  ;;  %26025 = vst [vmem:[#allocation54_spill] sm:$0xff] %v24582_v46 }
 0x487   :  { %13068 = vst.msk [vmem:[#allocation2 + $0x19] sm:$0x1] %vm647_vm7, %v13063_v15  ;;  %v24558_v15 = vld [vmem:[#allocation2 + $0x2] sm:$0xff] }
 0x488   :  { %26019 = vst [vmem:[#allocation48_spill] sm:$0xff] %v24540_v52  ;;  %v15199_v7 = vcombine.high %v24540_v52, %v24540_v52  ;;  %26021 = vst [vmem:[#allocation50_spill] sm:$0xff] %v24558_v15  ;;  %v24575_v52 = vstv %s17684_s15  ;;  %v17067_v47 = vmul.f32 %v24582_v46, %v24558_v15 }
 0x489   :  { %16807 = vrot.lane.b32.xlu0 %v16791_v25, %s20529_s4  ;;  %v16917_v25 = vmul.f32 %v24560_v24, %v24558_v15  ;;  %26024 = vst [vmem:[#allocation53_spill] sm:$0xff] %v24575_v52 }
 0x48a   :  { %v15213_v58 = vrot.slane %v15199_v7, %v21580_v59  ;;  %v24553_v5 = vpop.permute.xlu1 %15879  ;;  %v24568_v7 = vstv %s17683_s14 }
 0x48b   :  { %26023 = vst [vmem:[#allocation52_spill] sm:$0xff] %v24568_v7  ;;  %v16967_v11 = vmul.f32 %v24568_v7, %v24558_v15 }
 0x48c   :  { %v15221_v4 = vrot.slane %v15213_v58, %v21602_v9 }
 0x48d   :  { %16857 = vrot.lane.b32.xlu0 %v16841_v44, %s20530_s8 }
 0x48e   :  { %15224 = vrot.lane.b32.xlu1 %v15221_v4, %s20526_s5  ;;  %v24564_v51 = vpop.permute.xlu1 %15737  ;;  %v17017_v4 = vmul.f32 %v24575_v52, %v24558_v15 }
 0x491   :  { %16933 = vrot.lane.b32.xlu0 %v16917_v25, %s20527_s29  ;;  %v15242_v25 = vmul.f32 %v24074_v60, %v24130_v39 }
 0x492   :  { %v24571_v58 = vpop.permute.xlu1 %15787 }
 0x493   :  { %v15300_v13 = vadd.f32 %v24380_v34, %v15242_v25 }
 0x495   :  { %16983 = vrot.lane.b32.xlu0 %v16967_v11, %s20528_s7  ;;  %v24592_v11 = vld [vmem:[#allocation2 + $0x20] sm:$0xff] }
 0x496   :  { %v24578_v44 = vpop.permute.xlu1 %15837  ;;  %v16469_v39 = vmul.f32 %v24464_v42, %v24592_v11  ;;  %v16519_v34 = vmul.f32 %v24483_v30, %v24592_v11 }
 0x499   :  { %17033 = vrot.lane.b32.xlu0 %v17017_v4, %s20529_s4  ;;  %v15350_v4 = vadd.f32 %v24386_v18, %v15300_v13 }
 0x49a   :  { %v24585_v57 = vpop.permute.xlu1 %15887 }
 0x49b   :  { %v13603_v40 = vpop.permute.xlu0 %13602  ;;  %v15400_v54 = vadd.f32 %v24393_v50, %v15350_v4  ;;  %v24617_v4 = vld [vmem:[#allocation2 + $0x21] sm:$0xff] }
 0x49c   :  { %13608 = vst.msk [vmem:[#allocation2 + $0x1a] sm:$0x1] %vm647_vm7, %v13603_v40 }
 0x49d   :  { %17083 = vrot.lane.b32.xlu0 %v17067_v47, %s20530_s8  ;;  %v15450_v40 = vadd.f32 %v24398_v37, %v15400_v54  ;;  %v15468_v47 = vmul.f32 %v24122_v14, %v24242_v17  ;;  %v15246_v54 = vmul.f32 %v24074_v60, %v24182_v35  ;;  %v16619_v17 = vmul.f32 %v24507_v62, %v24592_v11 }
 0x49e   :  { %v11985_v6 = vpop.permute.xlu1 %11984  ;;  %v16695_v35 = vmul.f32 %v24519_v61, %v24617_v4  ;;  %v25035_v61 = vstv %s17694_s2 }
 0x49f   :  { %11989 = vst.msk [vmem:[#allocation2 + $0x37] sm:$0x1] %vm647_vm7, %v11985_v6  ;;  %v15476_v18 = vadd.f32 %v15468_v47, %v15450_v40  ;;  %v16569_v6 = vmul.f32 %v24495_v33, %v24592_v11 }
 0x4a1   :  { %16489 = vrot.lane.b32.xlu0 %v16469_v39, %s20527_s29  ;;  %v15526_v50 = vadd.f32 %v24431_v55, %v15476_v18  ;;  %v15304_v39 = vadd.f32 %v24403_v53, %v15246_v54  ;;  %v15694_v18 = vmul.f32 %v24168_v3, %v24322_v63 }
 0x4a2   :  { %v15956_v15 = vpop.permute.xlu1 %15955 }
 0x4a3   :  { %v15576_v37 = vadd.f32 %v24436_v49, %v15526_v50  ;;  %v16745_v50 = vmul.f32 %v24528_v41, %v24617_v4  ;;  %v25013_v41 = vstv %s17692_s24 }
 0x4a5   :  { %16539 = vrot.lane.b32.xlu0 %v16519_v34, %s20528_s7  ;;  %v15626_v40 = vadd.f32 %v24443_v45, %v15576_v37  ;;  %v15354_v34 = vadd.f32 %v24410_v27, %v15304_v39  ;;  %v15472_v27 = vmul.f32 %v24122_v14, %v24271_v31  ;;  %v16795_v37 = vmul.f32 %v24536_v36, %v24617_v4 }
 0x4a6   :  { %v16006_v13 = vpop.permute.xlu1 %16005 }
 0x4a7   :  { %v15676_v47 = vadd.f32 %v24448_v29, %v15626_v40  ;;  %v15404_v49 = vadd.f32 %v24416_v38, %v15354_v34  ;;  %v16845_v40 = vmul.f32 %v24549_v20, %v24617_v4  ;;  %v24647_v34 = vld [vmem:[#allocation2 + $0x22] sm:$0xff] }
 0x4a9   :  { %16589 = vrot.lane.b32.xlu0 %v16569_v6, %s20529_s4  ;;  %v15454_v45 = vadd.f32 %v24422_v8, %v15404_v49  ;;  %v15702_v6 = vadd.f32 %v15694_v18, %v15676_v47  ;;  %v15920_v47 = vmul.f32 %v24200_v22, %v24369_v48  ;;  %v16971_v48 = vmul.f32 %v24568_v7, %v24647_v34 }
 0x4aa   :  { %v16056_v25 = vpop.permute.xlu1 %16055 }
 0x4ab   :  { %v15752_v29 = vadd.f32 %v24522_v19, %v15702_v6  ;;  %v15480_v54 = vadd.f32 %v15472_v27, %v15454_v45 }
 0x4ad   :  { %16639 = vrot.lane.b32.xlu0 %v16619_v17, %s20530_s8  ;;  %v15802_v63 = vadd.f32 %v24531_v43, %v15752_v29  ;;  %v15530_v8 = vadd.f32 %v24454_v23, %v15480_v54 }
 0x4ae   :  { %v16106_v55 = vpop.permute.xlu1 %16105 }
 0x4af   :  { %v15852_v17 = vadd.f32 %v24542_v16, %v15802_v63  ;;  %v15580_v31 = vadd.f32 %v24466_v26, %v15530_v8  ;;  %v16921_v26 = vmul.f32 %v24560_v24, %v24647_v34 }
 0x4b1   :  { %16715 = vrot.lane.b32.xlu0 %v16695_v35, %s20527_s29  ;;  %v15902_v19 = vadd.f32 %v24553_v5, %v15852_v17  ;;  %v15630_v43 = vadd.f32 %v24485_v10, %v15580_v31  ;;  %v15698_v5 = vmul.f32 %v24168_v3, %v24343_v0 }
 0x4b2   :  { %v15964_v53 = vpop.permute.xlu1 %15963 }
 0x4b3   :  { %v15680_v16 = vadd.f32 %v24498_v28, %v15630_v43  ;;  %v15928_v35 = vadd.f32 %v15920_v47, %v15902_v19  ;;  %v24684_v47 = vld [vmem:[#allocation2 + $0x10] sm:$0xff] }
 0x4b5   :  { %16765 = vrot.lane.b32.xlu0 %v16745_v50, %s20528_s7  ;;  %v15978_v49 = vadd.f32 %v15956_v15, %v15928_v35  ;;  %v15706_v10 = vadd.f32 %v15698_v5, %v15680_v16  ;;  %v17021_v15 = vmul.f32 %v24575_v52, %v24647_v34 }
 0x4b6   :  { %v16014_v38 = vpop.permute.xlu1 %16013 }
 0x4b7   :  { %v16028_v45 = vadd.f32 %v16006_v13, %v15978_v49  ;;  %v15756_v28 = vadd.f32 %v24564_v51, %v15706_v10  ;;  %v16146_v13 = vmul.f32 %v24234_v12, %v24419_v56  ;;  %v14126_v51 = vrot.slane %v24461_v21, %v21580_v59 }
 0x4b9   :  { %16815 = vrot.lane.b32.xlu0 %v16795_v37, %s20529_s4  ;;  %v16078_v6 = vadd.f32 %v16056_v25, %v16028_v45  ;;  %v15806_v27 = vadd.f32 %v24571_v58, %v15756_v28  ;;  %v17071_v58 = vmul.f32 %v24582_v46, %v24647_v34  ;;  %v14137_v21 = vrot.slane %v14126_v51, %v21602_v9  ;;  %v26030_v51 = vld [vmem:[#allocation20_spill] sm:$0xff] }
 0x4ba   :  { %v16064_v39 = vpop.permute.xlu1 %16063 }
 0x4bb   :  { %v16128_v0 = vadd.f32 %v16106_v55, %v16078_v6  ;;  %v15856_v29 = vadd.f32 %v24578_v44, %v15806_v27  ;;  %v14666_v55 = vrot.slane %v24480_v32, %v21580_v59  ;;  %v15924_v44 = vmul.f32 %v24200_v22, %v24390_v1  ;;  %v26029_v27 = vld [vmem:[#allocation19_spill] sm:$0xff] }
 0x4bd   :  { %16865 = vrot.lane.b32.xlu0 %v16845_v40, %s20530_s8  ;;  %v15906_v25 = vadd.f32 %v24585_v57, %v15856_v29  ;;  %v16154_v63 = vadd.f32 %v16146_v13, %v16128_v0  ;;  %v14677_v19 = vrot.slane %v14666_v55, %v21602_v9  ;;  %v15361_v0 = vmul.f32 %v26029_v27, %v24684_v47 }
 0x4be   :  { %v16114_v23 = vpop.permute.xlu1 %16113  ;;  %v24705_v55 = vstv %s17671_s17 }
 0x4bf   :  { %v15932_v8 = vadd.f32 %v15924_v44, %v15906_v25  ;;  %v15411_v25 = vmul.f32 %v26030_v51, %v24684_v47 }
 0x4c1   :  { %16941 = vrot.lane.b32.xlu0 %v16921_v26, %s20527_s29  ;;  %v15982_v31 = vadd.f32 %v15964_v53, %v15932_v8  ;;  %v26026_v53 = vld [vmem:[#allocation17_spill] sm:$0xff] }
 0x4c2   :  { %v12525_v18 = vpop.permute.xlu1 %12524  ;;  %v15261_v49 = vmul.f32 %v26026_v53, %v24684_v47  ;;  %26031 = vst [vmem:[#allocation17_spill] sm:$0xff] %v24705_v55 }
 0x4c3   :  { %12529 = vst.msk [vmem:[#allocation2 + $0x38] sm:$0x1] %vm647_vm7, %v12525_v18  ;;  %v16032_v43 = vadd.f32 %v16014_v38, %v15982_v31  ;;  %v26027_v18 = vld [vmem:[#allocation38_spill] sm:$0xff] }
 0x4c4   :  { %v16150_v10 = vmul.f32 %v24234_v12, %v26027_v18  ;;  %v26034_v18 = vld [vmem:[#allocation44_spill] sm:$0xff] }
 0x4c5   :  { %16991 = vrot.lane.b32.xlu0 %v16971_v48, %s20528_s7  ;;  %v16082_v1 = vadd.f32 %v16064_v39, %v16032_v43  ;;  %v26028_v48 = vld [vmem:[#allocation18_spill] sm:$0xff] }
 0x4c6   :  { %v16182_v50 = vpop.permute.xlu1 %16181  ;;  %v15311_v28 = vmul.f32 %v26028_v48, %v24684_v47 }
 0x4c7   :  { %v16204_v37 = vadd.f32 %v16182_v50, %v16154_v63  ;;  %v16132_v26 = vadd.f32 %v16114_v23, %v16082_v1  ;;  %v24702_v63 = vld [vmem:[#allocation2 + $0x30] sm:$0xff]  ;;  %v24719_v1 = vstv %s17676_s18 }
 0x4c8   :  { %v15265_v8 = vmul.f32 %v26026_v53, %v24702_v63  ;;  %v15315_v43 = vmul.f32 %v26028_v48, %v24702_v63  ;;  %26033 = vst [vmem:[#allocation38_spill] sm:$0xff] %v24719_v1 }
 0x4c9   :  { %17041 = vrot.lane.b32.xlu0 %v17021_v15, %s20529_s4  ;;  %v16158_v39 = vadd.f32 %v16150_v10, %v16132_v26  ;;  %v16673_v10 = vmul.f32 %v24719_v1, %v26034_v18 }
 0x4ca   :  { %v16232_v54 = vpop.permute.xlu1 %16231 }
 0x4cb   :  { %v16254_v17 = vadd.f32 %v16232_v54, %v16204_v37 }
 0x4cd   :  { %17091 = vrot.lane.b32.xlu0 %v17071_v58, %s20530_s8 }
 0x4ce   :  { %v16282_v56 = vpop.permute.xlu1 %16281 }
 0x4cf   :  { %v16304_v57 = vadd.f32 %v16282_v56, %v16254_v17  ;;  %v26032_v17 = vld [vmem:[#allocation40_spill] sm:$0xff] }
 0x4d1   :  { %14142 = vrot.lane.b32.xlu0 %v14137_v21, %s20526_s5  ;;  %v16447_v21 = vmul.f32 %v24705_v55, %v26032_v17 }
 0x4d2   :  { %v16332_v40 = vpop.permute.xlu1 %16331 }
 0x4d3   :  { %v16354_v32 = vadd.f32 %v16332_v40, %v16304_v57 }
 0x4d5   :  { %v16363_v16 = vadd.f32 %v24255_v2, %v16354_v32  ;;  %14682 = vrot.lane.b32.xlu0 %v14677_v19, %s20526_s5 }
 0x4d6   :  { %v16190_v35 = vpop.permute.xlu1 %16189 }
 0x4d7   :  { %vm16371_vm4 = vcmp.ge.f32.partialorder %v16363_v16, 0.0  ;;  %v16379_v5 = vmul.f32 0.01, %v16363_v16  ;;  %v16208_v6 = vadd.f32 %v16190_v35, %v16158_v39 }
 0x4d9   :  { %v16387_v45 = vsel %vm16371_vm4, %v16363_v16, %v16379_v5  ;;  %15279 = vrot.lane.b32.xlu0 %v15261_v49, %s20527_s29  ;;  %v15365_v5 = vmul.f32 %v26029_v27, %v24702_v63 }
 0x4da   :  { %v16240_v38 = vpop.permute.xlu1 %16239  ;;  %16404 = vrot.lane.b32.xlu1 %v16387_v45, %s20526_s5  ;;  %v26035_v45 = vld [vmem:[#allocation48_spill] sm:$0xff] }
 0x4db   :  { %v16258_v50 = vadd.f32 %v16240_v38, %v16208_v6  ;;  %v15206_v38 = vrot.slane %v26035_v45, %v21580_v59 }
 0x4dd   :  { %15329 = vrot.lane.b32.xlu0 %v15311_v28, %s20528_s7 }
 0x4de   :  { %v16290_v23 = vpop.permute.xlu1 %16289 }
 0x4df   :  { %v16308_v15 = vadd.f32 %v16290_v23, %v16258_v50  ;;  %v15415_v23 = vmul.f32 %v26030_v51, %v24702_v63  ;;  %v15217_v50 = vrot.slane %v15206_v38, %v21602_v9  ;;  %v26038_v9 = vld [vmem:[#allocation22_spill] sm:$0xff] }
 0x4e1   :  { %15379 = vrot.lane.b32.xlu0 %v15361_v0, %s20529_s4 }
 0x4e2   :  { %v16340_v29 = vpop.permute.xlu1 %16339 }
 0x4e3   :  { %v16358_v13 = vadd.f32 %v16340_v29, %v16308_v15  ;;  %v16482_v54 = vpop.permute.xlu0 %16481  ;;  %v24734_v15 = vld [vmem:[#allocation2 + $0x11] sm:$0xff] }
 0x4e4   :  { %v16505_v57 = vadd.f32 %v16482_v54, %v16447_v21  ;;  %v26039_v21 = vld [vmem:[#allocation50_spill] sm:$0xff] }
 0x4e5   :  { %v16367_v58 = vadd.f32 %v24255_v2, %v16358_v13  ;;  %15429 = vrot.lane.b32.xlu0 %v15411_v25, %s20530_s8  ;;  %v26036_v13 = vld [vmem:[#allocation21_spill] sm:$0xff] }
 0x4e6   :  { %v13065_v44 = vpop.permute.xlu1 %13064  ;;  %v15487_v54 = vmul.f32 %v26036_v13, %v24734_v15 }
 0x4e7   :  { %13069 = vst.msk [vmem:[#allocation2 + $0x39] sm:$0x1] %vm647_vm7, %v13065_v44  ;;  %v16532_v37 = vpop.permute.xlu0 %16531  ;;  %vm16375_vm5 = vcmp.ge.f32.partialorder %v16367_v58, 0.0  ;;  %v16383_v56 = vmul.f32 0.01, %v16367_v58 }
 0x4e8   :  { %v16555_v32 = vadd.f32 %v16532_v37, %v16505_v57 }
 0x4e9   :  { %v16391_v31 = vsel %vm16375_vm5, %v16367_v58, %v16383_v56  ;;  %15287 = vrot.lane.b32.xlu0 %v15265_v8, %s20527_s29  ;;  %v24740_v58 = vstv %s17681_s19  ;;  %v15537_v56 = vmul.f32 %v26038_v9, %v24734_v15 }
 0x4ea   :  { %v13605_v19 = vpop.permute.xlu1 %13604  ;;  %16412 = vrot.lane.b32.xlu1 %v16391_v31, %s20526_s5  ;;  %26037 = vst [vmem:[#allocation18_spill] sm:$0xff] %v24740_v58  ;;  %v16899_v31 = vmul.f32 %v24740_v58, %v26039_v21 }
 0x4eb   :  { %13609 = vst.msk [vmem:[#allocation2 + $0x3a] sm:$0x1] %vm647_vm7, %v13605_v19  ;;  %v16582_v40 = vpop.permute.xlu0 %16581 }
 0x4ec   :  { %v16605_v16 = vadd.f32 %v16582_v40, %v16555_v32  ;;  %v26040_v40 = vld [vmem:[#allocation23_spill] sm:$0xff] }
 0x4ed   :  { %15337 = vrot.lane.b32.xlu0 %v15315_v43, %s20528_s7  ;;  %v15587_v43 = vmul.f32 %v26040_v40, %v24734_v15 }
 0x4ee   :  { %v14145_v35 = vpop.permute.xlu1 %14144 }
 0x4ef   :  { %14149 = vst.msk [vmem:[#allocation2 + $0x3b] sm:$0x1] %vm647_vm7, %v14145_v35  ;;  %v16632_v26 = vpop.permute.xlu0 %16631 }
 0x4f0   :  { %v16655_v49 = vadd.f32 %v16632_v26, %v16605_v16  ;;  %v26041_v16 = vld [vmem:[#allocation24_spill] sm:$0xff] }
 0x4f1   :  { %15387 = vrot.lane.b32.xlu0 %v15365_v5, %s20529_s4  ;;  %v15637_v35 = vmul.f32 %v26041_v16, %v24734_v15  ;;  %v24759_v26 = vld [vmem:[#allocation2 + $0x31] sm:$0xff] }
 0x4f2   :  { %v14685_v39 = vpop.permute.xlu1 %14684  ;;  %v16681_v28 = vadd.f32 %v16673_v10, %v16655_v49  ;;  %v15491_v49 = vmul.f32 %v26036_v13, %v24759_v26  ;;  %v15541_v10 = vmul.f32 %v26038_v9, %v24759_v26  ;;  %v15591_v38 = vmul.f32 %v26040_v40, %v24759_v26 }
 0x4f3   :  { %14689 = vst.msk [vmem:[#allocation2 + $0x3c] sm:$0x1] %vm647_vm7, %v14685_v39  ;;  %v16708_v6 = vpop.permute.xlu0 %16707 }
 0x4f4   :  { %v16731_v59 = vadd.f32 %v16708_v6, %v16681_v28  ;;  %v15641_v28 = vmul.f32 %v26041_v16, %v24759_v26  ;;  %v16451_v6 = vmul.f32 %v24705_v55, %v24592_v11  ;;  %v16677_v11 = vmul.f32 %v24719_v1, %v24617_v4 }
 0x4f5   :  { %15437 = vrot.lane.b32.xlu0 %v15415_v23, %s20530_s8  ;;  %v24779_v23 = vld [vmem:[#allocation2 + $0x12] sm:$0xff]  ;;  %v24870_v55 = vstv %s17686_s20 }
 0x4f6   :  { %26051 = vst [vmem:[#allocation20_spill] sm:$0xff] %v24870_v55 }
 0x4f7   :  { %v16758_v0 = vpop.permute.xlu0 %16757 }
 0x4f8   :  { %v16781_v25 = vadd.f32 %v16758_v0, %v16731_v59  ;;  %v26042_v59 = vld [vmem:[#allocation25_spill] sm:$0xff] }
 0x4f9   :  { %15222 = vrot.lane.b32.xlu0 %v15217_v50, %s20526_s5 }
 0x4fb   :  { %v16808_v29 = vpop.permute.xlu0 %16807 }
 0x4fc   :  { %v16831_v44 = vadd.f32 %v16808_v29, %v16781_v25  ;;  %v15713_v29 = vmul.f32 %v26042_v59, %v24779_v23 }
 0x4fd   :  { %15505 = vrot.lane.b32.xlu0 %v15487_v54, %s20527_s29 }
 0x4ff   :  { %v16858_v37 = vpop.permute.xlu0 %16857 }
 0x500   :  { %v15225_v8 = vpop.permute.xlu1 %15224  ;;  %v16881_v17 = vadd.f32 %v16858_v37, %v16831_v44  ;;  %v26043_v37 = vld [vmem:[#allocation26_spill] sm:$0xff] }
 0x501   :  { %15229 = vst.msk [vmem:[#allocation2 + $0x3d] sm:$0x1] %vm647_vm7, %v15225_v8  ;;  %15555 = vrot.lane.b32.xlu0 %v15537_v56, %s20528_s7  ;;  %v15763_v56 = vmul.f32 %v26043_v37, %v24779_v23 }
 0x502   :  { %v24748_v57 = vadd.f32 %v16899_v31, %v16881_v17  ;;  %v26044_v31 = vld [vmem:[#allocation27_spill] sm:$0xff] }
 0x503   :  { %v24750_v19 = vpop.permute.xlu0 %16933 }
 0x505   :  { %15605 = vrot.lane.b32.xlu0 %v15587_v43, %s20529_s4  ;;  %v15813_v43 = vmul.f32 %v26044_v31, %v24779_v23 }
 0x507   :  { %v24755_v32 = vpop.permute.xlu0 %16983 }
 0x509   :  { %15655 = vrot.lane.b32.xlu0 %v15637_v35, %s20530_s8 }
 0x50b   :  { %v24762_v5 = vpop.permute.xlu0 %17033 }
 0x50d   :  { %15513 = vrot.lane.b32.xlu0 %v15491_v49, %s20527_s29  ;;  %v26045_v49 = vld [vmem:[#allocation28_spill] sm:$0xff] }
 0x50e   :  { %26067 = vst [vmem:[#allocation28_spill] sm:$0xff] %v25035_v61 }
 0x50f   :  { %v24767_v18 = vpop.permute.xlu0 %17083 }
 0x511   :  { %15563 = vrot.lane.b32.xlu0 %v15541_v10, %s20528_s7  ;;  %v15863_v10 = vmul.f32 %v26045_v49, %v24779_v23 }
 0x513   :  { %v16490_v45 = vpop.permute.xlu0 %16489 }
 0x514   :  { %v16509_v50 = vadd.f32 %v16490_v45, %v16451_v6  ;;  %v24795_v45 = vld [vmem:[#allocation2 + $0x32] sm:$0xff] }
 0x515   :  { %15613 = vrot.lane.b32.xlu0 %v15591_v38, %s20529_s4  ;;  %v15717_v4 = vmul.f32 %v26042_v59, %v24795_v45 }
 0x517   :  { %v16540_v39 = vpop.permute.xlu0 %16539 }
 0x518   :  { %v16559_v54 = vadd.f32 %v16540_v39, %v16509_v50 }
 0x519   :  { %15663 = vrot.lane.b32.xlu0 %v15641_v28, %s20530_s8 }
 0x51b   :  { %v16590_v0 = vpop.permute.xlu0 %16589 }
 0x51c   :  { %v16609_v25 = vadd.f32 %v16590_v0, %v16559_v54  ;;  %v15767_v0 = vmul.f32 %v26043_v37, %v24795_v45  ;;  %v16903_v54 = vmul.f32 %v24740_v58, %v24647_v34 }
 0x51d   :  { %15731 = vrot.lane.b32.xlu0 %v15713_v29, %s20527_s29 }
 0x51f   :  { %v16640_v44 = vpop.permute.xlu0 %16639 }
 0x520   :  { %v16659_v8 = vadd.f32 %v16640_v44, %v16609_v25 }
 0x521   :  { %15781 = vrot.lane.b32.xlu0 %v15763_v56, %s20528_s7  ;;  %v15817_v56 = vmul.f32 %v26044_v31, %v24795_v45 }
 0x522   :  { %v16685_v17 = vadd.f32 %v16677_v11, %v16659_v8  ;;  %v15867_v11 = vmul.f32 %v26045_v49, %v24795_v45 }
 0x523   :  { %v16716_v21 = vpop.permute.xlu0 %16715 }
 0x524   :  { %v16735_v38 = vadd.f32 %v16716_v21, %v16685_v17  ;;  %v24817_v17 = vld [vmem:[#allocation2 + $0x13] sm:$0xff]  ;;  %v26046_v21 = vld [vmem:[#allocation29_spill] sm:$0xff] }
 0x525   :  { %15831 = vrot.lane.b32.xlu0 %v15813_v43, %s20529_s4  ;;  %v15939_v43 = vmul.f32 %v26046_v21, %v24817_v17 }
 0x527   :  { %v16766_v35 = vpop.permute.xlu0 %16765 }
 0x528   :  { %v16785_v28 = vadd.f32 %v16766_v35, %v16735_v38 }
 0x529   :  { %15881 = vrot.lane.b32.xlu0 %v15863_v10, %s20530_s8  ;;  %v26047_v10 = vld [vmem:[#allocation30_spill] sm:$0xff] }
 0x52a   :  { %v15989_v38 = vmul.f32 %v26047_v10, %v24817_v17 }
 0x52b   :  { %v16816_v39 = vpop.permute.xlu0 %16815 }
 0x52c   :  { %v16835_v6 = vadd.f32 %v16816_v39, %v16785_v28 }
 0x52d   :  { %15739 = vrot.lane.b32.xlu0 %v15717_v4, %s20527_s29  ;;  %v26048_v4 = vld [vmem:[#allocation31_spill] sm:$0xff] }
 0x52e   :  { %v16039_v28 = vmul.f32 %v26048_v4, %v24817_v17 }
 0x52f   :  { %v16866_v50 = vpop.permute.xlu0 %16865 }
 0x530   :  { %v16885_v29 = vadd.f32 %v16866_v50, %v16835_v6  ;;  %v26049_v50 = vld [vmem:[#allocation32_spill] sm:$0xff] }
 0x531   :  { %15789 = vrot.lane.b32.xlu0 %v15767_v0, %s20528_s7  ;;  %v16089_v0 = vmul.f32 %v26049_v50, %v24817_v17 }
 0x532   :  { %v24806_v25 = vadd.f32 %v16903_v54, %v16885_v29  ;;  %v24837_v29 = vld [vmem:[#allocation2 + $0x33] sm:$0xff] }
 0x533   :  { %v24808_v44 = vpop.permute.xlu0 %16941 }
 0x534   :  { %v16961_v7 = vadd.f32 %v24808_v44, %v24806_v25 }
 0x535   :  { %15839 = vrot.lane.b32.xlu0 %v15817_v56, %s20529_s4  ;;  %v15943_v56 = vmul.f32 %v26046_v21, %v24837_v29 }
 0x537   :  { %v24813_v8 = vpop.permute.xlu0 %16991 }
 0x539   :  { %15889 = vrot.lane.b32.xlu0 %v15867_v11, %s20530_s8 }
 0x53b   :  { %v24820_v34 = vpop.permute.xlu0 %17041 }
 0x53d   :  { %15957 = vrot.lane.b32.xlu0 %v15939_v43, %s20527_s29 }
 0x53f   :  { %v24825_v35 = vpop.permute.xlu0 %17091 }
 0x541   :  { %16007 = vrot.lane.b32.xlu0 %v15989_v38, %s20528_s7 }
 0x543   :  { %v14143_v39 = vpop.permute.xlu0 %14142 }
 0x544   :  { %14148 = vst.msk [vmem:[#allocation2 + $0x1b] sm:$0x1] %vm647_vm7, %v14143_v39 }
 0x545   :  { %16057 = vrot.lane.b32.xlu0 %v16039_v28, %s20529_s4  ;;  %v15993_v28 = vmul.f32 %v26047_v10, %v24837_v29 }
 0x547   :  { %v14683_v6 = vpop.permute.xlu0 %14682 }
 0x548   :  { %14688 = vst.msk [vmem:[#allocation2 + $0x1c] sm:$0x1] %vm647_vm7, %v14683_v6 }
 0x549   :  { %16107 = vrot.lane.b32.xlu0 %v16089_v0, %s20530_s8  ;;  %v16957_v0 = vadd.f32 %v24750_v19, %v24748_v57 }
 0x54b   :  { %v24840_v54 = vpop.permute.xlu0 %15279  ;;  %v24844_v11 = vld [vmem:[#allocation2 + $0x18] sm:$0xf] }
 0x54c   :  { %26050 = vst [vmem:[#allocation19_spill] sm:$0xff] %v24844_v11  ;;  %v16405_v43 = vpop.permute.xlu1 %16404  ;;  %v15262_v38 = vmul.f32 %v26026_v53, %v24844_v11  ;;  %v15312_v6 = vmul.f32 %v26028_v48, %v24844_v11  ;;  %v15362_v58 = vmul.f32 %v26029_v27, %v24844_v11  ;;  %v24884_v46 = vld [vmem:[#allocation2 + $0x14] sm:$0xff] }
 0x54d   :  { %16428 = vst.msk [vmem:[#allocation2 + $0xa] sm:$0xff] %vm16426_vm15, %v16405_v43  ;;  %15965 = vrot.lane.b32.xlu0 %v15943_v56, %s20527_s29  ;;  %v17007_v43 = vadd.f32 %v24755_v32, %v16957_v0  ;;  %v15412_v0 = vmul.f32 %v26030_v51, %v24844_v11  ;;  %v25001_v11 = vstv %s17690_s23 }
 0x54e   :  { %15281 = vrot.lane.b32.xlu1 %v15262_v38, %s20527_s29  ;;  %v16043_v38 = vmul.f32 %v26048_v4, %v24837_v29 }
 0x54f   :  { %v24851_v39 = vpop.permute.xlu0 %15329  ;;  %v17057_v57 = vadd.f32 %v24762_v5, %v17007_v43  ;;  %v24887_v5 = vld [vmem:[#allocation2 + $0x38] sm:$0xf]  ;;  %v26054_v43 = vld [vmem:[#allocation33_spill] sm:$0xff] }
 0x550   :  { %26052 = vst [vmem:[#allocation40_spill] sm:$0xff] %v24887_v5  ;;  %v15266_v52 = vmul.f32 %v26026_v53, %v24887_v5  ;;  %v17011_v53 = vadd.f32 %v24813_v8, %v16961_v7  ;;  %v15366_v24 = vmul.f32 %v26029_v27, %v24887_v5  ;;  %v26057_v7 = vld [vmem:[#allocation36_spill] sm:$0xff]  ;;  %v15416_v27 = vmul.f32 %v26030_v51, %v24887_v5 }
 0x551   :  { %16015 = vrot.lane.b32.xlu0 %v15993_v28, %s20528_s7  ;;  %v17107_v19 = vadd.f32 %v24767_v18, %v17057_v57  ;;  %v16093_v28 = vmul.f32 %v26049_v50, %v24837_v29  ;;  %v16315_v8 = vmul.f32 %v26057_v7, %v24884_v46 }
 0x552   :  { %15331 = vrot.lane.b32.xlu1 %v15312_v6, %s20528_s7 }
 0x553   :  { %v24862_v56 = vpop.permute.xlu0 %15379 }
 0x554   :  { %v24868_v1 = vld [vmem:[#allocation2 + $0x3] sm:$0xff] }
 0x555   :  { %16065 = vrot.lane.b32.xlu0 %v16043_v38, %s20529_s4  ;;  %v17125_v6 = vmul.f32 %v24870_v55, %v24868_v1  ;;  %v16165_v38 = vmul.f32 %v26054_v43, %v24884_v46  ;;  %v25011_v36 = vld [vmem:[#allocation2 + $0x4] sm:$0xff] }
 0x556   :  { %15381 = vrot.lane.b32.xlu1 %v15362_v58, %s20529_s4  ;;  %26065 = vst [vmem:[#allocation26_spill] sm:$0xff] %v25011_v36 }
 0x557   :  { %v24876_v32 = vpop.permute.xlu0 %15429  ;;  %v24889_v58 = vadd.f32 %v17125_v6, %v17107_v19  ;;  %v26055_v19 = vld [vmem:[#allocation34_spill] sm:$0xff] }
 0x558   :  { %v16215_v6 = vmul.f32 %v26055_v19, %v24884_v46 }
 0x559   :  { %16115 = vrot.lane.b32.xlu0 %v16093_v28, %s20530_s8  ;;  %26053 = vst [vmem:[#allocation44_spill] sm:$0xff] %v24889_v58  ;;  %v25045_v58 = vstv %s17517_s3 }
 0x55a   :  { %15431 = vrot.lane.b32.xlu1 %v15412_v0, %s20530_s8  ;;  %v15316_v0 = vmul.f32 %v26028_v48, %v24887_v5  ;;  %v17061_v48 = vadd.f32 %v24820_v34, %v17011_v53  ;;  %v24935_v34 = vld [vmem:[#allocation2 + $0x19] sm:$0xf]  ;;  %v24981_v5 = vstv %s17688_s22  ;;  %26068 = vst [vmem:[#allocation29_spill] sm:$0xff] %v25045_v58 }
 0x55b   :  { %v24892_v18 = vpop.permute.xlu0 %15287  ;;  %26059 = vst [vmem:[#allocation21_spill] sm:$0xff] %v24935_v34  ;;  %26063 = vst [vmem:[#allocation24_spill] sm:$0xff] %v24981_v5 }
 0x55c   :  { %v16413_v57 = vpop.permute.xlu1 %16412  ;;  %v17111_v25 = vadd.f32 %v24825_v35, %v17061_v48 }
 0x55d   :  { %16433 = vst.msk [vmem:[#allocation2 + $0x2a] sm:$0xff] %vm16426_vm15, %v16413_v57  ;;  %16183 = vrot.lane.b32.xlu0 %v16165_v38, %s20527_s29 }
 0x55e   :  { %15289 = vrot.lane.b32.xlu1 %v15266_v52, %s20527_s29  ;;  %v26056_v52 = vld [vmem:[#allocation35_spill] sm:$0xff] }
 0x55f   :  { %v24901_v28 = vpop.permute.xlu0 %15337  ;;  %v16265_v57 = vmul.f32 %v26056_v52, %v24884_v46 }
 0x561   :  { %16233 = vrot.lane.b32.xlu0 %v16215_v6, %s20528_s7 }
 0x562   :  { %15339 = vrot.lane.b32.xlu1 %v15316_v0, %s20528_s7  ;;  %v24932_v0 = vld [vmem:[#allocation2 + $0x34] sm:$0xff] }
 0x563   :  { %v24912_v38 = vpop.permute.xlu0 %15387  ;;  %26058 = vst [vmem:[#allocation48_spill] sm:$0xff] %v24932_v0  ;;  %v16169_v53 = vmul.f32 %v26054_v43, %v24932_v0  ;;  %v16219_v48 = vmul.f32 %v26055_v19, %v24932_v0 }
 0x564   :  { %v24918_v20 = vld [vmem:[#allocation2 + $0x23] sm:$0xff] }
 0x565   :  { %16283 = vrot.lane.b32.xlu0 %v16265_v57, %s20529_s4  ;;  %v17129_v6 = vmul.f32 %v24870_v55, %v24918_v20  ;;  %v15488_v57 = vmul.f32 %v26036_v13, %v24935_v34 }
 0x566   :  { %15389 = vrot.lane.b32.xlu1 %v15366_v24, %s20529_s4 }
 0x567   :  { %v24924_v44 = vpop.permute.xlu0 %15437  ;;  %v24937_v24 = vadd.f32 %v17129_v6, %v17111_v25  ;;  %v15538_v25 = vmul.f32 %v26038_v9, %v24935_v34  ;;  %v16269_v6 = vmul.f32 %v26056_v52, %v24932_v0 }
 0x569   :  { %16333 = vrot.lane.b32.xlu0 %v16315_v8, %s20530_s8  ;;  %26060 = vst [vmem:[#allocation22_spill] sm:$0xff] %v24937_v24 }
 0x56a   :  { %15439 = vrot.lane.b32.xlu1 %v15416_v27, %s20530_s8  ;;  %v15588_v27 = vmul.f32 %v26040_v40, %v24935_v34 }
 0x56b   :  { %v15223_v35 = vpop.permute.xlu0 %15222 }
 0x56c   :  { %15228 = vst.msk [vmem:[#allocation2 + $0x1d] sm:$0x1] %vm647_vm7, %v15223_v35 }
 0x56d   :  { %16191 = vrot.lane.b32.xlu0 %v16169_v53, %s20527_s29  ;;  %v16319_v53 = vmul.f32 %v26057_v7, %v24932_v0 }
 0x56e   :  { %15507 = vrot.lane.b32.xlu1 %v15488_v57, %s20527_s29  ;;  %v15638_v57 = vmul.f32 %v26041_v16, %v24935_v34  ;;  %v24991_v34 = vstv %s17689_s0 }
 0x56f   :  { %v24947_v51 = vpop.permute.xlu0 %15505  ;;  %26064 = vst [vmem:[#allocation25_spill] sm:$0xff] %v24991_v34 }
 0x571   :  { %16241 = vrot.lane.b32.xlu0 %v16219_v48, %s20528_s7  ;;  %v24969_v48 = vstv %s17687_s21 }
 0x572   :  { %15557 = vrot.lane.b32.xlu1 %v15538_v25, %s20528_s7  ;;  %26061 = vst [vmem:[#allocation50_spill] sm:$0xff] %v24969_v48  ;;  %v24972_v25 = vld [vmem:[#allocation2 + $0x39] sm:$0xf] }
 0x573   :  { %v24955_v8 = vpop.permute.xlu0 %15555  ;;  %26062 = vst [vmem:[#allocation23_spill] sm:$0xff] %v24972_v25  ;;  %v15492_v55 = vmul.f32 %v26036_v13, %v24972_v25  ;;  %v15542_v24 = vmul.f32 %v26038_v9, %v24972_v25  ;;  %v25056_v30 = vld [vmem:[#allocation2 + $0x1b] sm:$0xf] }
 0x574   :  { %v25096_v2 = vld [vmem:[#allocation2 + $0x1c] sm:$0xf] }
 0x575   :  { %16291 = vrot.lane.b32.xlu0 %v16269_v6, %s20529_s4 }
 0x576   :  { %15607 = vrot.lane.b32.xlu1 %v15588_v27, %s20529_s4  ;;  %v17143_v27 = vmul.f32 %v24969_v48, %v24868_v1 }
 0x577   :  { %v24963_v35 = vpop.permute.xlu0 %15605 }
 0x579   :  { %16341 = vrot.lane.b32.xlu0 %v16319_v53, %s20530_s8 }
 0x57a   :  { %15657 = vrot.lane.b32.xlu1 %v15638_v57, %s20530_s8  ;;  %v17193_v57 = vmul.f32 %v24981_v5, %v24868_v1 }
 0x57b   :  { %v24975_v6 = vpop.permute.xlu0 %15655 }
 0x57d   :  { %17159 = vrot.lane.b32.xlu0 %v17143_v27, %s20527_s29  ;;  %v15592_v27 = vmul.f32 %v26040_v40, %v24972_v25  ;;  %v25016_v40 = vld [vmem:[#allocation2 + $0x1a] sm:$0xf] }
 0x57e   :  { %15515 = vrot.lane.b32.xlu1 %v15492_v55, %s20527_s29  ;;  %v17243_v55 = vmul.f32 %v24991_v34, %v24868_v1  ;;  %26066 = vst [vmem:[#allocation27_spill] sm:$0xff] %v25016_v40 }
 0x57f   :  { %v24985_v53 = vpop.permute.xlu0 %15513 }
 0x581   :  { %17209 = vrot.lane.b32.xlu0 %v17193_v57, %s20528_s7  ;;  %v15642_v57 = vmul.f32 %v26041_v16, %v24972_v25  ;;  %v25025_v16 = vstv %s17693_s25  ;;  %v15764_v25 = vmul.f32 %v26043_v37, %v25016_v40 }
 0x582   :  { %15565 = vrot.lane.b32.xlu1 %v15542_v24, %s20528_s7  ;;  %v17293_v24 = vmul.f32 %v25001_v11, %v24868_v1  ;;  %v15714_v1 = vmul.f32 %v26042_v59, %v25016_v40 }
 0x583   :  { %v24995_v13 = vpop.permute.xlu0 %15563 }
 0x585   :  { %17259 = vrot.lane.b32.xlu0 %v17243_v55, %s20529_s4 }
 0x586   :  { %15615 = vrot.lane.b32.xlu1 %v15592_v27, %s20529_s4  ;;  %v17369_v27 = vmul.f32 %v25013_v41, %v25011_v36 }
 0x587   :  { %v25005_v9 = vpop.permute.xlu0 %15613 }
 0x589   :  { %17309 = vrot.lane.b32.xlu0 %v17293_v24, %s20530_s8 }
 0x58a   :  { %15665 = vrot.lane.b32.xlu1 %v15642_v57, %s20530_s8  ;;  %v17419_v57 = vmul.f32 %v25025_v16, %v25011_v36 }
 0x58b   :  { %v25019_v55 = vpop.permute.xlu0 %15663 }
 0x58d   :  { %17385 = vrot.lane.b32.xlu0 %v17369_v27, %s20527_s29  ;;  %v17469_v27 = vmul.f32 %v25035_v61, %v25011_v36 }
 0x58e   :  { %15733 = vrot.lane.b32.xlu1 %v15714_v1, %s20527_s29  ;;  %v15814_v1 = vmul.f32 %v26044_v31, %v25016_v40 }
 0x58f   :  { %v25029_v24 = vpop.permute.xlu0 %15731 }
 0x591   :  { %17435 = vrot.lane.b32.xlu0 %v17419_v57, %s20528_s7  ;;  %v17519_v57 = vmul.f32 %v25045_v58, %v25011_v36 }
 0x592   :  { %15783 = vrot.lane.b32.xlu1 %v15764_v25, %s20528_s7  ;;  %v15864_v25 = vmul.f32 %v26045_v49, %v25016_v40  ;;  %v17247_v40 = vmul.f32 %v24991_v34, %v24918_v20  ;;  %v16090_v34 = vmul.f32 %v26049_v50, %v25056_v30 }
 0x593   :  { %v25039_v62 = vpop.permute.xlu0 %15781 }
 0x595   :  { %17485 = vrot.lane.b32.xlu0 %v17469_v27, %s20529_s4  ;;  %v17147_v27 = vmul.f32 %v24969_v48, %v24918_v20 }
 0x596   :  { %15833 = vrot.lane.b32.xlu1 %v15814_v1, %s20529_s4  ;;  %v15940_v1 = vmul.f32 %v26046_v21, %v25056_v30 }
 0x597   :  { %v25049_v33 = vpop.permute.xlu0 %15831 }
 0x599   :  { %17535 = vrot.lane.b32.xlu0 %v17519_v57, %s20530_s8  ;;  %v17197_v57 = vmul.f32 %v24981_v5, %v24918_v20 }
 0x59a   :  { %15883 = vrot.lane.b32.xlu1 %v15864_v25, %s20530_s8  ;;  %v15990_v25 = vmul.f32 %v26047_v10, %v25056_v30 }
 0x59b   :  { %v25059_v42 = vpop.permute.xlu0 %15881 }
 0x59d   :  { %17167 = vrot.lane.b32.xlu0 %v17147_v27, %s20527_s29  ;;  %v15243_v27 = vmul.f32 %v24074_v60, %v24684_v47  ;;  %v25093_v47 = vld [vmem:[#allocation2 + $0x24] sm:$0xff] }
 0x59e   :  { %15959 = vrot.lane.b32.xlu1 %v15940_v1, %s20527_s29  ;;  %v16040_v1 = vmul.f32 %v26048_v4, %v25056_v30 }
 0x59f   :  { %v25067_v36 = vpop.permute.xlu0 %15739  ;;  %v15301_v5 = vadd.f32 %v24840_v54, %v15243_v27  ;;  %v15469_v27 = vmul.f32 %v24122_v14, %v24734_v15  ;;  %v17473_v15 = vmul.f32 %v25035_v61, %v25093_v47 }
 0x5a1   :  { %17217 = vrot.lane.b32.xlu0 %v17197_v57, %s20528_s7  ;;  %v15351_v0 = vadd.f32 %v24851_v39, %v15301_v5  ;;  %v16166_v5 = vmul.f32 %v26054_v43, %v25096_v2 }
 0x5a2   :  { %16009 = vrot.lane.b32.xlu1 %v15990_v25, %s20528_s7  ;;  %v17297_v25 = vmul.f32 %v25001_v11, %v24918_v20  ;;  %v17373_v20 = vmul.f32 %v25013_v41, %v25093_v47 }
 0x5a3   :  { %v25075_v48 = vpop.permute.xlu0 %15789  ;;  %v15401_v54 = vadd.f32 %v24862_v56, %v15351_v0  ;;  %v17423_v0 = vmul.f32 %v25025_v16, %v25093_v47 }
 0x5a5   :  { %17267 = vrot.lane.b32.xlu0 %v17247_v40, %s20529_s4  ;;  %v15451_v39 = vadd.f32 %v24876_v32, %v15401_v54  ;;  %v15247_v54 = vmul.f32 %v24074_v60, %v24702_v63 }
 0x5a6   :  { %16059 = vrot.lane.b32.xlu1 %v16040_v1, %s20529_s4  ;;  %v16216_v1 = vmul.f32 %v26055_v19, %v25096_v2 }
 0x5a7   :  { %v25086_v57 = vpop.permute.xlu0 %15839 }
 0x5a9   :  { %17317 = vrot.lane.b32.xlu0 %v17297_v25, %s20530_s8 }
 0x5aa   :  { %16109 = vrot.lane.b32.xlu1 %v16090_v34, %s20530_s8  ;;  %v15477_v34 = vadd.f32 %v15469_v27, %v15451_v39  ;;  %v16266_v39 = vmul.f32 %v26056_v52, %v25096_v2 }
 0x5ab   :  { %v25100_v40 = vpop.permute.xlu0 %15889 }
 0x5ac   :  { %v15527_v32 = vadd.f32 %v24947_v51, %v15477_v34 }
 0x5ad   :  { %17393 = vrot.lane.b32.xlu0 %v17373_v20, %s20527_s29 }
 0x5ae   :  { %16185 = vrot.lane.b32.xlu1 %v16166_v5, %s20527_s29  ;;  %v15577_v20 = vadd.f32 %v24955_v8, %v15527_v32  ;;  %v15305_v5 = vadd.f32 %v24892_v18, %v15247_v54  ;;  %v16316_v8 = vmul.f32 %v26057_v7, %v25096_v2  ;;  %v15473_v54 = vmul.f32 %v24122_v14, %v24759_v26 }
 0x5af   :  { %v15958_v56 = vpop.permute.xlu0 %15957 }
 0x5b0   :  { %v15627_v51 = vadd.f32 %v24963_v35, %v15577_v20  ;;  %v15355_v34 = vadd.f32 %v24901_v28, %v15305_v5  ;;  %v15695_v35 = vmul.f32 %v24168_v3, %v24779_v23 }
 0x5b1   :  { %17443 = vrot.lane.b32.xlu0 %v17423_v0, %s20528_s7  ;;  %v17523_v0 = vmul.f32 %v25045_v58, %v25093_v47 }
 0x5b2   :  { %16235 = vrot.lane.b32.xlu1 %v16216_v1, %s20528_s7  ;;  %v15677_v63 = vadd.f32 %v24975_v6, %v15627_v51  ;;  %v25136_v1 = vld [vmem:[#allocation2 + $0x3a] sm:$0xf]  ;;  %v15405_v18 = vadd.f32 %v24912_v38, %v15355_v34 }
 0x5b3   :  { %v16008_v25 = vpop.permute.xlu0 %16007  ;;  %v15718_v6 = vmul.f32 %v26042_v59, %v25136_v1 }
 0x5b4   :  { %v15703_v28 = vadd.f32 %v15695_v35, %v15677_v63 }
 0x5b5   :  { %17493 = vrot.lane.b32.xlu0 %v17473_v15, %s20529_s4  ;;  %v15455_v15 = vadd.f32 %v24924_v44, %v15405_v18  ;;  %v15768_v44 = vmul.f32 %v26043_v37, %v25136_v1  ;;  %v15921_v37 = vmul.f32 %v24200_v22, %v24817_v17 }
 0x5b6   :  { %16285 = vrot.lane.b32.xlu1 %v16266_v39, %s20529_s4  ;;  %v15753_v20 = vadd.f32 %v25029_v24, %v15703_v28 }
 0x5b7   :  { %v16058_v27 = vpop.permute.xlu0 %16057  ;;  %v15481_v39 = vadd.f32 %v15473_v54, %v15455_v15 }
 0x5b8   :  { %v15803_v23 = vadd.f32 %v25039_v62, %v15753_v20  ;;  %v15818_v62 = vmul.f32 %v26044_v31, %v25136_v1  ;;  %v15699_v31 = vmul.f32 %v24168_v3, %v24795_v45 }
 0x5b9   :  { %17543 = vrot.lane.b32.xlu0 %v17523_v0, %s20530_s8  ;;  %v15531_v51 = vadd.f32 %v24985_v53, %v15481_v39 }
 0x5ba   :  { %16335 = vrot.lane.b32.xlu1 %v16316_v8, %s20530_s8  ;;  %v15853_v59 = vadd.f32 %v25049_v33, %v15803_v23  ;;  %v16147_v23 = vmul.f32 %v24234_v12, %v24884_v46 }
 0x5bb   :  { %v16108_v32 = vpop.permute.xlu0 %16107  ;;  %v15581_v24 = vadd.f32 %v24995_v13, %v15531_v51  ;;  %v25172_v13 = vld [vmem:[#allocation2 + $0x3b] sm:$0xf] }
 0x5bc   :  { %v15903_v0 = vadd.f32 %v25059_v42, %v15853_v59  ;;  %v15868_v42 = vmul.f32 %v26045_v49, %v25136_v1  ;;  %v15994_v39 = vmul.f32 %v26047_v10, %v25172_v13 }
 0x5bd   :  { %v15631_v63 = vadd.f32 %v25005_v9, %v15581_v24  ;;  %v25204_v24 = vld [vmem:[#allocation2 + $0x3c] sm:$0xf] }
 0x5be   :  { %15741 = vrot.lane.b32.xlu1 %v15718_v6, %s20527_s29  ;;  %v15929_v8 = vadd.f32 %v15921_v37, %v15903_v0 }
 0x5bf   :  { %v15966_v38 = vpop.permute.xlu0 %15965  ;;  %v15681_v53 = vadd.f32 %v25019_v55, %v15631_v63  ;;  %v15944_v55 = vmul.f32 %v26046_v21, %v25172_v13 }
 0x5c0   :  { %v25150_v5 = vpop.permute.xlu1 %15281  ;;  %v15979_v9 = vadd.f32 %v15958_v56, %v15929_v8 }
 0x5c1   :  { %v15707_v35 = vadd.f32 %v15699_v31, %v15681_v53  ;;  %v16170_v53 = vmul.f32 %v26054_v43, %v25204_v24 }
 0x5c2   :  { %15791 = vrot.lane.b32.xlu1 %v15768_v44, %s20528_s7  ;;  %v16029_v15 = vadd.f32 %v16008_v25, %v15979_v9 }
 0x5c3   :  { %v16016_v26 = vpop.permute.xlu0 %16015  ;;  %v15757_v6 = vadd.f32 %v25067_v36, %v15707_v35 }
 0x5c4   :  { %v25159_v34 = vpop.permute.xlu1 %15331  ;;  %v16079_v54 = vadd.f32 %v16058_v27, %v16029_v15  ;;  %v26070_v15 = vld [vmem:[#allocation48_spill] sm:$0xff] }
 0x5c5   :  { %v15807_v20 = vadd.f32 %v25075_v48, %v15757_v6  ;;  %v16044_v48 = vmul.f32 %v26048_v4, %v25172_v13 }
 0x5c6   :  { %15841 = vrot.lane.b32.xlu1 %v15818_v62, %s20529_s4  ;;  %v16129_v45 = vadd.f32 %v16108_v32, %v16079_v54  ;;  %v15925_v32 = vmul.f32 %v24200_v22, %v24837_v29 }
 0x5c7   :  { %v16066_v33 = vpop.permute.xlu0 %16065  ;;  %v15857_v25 = vadd.f32 %v25086_v57, %v15807_v20 }
 0x5c8   :  { %v25168_v18 = vpop.permute.xlu1 %15381  ;;  %v16155_v27 = vadd.f32 %v16147_v23, %v16129_v45 }
 0x5c9   :  { %v15907_v21 = vadd.f32 %v25100_v40, %v15857_v25  ;;  %v16094_v40 = vmul.f32 %v26049_v50, %v25172_v13  ;;  %v25230_v25 = vld [vmem:[#allocation2 + $0x8] sm:$0xff] }
 0x5ca   :  { %15891 = vrot.lane.b32.xlu1 %v15868_v42, %s20530_s8  ;;  %v26069_v42 = vld [vmem:[#allocation37_spill] sm:$0xff] }
 0x5cb   :  { %v16116_v17 = vpop.permute.xlu0 %16115  ;;  %v15933_v51 = vadd.f32 %v15925_v32, %v15907_v21 }
 0x5cc   :  { %v25177_v28 = vpop.permute.xlu1 %15431 }
 0x5cd   :  { %v15983_v0 = vadd.f32 %v15966_v38, %v15933_v51  ;;  %v16220_v38 = vmul.f32 %v26055_v19, %v25204_v24 }
 0x5ce   :  { %15967 = vrot.lane.b32.xlu1 %v15944_v55, %s20527_s29  ;;  %v16151_v55 = vmul.f32 %v24234_v12, %v26070_v15  ;;  %v25257_v15 = vstv %s17691_s26 }
 0x5cf   :  { %v16184_v49 = vpop.permute.xlu0 %16183  ;;  %v16033_v63 = vadd.f32 %v16016_v26, %v15983_v0 }
 0x5d0   :  { %v25184_v56 = vpop.permute.xlu1 %15289  ;;  %v16205_v10 = vadd.f32 %v16184_v49, %v16155_v27 }
 0x5d1   :  { %v16083_v8 = vadd.f32 %v16066_v33, %v16033_v63 }
 0x5d2   :  { %16017 = vrot.lane.b32.xlu1 %v15994_v39, %s20528_s7  ;;  %v16320_v39 = vmul.f32 %v26057_v7, %v25204_v24  ;;  %v26072_v7 = vld [vmem:[#allocation41_spill] sm:$0xff] }
 0x5d3   :  { %v16234_v36 = vpop.permute.xlu0 %16233  ;;  %v16133_v9 = vadd.f32 %v16116_v17, %v16083_v8  ;;  %v16270_v17 = vmul.f32 %v26056_v52, %v25204_v24  ;;  %v26071_v52 = vld [vmem:[#allocation39_spill] sm:$0xff]  ;;  %v16516_v51 = vmul.f32 %v26072_v7, %v25230_v25 }
 0x5d4   :  { %v25193_v44 = vpop.permute.xlu1 %15339  ;;  %v16255_v46 = vadd.f32 %v16234_v36, %v16205_v10 }
 0x5d5   :  { %v16159_v6 = vadd.f32 %v16151_v55, %v16133_v9  ;;  %v26075_v9 = vld [vmem:[#allocation43_spill] sm:$0xff] }
 0x5d6   :  { %16067 = vrot.lane.b32.xlu1 %v16044_v48, %s20529_s4  ;;  %v16466_v48 = vmul.f32 %v26071_v52, %v25230_v25 }
 0x5d7   :  { %v16284_v57 = vpop.permute.xlu0 %16283 }
 0x5d8   :  { %v25200_v59 = vpop.permute.xlu1 %15389  ;;  %v16305_v62 = vadd.f32 %v16284_v57, %v16255_v46 }
 0x5da   :  { %16117 = vrot.lane.b32.xlu1 %v16094_v40, %s20530_s8 }
 0x5db   :  { %v16334_v4 = vpop.permute.xlu0 %16333 }
 0x5dc   :  { %v16355_v29 = vadd.f32 %v16334_v4, %v16305_v62  ;;  %v25207_v37 = vpop.permute.xlu1 %15439  ;;  %v26073_v4 = vld [vmem:[#allocation42_spill] sm:$0xff] }
 0x5dd   :  { %v16566_v63 = vmul.f32 %v26073_v4, %v25230_v25 }
 0x5de   :  { %v16364_v31 = vadd.f32 %v26069_v42, %v16355_v29  ;;  %16193 = vrot.lane.b32.xlu1 %v16170_v53, %s20527_s29  ;;  %v26074_v29 = vld [vmem:[#allocation44_spill] sm:$0xff] }
 0x5df   :  { %v16192_v50 = vpop.permute.xlu0 %16191 }
 0x5e0   :  { %v25213_v35 = vpop.permute.xlu1 %15507  ;;  %vm16372_vm7 = vcmp.ge.f32.partialorder %v16364_v31, 0.0  ;;  %v16380_v26 = vmul.f32 0.01, %v16364_v31  ;;  %v16209_v49 = vadd.f32 %v16192_v50, %v16159_v6 }
 0x5e2   :  { %16243 = vrot.lane.b32.xlu1 %v16220_v38, %s20528_s7  ;;  %v16388_v43 = vsel %vm16372_vm7, %v16364_v31, %v16380_v26  ;;  %v16616_v38 = vmul.f32 %v26075_v9, %v25230_v25  ;;  %v25255_v26 = vld [vmem:[#allocation2 + $0x9] sm:$0xff] }
 0x5e3   :  { %16406 = vrot.lane.b32.xlu0 %v16388_v43, %s20526_s5  ;;  %v16242_v33 = vpop.permute.xlu0 %16241 }
 0x5e4   :  { %v25221_v54 = vpop.permute.xlu1 %15557  ;;  %v16259_v20 = vadd.f32 %v16242_v33, %v16209_v49 }
 0x5e6   :  { %16293 = vrot.lane.b32.xlu1 %v16270_v17, %s20529_s4  ;;  %v26076_v17 = vld [vmem:[#allocation45_spill] sm:$0xff] }
 0x5e7   :  { %v16292_v19 = vpop.permute.xlu0 %16291  ;;  %v16692_v49 = vmul.f32 %v26076_v17, %v25255_v26 }
 0x5e8   :  { %v25226_v45 = vpop.permute.xlu1 %15607  ;;  %v16309_v23 = vadd.f32 %v16292_v19, %v16259_v20  ;;  %v26077_v19 = vld [vmem:[#allocation26_spill] sm:$0xff] }
 0x5e9   :  { %v17351_v20 = vmul.f32 %v25257_v15, %v26077_v19 }
 0x5ea   :  { %16343 = vrot.lane.b32.xlu1 %v16320_v39, %s20530_s8 }
 0x5eb   :  { %v16342_v36 = vpop.permute.xlu0 %16341 }
 0x5ec   :  { %v16359_v21 = vadd.f32 %v16342_v36, %v16309_v23  ;;  %v25233_v27 = vpop.permute.xlu1 %15657 }
 0x5ee   :  { %v16368_v32 = vadd.f32 %v26069_v42, %v16359_v21  ;;  %16483 = vrot.lane.b32.xlu1 %v16466_v48, %s20527_s29  ;;  %v26078_v21 = vld [vmem:[#allocation46_spill] sm:$0xff] }
 0x5ef   :  { %v17160_v10 = vpop.permute.xlu0 %17159  ;;  %v16742_v48 = vmul.f32 %v26078_v21, %v25255_v26 }
 0x5f0   :  { %v25239_v57 = vpop.permute.xlu1 %15515  ;;  %vm16376_vm6 = vcmp.ge.f32.partialorder %v16368_v32, 0.0  ;;  %v16384_v46 = vmul.f32 0.01, %v16368_v32  ;;  %v17183_v53 = vadd.f32 %v17160_v10, %v26074_v29 }
 0x5f2   :  { %16533 = vrot.lane.b32.xlu1 %v16516_v51, %s20528_s7  ;;  %v16392_v40 = vsel %vm16376_vm6, %v16368_v32, %v16384_v46  ;;  %v26079_v51 = vld [vmem:[#allocation47_spill] sm:$0xff] }
 0x5f3   :  { %16414 = vrot.lane.b32.xlu0 %v16392_v40, %s20526_s5  ;;  %v17210_v0 = vpop.permute.xlu0 %17209  ;;  %v16792_v46 = vmul.f32 %v26079_v51, %v25255_v26  ;;  %v26080_v40 = vld [vmem:[#allocation19_spill] sm:$0xff] }
 0x5f4   :  { %v25245_v62 = vpop.permute.xlu1 %15565  ;;  %v17233_v31 = vadd.f32 %v17210_v0, %v17183_v53  ;;  %v15244_v0 = vmul.f32 %v24074_v60, %v26080_v40 }
 0x5f6   :  { %16583 = vrot.lane.b32.xlu1 %v16566_v63, %s20529_s4  ;;  %v15302_v29 = vadd.f32 %v25150_v5, %v15244_v0 }
 0x5f7   :  { %v17260_v8 = vpop.permute.xlu0 %17259 }
 0x5f8   :  { %v25251_v50 = vpop.permute.xlu1 %15615  ;;  %v17283_v55 = vadd.f32 %v17260_v8, %v17233_v31 }
 0x5fa   :  { %16633 = vrot.lane.b32.xlu1 %v16616_v38, %s20530_s8  ;;  %v26081_v38 = vld [vmem:[#allocation49_spill] sm:$0xff] }
 0x5fb   :  { %v17310_v43 = vpop.permute.xlu0 %17309 }
 0x5fc   :  { %v17333_v33 = vadd.f32 %v17310_v43, %v17283_v55  ;;  %v25260_v6 = vpop.permute.xlu1 %15665  ;;  %v16842_v55 = vmul.f32 %v26081_v38, %v25255_v26  ;;  %v15352_v43 = vadd.f32 %v25159_v34, %v15302_v29  ;;  %v26083_v34 = vld [vmem:[#allocation21_spill] sm:$0xff] }
 0x5fd   :  { %v15470_v0 = vmul.f32 %v24122_v14, %v26083_v34  ;;  %v26086_v34 = vld [vmem:[#allocation22_spill] sm:$0xff] }
 0x5fe   :  { %16709 = vrot.lane.b32.xlu1 %v16692_v49, %s20527_s29  ;;  %v17359_v39 = vadd.f32 %v17351_v20, %v17333_v33  ;;  %v25283_v33 = vld [vmem:[#allocation2 + $0xa] sm:$0xff]  ;;  %v15402_v19 = vadd.f32 %v25168_v18, %v15352_v43  ;;  %v25287_v20 = vstv %s17670_s27 }
 0x5ff   :  { %v17386_v23 = vpop.permute.xlu0 %17385 }
 0x600   :  { %v25267_v36 = vpop.permute.xlu1 %15733  ;;  %v17409_v63 = vadd.f32 %v17386_v23, %v17359_v39 }
 0x602   :  { %16759 = vrot.lane.b32.xlu1 %v16742_v48, %s20528_s7  ;;  %v26082_v48 = vld [vmem:[#allocation51_spill] sm:$0xff] }
 0x603   :  { %v17436_v32 = vpop.permute.xlu0 %17435 }
 0x604   :  { %v25272_v10 = vpop.permute.xlu1 %15783  ;;  %v17459_v8 = vadd.f32 %v17436_v32, %v17409_v63  ;;  %v16918_v32 = vmul.f32 %v26082_v48, %v25283_v33 }
 0x606   :  { %16809 = vrot.lane.b32.xlu1 %v16792_v46, %s20529_s4  ;;  %v15452_v46 = vadd.f32 %v25177_v28, %v15402_v19 }
 0x607   :  { %v17486_v53 = vpop.permute.xlu0 %17485 }
 0x608   :  { %v15834_v31 = vpop.permute.xlu1 %15833  ;;  %v17509_v49 = vadd.f32 %v17486_v53, %v17459_v8  ;;  %v26084_v53 = vld [vmem:[#allocation52_spill] sm:$0xff] }
 0x609   :  { %v16968_v8 = vmul.f32 %v26084_v53, %v25283_v33 }
 0x60a   :  { %16859 = vrot.lane.b32.xlu1 %v16842_v55, %s20530_s8  ;;  %v15478_v55 = vadd.f32 %v15470_v0, %v15452_v46 }
 0x60b   :  { %v17536_v39 = vpop.permute.xlu0 %17535 }
 0x60c   :  { %v17559_v23 = vadd.f32 %v17536_v39, %v17509_v49  ;;  %v15884_v5 = vpop.permute.xlu1 %15883  ;;  %v15528_v28 = vadd.f32 %v25213_v35, %v15478_v55  ;;  %v26085_v39 = vld [vmem:[#allocation53_spill] sm:$0xff] }
 0x60e   :  { %v17568_v40 = vadd.f32 %v25287_v20, %v17559_v23  ;;  %16935 = vrot.lane.b32.xlu1 %v16918_v32, %s20527_s29  ;;  %v17018_v23 = vmul.f32 %v26085_v39, %v25283_v33  ;;  %v15578_v32 = vadd.f32 %v25221_v54, %v15528_v28  ;;  %v26088_v54 = vld [vmem:[#allocation27_spill] sm:$0xff] }
 0x60f   :  { %v17168_v63 = vpop.permute.xlu0 %17167 }
 0x610   :  { %vm17576_vm1 = vcmp.ge.f32.partialorder %v17568_v40, 0.0  ;;  %v17584_v18 = vmul.f32 0.01, %v17568_v40  ;;  %v25296_v29 = vpop.permute.xlu1 %15959  ;;  %v17187_v58 = vadd.f32 %v17168_v63, %v26086_v34  ;;  %v15628_v46 = vadd.f32 %v25226_v45, %v15578_v32 }
 0x611   :  { %v15696_v63 = vmul.f32 %v24168_v3, %v26088_v54  ;;  %v17355_v45 = vmul.f32 %v25257_v15, %v25093_v47 }
 0x612   :  { %v17592_v43 = vsel %vm17576_vm1, %v17568_v40, %v17584_v18  ;;  %16985 = vrot.lane.b32.xlu1 %v16968_v8, %s20528_s7  ;;  %v26087_v18 = vld [vmem:[#allocation54_spill] sm:$0xff]  ;;  %v15678_v55 = vadd.f32 %v25233_v27, %v15628_v46 }
 0x613   :  { %17601 = vst.msk [vmem:[%s25844_s6] sm:$0xff] %vm17600_vm8, %v17592_v43  ;;  %v17218_v49 = vpop.permute.xlu0 %17217  ;;  %v17068_v8 = vmul.f32 %v26087_v18, %v25283_v33  ;;  %v25315_v43 = vld [vmem:[#allocation2 + $0x28] sm:$0xff] }
 0x614   :  { %v16010_v19 = vpop.permute.xlu1 %16009  ;;  %v17237_v35 = vadd.f32 %v17218_v49, %v17187_v58  ;;  %v16470_v58 = vmul.f32 %v26071_v52, %v25315_v43  ;;  %v15704_v49 = vadd.f32 %v15696_v63, %v15678_v55 }
 0x616   :  { %17035 = vrot.lane.b32.xlu1 %v17018_v23, %s20529_s4  ;;  %v15754_v32 = vadd.f32 %v25267_v36, %v15704_v49  ;;  %v16570_v36 = vmul.f32 %v26073_v4, %v25315_v43 }
 0x617   :  { %v17268_v40 = vpop.permute.xlu0 %17267 }
 0x618   :  { %v16060_v0 = vpop.permute.xlu1 %16059  ;;  %v17287_v61 = vadd.f32 %v17268_v40, %v17237_v35  ;;  %v16520_v35 = vmul.f32 %v26072_v7, %v25315_v43  ;;  %v15804_v54 = vadd.f32 %v25272_v10, %v15754_v32  ;;  %v15922_v10 = vmul.f32 %v24200_v22, %v25056_v30 }
 0x61a   :  { %17085 = vrot.lane.b32.xlu1 %v17068_v8, %s20530_s8  ;;  %v26089_v8 = vld [vmem:[#allocation40_spill] sm:$0xff]  ;;  %v15854_v55 = vadd.f32 %v15834_v31, %v15804_v54  ;;  %v16620_v31 = vmul.f32 %v26075_v9, %v25315_v43 }
 0x61b   :  { %v17318_v28 = vpop.permute.xlu0 %17317 }
 0x61c   :  { %v17337_v23 = vadd.f32 %v17318_v28, %v17287_v61  ;;  %v16110_v34 = vpop.permute.xlu1 %16109  ;;  %v15248_v61 = vmul.f32 %v24074_v60, %v26089_v8 }
 0x61e   :  { %16491 = vrot.lane.b32.xlu1 %v16470_v58, %s20527_s29  ;;  %v17363_v27 = vadd.f32 %v17355_v45, %v17337_v23  ;;  %v15306_v47 = vadd.f32 %v25184_v56, %v15248_v61  ;;  %v15904_v58 = vadd.f32 %v15884_v5, %v15854_v55  ;;  %v25343_v61 = vld [vmem:[#allocation2 + $0x29] sm:$0xff] }
 0x61f   :  { %v17394_v46 = vpop.permute.xlu0 %17393  ;;  %v26090_v5 = vld [vmem:[#allocation23_spill] sm:$0xff]  ;;  %v16696_v54 = vmul.f32 %v26076_v17, %v25343_v61 }
 0x620   :  { %v16186_v40 = vpop.permute.xlu1 %16185  ;;  %v15356_v23 = vadd.f32 %v25193_v44, %v15306_v47  ;;  %v17413_v45 = vadd.f32 %v17394_v46, %v17363_v27  ;;  %v15930_v8 = vadd.f32 %v15922_v10, %v15904_v58 }
 0x622   :  { %16541 = vrot.lane.b32.xlu1 %v16520_v35, %s20528_s7  ;;  %v15406_v60 = vadd.f32 %v25200_v59, %v15356_v23  ;;  %v15474_v59 = vmul.f32 %v24122_v14, %v26090_v5  ;;  %v15980_v55 = vadd.f32 %v25296_v29, %v15930_v8  ;;  %v16746_v14 = vmul.f32 %v26078_v21, %v25343_v61  ;;  %v25373_v8 = vld [vmem:[#allocation2 + $0x2a] sm:$0xff] }
 0x623   :  { %v17444_v63 = vpop.permute.xlu0 %17443 }
 0x624   :  { %v16236_v28 = vpop.permute.xlu1 %16235  ;;  %v17463_v32 = vadd.f32 %v17444_v63, %v17413_v45  ;;  %v15456_v35 = vadd.f32 %v25207_v37, %v15406_v60 }
 0x626   :  { %16591 = vrot.lane.b32.xlu1 %v16570_v36, %s20529_s4  ;;  %v15482_v47 = vadd.f32 %v15474_v59, %v15456_v35  ;;  %v16030_v36 = vadd.f32 %v16010_v19, %v15980_v55  ;;  %v16796_v19 = vmul.f32 %v26079_v51, %v25343_v61 }
 0x627   :  { %v17494_v49 = vpop.permute.xlu0 %17493 }
 0x628   :  { %v16286_v56 = vpop.permute.xlu1 %16285  ;;  %v17513_v44 = vadd.f32 %v17494_v49, %v17463_v32  ;;  %v15532_v63 = vadd.f32 %v25239_v57, %v15482_v47  ;;  %v16080_v60 = vadd.f32 %v16060_v0, %v16030_v36 }
 0x62a   :  { %16641 = vrot.lane.b32.xlu1 %v16620_v31, %s20530_s8  ;;  %v15582_v45 = vadd.f32 %v25245_v62, %v15532_v63  ;;  %v16130_v49 = vadd.f32 %v16110_v34, %v16080_v60  ;;  %v16148_v62 = vmul.f32 %v24234_v12, %v25096_v2  ;;  %v16846_v31 = vmul.f32 %v26081_v38, %v25343_v61 }
 0x62b   :  { %v17544_v27 = vpop.permute.xlu0 %17543  ;;  %v16922_v2 = vmul.f32 %v26082_v48, %v25373_v8 }
 0x62c   :  { %v17563_v46 = vadd.f32 %v17544_v27, %v17513_v44  ;;  %v16336_v30 = vpop.permute.xlu1 %16335  ;;  %v15632_v29 = vadd.f32 %v25251_v50, %v15582_v45  ;;  %v16156_v0 = vadd.f32 %v16148_v62, %v16130_v49  ;;  %v15700_v50 = vmul.f32 %v24168_v3, %v25136_v1 }
 0x62e   :  { %v17572_v37 = vadd.f32 %v25287_v20, %v17563_v46  ;;  %16717 = vrot.lane.b32.xlu1 %v16696_v54, %s20527_s29  ;;  %v15682_v32 = vadd.f32 %v25260_v6, %v15632_v29  ;;  %v16206_v44 = vadd.f32 %v16186_v40, %v16156_v0  ;;  %v16972_v54 = vmul.f32 %v26084_v53, %v25373_v8 }
 0x62f   :  { %v15926_v40 = vmul.f32 %v24200_v22, %v25172_v13  ;;  %v16152_v29 = vmul.f32 %v24234_v12, %v25204_v24 }
 0x630   :  { %vm17580_vm9 = vcmp.ge.f32.partialorder %v17572_v37, 0.0  ;;  %v17588_v23 = vmul.f32 0.01, %v17572_v37  ;;  %v15742_v58 = vpop.permute.xlu1 %15741  ;;  %v15708_v35 = vadd.f32 %v15700_v50, %v15682_v32  ;;  %v16256_v59 = vadd.f32 %v16236_v28, %v16206_v44 }
 0x631   :  { %v17022_v28 = vmul.f32 %v26085_v39, %v25373_v8 }
 0x632   :  { %v17596_v10 = vsel %vm17580_vm9, %v17572_v37, %v17588_v23  ;;  %16767 = vrot.lane.b32.xlu1 %v16746_v14, %s20528_s7  ;;  %v15758_v6 = vadd.f32 %v15742_v58, %v15708_v35  ;;  %v16306_v3 = vadd.f32 %v16286_v56, %v16256_v59  ;;  %v17072_v23 = vmul.f32 %v26087_v18, %v25373_v8 }
 0x633   :  { %17606 = vst.msk [vmem:[%s25844_s6 + $0x20] sm:$0xff] %vm17600_vm8, %v17596_v10 }
 0x634   :  { %v15792_v57 = vpop.permute.xlu1 %15791  ;;  %v16356_v47 = vadd.f32 %v16336_v30, %v16306_v3  ;;  %v26091_v3 = vld [vmem:[#allocation17_spill] sm:$0xff] }
 0x635   :  { %v15808_v27 = vadd.f32 %v15792_v57, %v15758_v6 }
 0x636   :  { %16817 = vrot.lane.b32.xlu1 %v16796_v19, %s20529_s4  ;;  %v16365_v63 = vadd.f32 %v26069_v42, %v16356_v47 }
 0x638   :  { %v15842_v34 = vpop.permute.xlu1 %15841  ;;  %v16381_v58 = vmul.f32 0.01, %v16365_v63  ;;  %vm16373_vm10 = vcmp.ge.f32.partialorder %v16365_v63, 0.0 }
 0x639   :  { %v15858_v1 = vadd.f32 %v15842_v34, %v15808_v27 }
 0x63a   :  { %16867 = vrot.lane.b32.xlu1 %v16846_v31, %s20530_s8  ;;  %v16389_v45 = vsel %vm16373_vm10, %v16365_v63, %v16381_v58  ;;  %v26094_v58 = vld [vmem:[#allocation38_spill] sm:$0xff] }
 0x63c   :  { %v15892_v5 = vpop.permute.xlu1 %15891 }
 0x63d   :  { %v15908_v55 = vadd.f32 %v15892_v5, %v15858_v1  ;;  %v16448_v1 = vmul.f32 %v26091_v3, %v25230_v25 }
 0x63e   :  { %16943 = vrot.lane.b32.xlu1 %v16922_v2, %s20527_s29 }
 0x63f   :  { %v15934_v36 = vadd.f32 %v15926_v40, %v15908_v55 }
 0x640   :  { %v15968_v46 = vpop.permute.xlu1 %15967 }
 0x641   :  { %v15984_v30 = vadd.f32 %v15968_v46, %v15934_v36  ;;  %v26092_v46 = vld [vmem:[#allocation50_spill] sm:$0xff] }
 0x642   :  { %16993 = vrot.lane.b32.xlu1 %v16972_v54, %s20528_s7 }
 0x644   :  { %v16018_v37 = vpop.permute.xlu1 %16017 }
 0x645   :  { %v16034_v14 = vadd.f32 %v16018_v37, %v15984_v30 }
 0x646   :  { %17043 = vrot.lane.b32.xlu1 %v17022_v28, %s20529_s4  ;;  %v26093_v28 = vld [vmem:[#allocation24_spill] sm:$0xff] }
 0x648   :  { %v16068_v56 = vpop.permute.xlu1 %16067 }
 0x649   :  { %v16084_v13 = vadd.f32 %v16068_v56, %v16034_v14  ;;  %v16674_v14 = vmul.f32 %v26094_v58, %v25255_v26 }
 0x64a   :  { %17093 = vrot.lane.b32.xlu1 %v17072_v23, %s20530_s8 }
 0x64c   :  { %v16118_v22 = vpop.permute.xlu1 %16117 }
 0x64d   :  { %v16134_v60 = vadd.f32 %v16118_v22, %v16084_v13  ;;  %v26095_v22 = vld [vmem:[#allocation25_spill] sm:$0xff] }
 0x64e   :  { %16408 = vrot.lane.b32.xlu1 %v16389_v45, %s20526_s5 }
 0x64f   :  { %v16160_v49 = vadd.f32 %v16152_v29, %v16134_v60 }
 0x650   :  { %v16194_v10 = vpop.permute.xlu1 %16193 }
 0x651   :  { %v16210_v32 = vadd.f32 %v16194_v10, %v16160_v49 }
 0x654   :  { %v16244_v57 = vpop.permute.xlu1 %16243 }
 0x655   :  { %v16407_v19 = vpop.permute.xlu0 %16406  ;;  %v16260_v0 = vadd.f32 %v16244_v57, %v16210_v32 }
 0x656   :  { %16429 = vst.msk [vmem:[#allocation2 + $0x12] sm:$0xff] %vm16426_vm15, %v16407_v19 }
 0x658   :  { %v16294_v62 = vpop.permute.xlu1 %16293 }
 0x659   :  { %v16310_v50 = vadd.f32 %v16294_v62, %v16260_v0 }
 0x65c   :  { %v16344_v34 = vpop.permute.xlu1 %16343 }
 0x65d   :  { %v16360_v31 = vadd.f32 %v16344_v34, %v16310_v50  ;;  %v25395_v35 = vld [vmem:[#allocation2 + $0x10] sm:$0xff] }
 0x65e   :  { %v16467_v44 = vmul.f32 %v26071_v52, %v25395_v35  ;;  %v16517_v24 = vmul.f32 %v26072_v7, %v25395_v35  ;;  %v25403_v59 = vld [vmem:[#allocation2 + $0xb] sm:$0xff]  ;;  %v16567_v47 = vmul.f32 %v26073_v4, %v25395_v35  ;;  %v16617_v25 = vmul.f32 %v26075_v9, %v25395_v35 }
 0x65f   :  { %v16369_v6 = vadd.f32 %v26069_v42, %v16360_v31  ;;  %v17144_v54 = vmul.f32 %v26092_v46, %v25403_v59  ;;  %v17194_v63 = vmul.f32 %v26093_v28, %v25403_v59  ;;  %v25420_v56 = vld [vmem:[#allocation2 + $0x11] sm:$0xff]  ;;  %v17244_v13 = vmul.f32 %v26095_v22, %v25403_v59 }
 0x660   :  { %v16484_v5 = vpop.permute.xlu1 %16483  ;;  %16485 = vrot.lane.b32.xlu0 %v16467_v44, %s20527_s29  ;;  %v16693_v45 = vmul.f32 %v26076_v17, %v25420_v56  ;;  %v17294_v29 = vmul.f32 %v25001_v11, %v25403_v59  ;;  %v16743_v49 = vmul.f32 %v26078_v21, %v25420_v56  ;;  %v25436_v57 = vld [vmem:[#allocation2 + $0xc] sm:$0xff]  ;;  %v16793_v32 = vmul.f32 %v26079_v51, %v25420_v56 }
 0x661   :  { %vm16377_vm11 = vcmp.ge.f32.partialorder %v16369_v6, 0.0  ;;  %v16385_v12 = vmul.f32 0.01, %v16369_v6  ;;  %v16506_v55 = vadd.f32 %v16484_v5, %v16448_v1  ;;  %v17370_v19 = vmul.f32 %v25013_v41, %v25436_v57 }
 0x662   :  { %v17420_v34 = vmul.f32 %v25025_v16, %v25436_v57  ;;  %v16843_v31 = vmul.f32 %v26081_v38, %v25420_v56 }
 0x663   :  { %v16393_v2 = vsel %vm16377_vm11, %v16369_v6, %v16385_v12  ;;  %v25450_v6 = vld [vmem:[#allocation2 + $0x12] sm:$0xff] }
 0x664   :  { %v16534_v27 = vpop.permute.xlu1 %16533  ;;  %16416 = vrot.lane.b32.xlu1 %v16393_v2, %s20526_s5  ;;  %16535 = vrot.lane.b32.xlu0 %v16517_v24, %s20528_s7  ;;  %v26096_v24 = vld [vmem:[#allocation18_spill] sm:$0xff] }
 0x665   :  { %v16415_v42 = vpop.permute.xlu0 %16414  ;;  %v16556_v37 = vadd.f32 %v16534_v27, %v16506_v55  ;;  %v16900_v2 = vmul.f32 %v26096_v24, %v25283_v33  ;;  %v26097_v27 = vld [vmem:[#allocation28_spill] sm:$0xff]  ;;  %v26098_v55 = vld [vmem:[#allocation29_spill] sm:$0xff] }
 0x666   :  { %16434 = vst.msk [vmem:[#allocation2 + $0x32] sm:$0xff] %vm16426_vm15, %v16415_v42  ;;  %v17470_v1 = vmul.f32 %v26097_v27, %v25436_v57  ;;  %v16919_v42 = vmul.f32 %v26082_v48, %v25450_v6 }
 0x668   :  { %v16584_v40 = vpop.permute.xlu1 %16583  ;;  %17161 = vrot.lane.b32.xlu1 %v17144_v54, %s20527_s29  ;;  %16585 = vrot.lane.b32.xlu0 %v16567_v47, %s20529_s4 }
 0x669   :  { %v16606_v36 = vadd.f32 %v16584_v40, %v16556_v37  ;;  %v17520_v40 = vmul.f32 %v26098_v55, %v25436_v57  ;;  %v16969_v37 = vmul.f32 %v26084_v53, %v25450_v6 }
 0x66c   :  { %v16634_v23 = vpop.permute.xlu1 %16633  ;;  %17211 = vrot.lane.b32.xlu1 %v17194_v63, %s20528_s7  ;;  %16635 = vrot.lane.b32.xlu0 %v16617_v25, %s20530_s8  ;;  %v17019_v25 = vmul.f32 %v26085_v39, %v25450_v6 }
 0x66d   :  { %v16656_v30 = vadd.f32 %v16634_v23, %v16606_v36  ;;  %v25466_v63 = vld [vmem:[#allocation2 + $0x2b] sm:$0xff] }
 0x66e   :  { %v17148_v36 = vmul.f32 %v26092_v46, %v25466_v63 }
 0x66f   :  { %v16682_v60 = vadd.f32 %v16674_v14, %v16656_v30 }
 0x670   :  { %v16710_v10 = vpop.permute.xlu1 %16709  ;;  %17261 = vrot.lane.b32.xlu1 %v17244_v13, %s20529_s4  ;;  %16711 = vrot.lane.b32.xlu0 %v16693_v45, %s20527_s29  ;;  %v17069_v13 = vmul.f32 %v26087_v18, %v25450_v6  ;;  %v17198_v45 = vmul.f32 %v26093_v28, %v25466_v63 }
 0x671   :  { %v16732_v62 = vadd.f32 %v16710_v10, %v16682_v60  ;;  %v25480_v10 = vld [vmem:[#allocation2 + $0x30] sm:$0xff] }
 0x674   :  { %v16760_v26 = vpop.permute.xlu1 %16759  ;;  %17311 = vrot.lane.b32.xlu1 %v17294_v29, %s20530_s8  ;;  %16761 = vrot.lane.b32.xlu0 %v16743_v49, %s20528_s7 }
 0x675   :  { %v16782_v50 = vadd.f32 %v16760_v26, %v16732_v62  ;;  %v26099_v26 = vld [vmem:[#allocation20_spill] sm:$0xff]  ;;  %v16471_v62 = vmul.f32 %v26071_v52, %v25480_v10 }
 0x678   :  { %v16810_v0 = vpop.permute.xlu1 %16809  ;;  %17387 = vrot.lane.b32.xlu1 %v17370_v19, %s20527_s29  ;;  %16811 = vrot.lane.b32.xlu0 %v16793_v32, %s20529_s4  ;;  %v17126_v19 = vmul.f32 %v26099_v26, %v25403_v59  ;;  %v17248_v32 = vmul.f32 %v26095_v22, %v25466_v63  ;;  %v25498_v59 = vld [vmem:[#allocation2 + $0x2c] sm:$0xff] }
 0x679   :  { %v16832_v44 = vadd.f32 %v16810_v0, %v16782_v50 }
 0x67c   :  { %v16860_v5 = vpop.permute.xlu1 %16859  ;;  %17437 = vrot.lane.b32.xlu1 %v17420_v34, %s20528_s7  ;;  %16861 = vrot.lane.b32.xlu0 %v16843_v31, %s20530_s8  ;;  %v17298_v34 = vmul.f32 %v25001_v11, %v25466_v63  ;;  %v16521_v31 = vmul.f32 %v26072_v7, %v25480_v10 }
 0x67d   :  { %v16882_v12 = vadd.f32 %v16860_v5, %v16832_v44  ;;  %v16452_v5 = vmul.f32 %v26091_v3, %v25315_v43 }
 0x67f   :  { %v16908_v54 = vadd.f32 %v16900_v2, %v16882_v12  ;;  %v17374_v12 = vmul.f32 %v25013_v41, %v25498_v59  ;;  %v16571_v2 = vmul.f32 %v26073_v4, %v25480_v10 }
 0x680   :  { %v16936_v47 = vpop.permute.xlu1 %16935  ;;  %17487 = vrot.lane.b32.xlu1 %v17470_v1, %s20529_s4  ;;  %16937 = vrot.lane.b32.xlu0 %v16919_v42, %s20527_s29 }
 0x681   :  { %v16958_v23 = vadd.f32 %v16936_v47, %v16908_v54  ;;  %v17424_v47 = vmul.f32 %v25025_v16, %v25498_v59 }
 0x684   :  { %v16986_v33 = vpop.permute.xlu1 %16985  ;;  %17537 = vrot.lane.b32.xlu1 %v17520_v40, %s20530_s8  ;;  %16987 = vrot.lane.b32.xlu0 %v16969_v37, %s20528_s7  ;;  %v16621_v40 = vmul.f32 %v26075_v9, %v25480_v10  ;;  %v25514_v37 = vld [vmem:[#allocation2 + $0x31] sm:$0xff] }
 0x685   :  { %v17008_v14 = vadd.f32 %v16986_v33, %v16958_v23  ;;  %v17474_v23 = vmul.f32 %v26097_v27, %v25498_v59 }
 0x688   :  { %v17036_v30 = vpop.permute.xlu1 %17035  ;;  %17037 = vrot.lane.b32.xlu0 %v17019_v25, %s20529_s4  ;;  %17169 = vrot.lane.b32.xlu1 %v17148_v36, %s20527_s29  ;;  %v16678_v36 = vmul.f32 %v26094_v58, %v25343_v61  ;;  %v16797_v61 = vmul.f32 %v26079_v51, %v25514_v37 }
 0x689   :  { %v17058_v60 = vadd.f32 %v17036_v30, %v17008_v14  ;;  %v16697_v30 = vmul.f32 %v26076_v17, %v25514_v37 }
 0x68c   :  { %v17086_v29 = vpop.permute.xlu1 %17085  ;;  %17087 = vrot.lane.b32.xlu0 %v17069_v13, %s20530_s8  ;;  %17219 = vrot.lane.b32.xlu1 %v17198_v45, %s20528_s7  ;;  %v17524_v45 = vmul.f32 %v26098_v55, %v25498_v59 }
 0x68d   :  { %v17108_v49 = vadd.f32 %v17086_v29, %v17058_v60  ;;  %v16747_v60 = vmul.f32 %v26078_v21, %v25514_v37 }
 0x68f   :  { %v25490_v0 = vadd.f32 %v17126_v19, %v17108_v49 }
 0x690   :  { %v16492_v50 = vpop.permute.xlu1 %16491  ;;  %17269 = vrot.lane.b32.xlu1 %v17248_v32, %s20529_s4  ;;  %16493 = vrot.lane.b32.xlu0 %v16471_v62, %s20527_s29  ;;  %v16847_v62 = vmul.f32 %v26081_v38, %v25514_v37 }
 0x691   :  { %v16510_v1 = vadd.f32 %v16492_v50, %v16452_v5  ;;  %v16904_v5 = vmul.f32 %v26096_v24, %v25373_v8 }
 0x694   :  { %v16542_v44 = vpop.permute.xlu1 %16541  ;;  %17319 = vrot.lane.b32.xlu1 %v17298_v34, %s20530_s8  ;;  %16543 = vrot.lane.b32.xlu0 %v16521_v31, %s20528_s7  ;;  %v25537_v34 = vld [vmem:[#allocation2 + $0x32] sm:$0xff] }
 0x695   :  { %v16560_v54 = vadd.f32 %v16542_v44, %v16510_v1 }
 0x698   :  { %v16592_v42 = vpop.permute.xlu1 %16591  ;;  %17395 = vrot.lane.b32.xlu1 %v17374_v12, %s20527_s29  ;;  %16593 = vrot.lane.b32.xlu0 %v16571_v2, %s20529_s4  ;;  %v16923_v12 = vmul.f32 %v26082_v48, %v25537_v34 }
 0x699   :  { %v16610_v43 = vadd.f32 %v16592_v42, %v16560_v54  ;;  %v16973_v42 = vmul.f32 %v26084_v53, %v25537_v34 }
 0x69c   :  { %v16642_v33 = vpop.permute.xlu1 %16641  ;;  %17445 = vrot.lane.b32.xlu1 %v17424_v47, %s20528_s7  ;;  %16643 = vrot.lane.b32.xlu0 %v16621_v40, %s20530_s8  ;;  %v17023_v47 = vmul.f32 %v26085_v39, %v25537_v34 }
 0x69d   :  { %v16660_v25 = vadd.f32 %v16642_v33, %v16610_v43  ;;  %v17073_v33 = vmul.f32 %v26087_v18, %v25537_v34 }
 0x69f   :  { %v16686_v14 = vadd.f32 %v16678_v36, %v16660_v25 }
 0x6a0   :  { %v16718_v13 = vpop.permute.xlu1 %16717  ;;  %17495 = vrot.lane.b32.xlu1 %v17474_v23, %s20529_s4  ;;  %16719 = vrot.lane.b32.xlu0 %v16697_v30, %s20527_s29  ;;  %v17130_v30 = vmul.f32 %v26099_v26, %v25466_v63 }
 0x6a1   :  { %v16736_v49 = vadd.f32 %v16718_v13, %v16686_v14 }
 0x6a4   :  { %v16768_v29 = vpop.permute.xlu1 %16767  ;;  %17545 = vrot.lane.b32.xlu1 %v17524_v45, %s20530_s8  ;;  %16769 = vrot.lane.b32.xlu0 %v16747_v60, %s20528_s7 }
 0x6a5   :  { %v16786_v32 = vadd.f32 %v16768_v29, %v16736_v49 }
 0x6a8   :  { %v16818_v19 = vpop.permute.xlu1 %16817  ;;  %16819 = vrot.lane.b32.xlu0 %v16797_v61, %s20529_s4 }
 0x6a9   :  { %v16836_v50 = vadd.f32 %v16818_v19, %v16786_v32  ;;  %v16449_v19 = vmul.f32 %v26091_v3, %v25395_v35 }
 0x6ac   :  { %v16868_v31 = vpop.permute.xlu1 %16867  ;;  %16869 = vrot.lane.b32.xlu0 %v16847_v62, %s20530_s8 }
 0x6ad   :  { %v16886_v44 = vadd.f32 %v16868_v31, %v16836_v50 }
 0x6af   :  { %v16912_v2 = vadd.f32 %v16904_v5, %v16886_v44 }
 0x6b0   :  { %v16944_v1 = vpop.permute.xlu1 %16943  ;;  %16945 = vrot.lane.b32.xlu0 %v16923_v12, %s20527_s29 }
 0x6b1   :  { %v16962_v40 = vadd.f32 %v16944_v1, %v16912_v2 }
 0x6b4   :  { %v16994_v54 = vpop.permute.xlu1 %16993  ;;  %16995 = vrot.lane.b32.xlu0 %v16973_v42, %s20528_s7 }
 0x6b5   :  { %v17012_v8 = vadd.f32 %v16994_v54, %v16962_v40 }
 0x6b8   :  { %v17044_v43 = vpop.permute.xlu1 %17043  ;;  %17045 = vrot.lane.b32.xlu0 %v17023_v47, %s20529_s4 }
 0x6b9   :  { %v17062_v25 = vadd.f32 %v17044_v43, %v17012_v8 }
 0x6bc   :  { %v17094_v36 = vpop.permute.xlu1 %17093  ;;  %17095 = vrot.lane.b32.xlu0 %v17073_v33, %s20530_s8 }
 0x6bd   :  { %v17112_v23 = vadd.f32 %v17094_v36, %v17062_v25 }
 0x6bf   :  { %v25556_v14 = vadd.f32 %v17130_v30, %v17112_v23 }
 0x6c0   :  { %v16409_v13 = vpop.permute.xlu1 %16408 }
 0x6c1   :  { %16431 = vst.msk [vmem:[#allocation2 + $0x1a] sm:$0xf] %vm16430_vm12, %v16409_v13  ;;  %v16675_v13 = vmul.f32 %v26094_v58, %v25420_v56 }
 0x6c8   :  { %v25559_v45 = vld [vmem:[#allocation2 + $0x18] sm:$0xf] }
 0x6c9   :  { %v25561_v60 = vld [vmem:[#allocation2 + $0x13] sm:$0xff]  ;;  %v16468_v29 = vmul.f32 %v26071_v52, %v25559_v45  ;;  %v16518_v63 = vmul.f32 %v26072_v7, %v25559_v45  ;;  %v16568_v32 = vmul.f32 %v26073_v4, %v25559_v45  ;;  %v16618_v44 = vmul.f32 %v26075_v9, %v25559_v45 }
 0x6ca   :  { %v17145_v61 = vmul.f32 %v26092_v46, %v25561_v60  ;;  %v17195_v49 = vmul.f32 %v26093_v28, %v25561_v60  ;;  %v17245_v62 = vmul.f32 %v26095_v22, %v25561_v60  ;;  %v17295_v5 = vmul.f32 %v25001_v11, %v25561_v60  ;;  %v25587_v2 = vld [vmem:[#allocation2 + $0x19] sm:$0xf] }
 0x6cb   :  { %16487 = vrot.lane.b32.xlu1 %v16468_v29, %s20527_s29  ;;  %v25589_v1 = vld [vmem:[#allocation2 + $0x14] sm:$0xff]  ;;  %v16694_v54 = vmul.f32 %v26076_v17, %v25587_v2  ;;  %v16744_v33 = vmul.f32 %v26078_v21, %v25587_v2  ;;  %v16844_v56 = vmul.f32 %v26081_v38, %v25587_v2 }
 0x6cc   :  { %17163 = vrot.lane.b32.xlu0 %v17145_v61, %s20527_s29  ;;  %v17371_v47 = vmul.f32 %v25013_v41, %v25589_v1  ;;  %v17421_v25 = vmul.f32 %v25025_v16, %v25589_v1 }
 0x6cf   :  { %16537 = vrot.lane.b32.xlu1 %v16518_v63, %s20528_s7  ;;  %v16794_v63 = vmul.f32 %v26079_v51, %v25587_v2 }
 0x6d0   :  { %17213 = vrot.lane.b32.xlu0 %v17195_v49, %s20528_s7  ;;  %v17471_v49 = vmul.f32 %v26097_v27, %v25589_v1 }
 0x6d2   :  { %v16486_v50 = vpop.permute.xlu0 %16485 }
 0x6d3   :  { %v16507_v31 = vadd.f32 %v16486_v50, %v16449_v19  ;;  %16587 = vrot.lane.b32.xlu1 %v16568_v32, %s20529_s4 }
 0x6d4   :  { %17263 = vrot.lane.b32.xlu0 %v17245_v62, %s20529_s4 }
 0x6d6   :  { %v16417_v12 = vpop.permute.xlu1 %16416  ;;  %v16536_v35 = vpop.permute.xlu0 %16535 }
 0x6d7   :  { %16435 = vst.msk [vmem:[#allocation2 + $0x3a] sm:$0xf] %vm16430_vm12, %v16417_v12  ;;  %v16557_v42 = vadd.f32 %v16536_v35, %v16507_v31  ;;  %16637 = vrot.lane.b32.xlu1 %v16618_v44, %s20530_s8  ;;  %v25619_v12 = vld [vmem:[#allocation2 + $0x1a] sm:$0xf] }
 0x6d8   :  { %17313 = vrot.lane.b32.xlu0 %v17295_v5, %s20530_s8 }
 0x6da   :  { %v17162_v40 = vpop.permute.xlu1 %17161  ;;  %v16586_v43 = vpop.permute.xlu0 %16585 }
 0x6db   :  { %v16607_v8 = vadd.f32 %v16586_v43, %v16557_v42  ;;  %16713 = vrot.lane.b32.xlu1 %v16694_v54, %s20527_s29  ;;  %v17184_v29 = vadd.f32 %v17162_v40, %v25490_v0  ;;  %v17521_v0 = vmul.f32 %v26098_v55, %v25589_v1  ;;  %v16920_v43 = vmul.f32 %v26082_v48, %v25619_v12 }
 0x6dc   :  { %17389 = vrot.lane.b32.xlu0 %v17371_v47, %s20527_s29  ;;  %v17352_v47 = vmul.f32 %v25257_v15, %v25436_v57 }
 0x6de   :  { %v17212_v36 = vpop.permute.xlu1 %17211  ;;  %v16636_v23 = vpop.permute.xlu0 %16635  ;;  %v25621_v35 = vld [vmem:[#allocation2 + $0x33] sm:$0xff] }
 0x6df   :  { %v16657_v30 = vadd.f32 %v16636_v23, %v16607_v8  ;;  %16763 = vrot.lane.b32.xlu1 %v16744_v33, %s20528_s7  ;;  %v17234_v62 = vadd.f32 %v17212_v36, %v17184_v29  ;;  %v17149_v8 = vmul.f32 %v26092_v46, %v25621_v35  ;;  %v16970_v23 = vmul.f32 %v26084_v53, %v25619_v12 }
 0x6e0   :  { %17439 = vrot.lane.b32.xlu0 %v17421_v25, %s20528_s7  ;;  %v17199_v57 = vmul.f32 %v26093_v28, %v25621_v35 }
 0x6e1   :  { %v16683_v61 = vadd.f32 %v16675_v13, %v16657_v30 }
 0x6e2   :  { %v17262_v19 = vpop.permute.xlu1 %17261  ;;  %v16712_v32 = vpop.permute.xlu0 %16711 }
 0x6e3   :  { %v16733_v50 = vadd.f32 %v16712_v32, %v16683_v61  ;;  %16813 = vrot.lane.b32.xlu1 %v16794_v63, %s20529_s4  ;;  %v17284_v31 = vadd.f32 %v17262_v19, %v17234_v62  ;;  %v16901_v61 = vmul.f32 %v26096_v24, %v25450_v6  ;;  %v17020_v19 = vmul.f32 %v26085_v39, %v25619_v12 }
 0x6e4   :  { %17489 = vrot.lane.b32.xlu0 %v17471_v49, %s20529_s4  ;;  %v17249_v32 = vmul.f32 %v26095_v22, %v25621_v35  ;;  %v17070_v6 = vmul.f32 %v26087_v18, %v25619_v12 }
 0x6e6   :  { %v17312_v44 = vpop.permute.xlu1 %17311  ;;  %v16762_v5 = vpop.permute.xlu0 %16761 }
 0x6e7   :  { %v17334_v42 = vadd.f32 %v17312_v44, %v17284_v31  ;;  %v16783_v54 = vadd.f32 %v16762_v5, %v16733_v50  ;;  %16863 = vrot.lane.b32.xlu1 %v16844_v56, %s20530_s8  ;;  %v17299_v44 = vmul.f32 %v25001_v11, %v25621_v35 }
 0x6e8   :  { %17539 = vrot.lane.b32.xlu0 %v17521_v0, %s20530_s8 }
 0x6e9   :  { %v17360_v40 = vadd.f32 %v17352_v47, %v17334_v42  ;;  %v25653_v47 = vld [vmem:[#allocation2 + $0x34] sm:$0xff] }
 0x6ea   :  { %v17388_v33 = vpop.permute.xlu1 %17387  ;;  %v16812_v25 = vpop.permute.xlu0 %16811 }
 0x6eb   :  { %v16833_v36 = vadd.f32 %v16812_v25, %v16783_v54  ;;  %16939 = vrot.lane.b32.xlu1 %v16920_v43, %s20527_s29  ;;  %v17410_v63 = vadd.f32 %v17388_v33, %v17360_v40  ;;  %v25651_v54 = vld [vmem:[#allocation2 + $0x1b] sm:$0xf]  ;;  %v17375_v25 = vmul.f32 %v25013_v41, %v25653_v47 }
 0x6ec   :  { %17171 = vrot.lane.b32.xlu0 %v17149_v8, %s20527_s29  ;;  %v17146_v33 = vmul.f32 %v26092_v46, %v25651_v54 }
 0x6ee   :  { %v17438_v30 = vpop.permute.xlu1 %17437  ;;  %v16862_v13 = vpop.permute.xlu0 %16861 }
 0x6ef   :  { %v16883_v29 = vadd.f32 %v16862_v13, %v16833_v36  ;;  %16989 = vrot.lane.b32.xlu1 %v16970_v23, %s20528_s7  ;;  %v17460_v31 = vadd.f32 %v17438_v30, %v17410_v63 }
 0x6f0   :  { %17221 = vrot.lane.b32.xlu0 %v17199_v57, %s20528_s7 }
 0x6f1   :  { %v16909_v49 = vadd.f32 %v16901_v61, %v16883_v29  ;;  %v17196_v29 = vmul.f32 %v26093_v28, %v25651_v54  ;;  %v17425_v61 = vmul.f32 %v25025_v16, %v25653_v47 }
 0x6f2   :  { %v17488_v62 = vpop.permute.xlu1 %17487  ;;  %v16938_v50 = vpop.permute.xlu0 %16937 }
 0x6f3   :  { %v16959_v56 = vadd.f32 %v16938_v50, %v16909_v49  ;;  %17039 = vrot.lane.b32.xlu1 %v17020_v19, %s20529_s4  ;;  %v17510_v0 = vadd.f32 %v17488_v62, %v17460_v31  ;;  %v17246_v50 = vmul.f32 %v26095_v22, %v25651_v54  ;;  %v17475_v31 = vmul.f32 %v26097_v27, %v25653_v47 }
 0x6f4   :  { %17271 = vrot.lane.b32.xlu0 %v17249_v32, %s20529_s4  ;;  %v17127_v32 = vmul.f32 %v26099_v26, %v25561_v60  ;;  %v17296_v60 = vmul.f32 %v25001_v11, %v25651_v54 }
 0x6f6   :  { %v17538_v5 = vpop.permute.xlu1 %17537  ;;  %v16988_v42 = vpop.permute.xlu0 %16987 }
 0x6f7   :  { %v17560_v40 = vadd.f32 %v17538_v5, %v17510_v0  ;;  %v17009_v43 = vadd.f32 %v16988_v42, %v16959_v56  ;;  %17089 = vrot.lane.b32.xlu1 %v17070_v6, %s20530_s8 }
 0x6f8   :  { %17321 = vrot.lane.b32.xlu0 %v17299_v44, %s20530_s8 }
 0x6f9   :  { %v17569_v8 = vadd.f32 %v25287_v20, %v17560_v40 }
 0x6fa   :  { %v17170_v36 = vpop.permute.xlu1 %17169  ;;  %v17038_v23 = vpop.permute.xlu0 %17037 }
 0x6fb   :  { %vm17577_vm13 = vcmp.ge.f32.partialorder %v17569_v8, 0.0  ;;  %v17585_v57 = vmul.f32 0.01, %v17569_v8  ;;  %17165 = vrot.lane.b32.xlu1 %v17146_v33, %s20527_s29  ;;  %v17059_v13 = vadd.f32 %v17038_v23, %v17009_v43  ;;  %v17188_v62 = vadd.f32 %v17170_v36, %v25556_v14  ;;  %v25689_v43 = vld [vmem:[#allocation2 + $0x1c] sm:$0xf] }
 0x6fc   :  { %17397 = vrot.lane.b32.xlu0 %v17375_v25, %s20527_s29  ;;  %v17525_v14 = vmul.f32 %v26098_v55, %v25653_v47  ;;  %v17356_v25 = vmul.f32 %v25257_v15, %v25498_v59  ;;  %v16679_v59 = vmul.f32 %v26094_v58, %v25514_v37 }
 0x6fd   :  { %v17593_v30 = vsel %vm17577_vm13, %v17569_v8, %v17585_v57  ;;  %v16453_v8 = vmul.f32 %v26091_v3, %v25480_v10  ;;  %v17372_v57 = vmul.f32 %v25013_v41, %v25689_v43  ;;  %v17422_v10 = vmul.f32 %v25025_v16, %v25689_v43 }
 0x6fe   :  { %17602 = vst.msk [vmem:[%s25844_s6 + $0x8] sm:$0xff] %vm17600_vm8, %v17593_v30  ;;  %v17220_v63 = vpop.permute.xlu1 %17219  ;;  %v17088_v49 = vpop.permute.xlu0 %17087 }
 0x6ff   :  { %v17109_v19 = vadd.f32 %v17088_v49, %v17059_v13  ;;  %17215 = vrot.lane.b32.xlu1 %v17196_v29, %s20528_s7  ;;  %v17238_v44 = vadd.f32 %v17220_v63, %v17188_v62 }
 0x700   :  { %17447 = vrot.lane.b32.xlu0 %v17425_v61, %s20528_s7 }
 0x701   :  { %v25681_v56 = vadd.f32 %v17127_v32, %v17109_v19 }
 0x702   :  { %v17270_v0 = vpop.permute.xlu1 %17269  ;;  %v16494_v6 = vpop.permute.xlu0 %16493 }
 0x703   :  { %17265 = vrot.lane.b32.xlu1 %v17246_v50, %s20529_s4  ;;  %v17288_v5 = vadd.f32 %v17270_v0, %v17238_v44  ;;  %v16511_v36 = vadd.f32 %v16494_v6, %v16453_v8  ;;  %v17472_v50 = vmul.f32 %v26097_v27, %v25689_v43 }
 0x704   :  { %17497 = vrot.lane.b32.xlu0 %v17475_v31, %s20529_s4 }
 0x706   :  { %v17320_v42 = vpop.permute.xlu1 %17319  ;;  %v16544_v40 = vpop.permute.xlu0 %16543 }
 0x707   :  { %v17338_v33 = vadd.f32 %v17320_v42, %v17288_v5  ;;  %17315 = vrot.lane.b32.xlu1 %v17296_v60, %s20530_s8  ;;  %v16561_v29 = vadd.f32 %v16544_v40, %v16511_v36  ;;  %v17522_v5 = vmul.f32 %v26098_v55, %v25689_v43  ;;  %v25710_v42 = vld [vmem:[#allocation2 + $0x38] sm:$0xf] }
 0x708   :  { %17547 = vrot.lane.b32.xlu0 %v17525_v14, %s20530_s8 }
 0x709   :  { %v17364_v23 = vadd.f32 %v17356_v25, %v17338_v33  ;;  %v16472_v33 = vmul.f32 %v26071_v52, %v25710_v42  ;;  %v16905_v52 = vmul.f32 %v26096_v24, %v25537_v34 }
 0x70a   :  { %v17396_v30 = vpop.permute.xlu1 %17395  ;;  %v16594_v13 = vpop.permute.xlu0 %16593 }
 0x70b   :  { %17391 = vrot.lane.b32.xlu1 %v17372_v57, %s20527_s29  ;;  %v16611_v61 = vadd.f32 %v16594_v13, %v16561_v29  ;;  %v17414_v32 = vadd.f32 %v17396_v30, %v17364_v23  ;;  %v16522_v13 = vmul.f32 %v26072_v7, %v25710_v42  ;;  %v16622_v7 = vmul.f32 %v26075_v9, %v25710_v42 }
 0x70c   :  { %v17131_v9 = vmul.f32 %v26099_v26, %v25621_v35 }
 0x70e   :  { %v17446_v63 = vpop.permute.xlu1 %17445  ;;  %v16644_v49 = vpop.permute.xlu0 %16643 }
 0x70f   :  { %v16661_v19 = vadd.f32 %v16644_v49, %v16611_v61  ;;  %17441 = vrot.lane.b32.xlu1 %v17422_v10, %s20528_s7  ;;  %v17464_v6 = vadd.f32 %v17446_v63, %v17414_v32  ;;  %v16572_v63 = vmul.f32 %v26073_v4, %v25710_v42 }
 0x711   :  { %v16687_v62 = vadd.f32 %v16679_v59, %v16661_v19  ;;  %v25731_v59 = vld [vmem:[#allocation2 + $0x39] sm:$0xf] }
 0x712   :  { %v17496_v31 = vpop.permute.xlu1 %17495  ;;  %v16720_v0 = vpop.permute.xlu0 %16719 }
 0x713   :  { %17491 = vrot.lane.b32.xlu1 %v17472_v50, %s20529_s4  ;;  %v17514_v44 = vadd.f32 %v17496_v31, %v17464_v6  ;;  %v16737_v37 = vadd.f32 %v16720_v0, %v16687_v62  ;;  %v16698_v62 = vmul.f32 %v26076_v17, %v25731_v59  ;;  %v16748_v31 = vmul.f32 %v26078_v21, %v25731_v59 }
 0x714   :  { %v16848_v17 = vmul.f32 %v26081_v38, %v25731_v59 }
 0x716   :  { %v17546_v60 = vpop.permute.xlu1 %17545  ;;  %v16770_v14 = vpop.permute.xlu0 %16769 }
 0x717   :  { %v17564_v40 = vadd.f32 %v17546_v60, %v17514_v44  ;;  %17541 = vrot.lane.b32.xlu1 %v17522_v5, %s20530_s8  ;;  %v16787_v23 = vadd.f32 %v16770_v14, %v16737_v37  ;;  %v16798_v44 = vmul.f32 %v26079_v51, %v25731_v59  ;;  %v25749_v60 = vld [vmem:[#allocation2 + $0x3a] sm:$0xf] }
 0x718   :  { %v16924_v21 = vmul.f32 %v26082_v48, %v25749_v60  ;;  %v16974_v51 = vmul.f32 %v26084_v53, %v25749_v60  ;;  %v17024_v38 = vmul.f32 %v26085_v39, %v25749_v60  ;;  %v17074_v53 = vmul.f32 %v26087_v18, %v25749_v60 }
 0x719   :  { %v17573_v8 = vadd.f32 %v25287_v20, %v17564_v40  ;;  %v17353_v18 = vmul.f32 %v25257_v15, %v25589_v1 }
 0x71a   :  { %v16820_v25 = vpop.permute.xlu0 %16819 }
 0x71b   :  { %vm17581_vm14 = vcmp.ge.f32.partialorder %v17573_v8, 0.0  ;;  %v17589_v36 = vmul.f32 0.01, %v17573_v8  ;;  %16495 = vrot.lane.b32.xlu1 %v16472_v33, %s20527_s29  ;;  %v16837_v30 = vadd.f32 %v16820_v25, %v16787_v23 }
 0x71d   :  { %v17597_v57 = vsel %vm17581_vm14, %v17573_v8, %v17589_v36  ;;  %v16450_v8 = vmul.f32 %v26091_v3, %v25559_v45 }
 0x71e   :  { %17607 = vst.msk [vmem:[%s25844_s6 + $0x28] sm:$0xff] %vm17600_vm8, %v17597_v57  ;;  %v16870_v29 = vpop.permute.xlu0 %16869 }
 0x71f   :  { %v16887_v61 = vadd.f32 %v16870_v29, %v16837_v30  ;;  %16545 = vrot.lane.b32.xlu1 %v16522_v13, %s20528_s7  ;;  %v25766_v30 = vld [vmem:[#allocation2 + $0x3b] sm:$0xf] }
 0x721   :  { %v16913_v10 = vadd.f32 %v16905_v52, %v16887_v61  ;;  %v17150_v61 = vmul.f32 %v26092_v46, %v25766_v30 }
 0x722   :  { %v16946_v49 = vpop.permute.xlu0 %16945 }
 0x723   :  { %16595 = vrot.lane.b32.xlu1 %v16572_v63, %s20529_s4  ;;  %v16963_v32 = vadd.f32 %v16946_v49, %v16913_v10  ;;  %v16676_v10 = vmul.f32 %v26094_v58, %v25587_v2 }
 0x726   :  { %v16996_v19 = vpop.permute.xlu0 %16995 }
 0x727   :  { %16645 = vrot.lane.b32.xlu1 %v16622_v7, %s20530_s8  ;;  %v17013_v50 = vadd.f32 %v16996_v19, %v16963_v32  ;;  %v17200_v32 = vmul.f32 %v26093_v28, %v25766_v30 }
 0x72a   :  { %v17046_v34 = vpop.permute.xlu0 %17045 }
 0x72b   :  { %16721 = vrot.lane.b32.xlu1 %v16698_v62, %s20527_s29  ;;  %v17063_v4 = vadd.f32 %v17046_v34, %v17013_v50  ;;  %v17250_v34 = vmul.f32 %v26095_v22, %v25766_v30 }
 0x72e   :  { %v17096_v0 = vpop.permute.xlu0 %17095 }
 0x72f   :  { %v17113_v6 = vadd.f32 %v17096_v0, %v17063_v4  ;;  %16771 = vrot.lane.b32.xlu1 %v16748_v31, %s20528_s7  ;;  %v17300_v31 = vmul.f32 %v25001_v11, %v25766_v30 }
 0x731   :  { %v25744_v5 = vadd.f32 %v17131_v9, %v17113_v6  ;;  %v25784_v9 = vld [vmem:[#allocation2 + $0x3c] sm:$0xf] }
 0x732   :  { %v17376_v22 = vmul.f32 %v25013_v41, %v25784_v9 }
 0x733   :  { %16821 = vrot.lane.b32.xlu1 %v16798_v44, %s20529_s4 }
 0x737   :  { %16871 = vrot.lane.b32.xlu1 %v16848_v17, %s20530_s8 }
 0x73b   :  { %16947 = vrot.lane.b32.xlu1 %v16924_v21, %s20527_s29 }
 0x73d   :  { %v16488_v35 = vpop.permute.xlu1 %16487 }
 0x73e   :  { %v17164_v14 = vpop.permute.xlu0 %17163  ;;  %v16508_v48 = vadd.f32 %v16488_v35, %v16450_v8  ;;  %v17426_v8 = vmul.f32 %v25025_v16, %v25784_v9 }
 0x73f   :  { %16997 = vrot.lane.b32.xlu1 %v16974_v51, %s20528_s7  ;;  %v17185_v33 = vadd.f32 %v17164_v14, %v25681_v56  ;;  %v16902_v51 = vmul.f32 %v26096_v24, %v25619_v12 }
 0x741   :  { %v16538_v40 = vpop.permute.xlu1 %16537 }
 0x742   :  { %v17214_v37 = vpop.permute.xlu0 %17213  ;;  %v16558_v23 = vadd.f32 %v16538_v40, %v16508_v48 }
 0x743   :  { %17047 = vrot.lane.b32.xlu1 %v17024_v38, %s20529_s4  ;;  %v17235_v57 = vadd.f32 %v17214_v37, %v17185_v33 }
 0x745   :  { %v16588_v25 = vpop.permute.xlu1 %16587 }
 0x746   :  { %v17264_v36 = vpop.permute.xlu0 %17263  ;;  %v16608_v39 = vadd.f32 %v16588_v25, %v16558_v23  ;;  %v17476_v25 = vmul.f32 %v26097_v27, %v25784_v9 }
 0x747   :  { %17097 = vrot.lane.b32.xlu1 %v17074_v53, %s20530_s8  ;;  %v17285_v13 = vadd.f32 %v17264_v36, %v17235_v57  ;;  %v17526_v57 = vmul.f32 %v26098_v55, %v25784_v9 }
 0x749   :  { %v16638_v29 = vpop.permute.xlu1 %16637 }
 0x74a   :  { %v17314_v45 = vpop.permute.xlu0 %17313  ;;  %v16658_v52 = vadd.f32 %v16638_v29, %v16608_v39 }
 0x74b   :  { %v17335_v56 = vadd.f32 %v17314_v45, %v17285_v13  ;;  %17173 = vrot.lane.b32.xlu1 %v17150_v61, %s20527_s29 }
 0x74c   :  { %v16684_v63 = vadd.f32 %v16676_v10, %v16658_v52  ;;  %v17128_v10 = vmul.f32 %v26099_v26, %v25651_v54 }
 0x74d   :  { %v17361_v49 = vadd.f32 %v17353_v18, %v17335_v56  ;;  %v16714_v7 = vpop.permute.xlu1 %16713 }
 0x74e   :  { %v17390_v19 = vpop.permute.xlu0 %17389  ;;  %v16734_v2 = vadd.f32 %v16714_v7, %v16684_v63 }
 0x74f   :  { %17223 = vrot.lane.b32.xlu1 %v17200_v32, %s20528_s7  ;;  %v17411_v1 = vadd.f32 %v17390_v19, %v17361_v49 }
 0x751   :  { %v16764_v46 = vpop.permute.xlu1 %16763 }
 0x752   :  { %v17440_v62 = vpop.permute.xlu0 %17439  ;;  %v16784_v0 = vadd.f32 %v16764_v46, %v16734_v2 }
 0x753   :  { %17273 = vrot.lane.b32.xlu1 %v17250_v34, %s20529_s4  ;;  %v17461_v6 = vadd.f32 %v17440_v62, %v17411_v1 }
 0x755   :  { %v16814_v50 = vpop.permute.xlu1 %16813 }
 0x756   :  { %v17490_v4 = vpop.permute.xlu0 %17489  ;;  %v16834_v28 = vadd.f32 %v16814_v50, %v16784_v0 }
 0x757   :  { %17323 = vrot.lane.b32.xlu1 %v17300_v31, %s20530_s8  ;;  %v17511_v44 = vadd.f32 %v17490_v4, %v17461_v6 }
 0x759   :  { %v16864_v17 = vpop.permute.xlu1 %16863 }
 0x75a   :  { %v17540_v21 = vpop.permute.xlu0 %17539  ;;  %v16884_v35 = vadd.f32 %v16864_v17, %v16834_v28 }
 0x75b   :  { %v17561_v14 = vadd.f32 %v17540_v21, %v17511_v44  ;;  %17399 = vrot.lane.b32.xlu1 %v17376_v22, %s20527_s29 }
 0x75c   :  { %v16910_v40 = vadd.f32 %v16902_v51, %v16884_v35 }
 0x75d   :  { %v17570_v11 = vadd.f32 %v25287_v20, %v17561_v14  ;;  %v16940_v37 = vpop.permute.xlu1 %16939 }
 0x75e   :  { %v17172_v38 = vpop.permute.xlu0 %17171  ;;  %v16960_v36 = vadd.f32 %v16940_v37, %v16910_v40 }
 0x75f   :  { %vm17578_vm15 = vcmp.ge.f32.partialorder %v17570_v11, 0.0  ;;  %v17586_v48 = vmul.f32 0.01, %v17570_v11  ;;  %17449 = vrot.lane.b32.xlu1 %v17426_v8, %s20528_s7  ;;  %v17189_v16 = vadd.f32 %v17172_v38, %v25744_v5  ;;  %v17357_v5 = vmul.f32 %v25257_v15, %v25653_v47 }
 0x760   :  { %v17354_v47 = vmul.f32 %v25257_v15, %v25689_v43 }
 0x761   :  { %v17594_v41 = vsel %vm17578_vm15, %v17570_v11, %v17586_v48  ;;  %v16990_v12 = vpop.permute.xlu1 %16989 }
 0x762   :  { %17603 = vst.msk [vmem:[%s25844_s6 + $0x10] sm:$0xff] %vm17600_vm8, %v17594_v41  ;;  %v17222_v33 = vpop.permute.xlu0 %17221  ;;  %v17010_v39 = vadd.f32 %v16990_v12, %v16960_v36 }
 0x763   :  { %17499 = vrot.lane.b32.xlu1 %v17476_v25, %s20529_s4  ;;  %v17239_v13 = vadd.f32 %v17222_v33, %v17189_v16  ;;  %v16454_v33 = vmul.f32 %v26091_v3, %v25710_v42  ;;  %v16906_v3 = vmul.f32 %v26096_v24, %v25749_v60 }
 0x765   :  { %v17040_v53 = vpop.permute.xlu1 %17039 }
 0x766   :  { %v17272_v23 = vpop.permute.xlu0 %17271  ;;  %v17060_v29 = vadd.f32 %v17040_v53, %v17010_v39  ;;  %v16680_v39 = vmul.f32 %v26094_v58, %v25731_v59 }
 0x767   :  { %17549 = vrot.lane.b32.xlu1 %v17526_v57, %s20530_s8  ;;  %v17289_v45 = vadd.f32 %v17272_v23, %v17239_v13 }
 0x769   :  { %v17090_v61 = vpop.permute.xlu1 %17089 }
 0x76a   :  { %v17322_v52 = vpop.permute.xlu0 %17321  ;;  %v17110_v56 = vadd.f32 %v17090_v61, %v17060_v29 }
 0x76b   :  { %v17339_v27 = vadd.f32 %v17322_v52, %v17289_v45 }
 0x76c   :  { %v17136_v18 = vadd.f32 %v17128_v10, %v17110_v56 }
 0x76d   :  { %v17365_v63 = vadd.f32 %v17357_v5, %v17339_v27  ;;  %v17166_v49 = vpop.permute.xlu1 %17165 }
 0x76e   :  { %v17398_v55 = vpop.permute.xlu0 %17397  ;;  %v17186_v32 = vadd.f32 %v17166_v49, %v17136_v18 }
 0x76f   :  { %v17415_v46 = vadd.f32 %v17398_v55, %v17365_v63 }
 0x771   :  { %v17216_v7 = vpop.permute.xlu1 %17215 }
 0x772   :  { %v17448_v19 = vpop.permute.xlu0 %17447  ;;  %v17236_v2 = vadd.f32 %v17216_v7, %v17186_v32  ;;  %v17132_v32 = vmul.f32 %v26099_v26, %v25766_v30 }
 0x773   :  { %v17465_v1 = vadd.f32 %v17448_v19, %v17415_v46 }
 0x775   :  { %v17266_v62 = vpop.permute.xlu1 %17265 }
 0x776   :  { %v17498_v34 = vpop.permute.xlu0 %17497  ;;  %v17286_v50 = vadd.f32 %v17266_v62, %v17236_v2 }
 0x777   :  { %v17515_v4 = vadd.f32 %v17498_v34, %v17465_v1 }
 0x779   :  { %v17316_v31 = vpop.permute.xlu1 %17315 }
 0x77a   :  { %v17548_v0 = vpop.permute.xlu0 %17547  ;;  %v17336_v54 = vadd.f32 %v17316_v31, %v17286_v50  ;;  %v17358_v31 = vmul.f32 %v25257_v15, %v25784_v9 }
 0x77b   :  { %v17565_v6 = vadd.f32 %v17548_v0, %v17515_v4 }
 0x77c   :  { %v17362_v44 = vadd.f32 %v17354_v47, %v17336_v54 }
 0x77d   :  { %v17574_v28 = vadd.f32 %v25287_v20, %v17565_v6  ;;  %v17392_v17 = vpop.permute.xlu1 %17391 }
 0x77e   :  { %v17412_v14 = vadd.f32 %v17392_v17, %v17362_v44 }
 0x77f   :  { %vm17582_vm0 = vcmp.ge.f32.partialorder %v17574_v28, 0.0  ;;  %v17590_v21 = vmul.f32 0.01, %v17574_v28 }
 0x781   :  { %v17598_v22 = vsel %vm17582_vm0, %v17574_v28, %v17590_v21  ;;  %v17442_v35 = vpop.permute.xlu1 %17441 }
 0x782   :  { %17608 = vst.msk [vmem:[%s25844_s6 + $0x30] sm:$0xff] %vm17600_vm8, %v17598_v22  ;;  %v17462_v11 = vadd.f32 %v17442_v35, %v17412_v14 }
 0x785   :  { %v17492_v51 = vpop.permute.xlu1 %17491 }
 0x786   :  { %v17512_v40 = vadd.f32 %v17492_v51, %v17462_v11 }
 0x789   :  { %v17542_v37 = vpop.permute.xlu1 %17541 }
 0x78a   :  { %v17562_v38 = vadd.f32 %v17542_v37, %v17512_v40 }
 0x78c   :  { %v17571_v43 = vadd.f32 %v25287_v20, %v17562_v38 }
 0x78d   :  { %v16496_v8 = vpop.permute.xlu1 %16495 }
 0x78e   :  { %vm17579_vm3 = vcmp.ge.f32.partialorder %v17571_v43, 0.0  ;;  %v17587_v48 = vmul.f32 0.01, %v17571_v43  ;;  %v16512_v25 = vadd.f32 %v16496_v8, %v16454_v33 }
 0x790   :  { %v17595_v41 = vsel %vm17579_vm3, %v17571_v43, %v17587_v48 }
 0x791   :  { %17605 = vst.msk [vmem:[%s25844_s6 + $0x18] sm:$0xf] %vm17604_vm2, %v17595_v41  ;;  %v16546_v12 = vpop.permute.xlu1 %16545 }
 0x792   :  { %v16562_v16 = vadd.f32 %v16546_v12, %v16512_v25 }
 0x795   :  { %v16596_v36 = vpop.permute.xlu1 %16595 }
 0x796   :  { %v16612_v53 = vadd.f32 %v16596_v36, %v16562_v16 }
 0x799   :  { %v16646_v23 = vpop.permute.xlu1 %16645 }
 0x79a   :  { %v16662_v57 = vadd.f32 %v16646_v23, %v16612_v53 }
 0x79c   :  { %v16688_v13 = vadd.f32 %v16680_v39, %v16662_v57 }
 0x79d   :  { %v16722_v29 = vpop.permute.xlu1 %16721 }
 0x79e   :  { %v16738_v61 = vadd.f32 %v16722_v29, %v16688_v13 }
 0x7a1   :  { %v16772_v45 = vpop.permute.xlu1 %16771 }
 0x7a2   :  { %v16788_v56 = vadd.f32 %v16772_v45, %v16738_v61 }
 0x7a5   :  { %v16822_v52 = vpop.permute.xlu1 %16821 }
 0x7a6   :  { %v16838_v27 = vadd.f32 %v16822_v52, %v16788_v56 }
 0x7a9   :  { %v16872_v10 = vpop.permute.xlu1 %16871 }
 0x7aa   :  { %v16888_v5 = vadd.f32 %v16872_v10, %v16838_v27 }
 0x7ac   :  { %v16914_v42 = vadd.f32 %v16906_v3, %v16888_v5 }
 0x7ad   :  { %v16948_v18 = vpop.permute.xlu1 %16947 }
 0x7ae   :  { %v16964_v49 = vadd.f32 %v16948_v18, %v16914_v42 }
 0x7b1   :  { %v16998_v63 = vpop.permute.xlu1 %16997 }
 0x7b2   :  { %v17014_v7 = vadd.f32 %v16998_v63, %v16964_v49 }
 0x7b5   :  { %v17048_v55 = vpop.permute.xlu1 %17047 }
 0x7b6   :  { %v17064_v19 = vadd.f32 %v17048_v55, %v17014_v7 }
 0x7b9   :  { %v17098_v58 = vpop.permute.xlu1 %17097 }
 0x7ba   :  { %v17114_v59 = vadd.f32 %v17098_v58, %v17064_v19 }
 0x7bc   :  { %v17140_v46 = vadd.f32 %v17132_v32, %v17114_v59 }
 0x7bd   :  { %v17174_v62 = vpop.permute.xlu1 %17173 }
 0x7be   :  { %v17190_v2 = vadd.f32 %v17174_v62, %v17140_v46 }
 0x7c1   :  { %v17224_v34 = vpop.permute.xlu1 %17223 }
 0x7c2   :  { %v17240_v50 = vadd.f32 %v17224_v34, %v17190_v2 }
 0x7c5   :  { %v17274_v1 = vpop.permute.xlu1 %17273 }
 0x7c6   :  { %v17290_v4 = vadd.f32 %v17274_v1, %v17240_v50 }
 0x7c9   :  { %v17324_v24 = vpop.permute.xlu1 %17323 }
 0x7ca   :  { %v17340_v60 = vadd.f32 %v17324_v24, %v17290_v4 }
 0x7cc   :  { %v17366_v0 = vadd.f32 %v17358_v31, %v17340_v60 }
 0x7cd   :  { %v17400_v54 = vpop.permute.xlu1 %17399 }
 0x7ce   :  { %v17416_v47 = vadd.f32 %v17400_v54, %v17366_v0 }
 0x7d1   :  { %v17450_v6 = vpop.permute.xlu1 %17449 }
 0x7d2   :  { %v17466_v44 = vadd.f32 %v17450_v6, %v17416_v47 }
 0x7d5   :  { %v17500_v28 = vpop.permute.xlu1 %17499 }
 0x7d6   :  { %v17516_v17 = vadd.f32 %v17500_v28, %v17466_v44 }
 0x7d9   :  { %v17550_v26 = vpop.permute.xlu1 %17549 }
 0x7da   :  { %v17566_v30 = vadd.f32 %v17550_v26, %v17516_v17 }
 0x7dc   :  { %v17575_v21 = vadd.f32 %v25287_v20, %v17566_v30 }
 0x7de   :  { %vm17583_vm4 = vcmp.ge.f32.partialorder %v17575_v21, 0.0  ;;  %v17591_v22 = vmul.f32 0.01, %v17575_v21 }
 0x7e0   :  { %v17599_v35 = vsel %vm17583_vm4, %v17575_v21, %v17591_v22 }
 0x7e1   :  { %17609 = vst.msk [vmem:[%s25844_s6 + $0x38] sm:$0xf] %vm17604_vm2, %v17599_v35 }
 0x7e2   :  { %17614 = vsyncpa [#allocation4], 1 }
 0x7e3   :  { %17615 = vsyncpa [#allocation7], 1 }
 0x7e4   :  { %17616 = vsyncpa [#allocation5], 1 }
 0x7e5   :  { %17617 = vsyncpa [#allocation11], 1 }

</bundles_post_ra>
